<compile_context>
chip_gen: v6e
topology: v6e:2x2x1
jax: 0.10.0
libtpu: 0.0.40
codegen_flags: <defaults>
</compile_context>

<pallas_src>
import functools

import numpy as np
import jax
import jax.numpy as jnp
from jax import lax
from jax.experimental import pallas as pl
from jax.experimental.pallas import tpu as pltpu

# ---------------------------------------------------------------------------
# configuration (constructor args of unet_decoder, chosen small)
# ---------------------------------------------------------------------------
PAYLOAD_LENGTH = 4          # undefined global in the original code
IN_CHANNELS = 1
BASE_CHANNELS = 4
DEPTH = 2
ENC_KSIZE = 15              # hard-coded default of build_encoder_block
BN_EPS = 1e-5
LEAKY_SLOPE = 0.1
LANE = 128


# ---------------------------------------------------------------------------
# static per-layer configuration (mirrors the module structure)
# ---------------------------------------------------------------------------
def _layer_configs():
    enc_in = [IN_CHANNELS] + [2 ** i * BASE_CHANNELS for i in range(DEPTH - 1)]
    enc_out = [2 ** i * BASE_CHANNELS for i in range(DEPTH)]
    pad = (ENC_KSIZE - 1) // 2
    cfgs = []
    for i in range(DEPTH):
        cin, cout = enc_in[i], enc_out[i]
        cfgs.append(dict(cin=cin, cout=cout, kh=ENC_KSIZE, kw=ENC_KSIZE,
                         pad_h=pad, pad_w=pad, pad_mode="reflect",
                         stride_h=1, leaky=True, bn=True, select=False))
        cfgs.append(dict(cin=cout, cout=cout, kh=ENC_KSIZE, kw=ENC_KSIZE,
                         pad_h=pad, pad_w=pad, pad_mode="reflect",
                         stride_h=1, leaky=True, bn=True, select=False))
        cfgs.append(dict(cin=cout, cout=cout, kh=4, kw=3,
                         pad_h=1, pad_w=1, pad_mode="zeros",
                         stride_h=2, leaky=False, bn=False, select=False))
    cfgs.append(dict(cin=enc_out[-1], cout=1, kh=3, kw=3,
                     pad_h=1, pad_w=1, pad_mode="zeros",
                     stride_h=1, leaky=False, bn=False, select=True))
    return cfgs


LAYER_CFGS = _layer_configs()


# ---------------------------------------------------------------------------
# Pallas kernel: banded conv + folded affine + LeakyReLU (+ fused argmax select)
# ---------------------------------------------------------------------------
def _conv_band_kernel(*refs, KH, SH, H_out, leaky, select, payload, group_len):
    # refs: SH activation refs (1, Hq, Kpad) bf16, then
    #       w_ref (KH, Kpad, Wo*Cout) bf16, b_ref (1, Wo*Cout) f32, o_ref.
    x_refs = refs[:SH]
    w_ref, b_ref, o_ref = refs[SH], refs[SH + 1], refs[SH + 2]

    wo_cout = w_ref.shape[2]
    acc = jnp.zeros((H_out, wo_cout), jnp.float32)
    for kh in range(KH):                                   # small static unroll
        xr = x_refs[kh % SH]
        slab = xr[0, kh // SH: kh // SH + H_out, :]        # (H_out, Kpad) bf16
        acc = acc + jnp.dot(slab, w_ref[kh],
                            preferred_element_type=jnp.float32)
    y = acc + b_ref[...]                                   # (H_out, Wo*Cout) f32
    if leaky:
        y = jnp.where(y >= 0, y, LEAKY_SLOPE * y)

    if not select:
        o_ref[0] = y.astype(o_ref.dtype)
        return

    # fused: torch.max(|x|, dim=2) -> torch.max(., dim=3) -> double gather,
    # applied independently to each width chunk of `group_len` columns
    # (Cout == 1 here, so the minor dim of y is exactly the W axis).
    Hf, Wt = y.shape
    ay = jnp.abs(y)
    h_iota = lax.broadcasted_iota(jnp.int32, (Hf, Wt), 0)
    c_iota = lax.broadcasted_iota(jnp.int32, (1, Wt), 1)
    p_iota = lax.broadcasted_iota(jnp.int32, (1, payload), 1)
    out_vec = jnp.zeros((1, payload), jnp.float32)
    for p in range(payload):
        in_grp = (c_iota >= p * group_len) & (c_iota < (p + 1) * group_len)
        axp = jnp.where(in_grp, ay, -1.0)                              # (Hf, Wt)
        rmax = jnp.max(axp, axis=0, keepdims=True)                     # (1, Wt)
        rarg = jnp.min(jnp.where(axp == rmax, h_iota, Hf),
                       axis=0, keepdims=True)                          # (1, Wt)
        rval = jnp.sum(jnp.where(h_iota == rarg, y, 0.0),
                       axis=0, keepdims=True)                          # (1, Wt)
        cmax = jnp.max(rmax, axis=1, keepdims=True)                    # (1, 1)
        carg = jnp.min(jnp.where(rmax == cmax, c_iota, Wt),
                       axis=1, keepdims=True)                          # (1, 1)
        val = jnp.sum(jnp.where(c_iota == carg, rval, 0.0),
                      axis=1, keepdims=True)                           # (1, 1)
        out_vec = out_vec + val * (p_iota == p).astype(jnp.float32)
    o_ref[0] = out_vec                                                 # (1, P)


def conv_band_layer(x_list, wband, bias, *, KH, SH, H_out, leaky,
                    select=False, payload=1, group_len=1):
    N, Hq, Kpad = x_list[0].shape
    wo_cout = wband.shape[2]
    kernel = functools.partial(_conv_band_kernel, KH=KH, SH=SH, H_out=H_out,
                               leaky=leaky, select=select, payload=payload,
                               group_len=group_len)
    in_specs = [pl.BlockSpec((1, Hq, Kpad), lambda n: (n, 0, 0))
                for _ in x_list]
    in_specs.append(pl.BlockSpec((KH, Kpad, wo_cout), lambda n: (0, 0, 0)))
    in_specs.append(pl.BlockSpec((1, wo_cout), lambda n: (0, 0)))
    if select:
        out_shape = jax.ShapeDtypeStruct((N, 1, payload), jnp.float32)
        out_spec = pl.BlockSpec((1, 1, payload), lambda n: (n, 0, 0))
    else:
        out_shape = jax.ShapeDtypeStruct((N, H_out, wo_cout), jnp.bfloat16)
        out_spec = pl.BlockSpec((1, H_out, wo_cout), lambda n: (n, 0, 0))
    return pl.pallas_call(
        kernel,
        out_shape=out_shape,
        grid=(N,),                                   # >= 2 parallel steps (v7x megacore)
        in_specs=in_specs,
        out_specs=out_spec,
        compiler_params=pltpu.CompilerParams(
            dimension_semantics=("parallel",),
            vmem_limit_bytes=32 * 1024 * 1024),
    )(*x_list, wband, bias)


# ---------------------------------------------------------------------------
# init-time weight preprocessing: fold BN scale + W padding into a banded matrix
# ---------------------------------------------------------------------------
def make_banded_weights(w, scale, *, w_in, pad_w, pad_mode):
    """w: (Cout, Cin, KH, KW) numpy. Returns (KH, Kpad, Wout*Cout) f32 and Wout.

    band[kh, w*Cin+ci, wo*Cout+co] accumulates w[co,ci,kh,kw]*scale[co] for every
    kw whose (reflect / zero) padded column wo+kw maps to input column w."""
    cout, cin, kh_sz, kw_sz = w.shape
    if pad_mode == "reflect":
        assert pad_w <= w_in - 1, "reflect pad requires pad < spatial size"
    w_out = w_in + 2 * pad_w - kw_sz + 1
    k_real = w_in * cin
    k_pad = max(LANE, ((k_real + LANE - 1) // LANE) * LANE)
    ws = np.asarray(w, np.float32) * np.asarray(scale, np.float32)[:, None, None, None]
    band = np.zeros((kh_sz, k_pad, w_out * cout), np.float32)
    for kh in range(kh_sz):
        tap = ws[:, :, kh, :]                        # (cout, cin, kw)
        for wo in range(w_out):
            for kw in range(kw_sz):
                j = wo + kw - pad_w
                if pad_mode == "reflect":
                    if j < 0:
                        j = -j
                    elif j >= w_in:
                        j = 2 * (w_in - 1) - j
                elif j < 0 or j >= w_in:
                    continue                         # zero padding -> no term
                band[kh, j * cin:(j + 1) * cin,
                     wo * cout:(wo + 1) * cout] += tap[:, :, kw].T
    return band, w_out


def init_params(key, w_trim):
    params = []
    keys = jax.random.split(key, len(LAYER_CFGS))
    for cfg, k in zip(LAYER_CFGS, keys):
        k1, k2, k3, k4, k5, k6 = jax.random.split(k, 6)
        cout, cin, KH, KW = cfg["cout"], cfg["cin"], cfg["kh"], cfg["kw"]
        fan_in = cin * KH * KW
        w = np.asarray(jax.random.normal(k1, (cout, cin, KH, KW), jnp.float32))
        w = w / np.sqrt(fan_in)
        b = 0.1 * np.asarray(jax.random.normal(k2, (cout,), jnp.float32))
        if cfg["bn"]:
            gamma = 1.0 + 0.1 * np.asarray(jax.random.normal(k3, (cout,), jnp.float32))
            beta = 0.1 * np.asarray(jax.random.normal(k4, (cout,), jnp.float32))
            mean = 0.1 * np.asarray(jax.random.normal(k5, (cout,), jnp.float32))
            var = 1.0 + 0.1 * np.asarray(jax.random.uniform(k6, (cout,), jnp.float32))
            scale = gamma / np.sqrt(var + BN_EPS)
            bias = (b - mean) * scale + beta
        else:
            scale = np.ones((cout,), np.float32)
            bias = b
        band, w_out = make_banded_weights(w, scale, w_in=w_trim,
                                          pad_w=cfg["pad_w"],
                                          pad_mode=cfg["pad_mode"])
        bias_flat = np.tile(bias.astype(np.float32), w_out).reshape(1, w_out * cout)
        params.append({"wband": jnp.asarray(band, jnp.bfloat16),
                       "bias": jnp.asarray(bias_flat, jnp.float32)})
    return params


# ---------------------------------------------------------------------------
# full forward pass (mirrors unet_decoder.forward)
# ---------------------------------------------------------------------------
def forward(params, x):
    # x: (N, H, W); torch unsqueezes a channel dim -> here Cin=1 lives fused
    # inside the lane-dense minor dim as (w*Cin + ci).
    N, H, W = x.shape
    GL = W // PAYLOAD_LENGTH              # group_length (on the original width)
    rem = W % PAYLOAD_LENGTH
    assert rem > 0, "x[..., :-0] would be empty in the reference code"
    w_trim = W - rem                      # == PAYLOAD_LENGTH * GL
    h = x[:, :, :w_trim].astype(jnp.bfloat16)         # (N, H, Wt*Cin), Cin=1

    cur_h = H
    for cfg, p in zip(LAYER_CFGS, params):
        KH, SH, ph = cfg["kh"], cfg["stride_h"], cfg["pad_h"]
        if cfg["pad_mode"] == "reflect":
            assert ph <= cur_h - 1, "reflect pad requires pad < spatial size"
        mode = "reflect" if cfg["pad_mode"] == "reflect" else "constant"
        hp = jnp.pad(h, ((0, 0), (ph, ph), (0, 0)), mode=mode)
        k_pad = p["wband"].shape[1]
        if hp.shape[-1] < k_pad:          # zero lanes matched by zero band rows
            hp = jnp.pad(hp, ((0, 0), (0, 0), (0, k_pad - hp.shape[-1])))
        if SH == 2:                       # even/odd H rows for the stride-2 pool
            x_list = [hp[:, 0::2, :], hp[:, 1::2, :]]
        else:
            x_list = [hp]
        h_out = (cur_h + 2 * ph - KH) // SH + 1
        h = conv_band_layer(x_list, p["wband"], p["bias"],
                            KH=KH, SH=SH, H_out=h_out, leaky=cfg["leaky"],
                            select=cfg["select"],
                            payload=PAYLOAD_LENGTH, group_len=GL)
        cur_h = h_out
    # last layer (conv_out + fused select) returned (N, 1, PAYLOAD_LENGTH)
    return h


if __name__ == "__main__":
    key = jax.random.PRNGKey(0)
    k_in, k_par = jax.random.split(key)

    N, H, W = 2, 16, 33                   # W % payload_length != 0 (required)
    x = jax.random.normal(k_in, (N, H, W), dtype=jnp.float32)

    params = init_params(k_par, W - W % PAYLOAD_LENGTH)

    out = jax.jit(forward)(params, x)
    out = jax.block_until_ready(out)

    assert out.shape == (N, 1, PAYLOAD_LENGTH), out.shape
    assert bool(jnp.all(jnp.isfinite(out)))
    print("KERNEL_OK")
</pallas_src>

<mosaic_0001>
module attributes {stable_mosaic.version = 11 : i64} {
  func.func @_conv_band_kernel(%arg0: i32, %arg1: memref<1x30x128xbf16, #tpu.memory_space<vmem>>, %arg2: memref<15x128x128xbf16, #tpu.memory_space<vmem>>, %arg3: memref<1x128xf32, #tpu.memory_space<vmem>>, %arg4: memref<1x16x128xbf16, #tpu.memory_space<vmem>>) attributes {dimension_semantics = [#tpu.dimension_semantics<parallel>], iteration_bounds = array<i64: 2>, scalar_prefetch = 0 : i64, scratch_operands = 0 : i64, tpu.core_type = #tpu.core_type<tc>, window_params = [{transform_indices = @transform_0, window_bounds = array<i64: 1, 30, 128>}, {pipeline_mode = #tpu.pipeline_mode<synchronous>, transform_indices = @transform_1, window_bounds = array<i64: 15, 128, 128>}, {pipeline_mode = #tpu.pipeline_mode<synchronous>, transform_indices = @transform_2, window_bounds = array<i64: 1, 128>}, {transform_indices = @transform_3, window_bounds = array<i64: 1, 16, 128>}]} {
    %cst = arith.constant 0.000000e+00 : f32
    %0 = vector.broadcast %cst : f32 to vector<16x128xf32>
    %c0 = arith.constant 0 : index
    %c0_0 = arith.constant 0 : index
    %c0_1 = arith.constant 0 : index
    %1 = vector.load %arg1[%c0, %c0_0, %c0_1] : memref<1x30x128xbf16, #tpu.memory_space<vmem>>, vector<1x16x128xbf16>
    %2 = vector.shape_cast %1 : vector<1x16x128xbf16> to vector<16x128xbf16>
    %c0_2 = arith.constant 0 : index
    %c0_3 = arith.constant 0 : index
    %c0_4 = arith.constant 0 : index
    %3 = vector.load %arg2[%c0_2, %c0_3, %c0_4] : memref<15x128x128xbf16, #tpu.memory_space<vmem>>, vector<1x128x128xbf16>
    %4 = vector.shape_cast %3 : vector<1x128x128xbf16> to vector<128x128xbf16>
    %cst_5 = arith.constant dense<0.000000e+00> : vector<16x128xf32>
    %5 = tpu.matmul %2, %4, %cst_5 {dimension_numbers = #tpu.dot_dimension_numbers<[1], [0], [0], [1], [0, 0, 1, 1], [], []>} : vector<16x128xbf16>, vector<128x128xbf16>, vector<16x128xf32> -> vector<16x128xf32>
    %6 = arith.addf %0, %5 : vector<16x128xf32>
    %c0_6 = arith.constant 0 : index
    %c1 = arith.constant 1 : index
    %c0_7 = arith.constant 0 : index
    %7 = vector.load %arg1[%c0_6, %c1, %c0_7] : memref<1x30x128xbf16, #tpu.memory_space<vmem>>, vector<1x16x128xbf16>
    %8 = vector.shape_cast %7 : vector<1x16x128xbf16> to vector<16x128xbf16>
    %c1_8 = arith.constant 1 : index
    %c0_9 = arith.constant 0 : index
    %c0_10 = arith.constant 0 : index
    %9 = vector.load %arg2[%c1_8, %c0_9, %c0_10] : memref<15x128x128xbf16, #tpu.memory_space<vmem>>, vector<1x128x128xbf16>
    %10 = vector.shape_cast %9 : vector<1x128x128xbf16> to vector<128x128xbf16>
    %cst_11 = arith.constant dense<0.000000e+00> : vector<16x128xf32>
    %11 = tpu.matmul %8, %10, %cst_11 {dimension_numbers = #tpu.dot_dimension_numbers<[1], [0], [0], [1], [0, 0, 1, 1], [], []>} : vector<16x128xbf16>, vector<128x128xbf16>, vector<16x128xf32> -> vector<16x128xf32>
    %12 = arith.addf %6, %11 : vector<16x128xf32>
    %c0_12 = arith.constant 0 : index
    %c2 = arith.constant 2 : index
    %c0_13 = arith.constant 0 : index
    %13 = vector.load %arg1[%c0_12, %c2, %c0_13] : memref<1x30x128xbf16, #tpu.memory_space<vmem>>, vector<1x16x128xbf16>
    %14 = vector.shape_cast %13 : vector<1x16x128xbf16> to vector<16x128xbf16>
    %c2_14 = arith.constant 2 : index
    %c0_15 = arith.constant 0 : index
    %c0_16 = arith.constant 0 : index
    %15 = vector.load %arg2[%c2_14, %c0_15, %c0_16] : memref<15x128x128xbf16, #tpu.memory_space<vmem>>, vector<1x128x128xbf16>
    %16 = vector.shape_cast %15 : vector<1x128x128xbf16> to vector<128x128xbf16>
    %cst_17 = arith.constant dense<0.000000e+00> : vector<16x128xf32>
    %17 = tpu.matmul %14, %16, %cst_17 {dimension_numbers = #tpu.dot_dimension_numbers<[1], [0], [0], [1], [0, 0, 1, 1], [], []>} : vector<16x128xbf16>, vector<128x128xbf16>, vector<16x128xf32> -> vector<16x128xf32>
    %18 = arith.addf %12, %17 : vector<16x128xf32>
    %c0_18 = arith.constant 0 : index
    %c3 = arith.constant 3 : index
    %c0_19 = arith.constant 0 : index
    %19 = vector.load %arg1[%c0_18, %c3, %c0_19] : memref<1x30x128xbf16, #tpu.memory_space<vmem>>, vector<1x16x128xbf16>
    %20 = vector.shape_cast %19 : vector<1x16x128xbf16> to vector<16x128xbf16>
    %c3_20 = arith.constant 3 : index
    %c0_21 = arith.constant 0 : index
    %c0_22 = arith.constant 0 : index
    %21 = vector.load %arg2[%c3_20, %c0_21, %c0_22] : memref<15x128x128xbf16, #tpu.memory_space<vmem>>, vector<1x128x128xbf16>
    %22 = vector.shape_cast %21 : vector<1x128x128xbf16> to vector<128x128xbf16>
    %cst_23 = arith.constant dense<0.000000e+00> : vector<16x128xf32>
    %23 = tpu.matmul %20, %22, %cst_23 {dimension_numbers = #tpu.dot_dimension_numbers<[1], [0], [0], [1], [0, 0, 1, 1], [], []>} : vector<16x128xbf16>, vector<128x128xbf16>, vector<16x128xf32> -> vector<16x128xf32>
    %24 = arith.addf %18, %23 : vector<16x128xf32>
    %c0_24 = arith.constant 0 : index
    %c4 = arith.constant 4 : index
    %c0_25 = arith.constant 0 : index
    %25 = vector.load %arg1[%c0_24, %c4, %c0_25] : memref<1x30x128xbf16, #tpu.memory_space<vmem>>, vector<1x16x128xbf16>
    %26 = vector.shape_cast %25 : vector<1x16x128xbf16> to vector<16x128xbf16>
    %c4_26 = arith.constant 4 : index
    %c0_27 = arith.constant 0 : index
    %c0_28 = arith.constant 0 : index
    %27 = vector.load %arg2[%c4_26, %c0_27, %c0_28] : memref<15x128x128xbf16, #tpu.memory_space<vmem>>, vector<1x128x128xbf16>
    %28 = vector.shape_cast %27 : vector<1x128x128xbf16> to vector<128x128xbf16>
    %cst_29 = arith.constant dense<0.000000e+00> : vector<16x128xf32>
    %29 = tpu.matmul %26, %28, %cst_29 {dimension_numbers = #tpu.dot_dimension_numbers<[1], [0], [0], [1], [0, 0, 1, 1], [], []>} : vector<16x128xbf16>, vector<128x128xbf16>, vector<16x128xf32> -> vector<16x128xf32>
    %30 = arith.addf %24, %29 : vector<16x128xf32>
    %c0_30 = arith.constant 0 : index
    %c5 = arith.constant 5 : index
    %c0_31 = arith.constant 0 : index
    %31 = vector.load %arg1[%c0_30, %c5, %c0_31] : memref<1x30x128xbf16, #tpu.memory_space<vmem>>, vector<1x16x128xbf16>
    %32 = vector.shape_cast %31 : vector<1x16x128xbf16> to vector<16x128xbf16>
    %c5_32 = arith.constant 5 : index
    %c0_33 = arith.constant 0 : index
    %c0_34 = arith.constant 0 : index
    %33 = vector.load %arg2[%c5_32, %c0_33, %c0_34] : memref<15x128x128xbf16, #tpu.memory_space<vmem>>, vector<1x128x128xbf16>
    %34 = vector.shape_cast %33 : vector<1x128x128xbf16> to vector<128x128xbf16>
    %cst_35 = arith.constant dense<0.000000e+00> : vector<16x128xf32>
    %35 = tpu.matmul %32, %34, %cst_35 {dimension_numbers = #tpu.dot_dimension_numbers<[1], [0], [0], [1], [0, 0, 1, 1], [], []>} : vector<16x128xbf16>, vector<128x128xbf16>, vector<16x128xf32> -> vector<16x128xf32>
    %36 = arith.addf %30, %35 : vector<16x128xf32>
    %c0_36 = arith.constant 0 : index
    %c6 = arith.constant 6 : index
    %c0_37 = arith.constant 0 : index
    %37 = vector.load %arg1[%c0_36, %c6, %c0_37] : memref<1x30x128xbf16, #tpu.memory_space<vmem>>, vector<1x16x128xbf16>
    %38 = vector.shape_cast %37 : vector<1x16x128xbf16> to vector<16x128xbf16>
    %c6_38 = arith.constant 6 : index
    %c0_39 = arith.constant 0 : index
    %c0_40 = arith.constant 0 : index
    %39 = vector.load %arg2[%c6_38, %c0_39, %c0_40] : memref<15x128x128xbf16, #tpu.memory_space<vmem>>, vector<1x128x128xbf16>
    %40 = vector.shape_cast %39 : vector<1x128x128xbf16> to vector<128x128xbf16>
    %cst_41 = arith.constant dense<0.000000e+00> : vector<16x128xf32>
    %41 = tpu.matmul %38, %40, %cst_41 {dimension_numbers = #tpu.dot_dimension_numbers<[1], [0], [0], [1], [0, 0, 1, 1], [], []>} : vector<16x128xbf16>, vector<128x128xbf16>, vector<16x128xf32> -> vector<16x128xf32>
    %42 = arith.addf %36, %41 : vector<16x128xf32>
    %c0_42 = arith.constant 0 : index
    %c7 = arith.constant 7 : index
    %c0_43 = arith.constant 0 : index
    %43 = vector.load %arg1[%c0_42, %c7, %c0_43] : memref<1x30x128xbf16, #tpu.memory_space<vmem>>, vector<1x16x128xbf16>
    %44 = vector.shape_cast %43 : vector<1x16x128xbf16> to vector<16x128xbf16>
    %c7_44 = arith.constant 7 : index
    %c0_45 = arith.constant 0 : index
    %c0_46 = arith.constant 0 : index
    %45 = vector.load %arg2[%c7_44, %c0_45, %c0_46] : memref<15x128x128xbf16, #tpu.memory_space<vmem>>, vector<1x128x128xbf16>
    %46 = vector.shape_cast %45 : vector<1x128x128xbf16> to vector<128x128xbf16>
    %cst_47 = arith.constant dense<0.000000e+00> : vector<16x128xf32>
    %47 = tpu.matmul %44, %46, %cst_47 {dimension_numbers = #tpu.dot_dimension_numbers<[1], [0], [0], [1], [0, 0, 1, 1], [], []>} : vector<16x128xbf16>, vector<128x128xbf16>, vector<16x128xf32> -> vector<16x128xf32>
    %48 = arith.addf %42, %47 : vector<16x128xf32>
    %c0_48 = arith.constant 0 : index
    %c8 = arith.constant 8 : index
    %c0_49 = arith.constant 0 : index
    %49 = vector.load %arg1[%c0_48, %c8, %c0_49] : memref<1x30x128xbf16, #tpu.memory_space<vmem>>, vector<1x16x128xbf16>
    %50 = vector.shape_cast %49 : vector<1x16x128xbf16> to vector<16x128xbf16>
    %c8_50 = arith.constant 8 : index
    %c0_51 = arith.constant 0 : index
    %c0_52 = arith.constant 0 : index
    %51 = vector.load %arg2[%c8_50, %c0_51, %c0_52] : memref<15x128x128xbf16, #tpu.memory_space<vmem>>, vector<1x128x128xbf16>
    %52 = vector.shape_cast %51 : vector<1x128x128xbf16> to vector<128x128xbf16>
    %cst_53 = arith.constant dense<0.000000e+00> : vector<16x128xf32>
    %53 = tpu.matmul %50, %52, %cst_53 {dimension_numbers = #tpu.dot_dimension_numbers<[1], [0], [0], [1], [0, 0, 1, 1], [], []>} : vector<16x128xbf16>, vector<128x128xbf16>, vector<16x128xf32> -> vector<16x128xf32>
    %54 = arith.addf %48, %53 : vector<16x128xf32>
    %c0_54 = arith.constant 0 : index
    %c9 = arith.constant 9 : index
    %c0_55 = arith.constant 0 : index
    %55 = vector.load %arg1[%c0_54, %c9, %c0_55] : memref<1x30x128xbf16, #tpu.memory_space<vmem>>, vector<1x16x128xbf16>
    %56 = vector.shape_cast %55 : vector<1x16x128xbf16> to vector<16x128xbf16>
    %c9_56 = arith.constant 9 : index
    %c0_57 = arith.constant 0 : index
    %c0_58 = arith.constant 0 : index
    %57 = vector.load %arg2[%c9_56, %c0_57, %c0_58] : memref<15x128x128xbf16, #tpu.memory_space<vmem>>, vector<1x128x128xbf16>
    %58 = vector.shape_cast %57 : vector<1x128x128xbf16> to vector<128x128xbf16>
    %cst_59 = arith.constant dense<0.000000e+00> : vector<16x128xf32>
    %59 = tpu.matmul %56, %58, %cst_59 {dimension_numbers = #tpu.dot_dimension_numbers<[1], [0], [0], [1], [0, 0, 1, 1], [], []>} : vector<16x128xbf16>, vector<128x128xbf16>, vector<16x128xf32> -> vector<16x128xf32>
    %60 = arith.addf %54, %59 : vector<16x128xf32>
    %c0_60 = arith.constant 0 : index
    %c10 = arith.constant 10 : index
    %c0_61 = arith.constant 0 : index
    %61 = vector.load %arg1[%c0_60, %c10, %c0_61] : memref<1x30x128xbf16, #tpu.memory_space<vmem>>, vector<1x16x128xbf16>
    %62 = vector.shape_cast %61 : vector<1x16x128xbf16> to vector<16x128xbf16>
    %c10_62 = arith.constant 10 : index
    %c0_63 = arith.constant 0 : index
    %c0_64 = arith.constant 0 : index
    %63 = vector.load %arg2[%c10_62, %c0_63, %c0_64] : memref<15x128x128xbf16, #tpu.memory_space<vmem>>, vector<1x128x128xbf16>
    %64 = vector.shape_cast %63 : vector<1x128x128xbf16> to vector<128x128xbf16>
    %cst_65 = arith.constant dense<0.000000e+00> : vector<16x128xf32>
    %65 = tpu.matmul %62, %64, %cst_65 {dimension_numbers = #tpu.dot_dimension_numbers<[1], [0], [0], [1], [0, 0, 1, 1], [], []>} : vector<16x128xbf16>, vector<128x128xbf16>, vector<16x128xf32> -> vector<16x128xf32>
    %66 = arith.addf %60, %65 : vector<16x128xf32>
    %c0_66 = arith.constant 0 : index
    %c11 = arith.constant 11 : index
    %c0_67 = arith.constant 0 : index
    %67 = vector.load %arg1[%c0_66, %c11, %c0_67] : memref<1x30x128xbf16, #tpu.memory_space<vmem>>, vector<1x16x128xbf16>
    %68 = vector.shape_cast %67 : vector<1x16x128xbf16> to vector<16x128xbf16>
    %c11_68 = arith.constant 11 : index
    %c0_69 = arith.constant 0 : index
    %c0_70 = arith.constant 0 : index
    %69 = vector.load %arg2[%c11_68, %c0_69, %c0_70] : memref<15x128x128xbf16, #tpu.memory_space<vmem>>, vector<1x128x128xbf16>
    %70 = vector.shape_cast %69 : vector<1x128x128xbf16> to vector<128x128xbf16>
    %cst_71 = arith.constant dense<0.000000e+00> : vector<16x128xf32>
    %71 = tpu.matmul %68, %70, %cst_71 {dimension_numbers = #tpu.dot_dimension_numbers<[1], [0], [0], [1], [0, 0, 1, 1], [], []>} : vector<16x128xbf16>, vector<128x128xbf16>, vector<16x128xf32> -> vector<16x128xf32>
    %72 = arith.addf %66, %71 : vector<16x128xf32>
    %c0_72 = arith.constant 0 : index
    %c12 = arith.constant 12 : index
    %c0_73 = arith.constant 0 : index
    %73 = vector.load %arg1[%c0_72, %c12, %c0_73] : memref<1x30x128xbf16, #tpu.memory_space<vmem>>, vector<1x16x128xbf16>
    %74 = vector.shape_cast %73 : vector<1x16x128xbf16> to vector<16x128xbf16>
    %c12_74 = arith.constant 12 : index
    %c0_75 = arith.constant 0 : index
    %c0_76 = arith.constant 0 : index
    %75 = vector.load %arg2[%c12_74, %c0_75, %c0_76] : memref<15x128x128xbf16, #tpu.memory_space<vmem>>, vector<1x128x128xbf16>
    %76 = vector.shape_cast %75 : vector<1x128x128xbf16> to vector<128x128xbf16>
    %cst_77 = arith.constant dense<0.000000e+00> : vector<16x128xf32>
    %77 = tpu.matmul %74, %76, %cst_77 {dimension_numbers = #tpu.dot_dimension_numbers<[1], [0], [0], [1], [0, 0, 1, 1], [], []>} : vector<16x128xbf16>, vector<128x128xbf16>, vector<16x128xf32> -> vector<16x128xf32>
    %78 = arith.addf %72, %77 : vector<16x128xf32>
    %c0_78 = arith.constant 0 : index
    %c13 = arith.constant 13 : index
    %c0_79 = arith.constant 0 : index
    %79 = vector.load %arg1[%c0_78, %c13, %c0_79] : memref<1x30x128xbf16, #tpu.memory_space<vmem>>, vector<1x16x128xbf16>
    %80 = vector.shape_cast %79 : vector<1x16x128xbf16> to vector<16x128xbf16>
    %c13_80 = arith.constant 13 : index
    %c0_81 = arith.constant 0 : index
    %c0_82 = arith.constant 0 : index
    %81 = vector.load %arg2[%c13_80, %c0_81, %c0_82] : memref<15x128x128xbf16, #tpu.memory_space<vmem>>, vector<1x128x128xbf16>
    %82 = vector.shape_cast %81 : vector<1x128x128xbf16> to vector<128x128xbf16>
    %cst_83 = arith.constant dense<0.000000e+00> : vector<16x128xf32>
    %83 = tpu.matmul %80, %82, %cst_83 {dimension_numbers = #tpu.dot_dimension_numbers<[1], [0], [0], [1], [0, 0, 1, 1], [], []>} : vector<16x128xbf16>, vector<128x128xbf16>, vector<16x128xf32> -> vector<16x128xf32>
    %84 = arith.addf %78, %83 : vector<16x128xf32>
    %c0_84 = arith.constant 0 : index
    %c14 = arith.constant 14 : index
    %c0_85 = arith.constant 0 : index
    %85 = vector.load %arg1[%c0_84, %c14, %c0_85] : memref<1x30x128xbf16, #tpu.memory_space<vmem>>, vector<1x16x128xbf16>
    %86 = vector.shape_cast %85 : vector<1x16x128xbf16> to vector<16x128xbf16>
    %c14_86 = arith.constant 14 : index
    %c0_87 = arith.constant 0 : index
    %c0_88 = arith.constant 0 : index
    %87 = vector.load %arg2[%c14_86, %c0_87, %c0_88] : memref<15x128x128xbf16, #tpu.memory_space<vmem>>, vector<1x128x128xbf16>
    %88 = vector.shape_cast %87 : vector<1x128x128xbf16> to vector<128x128xbf16>
    %cst_89 = arith.constant dense<0.000000e+00> : vector<16x128xf32>
    %89 = tpu.matmul %86, %88, %cst_89 {dimension_numbers = #tpu.dot_dimension_numbers<[1], [0], [0], [1], [0, 0, 1, 1], [], []>} : vector<16x128xbf16>, vector<128x128xbf16>, vector<16x128xf32> -> vector<16x128xf32>
    %90 = arith.addf %84, %89 : vector<16x128xf32>
    %c0_90 = arith.constant 0 : index
    %c0_91 = arith.constant 0 : index
    %91 = vector.load %arg3[%c0_90, %c0_91] : memref<1x128xf32, #tpu.memory_space<vmem>>, vector<1x128xf32>
    %92 = vector.broadcast %91 : vector<1x128xf32> to vector<16x128xf32>
    %93 = arith.addf %90, %92 : vector<16x128xf32>
    %cst_92 = arith.constant 0.000000e+00 : f32
    %94 = vector.broadcast %cst_92 : f32 to vector<16x128xf32>
    %95 = arith.cmpf oge, %93, %94 : vector<16x128xf32>
    %cst_93 = arith.constant 1.000000e-01 : f32
    %96 = vector.broadcast %cst_93 : f32 to vector<16x128xf32>
    %97 = arith.mulf %96, %93 : vector<16x128xf32>
    %98 = arith.select %95, %93, %97 : vector<16x128xi1>, vector<16x128xf32>
    %99 = arith.truncf %98 : vector<16x128xf32> to vector<16x128xbf16>
    %c0_94 = arith.constant 0 : index
    %c0_95 = arith.constant 0 : index
    %c0_96 = arith.constant 0 : index
    %100 = vector.load %arg4[%c0_94, %c0_95, %c0_96] : memref<1x16x128xbf16, #tpu.memory_space<vmem>>, vector<1x16x128xbf16>
    %101 = vector.shape_cast %100 : vector<1x16x128xbf16> to vector<16x128xbf16>
    %102 = vector.shape_cast %99 : vector<16x128xbf16> to vector<1x16x128xbf16>
    tpu.vector_store %arg4[%c0_94, %c0_95, %c0_96], %102 {strides = array<i32>} : memref<1x16x128xbf16, #tpu.memory_space<vmem>>, vector<1x16x128xbf16>,
    return
  }
  func.func @transform_0(%arg0: i32) -> (i32, i32, i32) {
    %c0_i32 = arith.constant 0 : i32
    %c0_i32_0 = arith.constant 0 : i32
    %c0_i32_1 = arith.constant 0 : i32
    return %arg0, %c0_i32, %c0_i32_0 : i32, i32, i32
  }
  func.func @transform_1(%arg0: i32) -> (i32, i32, i32) {
    %c0_i32 = arith.constant 0 : i32
    %c0_i32_0 = arith.constant 0 : i32
    %c0_i32_1 = arith.constant 0 : i32
    %c0_i32_2 = arith.constant 0 : i32
    return %c0_i32, %c0_i32_0, %c0_i32_1 : i32, i32, i32
  }
  func.func @transform_2(%arg0: i32) -> (i32, i32) {
    %c0_i32 = arith.constant 0 : i32
    %c0_i32_0 = arith.constant 0 : i32
    %c0_i32_1 = arith.constant 0 : i32
    return %c0_i32, %c0_i32_0 : i32, i32
  }
  func.func @transform_3(%arg0: i32) -> (i32, i32, i32) {
    %c0_i32 = arith.constant 0 : i32
    %c0_i32_0 = arith.constant 0 : i32
    %c0_i32_1 = arith.constant 0 : i32
    return %arg0, %c0_i32, %c0_i32_0 : i32, i32, i32
  }
}

module attributes {stable_mosaic.version = 11 : i64} {
  func.func @_conv_band_kernel(%arg0: i32, %arg1: memref<1x22x128xbf16, #tpu.memory_space<vmem>>, %arg2: memref<15x128x256xbf16, #tpu.memory_space<vmem>>, %arg3: memref<1x256xf32, #tpu.memory_space<vmem>>, %arg4: memref<1x8x256xbf16, #tpu.memory_space<vmem>>) attributes {dimension_semantics = [#tpu.dimension_semantics<parallel>], iteration_bounds = array<i64: 2>, scalar_prefetch = 0 : i64, scratch_operands = 0 : i64, tpu.core_type = #tpu.core_type<tc>, window_params = [{transform_indices = @transform_0, window_bounds = array<i64: 1, 22, 128>}, {pipeline_mode = #tpu.pipeline_mode<synchronous>, transform_indices = @transform_1, window_bounds = array<i64: 15, 128, 256>}, {pipeline_mode = #tpu.pipeline_mode<synchronous>, transform_indices = @transform_2, window_bounds = array<i64: 1, 256>}, {transform_indices = @transform_3, window_bounds = array<i64: 1, 8, 256>}]} {
    %cst = arith.constant 0.000000e+00 : f32
    %0 = vector.broadcast %cst : f32 to vector<8x256xf32>
    %c0 = arith.constant 0 : index
    %c0_0 = arith.constant 0 : index
    %c0_1 = arith.constant 0 : index
    %1 = vector.load %arg1[%c0, %c0_0, %c0_1] : memref<1x22x128xbf16, #tpu.memory_space<vmem>>, vector<1x8x128xbf16>
    %2 = vector.shape_cast %1 : vector<1x8x128xbf16> to vector<8x128xbf16>
    %c0_2 = arith.constant 0 : index
    %c0_3 = arith.constant 0 : index
    %c0_4 = arith.constant 0 : index
    %3 = vector.load %arg2[%c0_2, %c0_3, %c0_4] : memref<15x128x256xbf16, #tpu.memory_space<vmem>>, vector<1x128x256xbf16>
    %4 = vector.shape_cast %3 : vector<1x128x256xbf16> to vector<128x256xbf16>
    %cst_5 = arith.constant dense<0.000000e+00> : vector<8x256xf32>
    %5 = tpu.matmul %2, %4, %cst_5 {dimension_numbers = #tpu.dot_dimension_numbers<[1], [0], [0], [1], [0, 0, 1, 1], [], []>} : vector<8x128xbf16>, vector<128x256xbf16>, vector<8x256xf32> -> vector<8x256xf32>
    %6 = arith.addf %0, %5 : vector<8x256xf32>
    %c0_6 = arith.constant 0 : index
    %c1 = arith.constant 1 : index
    %c0_7 = arith.constant 0 : index
    %7 = vector.load %arg1[%c0_6, %c1, %c0_7] : memref<1x22x128xbf16, #tpu.memory_space<vmem>>, vector<1x8x128xbf16>
    %8 = vector.shape_cast %7 : vector<1x8x128xbf16> to vector<8x128xbf16>
    %c1_8 = arith.constant 1 : index
    %c0_9 = arith.constant 0 : index
    %c0_10 = arith.constant 0 : index
    %9 = vector.load %arg2[%c1_8, %c0_9, %c0_10] : memref<15x128x256xbf16, #tpu.memory_space<vmem>>, vector<1x128x256xbf16>
    %10 = vector.shape_cast %9 : vector<1x128x256xbf16> to vector<128x256xbf16>
    %cst_11 = arith.constant dense<0.000000e+00> : vector<8x256xf32>
    %11 = tpu.matmul %8, %10, %cst_11 {dimension_numbers = #tpu.dot_dimension_numbers<[1], [0], [0], [1], [0, 0, 1, 1], [], []>} : vector<8x128xbf16>, vector<128x256xbf16>, vector<8x256xf32> -> vector<8x256xf32>
    %12 = arith.addf %6, %11 : vector<8x256xf32>
    %c0_12 = arith.constant 0 : index
    %c2 = arith.constant 2 : index
    %c0_13 = arith.constant 0 : index
    %13 = vector.load %arg1[%c0_12, %c2, %c0_13] : memref<1x22x128xbf16, #tpu.memory_space<vmem>>, vector<1x8x128xbf16>
    %14 = vector.shape_cast %13 : vector<1x8x128xbf16> to vector<8x128xbf16>
    %c2_14 = arith.constant 2 : index
    %c0_15 = arith.constant 0 : index
    %c0_16 = arith.constant 0 : index
    %15 = vector.load %arg2[%c2_14, %c0_15, %c0_16] : memref<15x128x256xbf16, #tpu.memory_space<vmem>>, vector<1x128x256xbf16>
    %16 = vector.shape_cast %15 : vector<1x128x256xbf16> to vector<128x256xbf16>
    %cst_17 = arith.constant dense<0.000000e+00> : vector<8x256xf32>
    %17 = tpu.matmul %14, %16, %cst_17 {dimension_numbers = #tpu.dot_dimension_numbers<[1], [0], [0], [1], [0, 0, 1, 1], [], []>} : vector<8x128xbf16>, vector<128x256xbf16>, vector<8x256xf32> -> vector<8x256xf32>
    %18 = arith.addf %12, %17 : vector<8x256xf32>
    %c0_18 = arith.constant 0 : index
    %c3 = arith.constant 3 : index
    %c0_19 = arith.constant 0 : index
    %19 = vector.load %arg1[%c0_18, %c3, %c0_19] : memref<1x22x128xbf16, #tpu.memory_space<vmem>>, vector<1x8x128xbf16>
    %20 = vector.shape_cast %19 : vector<1x8x128xbf16> to vector<8x128xbf16>
    %c3_20 = arith.constant 3 : index
    %c0_21 = arith.constant 0 : index
    %c0_22 = arith.constant 0 : index
    %21 = vector.load %arg2[%c3_20, %c0_21, %c0_22] : memref<15x128x256xbf16, #tpu.memory_space<vmem>>, vector<1x128x256xbf16>
    %22 = vector.shape_cast %21 : vector<1x128x256xbf16> to vector<128x256xbf16>
    %cst_23 = arith.constant dense<0.000000e+00> : vector<8x256xf32>
    %23 = tpu.matmul %20, %22, %cst_23 {dimension_numbers = #tpu.dot_dimension_numbers<[1], [0], [0], [1], [0, 0, 1, 1], [], []>} : vector<8x128xbf16>, vector<128x256xbf16>, vector<8x256xf32> -> vector<8x256xf32>
    %24 = arith.addf %18, %23 : vector<8x256xf32>
    %c0_24 = arith.constant 0 : index
    %c4 = arith.constant 4 : index
    %c0_25 = arith.constant 0 : index
    %25 = vector.load %arg1[%c0_24, %c4, %c0_25] : memref<1x22x128xbf16, #tpu.memory_space<vmem>>, vector<1x8x128xbf16>
    %26 = vector.shape_cast %25 : vector<1x8x128xbf16> to vector<8x128xbf16>
    %c4_26 = arith.constant 4 : index
    %c0_27 = arith.constant 0 : index
    %c0_28 = arith.constant 0 : index
    %27 = vector.load %arg2[%c4_26, %c0_27, %c0_28] : memref<15x128x256xbf16, #tpu.memory_space<vmem>>, vector<1x128x256xbf16>
    %28 = vector.shape_cast %27 : vector<1x128x256xbf16> to vector<128x256xbf16>
    %cst_29 = arith.constant dense<0.000000e+00> : vector<8x256xf32>
    %29 = tpu.matmul %26, %28, %cst_29 {dimension_numbers = #tpu.dot_dimension_numbers<[1], [0], [0], [1], [0, 0, 1, 1], [], []>} : vector<8x128xbf16>, vector<128x256xbf16>, vector<8x256xf32> -> vector<8x256xf32>
    %30 = arith.addf %24, %29 : vector<8x256xf32>
    %c0_30 = arith.constant 0 : index
    %c5 = arith.constant 5 : index
    %c0_31 = arith.constant 0 : index
    %31 = vector.load %arg1[%c0_30, %c5, %c0_31] : memref<1x22x128xbf16, #tpu.memory_space<vmem>>, vector<1x8x128xbf16>
    %32 = vector.shape_cast %31 : vector<1x8x128xbf16> to vector<8x128xbf16>
    %c5_32 = arith.constant 5 : index
    %c0_33 = arith.constant 0 : index
    %c0_34 = arith.constant 0 : index
    %33 = vector.load %arg2[%c5_32, %c0_33, %c0_34] : memref<15x128x256xbf16, #tpu.memory_space<vmem>>, vector<1x128x256xbf16>
    %34 = vector.shape_cast %33 : vector<1x128x256xbf16> to vector<128x256xbf16>
    %cst_35 = arith.constant dense<0.000000e+00> : vector<8x256xf32>
    %35 = tpu.matmul %32, %34, %cst_35 {dimension_numbers = #tpu.dot_dimension_numbers<[1], [0], [0], [1], [0, 0, 1, 1], [], []>} : vector<8x128xbf16>, vector<128x256xbf16>, vector<8x256xf32> -> vector<8x256xf32>
    %36 = arith.addf %30, %35 : vector<8x256xf32>
    %c0_36 = arith.constant 0 : index
    %c6 = arith.constant 6 : index
    %c0_37 = arith.constant 0 : index
    %37 = vector.load %arg1[%c0_36, %c6, %c0_37] : memref<1x22x128xbf16, #tpu.memory_space<vmem>>, vector<1x8x128xbf16>
    %38 = vector.shape_cast %37 : vector<1x8x128xbf16> to vector<8x128xbf16>
    %c6_38 = arith.constant 6 : index
    %c0_39 = arith.constant 0 : index
    %c0_40 = arith.constant 0 : index
    %39 = vector.load %arg2[%c6_38, %c0_39, %c0_40] : memref<15x128x256xbf16, #tpu.memory_space<vmem>>, vector<1x128x256xbf16>
    %40 = vector.shape_cast %39 : vector<1x128x256xbf16> to vector<128x256xbf16>
    %cst_41 = arith.constant dense<0.000000e+00> : vector<8x256xf32>
    %41 = tpu.matmul %38, %40, %cst_41 {dimension_numbers = #tpu.dot_dimension_numbers<[1], [0], [0], [1], [0, 0, 1, 1], [], []>} : vector<8x128xbf16>, vector<128x256xbf16>, vector<8x256xf32> -> vector<8x256xf32>
    %42 = arith.addf %36, %41 : vector<8x256xf32>
    %c0_42 = arith.constant 0 : index
    %c7 = arith.constant 7 : index
    %c0_43 = arith.constant 0 : index
    %43 = vector.load %arg1[%c0_42, %c7, %c0_43] : memref<1x22x128xbf16, #tpu.memory_space<vmem>>, vector<1x8x128xbf16>
    %44 = vector.shape_cast %43 : vector<1x8x128xbf16> to vector<8x128xbf16>
    %c7_44 = arith.constant 7 : index
    %c0_45 = arith.constant 0 : index
    %c0_46 = arith.constant 0 : index
    %45 = vector.load %arg2[%c7_44, %c0_45, %c0_46] : memref<15x128x256xbf16, #tpu.memory_space<vmem>>, vector<1x128x256xbf16>
    %46 = vector.shape_cast %45 : vector<1x128x256xbf16> to vector<128x256xbf16>
    %cst_47 = arith.constant dense<0.000000e+00> : vector<8x256xf32>
    %47 = tpu.matmul %44, %46, %cst_47 {dimension_numbers = #tpu.dot_dimension_numbers<[1], [0], [0], [1], [0, 0, 1, 1], [], []>} : vector<8x128xbf16>, vector<128x256xbf16>, vector<8x256xf32> -> vector<8x256xf32>
    %48 = arith.addf %42, %47 : vector<8x256xf32>
    %c0_48 = arith.constant 0 : index
    %c8 = arith.constant 8 : index
    %c0_49 = arith.constant 0 : index
    %49 = vector.load %arg1[%c0_48, %c8, %c0_49] : memref<1x22x128xbf16, #tpu.memory_space<vmem>>, vector<1x8x128xbf16>
    %50 = vector.shape_cast %49 : vector<1x8x128xbf16> to vector<8x128xbf16>
    %c8_50 = arith.constant 8 : index
    %c0_51 = arith.constant 0 : index
    %c0_52 = arith.constant 0 : index
    %51 = vector.load %arg2[%c8_50, %c0_51, %c0_52] : memref<15x128x256xbf16, #tpu.memory_space<vmem>>, vector<1x128x256xbf16>
    %52 = vector.shape_cast %51 : vector<1x128x256xbf16> to vector<128x256xbf16>
    %cst_53 = arith.constant dense<0.000000e+00> : vector<8x256xf32>
    %53 = tpu.matmul %50, %52, %cst_53 {dimension_numbers = #tpu.dot_dimension_numbers<[1], [0], [0], [1], [0, 0, 1, 1], [], []>} : vector<8x128xbf16>, vector<128x256xbf16>, vector<8x256xf32> -> vector<8x256xf32>
    %54 = arith.addf %48, %53 : vector<8x256xf32>
    %c0_54 = arith.constant 0 : index
    %c9 = arith.constant 9 : index
    %c0_55 = arith.constant 0 : index
    %55 = vector.load %arg1[%c0_54, %c9, %c0_55] : memref<1x22x128xbf16, #tpu.memory_space<vmem>>, vector<1x8x128xbf16>
    %56 = vector.shape_cast %55 : vector<1x8x128xbf16> to vector<8x128xbf16>
    %c9_56 = arith.constant 9 : index
    %c0_57 = arith.constant 0 : index
    %c0_58 = arith.constant 0 : index
    %57 = vector.load %arg2[%c9_56, %c0_57, %c0_58] : memref<15x128x256xbf16, #tpu.memory_space<vmem>>, vector<1x128x256xbf16>
    %58 = vector.shape_cast %57 : vector<1x128x256xbf16> to vector<128x256xbf16>
    %cst_59 = arith.constant dense<0.000000e+00> : vector<8x256xf32>
    %59 = tpu.matmul %56, %58, %cst_59 {dimension_numbers = #tpu.dot_dimension_numbers<[1], [0], [0], [1], [0, 0, 1, 1], [], []>} : vector<8x128xbf16>, vector<128x256xbf16>, vector<8x256xf32> -> vector<8x256xf32>
    %60 = arith.addf %54, %59 : vector<8x256xf32>
    %c0_60 = arith.constant 0 : index
    %c10 = arith.constant 10 : index
    %c0_61 = arith.constant 0 : index
    %61 = vector.load %arg1[%c0_60, %c10, %c0_61] : memref<1x22x128xbf16, #tpu.memory_space<vmem>>, vector<1x8x128xbf16>
    %62 = vector.shape_cast %61 : vector<1x8x128xbf16> to vector<8x128xbf16>
    %c10_62 = arith.constant 10 : index
    %c0_63 = arith.constant 0 : index
    %c0_64 = arith.constant 0 : index
    %63 = vector.load %arg2[%c10_62, %c0_63, %c0_64] : memref<15x128x256xbf16, #tpu.memory_space<vmem>>, vector<1x128x256xbf16>
    %64 = vector.shape_cast %63 : vector<1x128x256xbf16> to vector<128x256xbf16>
    %cst_65 = arith.constant dense<0.000000e+00> : vector<8x256xf32>
    %65 = tpu.matmul %62, %64, %cst_65 {dimension_numbers = #tpu.dot_dimension_numbers<[1], [0], [0], [1], [0, 0, 1, 1], [], []>} : vector<8x128xbf16>, vector<128x256xbf16>, vector<8x256xf32> -> vector<8x256xf32>
    %66 = arith.addf %60, %65 : vector<8x256xf32>
    %c0_66 = arith.constant 0 : index
    %c11 = arith.constant 11 : index
    %c0_67 = arith.constant 0 : index
    %67 = vector.load %arg1[%c0_66, %c11, %c0_67] : memref<1x22x128xbf16, #tpu.memory_space<vmem>>, vector<1x8x128xbf16>
    %68 = vector.shape_cast %67 : vector<1x8x128xbf16> to vector<8x128xbf16>
    %c11_68 = arith.constant 11 : index
    %c0_69 = arith.constant 0 : index
    %c0_70 = arith.constant 0 : index
    %69 = vector.load %arg2[%c11_68, %c0_69, %c0_70] : memref<15x128x256xbf16, #tpu.memory_space<vmem>>, vector<1x128x256xbf16>
    %70 = vector.shape_cast %69 : vector<1x128x256xbf16> to vector<128x256xbf16>
    %cst_71 = arith.constant dense<0.000000e+00> : vector<8x256xf32>
    %71 = tpu.matmul %68, %70, %cst_71 {dimension_numbers = #tpu.dot_dimension_numbers<[1], [0], [0], [1], [0, 0, 1, 1], [], []>} : vector<8x128xbf16>, vector<128x256xbf16>, vector<8x256xf32> -> vector<8x256xf32>
    %72 = arith.addf %66, %71 : vector<8x256xf32>
    %c0_72 = arith.constant 0 : index
    %c12 = arith.constant 12 : index
    %c0_73 = arith.constant 0 : index
    %73 = vector.load %arg1[%c0_72, %c12, %c0_73] : memref<1x22x128xbf16, #tpu.memory_space<vmem>>, vector<1x8x128xbf16>
    %74 = vector.shape_cast %73 : vector<1x8x128xbf16> to vector<8x128xbf16>
    %c12_74 = arith.constant 12 : index
    %c0_75 = arith.constant 0 : index
    %c0_76 = arith.constant 0 : index
    %75 = vector.load %arg2[%c12_74, %c0_75, %c0_76] : memref<15x128x256xbf16, #tpu.memory_space<vmem>>, vector<1x128x256xbf16>
    %76 = vector.shape_cast %75 : vector<1x128x256xbf16> to vector<128x256xbf16>
    %cst_77 = arith.constant dense<0.000000e+00> : vector<8x256xf32>
    %77 = tpu.matmul %74, %76, %cst_77 {dimension_numbers = #tpu.dot_dimension_numbers<[1], [0], [0], [1], [0, 0, 1, 1], [], []>} : vector<8x128xbf16>, vector<128x256xbf16>, vector<8x256xf32> -> vector<8x256xf32>
    %78 = arith.addf %72, %77 : vector<8x256xf32>
    %c0_78 = arith.constant 0 : index
    %c13 = arith.constant 13 : index
    %c0_79 = arith.constant 0 : index
    %79 = vector.load %arg1[%c0_78, %c13, %c0_79] : memref<1x22x128xbf16, #tpu.memory_space<vmem>>, vector<1x8x128xbf16>
    %80 = vector.shape_cast %79 : vector<1x8x128xbf16> to vector<8x128xbf16>
    %c13_80 = arith.constant 13 : index
    %c0_81 = arith.constant 0 : index
    %c0_82 = arith.constant 0 : index
    %81 = vector.load %arg2[%c13_80, %c0_81, %c0_82] : memref<15x128x256xbf16, #tpu.memory_space<vmem>>, vector<1x128x256xbf16>
    %82 = vector.shape_cast %81 : vector<1x128x256xbf16> to vector<128x256xbf16>
    %cst_83 = arith.constant dense<0.000000e+00> : vector<8x256xf32>
    %83 = tpu.matmul %80, %82, %cst_83 {dimension_numbers = #tpu.dot_dimension_numbers<[1], [0], [0], [1], [0, 0, 1, 1], [], []>} : vector<8x128xbf16>, vector<128x256xbf16>, vector<8x256xf32> -> vector<8x256xf32>
    %84 = arith.addf %78, %83 : vector<8x256xf32>
    %c0_84 = arith.constant 0 : index
    %c14 = arith.constant 14 : index
    %c0_85 = arith.constant 0 : index
    %85 = vector.load %arg1[%c0_84, %c14, %c0_85] : memref<1x22x128xbf16, #tpu.memory_space<vmem>>, vector<1x8x128xbf16>
    %86 = vector.shape_cast %85 : vector<1x8x128xbf16> to vector<8x128xbf16>
    %c14_86 = arith.constant 14 : index
    %c0_87 = arith.constant 0 : index
    %c0_88 = arith.constant 0 : index
    %87 = vector.load %arg2[%c14_86, %c0_87, %c0_88] : memref<15x128x256xbf16, #tpu.memory_space<vmem>>, vector<1x128x256xbf16>
    %88 = vector.shape_cast %87 : vector<1x128x256xbf16> to vector<128x256xbf16>
    %cst_89 = arith.constant dense<0.000000e+00> : vector<8x256xf32>
    %89 = tpu.matmul %86, %88, %cst_89 {dimension_numbers = #tpu.dot_dimension_numbers<[1], [0], [0], [1], [0, 0, 1, 1], [], []>} : vector<8x128xbf16>, vector<128x256xbf16>, vector<8x256xf32> -> vector<8x256xf32>
    %90 = arith.addf %84, %89 : vector<8x256xf32>
    %c0_90 = arith.constant 0 : index
    %c0_91 = arith.constant 0 : index
    %91 = vector.load %arg3[%c0_90, %c0_91] : memref<1x256xf32, #tpu.memory_space<vmem>>, vector<1x256xf32>
    %92 = vector.broadcast %91 : vector<1x256xf32> to vector<8x256xf32>
    %93 = arith.addf %90, %92 : vector<8x256xf32>
    %cst_92 = arith.constant 0.000000e+00 : f32
    %94 = vector.broadcast %cst_92 : f32 to vector<8x256xf32>
    %95 = arith.cmpf oge, %93, %94 : vector<8x256xf32>
    %cst_93 = arith.constant 1.000000e-01 : f32
    %96 = vector.broadcast %cst_93 : f32 to vector<8x256xf32>
    %97 = arith.mulf %96, %93 : vector<8x256xf32>
    %98 = arith.select %95, %93, %97 : vector<8x256xi1>, vector<8x256xf32>
    %99 = arith.truncf %98 : vector<8x256xf32> to vector<8x256xbf16>
    %c0_94 = arith.constant 0 : index
    %c0_95 = arith.constant 0 : index
    %c0_96 = arith.constant 0 : index
    %100 = vector.load %arg4[%c0_94, %c0_95, %c0_96] : memref<1x8x256xbf16, #tpu.memory_space<vmem>>, vector<1x8x256xbf16>
    %101 = vector.shape_cast %100 : vector<1x8x256xbf16> to vector<8x256xbf16>
    %102 = vector.shape_cast %99 : vector<8x256xbf16> to vector<1x8x256xbf16>
    tpu.vector_store %arg4[%c0_94, %c0_95, %c0_96], %102 {strides = array<i32>} : memref<1x8x256xbf16, #tpu.memory_space<vmem>>, vector<1x8x256xbf16>,
    return
  }
  func.func @transform_0(%arg0: i32) -> (i32, i32, i32) {
    %c0_i32 = arith.constant 0 : i32
    %c0_i32_0 = arith.constant 0 : i32
    %c0_i32_1 = arith.constant 0 : i32
    return %arg0, %c0_i32, %c0_i32_0 : i32, i32, i32
  }
  func.func @transform_1(%arg0: i32) -> (i32, i32, i32) {
    %c0_i32 = arith.constant 0 : i32
    %c0_i32_0 = arith.constant 0 : i32
    %c0_i32_1 = arith.constant 0 : i32
    %c0_i32_2 = arith.constant 0 : i32
    return %c0_i32, %c0_i32_0, %c0_i32_1 : i32, i32, i32
  }
  func.func @transform_2(%arg0: i32) -> (i32, i32) {
    %c0_i32 = arith.constant 0 : i32
    %c0_i32_0 = arith.constant 0 : i32
    %c0_i32_1 = arith.constant 0 : i32
    return %c0_i32, %c0_i32_0 : i32, i32
  }
  func.func @transform_3(%arg0: i32) -> (i32, i32, i32) {
    %c0_i32 = arith.constant 0 : i32
    %c0_i32_0 = arith.constant 0 : i32
    %c0_i32_1 = arith.constant 0 : i32
    return %arg0, %c0_i32, %c0_i32_0 : i32, i32, i32
  }
}

module attributes {stable_mosaic.version = 11 : i64} {
  func.func @_conv_band_kernel(%arg0: i32, %arg1: memref<1x9x128xbf16, #tpu.memory_space<vmem>>, %arg2: memref<1x9x128xbf16, #tpu.memory_space<vmem>>, %arg3: memref<4x128x128xbf16, #tpu.memory_space<vmem>>, %arg4: memref<1x128xf32, #tpu.memory_space<vmem>>, %arg5: memref<1x8x128xbf16, #tpu.memory_space<vmem>>) attributes {dimension_semantics = [#tpu.dimension_semantics<parallel>], iteration_bounds = array<i64: 2>, scalar_prefetch = 0 : i64, scratch_operands = 0 : i64, tpu.core_type = #tpu.core_type<tc>, window_params = [{transform_indices = @transform_0, window_bounds = array<i64: 1, 9, 128>}, {transform_indices = @transform_1, window_bounds = array<i64: 1, 9, 128>}, {pipeline_mode = #tpu.pipeline_mode<synchronous>, transform_indices = @transform_2, window_bounds = array<i64: 4, 128, 128>}, {pipeline_mode = #tpu.pipeline_mode<synchronous>, transform_indices = @transform_3, window_bounds = array<i64: 1, 128>}, {transform_indices = @transform_4, window_bounds = array<i64: 1, 8, 128>}]} {
    %cst = arith.constant 0.000000e+00 : f32
    %0 = vector.broadcast %cst : f32 to vector<8x128xf32>
    %c0 = arith.constant 0 : index
    %c0_0 = arith.constant 0 : index
    %c0_1 = arith.constant 0 : index
    %1 = vector.load %arg1[%c0, %c0_0, %c0_1] : memref<1x9x128xbf16, #tpu.memory_space<vmem>>, vector<1x8x128xbf16>
    %2 = vector.shape_cast %1 : vector<1x8x128xbf16> to vector<8x128xbf16>
    %c0_2 = arith.constant 0 : index
    %c0_3 = arith.constant 0 : index
    %c0_4 = arith.constant 0 : index
    %3 = vector.load %arg3[%c0_2, %c0_3, %c0_4] : memref<4x128x128xbf16, #tpu.memory_space<vmem>>, vector<1x128x128xbf16>
    %4 = vector.shape_cast %3 : vector<1x128x128xbf16> to vector<128x128xbf16>
    %cst_5 = arith.constant dense<0.000000e+00> : vector<8x128xf32>
    %5 = tpu.matmul %2, %4, %cst_5 {dimension_numbers = #tpu.dot_dimension_numbers<[1], [0], [0], [1], [0, 0, 1, 1], [], []>} : vector<8x128xbf16>, vector<128x128xbf16>, vector<8x128xf32> -> vector<8x128xf32>
    %6 = arith.addf %0, %5 : vector<8x128xf32>
    %c0_6 = arith.constant 0 : index
    %c0_7 = arith.constant 0 : index
    %c0_8 = arith.constant 0 : index
    %7 = vector.load %arg2[%c0_6, %c0_7, %c0_8] : memref<1x9x128xbf16, #tpu.memory_space<vmem>>, vector<1x8x128xbf16>
    %8 = vector.shape_cast %7 : vector<1x8x128xbf16> to vector<8x128xbf16>
    %c1 = arith.constant 1 : index
    %c0_9 = arith.constant 0 : index
    %c0_10 = arith.constant 0 : index
    %9 = vector.load %arg3[%c1, %c0_9, %c0_10] : memref<4x128x128xbf16, #tpu.memory_space<vmem>>, vector<1x128x128xbf16>
    %10 = vector.shape_cast %9 : vector<1x128x128xbf16> to vector<128x128xbf16>
    %cst_11 = arith.constant dense<0.000000e+00> : vector<8x128xf32>
    %11 = tpu.matmul %8, %10, %cst_11 {dimension_numbers = #tpu.dot_dimension_numbers<[1], [0], [0], [1], [0, 0, 1, 1], [], []>} : vector<8x128xbf16>, vector<128x128xbf16>, vector<8x128xf32> -> vector<8x128xf32>
    %12 = arith.addf %6, %11 : vector<8x128xf32>
    %c0_12 = arith.constant 0 : index
    %c1_13 = arith.constant 1 : index
    %c0_14 = arith.constant 0 : index
    %13 = vector.load %arg1[%c0_12, %c1_13, %c0_14] : memref<1x9x128xbf16, #tpu.memory_space<vmem>>, vector<1x8x128xbf16>
    %14 = vector.shape_cast %13 : vector<1x8x128xbf16> to vector<8x128xbf16>
    %c2 = arith.constant 2 : index
    %c0_15 = arith.constant 0 : index
    %c0_16 = arith.constant 0 : index
    %15 = vector.load %arg3[%c2, %c0_15, %c0_16] : memref<4x128x128xbf16, #tpu.memory_space<vmem>>, vector<1x128x128xbf16>
    %16 = vector.shape_cast %15 : vector<1x128x128xbf16> to vector<128x128xbf16>
    %cst_17 = arith.constant dense<0.000000e+00> : vector<8x128xf32>
    %17 = tpu.matmul %14, %16, %cst_17 {dimension_numbers = #tpu.dot_dimension_numbers<[1], [0], [0], [1], [0, 0, 1, 1], [], []>} : vector<8x128xbf16>, vector<128x128xbf16>, vector<8x128xf32> -> vector<8x128xf32>
    %18 = arith.addf %12, %17 : vector<8x128xf32>
    %c0_18 = arith.constant 0 : index
    %c1_19 = arith.constant 1 : index
    %c0_20 = arith.constant 0 : index
    %19 = vector.load %arg2[%c0_18, %c1_19, %c0_20] : memref<1x9x128xbf16, #tpu.memory_space<vmem>>, vector<1x8x128xbf16>
    %20 = vector.shape_cast %19 : vector<1x8x128xbf16> to vector<8x128xbf16>
    %c3 = arith.constant 3 : index
    %c0_21 = arith.constant 0 : index
    %c0_22 = arith.constant 0 : index
    %21 = vector.load %arg3[%c3, %c0_21, %c0_22] : memref<4x128x128xbf16, #tpu.memory_space<vmem>>, vector<1x128x128xbf16>
    %22 = vector.shape_cast %21 : vector<1x128x128xbf16> to vector<128x128xbf16>
    %cst_23 = arith.constant dense<0.000000e+00> : vector<8x128xf32>
    %23 = tpu.matmul %20, %22, %cst_23 {dimension_numbers = #tpu.dot_dimension_numbers<[1], [0], [0], [1], [0, 0, 1, 1], [], []>} : vector<8x128xbf16>, vector<128x128xbf16>, vector<8x128xf32> -> vector<8x128xf32>
    %24 = arith.addf %18, %23 : vector<8x128xf32>
    %c0_24 = arith.constant 0 : index
    %c0_25 = arith.constant 0 : index
    %25 = vector.load %arg4[%c0_24, %c0_25] : memref<1x128xf32, #tpu.memory_space<vmem>>, vector<1x128xf32>
    %26 = vector.broadcast %25 : vector<1x128xf32> to vector<8x128xf32>
    %27 = arith.addf %24, %26 : vector<8x128xf32>
    %28 = arith.truncf %27 : vector<8x128xf32> to vector<8x128xbf16>
    %c0_26 = arith.constant 0 : index
    %c0_27 = arith.constant 0 : index
    %c0_28 = arith.constant 0 : index
    %29 = vector.load %arg5[%c0_26, %c0_27, %c0_28] : memref<1x8x128xbf16, #tpu.memory_space<vmem>>, vector<1x8x128xbf16>
    %30 = vector.shape_cast %29 : vector<1x8x128xbf16> to vector<8x128xbf16>
    %31 = vector.shape_cast %28 : vector<8x128xbf16> to vector<1x8x128xbf16>
    tpu.vector_store %arg5[%c0_26, %c0_27, %c0_28], %31 {strides = array<i32>} : memref<1x8x128xbf16, #tpu.memory_space<vmem>>, vector<1x8x128xbf16>,
    return
  }
  func.func @transform_0(%arg0: i32) -> (i32, i32, i32) {
    %c0_i32 = arith.constant 0 : i32
    %c0_i32_0 = arith.constant 0 : i32
    %c0_i32_1 = arith.constant 0 : i32
    return %arg0, %c0_i32, %c0_i32_0 : i32, i32, i32
  }
  func.func @transform_1(%arg0: i32) -> (i32, i32, i32) {
    %c0_i32 = arith.constant 0 : i32
    %c0_i32_0 = arith.constant 0 : i32
    %c0_i32_1 = arith.constant 0 : i32
    return %arg0, %c0_i32, %c0_i32_0 : i32, i32, i32
  }
  func.func @transform_2(%arg0: i32) -> (i32, i32, i32) {
    %c0_i32 = arith.constant 0 : i32
    %c0_i32_0 = arith.constant 0 : i32
    %c0_i32_1 = arith.constant 0 : i32
    %c0_i32_2 = arith.constant 0 : i32
    return %c0_i32, %c0_i32_0, %c0_i32_1 : i32, i32, i32
  }
  func.func @transform_3(%arg0: i32) -> (i32, i32) {
    %c0_i32 = arith.constant 0 : i32
    %c0_i32_0 = arith.constant 0 : i32
    %c0_i32_1 = arith.constant 0 : i32
    return %c0_i32, %c0_i32_0 : i32, i32
  }
  func.func @transform_4(%arg0: i32) -> (i32, i32, i32) {
    %c0_i32 = arith.constant 0 : i32
    %c0_i32_0 = arith.constant 0 : i32
    %c0_i32_1 = arith.constant 0 : i32
    return %arg0, %c0_i32, %c0_i32_0 : i32, i32, i32
  }
}

module attributes {stable_mosaic.version = 11 : i64} {
  func.func @_conv_band_kernel(%arg0: i32, %arg1: memref<1x22x256xbf16, #tpu.memory_space<vmem>>, %arg2: memref<15x256x256xbf16, #tpu.memory_space<vmem>>, %arg3: memref<1x256xf32, #tpu.memory_space<vmem>>, %arg4: memref<1x8x256xbf16, #tpu.memory_space<vmem>>) attributes {dimension_semantics = [#tpu.dimension_semantics<parallel>], iteration_bounds = array<i64: 2>, scalar_prefetch = 0 : i64, scratch_operands = 0 : i64, tpu.core_type = #tpu.core_type<tc>, window_params = [{transform_indices = @transform_0, window_bounds = array<i64: 1, 22, 256>}, {pipeline_mode = #tpu.pipeline_mode<synchronous>, transform_indices = @transform_1, window_bounds = array<i64: 15, 256, 256>}, {pipeline_mode = #tpu.pipeline_mode<synchronous>, transform_indices = @transform_2, window_bounds = array<i64: 1, 256>}, {transform_indices = @transform_3, window_bounds = array<i64: 1, 8, 256>}]} {
    %cst = arith.constant 0.000000e+00 : f32
    %0 = vector.broadcast %cst : f32 to vector<8x256xf32>
    %c0 = arith.constant 0 : index
    %c0_0 = arith.constant 0 : index
    %c0_1 = arith.constant 0 : index
    %1 = vector.load %arg1[%c0, %c0_0, %c0_1] : memref<1x22x256xbf16, #tpu.memory_space<vmem>>, vector<1x8x256xbf16>
    %2 = vector.shape_cast %1 : vector<1x8x256xbf16> to vector<8x256xbf16>
    %c0_2 = arith.constant 0 : index
    %c0_3 = arith.constant 0 : index
    %c0_4 = arith.constant 0 : index
    %3 = vector.load %arg2[%c0_2, %c0_3, %c0_4] : memref<15x256x256xbf16, #tpu.memory_space<vmem>>, vector<1x256x256xbf16>
    %4 = vector.shape_cast %3 : vector<1x256x256xbf16> to vector<256x256xbf16>
    %cst_5 = arith.constant dense<0.000000e+00> : vector<8x256xf32>
    %5 = tpu.matmul %2, %4, %cst_5 {dimension_numbers = #tpu.dot_dimension_numbers<[1], [0], [0], [1], [0, 0, 1, 1], [], []>} : vector<8x256xbf16>, vector<256x256xbf16>, vector<8x256xf32> -> vector<8x256xf32>
    %6 = arith.addf %0, %5 : vector<8x256xf32>
    %c0_6 = arith.constant 0 : index
    %c1 = arith.constant 1 : index
    %c0_7 = arith.constant 0 : index
    %7 = vector.load %arg1[%c0_6, %c1, %c0_7] : memref<1x22x256xbf16, #tpu.memory_space<vmem>>, vector<1x8x256xbf16>
    %8 = vector.shape_cast %7 : vector<1x8x256xbf16> to vector<8x256xbf16>
    %c1_8 = arith.constant 1 : index
    %c0_9 = arith.constant 0 : index
    %c0_10 = arith.constant 0 : index
    %9 = vector.load %arg2[%c1_8, %c0_9, %c0_10] : memref<15x256x256xbf16, #tpu.memory_space<vmem>>, vector<1x256x256xbf16>
    %10 = vector.shape_cast %9 : vector<1x256x256xbf16> to vector<256x256xbf16>
    %cst_11 = arith.constant dense<0.000000e+00> : vector<8x256xf32>
    %11 = tpu.matmul %8, %10, %cst_11 {dimension_numbers = #tpu.dot_dimension_numbers<[1], [0], [0], [1], [0, 0, 1, 1], [], []>} : vector<8x256xbf16>, vector<256x256xbf16>, vector<8x256xf32> -> vector<8x256xf32>
    %12 = arith.addf %6, %11 : vector<8x256xf32>
    %c0_12 = arith.constant 0 : index
    %c2 = arith.constant 2 : index
    %c0_13 = arith.constant 0 : index
    %13 = vector.load %arg1[%c0_12, %c2, %c0_13] : memref<1x22x256xbf16, #tpu.memory_space<vmem>>, vector<1x8x256xbf16>
    %14 = vector.shape_cast %13 : vector<1x8x256xbf16> to vector<8x256xbf16>
    %c2_14 = arith.constant 2 : index
    %c0_15 = arith.constant 0 : index
    %c0_16 = arith.constant 0 : index
    %15 = vector.load %arg2[%c2_14, %c0_15, %c0_16] : memref<15x256x256xbf16, #tpu.memory_space<vmem>>, vector<1x256x256xbf16>
    %16 = vector.shape_cast %15 : vector<1x256x256xbf16> to vector<256x256xbf16>
    %cst_17 = arith.constant dense<0.000000e+00> : vector<8x256xf32>
    %17 = tpu.matmul %14, %16, %cst_17 {dimension_numbers = #tpu.dot_dimension_numbers<[1], [0], [0], [1], [0, 0, 1, 1], [], []>} : vector<8x256xbf16>, vector<256x256xbf16>, vector<8x256xf32> -> vector<8x256xf32>
    %18 = arith.addf %12, %17 : vector<8x256xf32>
    %c0_18 = arith.constant 0 : index
    %c3 = arith.constant 3 : index
    %c0_19 = arith.constant 0 : index
    %19 = vector.load %arg1[%c0_18, %c3, %c0_19] : memref<1x22x256xbf16, #tpu.memory_space<vmem>>, vector<1x8x256xbf16>
    %20 = vector.shape_cast %19 : vector<1x8x256xbf16> to vector<8x256xbf16>
    %c3_20 = arith.constant 3 : index
    %c0_21 = arith.constant 0 : index
    %c0_22 = arith.constant 0 : index
    %21 = vector.load %arg2[%c3_20, %c0_21, %c0_22] : memref<15x256x256xbf16, #tpu.memory_space<vmem>>, vector<1x256x256xbf16>
    %22 = vector.shape_cast %21 : vector<1x256x256xbf16> to vector<256x256xbf16>
    %cst_23 = arith.constant dense<0.000000e+00> : vector<8x256xf32>
    %23 = tpu.matmul %20, %22, %cst_23 {dimension_numbers = #tpu.dot_dimension_numbers<[1], [0], [0], [1], [0, 0, 1, 1], [], []>} : vector<8x256xbf16>, vector<256x256xbf16>, vector<8x256xf32> -> vector<8x256xf32>
    %24 = arith.addf %18, %23 : vector<8x256xf32>
    %c0_24 = arith.constant 0 : index
    %c4 = arith.constant 4 : index
    %c0_25 = arith.constant 0 : index
    %25 = vector.load %arg1[%c0_24, %c4, %c0_25] : memref<1x22x256xbf16, #tpu.memory_space<vmem>>, vector<1x8x256xbf16>
    %26 = vector.shape_cast %25 : vector<1x8x256xbf16> to vector<8x256xbf16>
    %c4_26 = arith.constant 4 : index
    %c0_27 = arith.constant 0 : index
    %c0_28 = arith.constant 0 : index
    %27 = vector.load %arg2[%c4_26, %c0_27, %c0_28] : memref<15x256x256xbf16, #tpu.memory_space<vmem>>, vector<1x256x256xbf16>
    %28 = vector.shape_cast %27 : vector<1x256x256xbf16> to vector<256x256xbf16>
    %cst_29 = arith.constant dense<0.000000e+00> : vector<8x256xf32>
    %29 = tpu.matmul %26, %28, %cst_29 {dimension_numbers = #tpu.dot_dimension_numbers<[1], [0], [0], [1], [0, 0, 1, 1], [], []>} : vector<8x256xbf16>, vector<256x256xbf16>, vector<8x256xf32> -> vector<8x256xf32>
    %30 = arith.addf %24, %29 : vector<8x256xf32>
    %c0_30 = arith.constant 0 : index
    %c5 = arith.constant 5 : index
    %c0_31 = arith.constant 0 : index
    %31 = vector.load %arg1[%c0_30, %c5, %c0_31] : memref<1x22x256xbf16, #tpu.memory_space<vmem>>, vector<1x8x256xbf16>
    %32 = vector.shape_cast %31 : vector<1x8x256xbf16> to vector<8x256xbf16>
    %c5_32 = arith.constant 5 : index
    %c0_33 = arith.constant 0 : index
    %c0_34 = arith.constant 0 : index
    %33 = vector.load %arg2[%c5_32, %c0_33, %c0_34] : memref<15x256x256xbf16, #tpu.memory_space<vmem>>, vector<1x256x256xbf16>
    %34 = vector.shape_cast %33 : vector<1x256x256xbf16> to vector<256x256xbf16>
    %cst_35 = arith.constant dense<0.000000e+00> : vector<8x256xf32>
    %35 = tpu.matmul %32, %34, %cst_35 {dimension_numbers = #tpu.dot_dimension_numbers<[1], [0], [0], [1], [0, 0, 1, 1], [], []>} : vector<8x256xbf16>, vector<256x256xbf16>, vector<8x256xf32> -> vector<8x256xf32>
    %36 = arith.addf %30, %35 : vector<8x256xf32>
    %c0_36 = arith.constant 0 : index
    %c6 = arith.constant 6 : index
    %c0_37 = arith.constant 0 : index
    %37 = vector.load %arg1[%c0_36, %c6, %c0_37] : memref<1x22x256xbf16, #tpu.memory_space<vmem>>, vector<1x8x256xbf16>
    %38 = vector.shape_cast %37 : vector<1x8x256xbf16> to vector<8x256xbf16>
    %c6_38 = arith.constant 6 : index
    %c0_39 = arith.constant 0 : index
    %c0_40 = arith.constant 0 : index
    %39 = vector.load %arg2[%c6_38, %c0_39, %c0_40] : memref<15x256x256xbf16, #tpu.memory_space<vmem>>, vector<1x256x256xbf16>
    %40 = vector.shape_cast %39 : vector<1x256x256xbf16> to vector<256x256xbf16>
    %cst_41 = arith.constant dense<0.000000e+00> : vector<8x256xf32>
    %41 = tpu.matmul %38, %40, %cst_41 {dimension_numbers = #tpu.dot_dimension_numbers<[1], [0], [0], [1], [0, 0, 1, 1], [], []>} : vector<8x256xbf16>, vector<256x256xbf16>, vector<8x256xf32> -> vector<8x256xf32>
    %42 = arith.addf %36, %41 : vector<8x256xf32>
    %c0_42 = arith.constant 0 : index
    %c7 = arith.constant 7 : index
    %c0_43 = arith.constant 0 : index
    %43 = vector.load %arg1[%c0_42, %c7, %c0_43] : memref<1x22x256xbf16, #tpu.memory_space<vmem>>, vector<1x8x256xbf16>
    %44 = vector.shape_cast %43 : vector<1x8x256xbf16> to vector<8x256xbf16>
    %c7_44 = arith.constant 7 : index
    %c0_45 = arith.constant 0 : index
    %c0_46 = arith.constant 0 : index
    %45 = vector.load %arg2[%c7_44, %c0_45, %c0_46] : memref<15x256x256xbf16, #tpu.memory_space<vmem>>, vector<1x256x256xbf16>
    %46 = vector.shape_cast %45 : vector<1x256x256xbf16> to vector<256x256xbf16>
    %cst_47 = arith.constant dense<0.000000e+00> : vector<8x256xf32>
    %47 = tpu.matmul %44, %46, %cst_47 {dimension_numbers = #tpu.dot_dimension_numbers<[1], [0], [0], [1], [0, 0, 1, 1], [], []>} : vector<8x256xbf16>, vector<256x256xbf16>, vector<8x256xf32> -> vector<8x256xf32>
    %48 = arith.addf %42, %47 : vector<8x256xf32>
    %c0_48 = arith.constant 0 : index
    %c8 = arith.constant 8 : index
    %c0_49 = arith.constant 0 : index
    %49 = vector.load %arg1[%c0_48, %c8, %c0_49] : memref<1x22x256xbf16, #tpu.memory_space<vmem>>, vector<1x8x256xbf16>
    %50 = vector.shape_cast %49 : vector<1x8x256xbf16> to vector<8x256xbf16>
    %c8_50 = arith.constant 8 : index
    %c0_51 = arith.constant 0 : index
    %c0_52 = arith.constant 0 : index
    %51 = vector.load %arg2[%c8_50, %c0_51, %c0_52] : memref<15x256x256xbf16, #tpu.memory_space<vmem>>, vector<1x256x256xbf16>
    %52 = vector.shape_cast %51 : vector<1x256x256xbf16> to vector<256x256xbf16>
    %cst_53 = arith.constant dense<0.000000e+00> : vector<8x256xf32>
    %53 = tpu.matmul %50, %52, %cst_53 {dimension_numbers = #tpu.dot_dimension_numbers<[1], [0], [0], [1], [0, 0, 1, 1], [], []>} : vector<8x256xbf16>, vector<256x256xbf16>, vector<8x256xf32> -> vector<8x256xf32>
    %54 = arith.addf %48, %53 : vector<8x256xf32>
    %c0_54 = arith.constant 0 : index
    %c9 = arith.constant 9 : index
    %c0_55 = arith.constant 0 : index
    %55 = vector.load %arg1[%c0_54, %c9, %c0_55] : memref<1x22x256xbf16, #tpu.memory_space<vmem>>, vector<1x8x256xbf16>
    %56 = vector.shape_cast %55 : vector<1x8x256xbf16> to vector<8x256xbf16>
    %c9_56 = arith.constant 9 : index
    %c0_57 = arith.constant 0 : index
    %c0_58 = arith.constant 0 : index
    %57 = vector.load %arg2[%c9_56, %c0_57, %c0_58] : memref<15x256x256xbf16, #tpu.memory_space<vmem>>, vector<1x256x256xbf16>
    %58 = vector.shape_cast %57 : vector<1x256x256xbf16> to vector<256x256xbf16>
    %cst_59 = arith.constant dense<0.000000e+00> : vector<8x256xf32>
    %59 = tpu.matmul %56, %58, %cst_59 {dimension_numbers = #tpu.dot_dimension_numbers<[1], [0], [0], [1], [0, 0, 1, 1], [], []>} : vector<8x256xbf16>, vector<256x256xbf16>, vector<8x256xf32> -> vector<8x256xf32>
    %60 = arith.addf %54, %59 : vector<8x256xf32>
    %c0_60 = arith.constant 0 : index
    %c10 = arith.constant 10 : index
    %c0_61 = arith.constant 0 : index
    %61 = vector.load %arg1[%c0_60, %c10, %c0_61] : memref<1x22x256xbf16, #tpu.memory_space<vmem>>, vector<1x8x256xbf16>
    %62 = vector.shape_cast %61 : vector<1x8x256xbf16> to vector<8x256xbf16>
    %c10_62 = arith.constant 10 : index
    %c0_63 = arith.constant 0 : index
    %c0_64 = arith.constant 0 : index
    %63 = vector.load %arg2[%c10_62, %c0_63, %c0_64] : memref<15x256x256xbf16, #tpu.memory_space<vmem>>, vector<1x256x256xbf16>
    %64 = vector.shape_cast %63 : vector<1x256x256xbf16> to vector<256x256xbf16>
    %cst_65 = arith.constant dense<0.000000e+00> : vector<8x256xf32>
    %65 = tpu.matmul %62, %64, %cst_65 {dimension_numbers = #tpu.dot_dimension_numbers<[1], [0], [0], [1], [0, 0, 1, 1], [], []>} : vector<8x256xbf16>, vector<256x256xbf16>, vector<8x256xf32> -> vector<8x256xf32>
    %66 = arith.addf %60, %65 : vector<8x256xf32>
    %c0_66 = arith.constant 0 : index
    %c11 = arith.constant 11 : index
    %c0_67 = arith.constant 0 : index
    %67 = vector.load %arg1[%c0_66, %c11, %c0_67] : memref<1x22x256xbf16, #tpu.memory_space<vmem>>, vector<1x8x256xbf16>
    %68 = vector.shape_cast %67 : vector<1x8x256xbf16> to vector<8x256xbf16>
    %c11_68 = arith.constant 11 : index
    %c0_69 = arith.constant 0 : index
    %c0_70 = arith.constant 0 : index
    %69 = vector.load %arg2[%c11_68, %c0_69, %c0_70] : memref<15x256x256xbf16, #tpu.memory_space<vmem>>, vector<1x256x256xbf16>
    %70 = vector.shape_cast %69 : vector<1x256x256xbf16> to vector<256x256xbf16>
    %cst_71 = arith.constant dense<0.000000e+00> : vector<8x256xf32>
    %71 = tpu.matmul %68, %70, %cst_71 {dimension_numbers = #tpu.dot_dimension_numbers<[1], [0], [0], [1], [0, 0, 1, 1], [], []>} : vector<8x256xbf16>, vector<256x256xbf16>, vector<8x256xf32> -> vector<8x256xf32>
    %72 = arith.addf %66, %71 : vector<8x256xf32>
    %c0_72 = arith.constant 0 : index
    %c12 = arith.constant 12 : index
    %c0_73 = arith.constant 0 : index
    %73 = vector.load %arg1[%c0_72, %c12, %c0_73] : memref<1x22x256xbf16, #tpu.memory_space<vmem>>, vector<1x8x256xbf16>
    %74 = vector.shape_cast %73 : vector<1x8x256xbf16> to vector<8x256xbf16>
    %c12_74 = arith.constant 12 : index
    %c0_75 = arith.constant 0 : index
    %c0_76 = arith.constant 0 : index
    %75 = vector.load %arg2[%c12_74, %c0_75, %c0_76] : memref<15x256x256xbf16, #tpu.memory_space<vmem>>, vector<1x256x256xbf16>
    %76 = vector.shape_cast %75 : vector<1x256x256xbf16> to vector<256x256xbf16>
    %cst_77 = arith.constant dense<0.000000e+00> : vector<8x256xf32>
    %77 = tpu.matmul %74, %76, %cst_77 {dimension_numbers = #tpu.dot_dimension_numbers<[1], [0], [0], [1], [0, 0, 1, 1], [], []>} : vector<8x256xbf16>, vector<256x256xbf16>, vector<8x256xf32> -> vector<8x256xf32>
    %78 = arith.addf %72, %77 : vector<8x256xf32>
    %c0_78 = arith.constant 0 : index
    %c13 = arith.constant 13 : index
    %c0_79 = arith.constant 0 : index
    %79 = vector.load %arg1[%c0_78, %c13, %c0_79] : memref<1x22x256xbf16, #tpu.memory_space<vmem>>, vector<1x8x256xbf16>
    %80 = vector.shape_cast %79 : vector<1x8x256xbf16> to vector<8x256xbf16>
    %c13_80 = arith.constant 13 : index
    %c0_81 = arith.constant 0 : index
    %c0_82 = arith.constant 0 : index
    %81 = vector.load %arg2[%c13_80, %c0_81, %c0_82] : memref<15x256x256xbf16, #tpu.memory_space<vmem>>, vector<1x256x256xbf16>
    %82 = vector.shape_cast %81 : vector<1x256x256xbf16> to vector<256x256xbf16>
    %cst_83 = arith.constant dense<0.000000e+00> : vector<8x256xf32>
    %83 = tpu.matmul %80, %82, %cst_83 {dimension_numbers = #tpu.dot_dimension_numbers<[1], [0], [0], [1], [0, 0, 1, 1], [], []>} : vector<8x256xbf16>, vector<256x256xbf16>, vector<8x256xf32> -> vector<8x256xf32>
    %84 = arith.addf %78, %83 : vector<8x256xf32>
    %c0_84 = arith.constant 0 : index
    %c14 = arith.constant 14 : index
    %c0_85 = arith.constant 0 : index
    %85 = vector.load %arg1[%c0_84, %c14, %c0_85] : memref<1x22x256xbf16, #tpu.memory_space<vmem>>, vector<1x8x256xbf16>
    %86 = vector.shape_cast %85 : vector<1x8x256xbf16> to vector<8x256xbf16>
    %c14_86 = arith.constant 14 : index
    %c0_87 = arith.constant 0 : index
    %c0_88 = arith.constant 0 : index
    %87 = vector.load %arg2[%c14_86, %c0_87, %c0_88] : memref<15x256x256xbf16, #tpu.memory_space<vmem>>, vector<1x256x256xbf16>
    %88 = vector.shape_cast %87 : vector<1x256x256xbf16> to vector<256x256xbf16>
    %cst_89 = arith.constant dense<0.000000e+00> : vector<8x256xf32>
    %89 = tpu.matmul %86, %88, %cst_89 {dimension_numbers = #tpu.dot_dimension_numbers<[1], [0], [0], [1], [0, 0, 1, 1], [], []>} : vector<8x256xbf16>, vector<256x256xbf16>, vector<8x256xf32> -> vector<8x256xf32>
    %90 = arith.addf %84, %89 : vector<8x256xf32>
    %c0_90 = arith.constant 0 : index
    %c0_91 = arith.constant 0 : index
    %91 = vector.load %arg3[%c0_90, %c0_91] : memref<1x256xf32, #tpu.memory_space<vmem>>, vector<1x256xf32>
    %92 = vector.broadcast %91 : vector<1x256xf32> to vector<8x256xf32>
    %93 = arith.addf %90, %92 : vector<8x256xf32>
    %cst_92 = arith.constant 0.000000e+00 : f32
    %94 = vector.broadcast %cst_92 : f32 to vector<8x256xf32>
    %95 = arith.cmpf oge, %93, %94 : vector<8x256xf32>
    %cst_93 = arith.constant 1.000000e-01 : f32
    %96 = vector.broadcast %cst_93 : f32 to vector<8x256xf32>
    %97 = arith.mulf %96, %93 : vector<8x256xf32>
    %98 = arith.select %95, %93, %97 : vector<8x256xi1>, vector<8x256xf32>
    %99 = arith.truncf %98 : vector<8x256xf32> to vector<8x256xbf16>
    %c0_94 = arith.constant 0 : index
    %c0_95 = arith.constant 0 : index
    %c0_96 = arith.constant 0 : index
    %100 = vector.load %arg4[%c0_94, %c0_95, %c0_96] : memref<1x8x256xbf16, #tpu.memory_space<vmem>>, vector<1x8x256xbf16>
    %101 = vector.shape_cast %100 : vector<1x8x256xbf16> to vector<8x256xbf16>
    %102 = vector.shape_cast %99 : vector<8x256xbf16> to vector<1x8x256xbf16>
    tpu.vector_store %arg4[%c0_94, %c0_95, %c0_96], %102 {strides = array<i32>} : memref<1x8x256xbf16, #tpu.memory_space<vmem>>, vector<1x8x256xbf16>,
    return
  }
  func.func @transform_0(%arg0: i32) -> (i32, i32, i32) {
    %c0_i32 = arith.constant 0 : i32
    %c0_i32_0 = arith.constant 0 : i32
    %c0_i32_1 = arith.constant 0 : i32
    return %arg0, %c0_i32, %c0_i32_0 : i32, i32, i32
  }
  func.func @transform_1(%arg0: i32) -> (i32, i32, i32) {
    %c0_i32 = arith.constant 0 : i32
    %c0_i32_0 = arith.constant 0 : i32
    %c0_i32_1 = arith.constant 0 : i32
    %c0_i32_2 = arith.constant 0 : i32
    return %c0_i32, %c0_i32_0, %c0_i32_1 : i32, i32, i32
  }
  func.func @transform_2(%arg0: i32) -> (i32, i32) {
    %c0_i32 = arith.constant 0 : i32
    %c0_i32_0 = arith.constant 0 : i32
    %c0_i32_1 = arith.constant 0 : i32
    return %c0_i32, %c0_i32_0 : i32, i32
  }
  func.func @transform_3(%arg0: i32) -> (i32, i32, i32) {
    %c0_i32 = arith.constant 0 : i32
    %c0_i32_0 = arith.constant 0 : i32
    %c0_i32_1 = arith.constant 0 : i32
    return %arg0, %c0_i32, %c0_i32_0 : i32, i32, i32
  }
}

module attributes {stable_mosaic.version = 11 : i64} {
  func.func @_conv_band_kernel(%arg0: i32, %arg1: memref<1x5x256xbf16, #tpu.memory_space<vmem>>, %arg2: memref<1x5x256xbf16, #tpu.memory_space<vmem>>, %arg3: memref<4x256x256xbf16, #tpu.memory_space<vmem>>, %arg4: memref<1x256xf32, #tpu.memory_space<vmem>>, %arg5: memref<1x4x256xbf16, #tpu.memory_space<vmem>>) attributes {dimension_semantics = [#tpu.dimension_semantics<parallel>], iteration_bounds = array<i64: 2>, scalar_prefetch = 0 : i64, scratch_operands = 0 : i64, tpu.core_type = #tpu.core_type<tc>, window_params = [{transform_indices = @transform_0, window_bounds = array<i64: 1, 5, 256>}, {transform_indices = @transform_1, window_bounds = array<i64: 1, 5, 256>}, {pipeline_mode = #tpu.pipeline_mode<synchronous>, transform_indices = @transform_2, window_bounds = array<i64: 4, 256, 256>}, {pipeline_mode = #tpu.pipeline_mode<synchronous>, transform_indices = @transform_3, window_bounds = array<i64: 1, 256>}, {transform_indices = @transform_4, window_bounds = array<i64: 1, 4, 256>}]} {
    %cst = arith.constant 0.000000e+00 : f32
    %0 = vector.broadcast %cst : f32 to vector<4x256xf32>
    %c0 = arith.constant 0 : index
    %c0_0 = arith.constant 0 : index
    %c0_1 = arith.constant 0 : index
    %1 = vector.load %arg1[%c0, %c0_0, %c0_1] : memref<1x5x256xbf16, #tpu.memory_space<vmem>>, vector<1x4x256xbf16>
    %2 = vector.shape_cast %1 : vector<1x4x256xbf16> to vector<4x256xbf16>
    %c0_2 = arith.constant 0 : index
    %c0_3 = arith.constant 0 : index
    %c0_4 = arith.constant 0 : index
    %3 = vector.load %arg3[%c0_2, %c0_3, %c0_4] : memref<4x256x256xbf16, #tpu.memory_space<vmem>>, vector<1x256x256xbf16>
    %4 = vector.shape_cast %3 : vector<1x256x256xbf16> to vector<256x256xbf16>
    %cst_5 = arith.constant dense<0.000000e+00> : vector<4x256xf32>
    %5 = tpu.matmul %2, %4, %cst_5 {dimension_numbers = #tpu.dot_dimension_numbers<[1], [0], [0], [1], [0, 0, 1, 1], [], []>} : vector<4x256xbf16>, vector<256x256xbf16>, vector<4x256xf32> -> vector<4x256xf32>
    %6 = arith.addf %0, %5 : vector<4x256xf32>
    %c0_6 = arith.constant 0 : index
    %c0_7 = arith.constant 0 : index
    %c0_8 = arith.constant 0 : index
    %7 = vector.load %arg2[%c0_6, %c0_7, %c0_8] : memref<1x5x256xbf16, #tpu.memory_space<vmem>>, vector<1x4x256xbf16>
    %8 = vector.shape_cast %7 : vector<1x4x256xbf16> to vector<4x256xbf16>
    %c1 = arith.constant 1 : index
    %c0_9 = arith.constant 0 : index
    %c0_10 = arith.constant 0 : index
    %9 = vector.load %arg3[%c1, %c0_9, %c0_10] : memref<4x256x256xbf16, #tpu.memory_space<vmem>>, vector<1x256x256xbf16>
    %10 = vector.shape_cast %9 : vector<1x256x256xbf16> to vector<256x256xbf16>
    %cst_11 = arith.constant dense<0.000000e+00> : vector<4x256xf32>
    %11 = tpu.matmul %8, %10, %cst_11 {dimension_numbers = #tpu.dot_dimension_numbers<[1], [0], [0], [1], [0, 0, 1, 1], [], []>} : vector<4x256xbf16>, vector<256x256xbf16>, vector<4x256xf32> -> vector<4x256xf32>
    %12 = arith.addf %6, %11 : vector<4x256xf32>
    %c0_12 = arith.constant 0 : index
    %c1_13 = arith.constant 1 : index
    %c0_14 = arith.constant 0 : index
    %13 = vector.load %arg1[%c0_12, %c1_13, %c0_14] : memref<1x5x256xbf16, #tpu.memory_space<vmem>>, vector<1x4x256xbf16>
    %14 = vector.shape_cast %13 : vector<1x4x256xbf16> to vector<4x256xbf16>
    %c2 = arith.constant 2 : index
    %c0_15 = arith.constant 0 : index
    %c0_16 = arith.constant 0 : index
    %15 = vector.load %arg3[%c2, %c0_15, %c0_16] : memref<4x256x256xbf16, #tpu.memory_space<vmem>>, vector<1x256x256xbf16>
    %16 = vector.shape_cast %15 : vector<1x256x256xbf16> to vector<256x256xbf16>
    %cst_17 = arith.constant dense<0.000000e+00> : vector<4x256xf32>
    %17 = tpu.matmul %14, %16, %cst_17 {dimension_numbers = #tpu.dot_dimension_numbers<[1], [0], [0], [1], [0, 0, 1, 1], [], []>} : vector<4x256xbf16>, vector<256x256xbf16>, vector<4x256xf32> -> vector<4x256xf32>
    %18 = arith.addf %12, %17 : vector<4x256xf32>
    %c0_18 = arith.constant 0 : index
    %c1_19 = arith.constant 1 : index
    %c0_20 = arith.constant 0 : index
    %19 = vector.load %arg2[%c0_18, %c1_19, %c0_20] : memref<1x5x256xbf16, #tpu.memory_space<vmem>>, vector<1x4x256xbf16>
    %20 = vector.shape_cast %19 : vector<1x4x256xbf16> to vector<4x256xbf16>
    %c3 = arith.constant 3 : index
    %c0_21 = arith.constant 0 : index
    %c0_22 = arith.constant 0 : index
    %21 = vector.load %arg3[%c3, %c0_21, %c0_22] : memref<4x256x256xbf16, #tpu.memory_space<vmem>>, vector<1x256x256xbf16>
    %22 = vector.shape_cast %21 : vector<1x256x256xbf16> to vector<256x256xbf16>
    %cst_23 = arith.constant dense<0.000000e+00> : vector<4x256xf32>
    %23 = tpu.matmul %20, %22, %cst_23 {dimension_numbers = #tpu.dot_dimension_numbers<[1], [0], [0], [1], [0, 0, 1, 1], [], []>} : vector<4x256xbf16>, vector<256x256xbf16>, vector<4x256xf32> -> vector<4x256xf32>
    %24 = arith.addf %18, %23 : vector<4x256xf32>
    %c0_24 = arith.constant 0 : index
    %c0_25 = arith.constant 0 : index
    %25 = vector.load %arg4[%c0_24, %c0_25] : memref<1x256xf32, #tpu.memory_space<vmem>>, vector<1x256xf32>
    %26 = vector.broadcast %25 : vector<1x256xf32> to vector<4x256xf32>
    %27 = arith.addf %24, %26 : vector<4x256xf32>
    %28 = arith.truncf %27 : vector<4x256xf32> to vector<4x256xbf16>
    %c0_26 = arith.constant 0 : index
    %c0_27 = arith.constant 0 : index
    %c0_28 = arith.constant 0 : index
    %29 = vector.load %arg5[%c0_26, %c0_27, %c0_28] : memref<1x4x256xbf16, #tpu.memory_space<vmem>>, vector<1x4x256xbf16>
    %30 = vector.shape_cast %29 : vector<1x4x256xbf16> to vector<4x256xbf16>
    %31 = vector.shape_cast %28 : vector<4x256xbf16> to vector<1x4x256xbf16>
    tpu.vector_store %arg5[%c0_26, %c0_27, %c0_28], %31 {strides = array<i32>} : memref<1x4x256xbf16, #tpu.memory_space<vmem>>, vector<1x4x256xbf16>,
    return
  }
  func.func @transform_0(%arg0: i32) -> (i32, i32, i32) {
    %c0_i32 = arith.constant 0 : i32
    %c0_i32_0 = arith.constant 0 : i32
    %c0_i32_1 = arith.constant 0 : i32
    return %arg0, %c0_i32, %c0_i32_0 : i32, i32, i32
  }
  func.func @transform_1(%arg0: i32) -> (i32, i32, i32) {
    %c0_i32 = arith.constant 0 : i32
    %c0_i32_0 = arith.constant 0 : i32
    %c0_i32_1 = arith.constant 0 : i32
    return %arg0, %c0_i32, %c0_i32_0 : i32, i32, i32
  }
  func.func @transform_2(%arg0: i32) -> (i32, i32, i32) {
    %c0_i32 = arith.constant 0 : i32
    %c0_i32_0 = arith.constant 0 : i32
    %c0_i32_1 = arith.constant 0 : i32
    %c0_i32_2 = arith.constant 0 : i32
    return %c0_i32, %c0_i32_0, %c0_i32_1 : i32, i32, i32
  }
  func.func @transform_3(%arg0: i32) -> (i32, i32) {
    %c0_i32 = arith.constant 0 : i32
    %c0_i32_0 = arith.constant 0 : i32
    %c0_i32_1 = arith.constant 0 : i32
    return %c0_i32, %c0_i32_0 : i32, i32
  }
  func.func @transform_4(%arg0: i32) -> (i32, i32, i32) {
    %c0_i32 = arith.constant 0 : i32
    %c0_i32_0 = arith.constant 0 : i32
    %c0_i32_1 = arith.constant 0 : i32
    return %arg0, %c0_i32, %c0_i32_0 : i32, i32, i32
  }
}

module attributes {stable_mosaic.version = 11 : i64} {
  func.func @_conv_band_kernel(%arg0: i32, %arg1: memref<1x6x256xbf16, #tpu.memory_space<vmem>>, %arg2: memref<3x256x32xbf16, #tpu.memory_space<vmem>>, %arg3: memref<1x32xf32, #tpu.memory_space<vmem>>, %arg4: memref<1x1x4xf32, #tpu.memory_space<vmem>>) attributes {dimension_semantics = [#tpu.dimension_semantics<parallel>], iteration_bounds = array<i64: 2>, scalar_prefetch = 0 : i64, scratch_operands = 0 : i64, tpu.core_type = #tpu.core_type<tc>, window_params = [{transform_indices = @transform_0, window_bounds = array<i64: 1, 6, 256>}, {pipeline_mode = #tpu.pipeline_mode<synchronous>, transform_indices = @transform_1, window_bounds = array<i64: 3, 256, 32>}, {pipeline_mode = #tpu.pipeline_mode<synchronous>, transform_indices = @transform_2, window_bounds = array<i64: 1, 32>}, {transform_indices = @transform_3, window_bounds = array<i64: 1, 1, 4>}]} {
    %cst = arith.constant 0.000000e+00 : f32
    %0 = vector.broadcast %cst : f32 to vector<4x32xf32>
    %c0 = arith.constant 0 : index
    %c0_0 = arith.constant 0 : index
    %c0_1 = arith.constant 0 : index
    %1 = vector.load %arg1[%c0, %c0_0, %c0_1] : memref<1x6x256xbf16, #tpu.memory_space<vmem>>, vector<1x4x256xbf16>
    %2 = vector.shape_cast %1 : vector<1x4x256xbf16> to vector<4x256xbf16>
    %c0_2 = arith.constant 0 : index
    %c0_3 = arith.constant 0 : index
    %c0_4 = arith.constant 0 : index
    %3 = vector.load %arg2[%c0_2, %c0_3, %c0_4] : memref<3x256x32xbf16, #tpu.memory_space<vmem>>, vector<1x256x32xbf16>
    %4 = vector.shape_cast %3 : vector<1x256x32xbf16> to vector<256x32xbf16>
    %cst_5 = arith.constant dense<0.000000e+00> : vector<4x32xf32>
    %5 = tpu.matmul %2, %4, %cst_5 {dimension_numbers = #tpu.dot_dimension_numbers<[1], [0], [0], [1], [0, 0, 1, 1], [], []>} : vector<4x256xbf16>, vector<256x32xbf16>, vector<4x32xf32> -> vector<4x32xf32>
    %6 = arith.addf %0, %5 : vector<4x32xf32>
    %c0_6 = arith.constant 0 : index
    %c1 = arith.constant 1 : index
    %c0_7 = arith.constant 0 : index
    %7 = vector.load %arg1[%c0_6, %c1, %c0_7] : memref<1x6x256xbf16, #tpu.memory_space<vmem>>, vector<1x4x256xbf16>
    %8 = vector.shape_cast %7 : vector<1x4x256xbf16> to vector<4x256xbf16>
    %c1_8 = arith.constant 1 : index
    %c0_9 = arith.constant 0 : index
    %c0_10 = arith.constant 0 : index
    %9 = vector.load %arg2[%c1_8, %c0_9, %c0_10] : memref<3x256x32xbf16, #tpu.memory_space<vmem>>, vector<1x256x32xbf16>
    %10 = vector.shape_cast %9 : vector<1x256x32xbf16> to vector<256x32xbf16>
    %cst_11 = arith.constant dense<0.000000e+00> : vector<4x32xf32>
    %11 = tpu.matmul %8, %10, %cst_11 {dimension_numbers = #tpu.dot_dimension_numbers<[1], [0], [0], [1], [0, 0, 1, 1], [], []>} : vector<4x256xbf16>, vector<256x32xbf16>, vector<4x32xf32> -> vector<4x32xf32>
    %12 = arith.addf %6, %11 : vector<4x32xf32>
    %c0_12 = arith.constant 0 : index
    %c2 = arith.constant 2 : index
    %c0_13 = arith.constant 0 : index
    %13 = vector.load %arg1[%c0_12, %c2, %c0_13] : memref<1x6x256xbf16, #tpu.memory_space<vmem>>, vector<1x4x256xbf16>
    %14 = vector.shape_cast %13 : vector<1x4x256xbf16> to vector<4x256xbf16>
    %c2_14 = arith.constant 2 : index
    %c0_15 = arith.constant 0 : index
    %c0_16 = arith.constant 0 : index
    %15 = vector.load %arg2[%c2_14, %c0_15, %c0_16] : memref<3x256x32xbf16, #tpu.memory_space<vmem>>, vector<1x256x32xbf16>
    %16 = vector.shape_cast %15 : vector<1x256x32xbf16> to vector<256x32xbf16>
    %cst_17 = arith.constant dense<0.000000e+00> : vector<4x32xf32>
    %17 = tpu.matmul %14, %16, %cst_17 {dimension_numbers = #tpu.dot_dimension_numbers<[1], [0], [0], [1], [0, 0, 1, 1], [], []>} : vector<4x256xbf16>, vector<256x32xbf16>, vector<4x32xf32> -> vector<4x32xf32>
    %18 = arith.addf %12, %17 : vector<4x32xf32>
    %c0_18 = arith.constant 0 : index
    %c0_19 = arith.constant 0 : index
    %19 = vector.load %arg3[%c0_18, %c0_19] : memref<1x32xf32, #tpu.memory_space<vmem>>, vector<1x32xf32>
    %20 = vector.broadcast %19 : vector<1x32xf32> to vector<4x32xf32>
    %21 = arith.addf %18, %20 : vector<4x32xf32>
    %22 = math.absf %21 : vector<4x32xf32>
    %23 = tpu.iota {dimensions = array<i32: 0>} : vector<4x32xi32>
    %24 = tpu.iota {dimensions = array<i32: 1>} : vector<1x32xi32>
    %25 = tpu.iota {dimensions = array<i32: 1>} : vector<1x4xi32>
    %cst_20 = arith.constant 0.000000e+00 : f32
    %26 = vector.broadcast %cst_20 : f32 to vector<1x4xf32>
    %c0_i32 = arith.constant 0 : i32
    %27 = vector.broadcast %c0_i32 : i32 to vector<1x32xi32>
    %28 = arith.cmpi sge, %24, %27 : vector<1x32xi32>
    %c8_i32 = arith.constant 8 : i32
    %29 = vector.broadcast %c8_i32 : i32 to vector<1x32xi32>
    %30 = arith.cmpi slt, %24, %29 : vector<1x32xi32>
    %31 = arith.andi %28, %30 : vector<1x32xi1>
    %cst_21 = arith.constant -1.000000e+00 : f32
    %32 = vector.shape_cast %31 : vector<1x32xi1> to vector<1x32xi1>
    %33 = vector.broadcast %32 : vector<1x32xi1> to vector<4x32xi1>
    %34 = vector.broadcast %cst_21 : f32 to vector<4x32xf32>
    %35 = arith.select %33, %22, %34 : vector<4x32xi1>, vector<4x32xf32>
    %cst_22 = arith.constant dense<0xFF800000> : vector<32xf32>
    %36 = vector.multi_reduction <maximumf>, %35, %cst_22 [0] : vector<4x32xf32> to vector<32xf32>
    %37 = vector.shape_cast %36 : vector<32xf32> to vector<1x32xf32>
    %38 = vector.broadcast %37 : vector<1x32xf32> to vector<4x32xf32>
    %39 = arith.cmpf oeq, %35, %38 : vector<4x32xf32>
    %c4_i32 = arith.constant 4 : i32
    %40 = vector.broadcast %c4_i32 : i32 to vector<4x32xi32>
    %41 = arith.select %39, %23, %40 : vector<4x32xi1>, vector<4x32xi32>
    %cst_23 = arith.constant dense<2147483647> : vector<32xi32>
    %42 = vector.multi_reduction <minsi>, %41, %cst_23 [0] : vector<4x32xi32> to vector<32xi32>
    %43 = vector.shape_cast %42 : vector<32xi32> to vector<1x32xi32>
    %44 = vector.broadcast %43 : vector<1x32xi32> to vector<4x32xi32>
    %45 = arith.cmpi eq, %23, %44 : vector<4x32xi32>
    %cst_24 = arith.constant 0.000000e+00 : f32
    %46 = vector.broadcast %cst_24 : f32 to vector<4x32xf32>
    %47 = arith.select %45, %21, %46 : vector<4x32xi1>, vector<4x32xf32>
    %cst_25 = arith.constant dense<0.000000e+00> : vector<32xf32>
    %48 = vector.multi_reduction <add>, %47, %cst_25 [0] : vector<4x32xf32> to vector<32xf32>
    %49 = vector.shape_cast %48 : vector<32xf32> to vector<1x32xf32>
    %cst_26 = arith.constant dense<0xFF800000> : vector<1xf32>
    %50 = vector.multi_reduction <maximumf>, %37, %cst_26 [1] : vector<1x32xf32> to vector<1xf32>
    %51 = vector.shape_cast %50 : vector<1xf32> to vector<1x1xf32>
    %52 = vector.broadcast %51 : vector<1x1xf32> to vector<1x32xf32>
    %53 = arith.cmpf oeq, %37, %52 : vector<1x32xf32>
    %c32_i32 = arith.constant 32 : i32
    %54 = vector.broadcast %c32_i32 : i32 to vector<1x32xi32>
    %55 = arith.select %53, %24, %54 : vector<1x32xi1>, vector<1x32xi32>
    %cst_27 = arith.constant dense<2147483647> : vector<1xi32>
    %56 = vector.multi_reduction <minsi>, %55, %cst_27 [1] : vector<1x32xi32> to vector<1xi32>
    %57 = vector.shape_cast %56 : vector<1xi32> to vector<1x1xi32>
    %58 = vector.broadcast %57 : vector<1x1xi32> to vector<1x32xi32>
    %59 = arith.cmpi eq, %24, %58 : vector<1x32xi32>
    %cst_28 = arith.constant 0.000000e+00 : f32
    %60 = vector.broadcast %cst_28 : f32 to vector<1x32xf32>
    %61 = arith.select %59, %49, %60 : vector<1x32xi1>, vector<1x32xf32>
    %cst_29 = arith.constant dense<0.000000e+00> : vector<1xf32>
    %62 = vector.multi_reduction <add>, %61, %cst_29 [1] : vector<1x32xf32> to vector<1xf32>
    %63 = vector.shape_cast %62 : vector<1xf32> to vector<1x1xf32>
    %c0_i32_30 = arith.constant 0 : i32
    %64 = vector.broadcast %c0_i32_30 : i32 to vector<1x4xi32>
    %65 = arith.cmpi eq, %25, %64 : vector<1x4xi32>
    %66 = arith.extui %65 : vector<1x4xi1> to vector<1x4xi32>
    %67 = arith.sitofp %66 : vector<1x4xi32> to vector<1x4xf32>
    %68 = vector.broadcast %63 : vector<1x1xf32> to vector<1x4xf32>
    %69 = arith.mulf %68, %67 : vector<1x4xf32>
    %70 = arith.addf %26, %69 : vector<1x4xf32>
    %c8_i32_31 = arith.constant 8 : i32
    %71 = vector.broadcast %c8_i32_31 : i32 to vector<1x32xi32>
    %72 = arith.cmpi sge, %24, %71 : vector<1x32xi32>
    %c16_i32 = arith.constant 16 : i32
    %73 = vector.broadcast %c16_i32 : i32 to vector<1x32xi32>
    %74 = arith.cmpi slt, %24, %73 : vector<1x32xi32>
    %75 = arith.andi %72, %74 : vector<1x32xi1>
    %cst_32 = arith.constant -1.000000e+00 : f32
    %76 = vector.shape_cast %75 : vector<1x32xi1> to vector<1x32xi1>
    %77 = vector.broadcast %76 : vector<1x32xi1> to vector<4x32xi1>
    %78 = vector.broadcast %cst_32 : f32 to vector<4x32xf32>
    %79 = arith.select %77, %22, %78 : vector<4x32xi1>, vector<4x32xf32>
    %cst_33 = arith.constant dense<0xFF800000> : vector<32xf32>
    %80 = vector.multi_reduction <maximumf>, %79, %cst_33 [0] : vector<4x32xf32> to vector<32xf32>
    %81 = vector.shape_cast %80 : vector<32xf32> to vector<1x32xf32>
    %82 = vector.broadcast %81 : vector<1x32xf32> to vector<4x32xf32>
    %83 = arith.cmpf oeq, %79, %82 : vector<4x32xf32>
    %c4_i32_34 = arith.constant 4 : i32
    %84 = vector.broadcast %c4_i32_34 : i32 to vector<4x32xi32>
    %85 = arith.select %83, %23, %84 : vector<4x32xi1>, vector<4x32xi32>
    %cst_35 = arith.constant dense<2147483647> : vector<32xi32>
    %86 = vector.multi_reduction <minsi>, %85, %cst_35 [0] : vector<4x32xi32> to vector<32xi32>
    %87 = vector.shape_cast %86 : vector<32xi32> to vector<1x32xi32>
    %88 = vector.broadcast %87 : vector<1x32xi32> to vector<4x32xi32>
    %89 = arith.cmpi eq, %23, %88 : vector<4x32xi32>
    %cst_36 = arith.constant 0.000000e+00 : f32
    %90 = vector.broadcast %cst_36 : f32 to vector<4x32xf32>
    %91 = arith.select %89, %21, %90 : vector<4x32xi1>, vector<4x32xf32>
    %cst_37 = arith.constant dense<0.000000e+00> : vector<32xf32>
    %92 = vector.multi_reduction <add>, %91, %cst_37 [0] : vector<4x32xf32> to vector<32xf32>
    %93 = vector.shape_cast %92 : vector<32xf32> to vector<1x32xf32>
    %cst_38 = arith.constant dense<0xFF800000> : vector<1xf32>
    %94 = vector.multi_reduction <maximumf>, %81, %cst_38 [1] : vector<1x32xf32> to vector<1xf32>
    %95 = vector.shape_cast %94 : vector<1xf32> to vector<1x1xf32>
    %96 = vector.broadcast %95 : vector<1x1xf32> to vector<1x32xf32>
    %97 = arith.cmpf oeq, %81, %96 : vector<1x32xf32>
    %c32_i32_39 = arith.constant 32 : i32
    %98 = vector.broadcast %c32_i32_39 : i32 to vector<1x32xi32>
    %99 = arith.select %97, %24, %98 : vector<1x32xi1>, vector<1x32xi32>
    %cst_40 = arith.constant dense<2147483647> : vector<1xi32>
    %100 = vector.multi_reduction <minsi>, %99, %cst_40 [1] : vector<1x32xi32> to vector<1xi32>
    %101 = vector.shape_cast %100 : vector<1xi32> to vector<1x1xi32>
    %102 = vector.broadcast %101 : vector<1x1xi32> to vector<1x32xi32>
    %103 = arith.cmpi eq, %24, %102 : vector<1x32xi32>
    %cst_41 = arith.constant 0.000000e+00 : f32
    %104 = vector.broadcast %cst_41 : f32 to vector<1x32xf32>
    %105 = arith.select %103, %93, %104 : vector<1x32xi1>, vector<1x32xf32>
    %cst_42 = arith.constant dense<0.000000e+00> : vector<1xf32>
    %106 = vector.multi_reduction <add>, %105, %cst_42 [1] : vector<1x32xf32> to vector<1xf32>
    %107 = vector.shape_cast %106 : vector<1xf32> to vector<1x1xf32>
    %c1_i32 = arith.constant 1 : i32
    %108 = vector.broadcast %c1_i32 : i32 to vector<1x4xi32>
    %109 = arith.cmpi eq, %25, %108 : vector<1x4xi32>
    %110 = arith.extui %109 : vector<1x4xi1> to vector<1x4xi32>
    %111 = arith.sitofp %110 : vector<1x4xi32> to vector<1x4xf32>
    %112 = vector.broadcast %107 : vector<1x1xf32> to vector<1x4xf32>
    %113 = arith.mulf %112, %111 : vector<1x4xf32>
    %114 = arith.addf %70, %113 : vector<1x4xf32>
    %c16_i32_43 = arith.constant 16 : i32
    %115 = vector.broadcast %c16_i32_43 : i32 to vector<1x32xi32>
    %116 = arith.cmpi sge, %24, %115 : vector<1x32xi32>
    %c24_i32 = arith.constant 24 : i32
    %117 = vector.broadcast %c24_i32 : i32 to vector<1x32xi32>
    %118 = arith.cmpi slt, %24, %117 : vector<1x32xi32>
    %119 = arith.andi %116, %118 : vector<1x32xi1>
    %cst_44 = arith.constant -1.000000e+00 : f32
    %120 = vector.shape_cast %119 : vector<1x32xi1> to vector<1x32xi1>
    %121 = vector.broadcast %120 : vector<1x32xi1> to vector<4x32xi1>
    %122 = vector.broadcast %cst_44 : f32 to vector<4x32xf32>
    %123 = arith.select %121, %22, %122 : vector<4x32xi1>, vector<4x32xf32>
    %cst_45 = arith.constant dense<0xFF800000> : vector<32xf32>
    %124 = vector.multi_reduction <maximumf>, %123, %cst_45 [0] : vector<4x32xf32> to vector<32xf32>
    %125 = vector.shape_cast %124 : vector<32xf32> to vector<1x32xf32>
    %126 = vector.broadcast %125 : vector<1x32xf32> to vector<4x32xf32>
    %127 = arith.cmpf oeq, %123, %126 : vector<4x32xf32>
    %c4_i32_46 = arith.constant 4 : i32
    %128 = vector.broadcast %c4_i32_46 : i32 to vector<4x32xi32>
    %129 = arith.select %127, %23, %128 : vector<4x32xi1>, vector<4x32xi32>
    %cst_47 = arith.constant dense<2147483647> : vector<32xi32>
    %130 = vector.multi_reduction <minsi>, %129, %cst_47 [0] : vector<4x32xi32> to vector<32xi32>
    %131 = vector.shape_cast %130 : vector<32xi32> to vector<1x32xi32>
    %132 = vector.broadcast %131 : vector<1x32xi32> to vector<4x32xi32>
    %133 = arith.cmpi eq, %23, %132 : vector<4x32xi32>
    %cst_48 = arith.constant 0.000000e+00 : f32
    %134 = vector.broadcast %cst_48 : f32 to vector<4x32xf32>
    %135 = arith.select %133, %21, %134 : vector<4x32xi1>, vector<4x32xf32>
    %cst_49 = arith.constant dense<0.000000e+00> : vector<32xf32>
    %136 = vector.multi_reduction <add>, %135, %cst_49 [0] : vector<4x32xf32> to vector<32xf32>
    %137 = vector.shape_cast %136 : vector<32xf32> to vector<1x32xf32>
    %cst_50 = arith.constant dense<0xFF800000> : vector<1xf32>
    %138 = vector.multi_reduction <maximumf>, %125, %cst_50 [1] : vector<1x32xf32> to vector<1xf32>
    %139 = vector.shape_cast %138 : vector<1xf32> to vector<1x1xf32>
    %140 = vector.broadcast %139 : vector<1x1xf32> to vector<1x32xf32>
    %141 = arith.cmpf oeq, %125, %140 : vector<1x32xf32>
    %c32_i32_51 = arith.constant 32 : i32
    %142 = vector.broadcast %c32_i32_51 : i32 to vector<1x32xi32>
    %143 = arith.select %141, %24, %142 : vector<1x32xi1>, vector<1x32xi32>
    %cst_52 = arith.constant dense<2147483647> : vector<1xi32>
    %144 = vector.multi_reduction <minsi>, %143, %cst_52 [1] : vector<1x32xi32> to vector<1xi32>
    %145 = vector.shape_cast %144 : vector<1xi32> to vector<1x1xi32>
    %146 = vector.broadcast %145 : vector<1x1xi32> to vector<1x32xi32>
    %147 = arith.cmpi eq, %24, %146 : vector<1x32xi32>
    %cst_53 = arith.constant 0.000000e+00 : f32
    %148 = vector.broadcast %cst_53 : f32 to vector<1x32xf32>
    %149 = arith.select %147, %137, %148 : vector<1x32xi1>, vector<1x32xf32>
    %cst_54 = arith.constant dense<0.000000e+00> : vector<1xf32>
    %150 = vector.multi_reduction <add>, %149, %cst_54 [1] : vector<1x32xf32> to vector<1xf32>
    %151 = vector.shape_cast %150 : vector<1xf32> to vector<1x1xf32>
    %c2_i32 = arith.constant 2 : i32
    %152 = vector.broadcast %c2_i32 : i32 to vector<1x4xi32>
    %153 = arith.cmpi eq, %25, %152 : vector<1x4xi32>
    %154 = arith.extui %153 : vector<1x4xi1> to vector<1x4xi32>
    %155 = arith.sitofp %154 : vector<1x4xi32> to vector<1x4xf32>
    %156 = vector.broadcast %151 : vector<1x1xf32> to vector<1x4xf32>
    %157 = arith.mulf %156, %155 : vector<1x4xf32>
    %158 = arith.addf %114, %157 : vector<1x4xf32>
    %c24_i32_55 = arith.constant 24 : i32
    %159 = vector.broadcast %c24_i32_55 : i32 to vector<1x32xi32>
    %160 = arith.cmpi sge, %24, %159 : vector<1x32xi32>
    %c32_i32_56 = arith.constant 32 : i32
    %161 = vector.broadcast %c32_i32_56 : i32 to vector<1x32xi32>
    %162 = arith.cmpi slt, %24, %161 : vector<1x32xi32>
    %163 = arith.andi %160, %162 : vector<1x32xi1>
    %cst_57 = arith.constant -1.000000e+00 : f32
    %164 = vector.shape_cast %163 : vector<1x32xi1> to vector<1x32xi1>
    %165 = vector.broadcast %164 : vector<1x32xi1> to vector<4x32xi1>
    %166 = vector.broadcast %cst_57 : f32 to vector<4x32xf32>
    %167 = arith.select %165, %22, %166 : vector<4x32xi1>, vector<4x32xf32>
    %cst_58 = arith.constant dense<0xFF800000> : vector<32xf32>
    %168 = vector.multi_reduction <maximumf>, %167, %cst_58 [0] : vector<4x32xf32> to vector<32xf32>
    %169 = vector.shape_cast %168 : vector<32xf32> to vector<1x32xf32>
    %170 = vector.broadcast %169 : vector<1x32xf32> to vector<4x32xf32>
    %171 = arith.cmpf oeq, %167, %170 : vector<4x32xf32>
    %c4_i32_59 = arith.constant 4 : i32
    %172 = vector.broadcast %c4_i32_59 : i32 to vector<4x32xi32>
    %173 = arith.select %171, %23, %172 : vector<4x32xi1>, vector<4x32xi32>
    %cst_60 = arith.constant dense<2147483647> : vector<32xi32>
    %174 = vector.multi_reduction <minsi>, %173, %cst_60 [0] : vector<4x32xi32> to vector<32xi32>
    %175 = vector.shape_cast %174 : vector<32xi32> to vector<1x32xi32>
    %176 = vector.broadcast %175 : vector<1x32xi32> to vector<4x32xi32>
    %177 = arith.cmpi eq, %23, %176 : vector<4x32xi32>
    %cst_61 = arith.constant 0.000000e+00 : f32
    %178 = vector.broadcast %cst_61 : f32 to vector<4x32xf32>
    %179 = arith.select %177, %21, %178 : vector<4x32xi1>, vector<4x32xf32>
    %cst_62 = arith.constant dense<0.000000e+00> : vector<32xf32>
    %180 = vector.multi_reduction <add>, %179, %cst_62 [0] : vector<4x32xf32> to vector<32xf32>
    %181 = vector.shape_cast %180 : vector<32xf32> to vector<1x32xf32>
    %cst_63 = arith.constant dense<0xFF800000> : vector<1xf32>
    %182 = vector.multi_reduction <maximumf>, %169, %cst_63 [1] : vector<1x32xf32> to vector<1xf32>
    %183 = vector.shape_cast %182 : vector<1xf32> to vector<1x1xf32>
    %184 = vector.broadcast %183 : vector<1x1xf32> to vector<1x32xf32>
    %185 = arith.cmpf oeq, %169, %184 : vector<1x32xf32>
    %c32_i32_64 = arith.constant 32 : i32
    %186 = vector.broadcast %c32_i32_64 : i32 to vector<1x32xi32>
    %187 = arith.select %185, %24, %186 : vector<1x32xi1>, vector<1x32xi32>
    %cst_65 = arith.constant dense<2147483647> : vector<1xi32>
    %188 = vector.multi_reduction <minsi>, %187, %cst_65 [1] : vector<1x32xi32> to vector<1xi32>
    %189 = vector.shape_cast %188 : vector<1xi32> to vector<1x1xi32>
    %190 = vector.broadcast %189 : vector<1x1xi32> to vector<1x32xi32>
    %191 = arith.cmpi eq, %24, %190 : vector<1x32xi32>
    %cst_66 = arith.constant 0.000000e+00 : f32
    %192 = vector.broadcast %cst_66 : f32 to vector<1x32xf32>
    %193 = arith.select %191, %181, %192 : vector<1x32xi1>, vector<1x32xf32>
    %cst_67 = arith.constant dense<0.000000e+00> : vector<1xf32>
    %194 = vector.multi_reduction <add>, %193, %cst_67 [1] : vector<1x32xf32> to vector<1xf32>
    %195 = vector.shape_cast %194 : vector<1xf32> to vector<1x1xf32>
    %c3_i32 = arith.constant 3 : i32
    %196 = vector.broadcast %c3_i32 : i32 to vector<1x4xi32>
    %197 = arith.cmpi eq, %25, %196 : vector<1x4xi32>
    %198 = arith.extui %197 : vector<1x4xi1> to vector<1x4xi32>
    %199 = arith.sitofp %198 : vector<1x4xi32> to vector<1x4xf32>
    %200 = vector.broadcast %195 : vector<1x1xf32> to vector<1x4xf32>
    %201 = arith.mulf %200, %199 : vector<1x4xf32>
    %202 = arith.addf %158, %201 : vector<1x4xf32>
    %c0_68 = arith.constant 0 : index
    %c0_69 = arith.constant 0 : index
    %c0_70 = arith.constant 0 : index
    %203 = vector.load %arg4[%c0_68, %c0_69, %c0_70] : memref<1x1x4xf32, #tpu.memory_space<vmem>>, vector<1x1x4xf32>
    %204 = vector.shape_cast %203 : vector<1x1x4xf32> to vector<1x4xf32>
    %205 = vector.shape_cast %202 : vector<1x4xf32> to vector<1x1x4xf32>
    tpu.vector_store %arg4[%c0_68, %c0_69, %c0_70], %205 {strides = array<i32>} : memref<1x1x4xf32, #tpu.memory_space<vmem>>, vector<1x1x4xf32>,
    return
  }
  func.func @transform_0(%arg0: i32) -> (i32, i32, i32) {
    %c0_i32 = arith.constant 0 : i32
    %c0_i32_0 = arith.constant 0 : i32
    %c0_i32_1 = arith.constant 0 : i32
    return %arg0, %c0_i32, %c0_i32_0 : i32, i32, i32
  }
  func.func @transform_1(%arg0: i32) -> (i32, i32, i32) {
    %c0_i32 = arith.constant 0 : i32
    %c0_i32_0 = arith.constant 0 : i32
    %c0_i32_1 = arith.constant 0 : i32
    %c0_i32_2 = arith.constant 0 : i32
    return %c0_i32, %c0_i32_0, %c0_i32_1 : i32, i32, i32
  }
  func.func @transform_2(%arg0: i32) -> (i32, i32) {
    %c0_i32 = arith.constant 0 : i32
    %c0_i32_0 = arith.constant 0 : i32
    %c0_i32_1 = arith.constant 0 : i32
    return %c0_i32, %c0_i32_0 : i32, i32
  }
  func.func @transform_3(%arg0: i32) -> (i32, i32, i32) {
    %c0_i32 = arith.constant 0 : i32
    %c0_i32_0 = arith.constant 0 : i32
    %c0_i32_1 = arith.constant 0 : i32
    return %arg0, %c0_i32, %c0_i32_0 : i32, i32, i32
  }
}

</mosaic_0001>

<bundles_post_ra>
// kernel: forward.9
= control target key start
LH: loop header
LB: loop body
LE: loop exit
PB: predicated region body
PF: predicated region fallthrough
CT: control target
= control target key end

     0   :  { %9 = vsyncpa [#allocation3], 0  ;;  %s1247_s0 = inlined_call_operand.vmem [shape: bf16[2,9,128], index: 0, kind: input, shape index: {}]   ;;  %s1248_s1 = inlined_call_operand.vmem [shape: bf16[2,9,128], index: 1, kind: input, shape index: {}]   ;;  %s1249_s2 = inlined_call_operand.hbm [shape: bf16[4,128,128], index: 2, kind: input, shape index: {}]   ;;  %s1250_s3 = inlined_call_operand.hbm [shape: f32[1,128], index: 3, kind: input, shape index: {}]   ;;  %s1251_s4 = inlined_call_operand.vmem [shape: bf16[2,8,128], index: 4, kind: output, shape index: {}]  }
   0x1   :  { %10 = vsyncpa [#allocation5], 0  ;;  %s1130_s15 = smov 0  }
   0x2 LB: > { %s1136_s16 = sadd.s32 4294967295, %s1097_s15   ;;  %p797_p0 = scmp.ge.s32.totalorder %s1097_s15, 1  ;;  %s1097_s15 = sphi %s1130_s15, %s16_s15  }
   0x3   : > { %p141_p1 = scmp.lt.s32.totalorder %s1097_s15, 3  ;;  %s1099_s17 = smov [#allocation2]  }
   0x4   : > { %s153_s18 = sshll.u32 %s1099_s17, 4  ;;  %p979_p3 = scmp.eq.s32.totalorder %s1136_s16, 0  ;;  %s154_s18 = int_to_ptr.vmem [resolvable:$true] %s153_s18 }
   0x5   : > { %p1140_p2 = pnand %p797_p0, %p141_p1  ;;  %s1100_s20 = smov [#allocation4]  }
   0x6   : > { %s167_s21 = sshll.u32 %s1100_s20, 4  ;;  %s1042_s23 = scalar_lea.vmem %s154_s18, 4096  ;;  %s168_s21 = int_to_ptr.vmem [resolvable:$true] %s167_s21 }
   0x7   : > { %p972_p4 = pneg %p1140_p2  ;;  %p1043_p7 = scmp.ne.s32.totalorder %s154_s18, %s1042_s23 }
   0x8   : > { %p1050_p10 = scmp.lt.s32.totalorder %s154_s18, %s154_s18  ;;  %p1051_p11 = scmp.lt.s32.totalorder %s1042_s23, %s1042_s23 }
   0x9   : > { %p1149_p5 = pnand %p979_p3, %p972_p4 }
   0xa   : > { %p1052_p12 = por %p1051_p11, %p1050_p10 }
   0xb   : > { %p1033_p6 = pneg %p1149_p5 }
   0xd   : > { %p1045_p8 = pnand %p1043_p7, %p1033_p6 }
   0xf   : > { %p1046_p9 = pneg %p1045_p8 }
  0x11   : > { %p1053_p13 = pnand %p1052_p12, %p1046_p9 }
  0x13   : > { %1056 = shalt.err (!%p1053_p13)
}
  0x14   : > { %s1101_s24 = smov 64   ;;  %s1102_s25 = smov 4  }
  0x15   : > { %975 = dma.hbm_to_vmem [thread:$0]  (!%p1149_p5), %s1249_s2, 4096, %s154_s18, [#allocation3], %s1101_s24, %s1101_s24, %s1102_s25  }
  0x16   : > { %s1068_s28 = scalar_lea.vmem %s168_s21, 16  ;;  %s1075_s29 = scalar_lea.vmem %s168_s21, 32 }
  0x17   : > { %p1069_p0 = scmp.ne.s32.totalorder %s168_s21, %s1068_s28  ;;  %p1076_p7 = scmp.lt.s32.totalorder %s168_s21, %s168_s21 }
  0x18   : > { %p1077_p8 = scmp.lt.s32.totalorder %s1075_s29, %s1068_s28 }
  0x19   : > { %p1071_p1 = pnand %p1069_p0, %p1033_p6 }
  0x1a   : > { %p1078_p9 = por %p1077_p8, %p1076_p7 }
  0x1b   : > { %p1072_p4 = pneg %p1071_p1 }
  0x1d   : > { %p1079_p10 = pnand %p1078_p9, %p1072_p4 }
  0x1f   : > { %1082 = shalt.err (!%p1079_p10)
}
  0x20   : > { %978 = dma.hbm_to_vmem [thread:$0]  (!%p1149_p5), %s1250_s3, 16, %s168_s21, [#allocation5]  }
  0x21   : > { %196 = sbr.rel (%p1140_p2) target bundleno = 309 (0x135), region = 36 }
  0x26   : > { %1088 = dma.done.wait (%p979_p3), [#allocation3], 4096  }
  0x27   : > { %1090 = vsyncadd (%p979_p3), [#allocation3], 4294963200 }
  0x28   : > { %1092 = dma.done.wait (%p979_p3), [#allocation5], 16  }
  0x29   : > { %1094 = vsyncadd (%p979_p3), [#allocation5], 4294967280  ;;  %v1103_v0 = vmov 0.0   ;;  %vm1104_vm0 = vmmov 0   ;;  %v997_v1 = vld [vmem:[#allocation2 + $0x78] sm:$0xff]   ;;  %v999_v3 = vld [vmem:[#allocation2 + $0x70] sm:$0xff]  }
  0x2a   : > { %884 = vmatprep.subr.bf16.mxu0 %v1103_v0  ;;  %904 = vmatprep.subr.bf16.mxu1 %v1103_v0  ;;  %v998_v2 = vld [vmem:[#allocation2 + $0x38] sm:$0xff]   ;;  %v1000_v4 = vld [vmem:[#allocation2 + $0x30] sm:$0xff]   ;;  %p230_p2 = scmp.lt.s32.totalorder %s1136_s16, 1  ;;  %v1001_v5 = vld [vmem:[#allocation2 + $0x68] sm:$0xff]  }
  0x2b   : > { %900 = vmatprep.mubr.msk.bf16.mxu0 %vm1104_vm0, %v1103_v0  ;;  %920 = vmatprep.mubr.msk.bf16.mxu1 %vm1104_vm0, %v1103_v0  ;;  %v1002_v6 = vld [vmem:[#allocation2 + $0x28] sm:$0xff]   ;;  %v1003_v7 = vld [vmem:[#allocation2 + $0x60] sm:$0xff]   ;;  %v1005_v9 = vld [vmem:[#allocation2 + $0x58] sm:$0xff]  }
  0x2c   : > { %885 = vmatpush3.bf16.msra.mxu0 %v997_v1  ;;  %905 = vmatpush3.bf16.msra.mxu1 %v998_v2  ;;  %s1255_s16 = smov (!%p230_p2, %s1136_s16), 1  ;;  %v1004_v8 = vld [vmem:[#allocation2 + $0x20] sm:$0xff]   ;;  %v1006_v10 = vld [vmem:[#allocation2 + $0x18] sm:$0xff]   ;;  %v1007_v11 = vld [vmem:[#allocation2 + $0x50] sm:$0xff]  }
  0x2d   : > { %886 = vmatprep.subr.bf16.mxu0 %v1103_v0  ;;  %906 = vmatprep.subr.bf16.mxu1 %v1103_v0  ;;  %s846_s6 = sshll.u32 %s1255_s16, 3  ;;  %v1008_v12 = vld [vmem:[#allocation2 + $0x10] sm:$0xff]   ;;  %v1009_v13 = vld [vmem:[#allocation2 + $0x48] sm:$0xff]   ;;  %v1011_v15 = vld [vmem:[#allocation2 + $0x40] sm:$0xff]   ;;  %s808_s13 = sshll.u32 %s1255_s16, 2 }
  0x2e   : > { %s1202_s9 = scalar_lea.vmem %s1248_s1, %s846_s6  ;;  %s1208_s12 = scalar_lea.vmem %s1247_s0, %s846_s6  ;;  %v1010_v14 = vld [vmem:[#allocation2 + $0x8] sm:$0xff]   ;;  %v1012_v16 = vld [vmem:[#allocation2] sm:$0xff]   ;;  %v1015_v19 = vld [vmem:[#allocation2 + $0xb8] sm:$0xff]  }
  0x2f   : > { %v262_v17 = vld [vmem:[%s1202_s9] sm:$0xf]  ;;  %v1016_v20 = vld [vmem:[#allocation2 + $0xf8] sm:$0xff]   ;;  %v1017_v21 = vld [vmem:[#allocation2 + $0xb0] sm:$0xff]   ;;  %s243_s18 = scalar_lea.vmem %s1251_s4, %s808_s13 }
  0x30   : > { %887 = vmatpush3.bf16.msra.mxu0 %v999_v3  ;;  %907 = vmatpush3.bf16.msra.mxu1 %v1000_v4  ;;  %v245_v18 = vld [vmem:[%s1208_s12] sm:$0xf]  ;;  %v1018_v22 = vld [vmem:[#allocation2 + $0xf0] sm:$0xff]   ;;  %v1019_v23 = vld [vmem:[#allocation2 + $0xa8] sm:$0xff]  }
  0x31   : > { %888 = vmatprep.subr.bf16.mxu0 %v1103_v0  ;;  %908 = vmatprep.subr.bf16.mxu1 %v1103_v0  ;;  %v1020_v24 = vld [vmem:[#allocation2 + $0xe8] sm:$0xff]   ;;  %v1021_v25 = vld [vmem:[#allocation2 + $0xa0] sm:$0xff]   ;;  %v1023_v27 = vld [vmem:[#allocation2 + $0x98] sm:$0xff]  }
  0x32   : > { %v1022_v26 = vld [vmem:[#allocation2 + $0xe0] sm:$0xff]   ;;  %v1024_v28 = vld [vmem:[#allocation2 + $0xd8] sm:$0xff]   ;;  %v1025_v31 = vld [vmem:[#allocation2 + $0x90] sm:$0xff]  }
  0x33   : > { %v1014_v29 = vld [vmem:[%s1208_s12] sm:$0x1f]   ;;  %v1026_v32 = vld [vmem:[#allocation2 + $0xd0] sm:$0xff]   ;;  %v1027_v35 = vld [vmem:[#allocation2 + $0x88] sm:$0xff]  }
  0x34   : > { %889 = vmatpush3.bf16.msra.mxu0 %v1001_v5  ;;  %909 = vmatpush3.bf16.msra.mxu1 %v1002_v6  ;;  %v1013_v30 = vld [vmem:[%s1202_s9] sm:$0x1f]   ;;  %v483_v33 = vshll.u32 %v1014_v29, 16  ;;  %v1028_v36 = vld [vmem:[#allocation2 + $0xc8] sm:$0xff]   ;;  %v481_v37 = vshrl.u32 %v1014_v29, 16 }
  0x35   : > { %890 = vmatprep.subr.bf16.mxu0 %v1103_v0  ;;  %910 = vmatprep.subr.bf16.mxu1 %v1103_v0  ;;  %v604_v34 = vshll.u32 %v1013_v30, 16  ;;  %v602_v39 = vshrl.u32 %v1013_v30, 16  ;;  %v1029_v40 = vld [vmem:[#allocation2 + $0x80] sm:$0xff]  }
  0x36   : > { %v485_v38 = vrot.slane %v483_v33, 1  ;;  %v1030_v42 = vld [vmem:[#allocation2 + $0xc0] sm:$0xff]  }
  0x37   : > { %v606_v41 = vrot.slane %v604_v34, 1  ;;  %v843_v57 = vld [vmem:[#allocation4] ss:$0 sm:$0xff] }
  0x38   : > { %891 = vmatpush3.bf16.msra.mxu0 %v1003_v7  ;;  %911 = vmatpush3.bf16.msra.mxu1 %v1004_v8  ;;  %v486_v43 = vor.u32 %v485_v38, %v481_v37 }
  0x39   : > { %892 = vmatprep.subr.bf16.mxu0 %v1103_v0  ;;  %912 = vmatprep.subr.bf16.mxu1 %v1103_v0  ;;  %v607_v44 = vor.u32 %v606_v41, %v602_v39 }
  0x3c   : > { %893 = vmatpush3.bf16.msra.mxu0 %v1005_v9  ;;  %913 = vmatpush3.bf16.msra.mxu1 %v1006_v10 }
  0x3d   : > { %894 = vmatprep.subr.bf16.mxu0 %v1103_v0  ;;  %914 = vmatprep.subr.bf16.mxu1 %v1103_v0 }
  0x40   : > { %895 = vmatpush3.bf16.msra.mxu0 %v1007_v11  ;;  %915 = vmatpush3.bf16.msra.mxu1 %v1008_v12 }
  0x41   : > { %896 = vmatprep.subr.bf16.mxu0 %v1103_v0  ;;  %916 = vmatprep.subr.bf16.mxu1 %v1103_v0 }
  0x44   : > { %897 = vmatpush3.bf16.msra.mxu0 %v1009_v13  ;;  %917 = vmatpush3.bf16.msra.mxu1 %v1010_v14 }
  0x45   : > { %898 = vmatprep.subr.bf16.mxu0 %v1103_v0  ;;  %918 = vmatprep.subr.bf16.mxu1 %v1103_v0 }
  0x48   : > { %899 = vmatpush3.bf16.msra.mxu0 %v1011_v15  ;;  %919 = vmatpush3.bf16.msra.mxu1 %v1012_v16 }
  0x49   : > { %924 = vmatprep.subr.bf16.mxu0 %v1103_v0  ;;  %944 = vmatprep.subr.bf16.mxu1 %v1103_v0 }
  0x4b   : > { %901 = vmatmul.mubr.bf16.vlgmr.msra.gmra.mxu0 %v262_v17  ;;  %921 = vmatmul.mubr.bf16.vlgmr.msra.gmra.mxu1 %v245_v18 }
  0x4c   : > { %925 = vmatpush3.bf16.msra.mxu0 %v1015_v19  ;;  %945 = vmatpush3.bf16.msra.mxu1 %v1016_v20 }
  0x4d   : > { %926 = vmatprep.subr.bf16.mxu0 %v1103_v0  ;;  %946 = vmatprep.subr.bf16.mxu1 %v1103_v0 }
  0x4e   : > { %940 = vmatprep.mubr.msk.bf16.mxu0 %vm1104_vm0, %v1103_v0  ;;  %960 = vmatprep.mubr.msk.bf16.mxu1 %vm1104_vm0, %v1103_v0 }
  0x50   : > { %927 = vmatpush3.bf16.msra.mxu0 %v1017_v21  ;;  %947 = vmatpush3.bf16.msra.mxu1 %v1018_v22 }
  0x51   : > { %928 = vmatprep.subr.bf16.mxu0 %v1103_v0  ;;  %948 = vmatprep.subr.bf16.mxu1 %v1103_v0 }
  0x54   : > { %929 = vmatpush3.bf16.msra.mxu0 %v1019_v23  ;;  %949 = vmatpush3.bf16.msra.mxu1 %v1020_v24 }
  0x55   : > { %930 = vmatprep.subr.bf16.mxu0 %v1103_v0  ;;  %950 = vmatprep.subr.bf16.mxu1 %v1103_v0 }
  0x58   : > { %931 = vmatpush3.bf16.msra.mxu0 %v1021_v25  ;;  %951 = vmatpush3.bf16.msra.mxu1 %v1022_v26 }
  0x59   : > { %932 = vmatprep.subr.bf16.mxu0 %v1103_v0  ;;  %952 = vmatprep.subr.bf16.mxu1 %v1103_v0 }
  0x5c   : > { %933 = vmatpush3.bf16.msra.mxu0 %v1023_v27  ;;  %953 = vmatpush3.bf16.msra.mxu1 %v1024_v28 }
  0x5d   : > { %934 = vmatprep.subr.bf16.mxu0 %v1103_v0  ;;  %954 = vmatprep.subr.bf16.mxu1 %v1103_v0 }
  0x60   : > { %935 = vmatpush3.bf16.msra.mxu0 %v1025_v31  ;;  %955 = vmatpush3.bf16.msra.mxu1 %v1026_v32 }
  0x61   : > { %936 = vmatprep.subr.bf16.mxu0 %v1103_v0  ;;  %956 = vmatprep.subr.bf16.mxu1 %v1103_v0 }
  0x64   : > { %937 = vmatpush3.bf16.msra.mxu0 %v1027_v35  ;;  %957 = vmatpush3.bf16.msra.mxu1 %v1028_v36 }
  0x65   : > { %938 = vmatprep.subr.bf16.mxu0 %v1103_v0  ;;  %958 = vmatprep.subr.bf16.mxu1 %v1103_v0 }
  0x68   : > { %939 = vmatpush3.bf16.msra.mxu0 %v1029_v40  ;;  %959 = vmatpush3.bf16.msra.mxu1 %v1030_v42 }
  0x6b   : > { %941 = vmatmul.mubr.bf16.vlgmr.msra.gmra.mxu0 %v486_v43  ;;  %961 = vmatmul.mubr.bf16.vlgmr.msra.gmra.mxu1 %v607_v44 }
 0x10b   : > { %v362_v45 = vpop.f32.mrf.mxu0  ;;  %v450_v46 = vpop.f32.mrf.mxu1 }
 0x10c   : > { %v451_v53 = vadd.f32 %v450_v46, %v362_v45 }
 0x10d   : > { %v902_v47 = vpop.f32.mrf.mxu0  ;;  %v922_v48 = vpop.f32.mrf.mxu1 }
 0x10f   : > { %v365_v49 = vpop.f32.mrf.mxu0  ;;  %v453_v50 = vpop.f32.mrf.mxu1 }
 0x111   : > { %v903_v51 = vpop.f32.mrf.mxu0  ;;  %v923_v52 = vpop.f32.mrf.mxu1 }
 0x12b   : > { %v570_v54 = vpop.f32.mrf.mxu0  ;;  %v691_v56 = vpop.f32.mrf.mxu1 }
 0x12c   : > { %v576_v55 = vadd.f32 %v570_v54, %v451_v53 }
 0x12d   : > { %v942_v58 = vpop.f32.mrf.mxu0  ;;  %v962_v60 = vpop.f32.mrf.mxu1 }
 0x12e   : > { %v697_v59 = vadd.f32 %v691_v56, %v576_v55 }
 0x12f   : > { %v573_v61 = vpop.f32.mrf.mxu0  ;;  %v694_v63 = vpop.f32.mrf.mxu1 }
 0x130   : > { %v705_v62 = vadd.f32 %v843_v57, %v697_v59 }
 0x131   : > { %v943_v0 = vpop.f32.mrf.mxu0  ;;  %v963_v2 = vpop.f32.mrf.mxu1 }
 0x132   : > { %v706_v1 = vpack.c.bf16 %v705_v62, %v705_v62 }
 0x134   : > { %707 = vst [vmem:[%s243_s18] sm:$0xf] %v706_v1 }
 0x135 PF: > { %s16_s15 = sadd.s32 1, %s1097_s15  }
 0x136   : > { %p13_p3 = scmp.ge.s32.totalorder %s16_s15, 4  }
 0x138   :  { %15 = sbr.rel (!%p13_p3) target bundleno = 2 (0x2), region = 81 }
 0x13d   :  { %727 = vsyncpa [#allocation3], 1 }
 0x13e   :  { %729 = vsyncpa [#allocation3 + $0x1], 1 }
 0x13f   :  { %730 = vsyncpa [#allocation5], 1 }

// kernel: forward.7
= control target key start
LH: loop header
LB: loop body
LE: loop exit
PB: predicated region body
PF: predicated region fallthrough
CT: control target
= control target key end

     0   :  { %8 = vsyncpa [#allocation3], 0  ;;  %s3291_s0 = inlined_call_operand.vmem [shape: bf16[2,30,128], index: 0, kind: input, shape index: {}]   ;;  %s3292_s1 = inlined_call_operand.hbm [shape: bf16[15,128,128], index: 1, kind: input, shape index: {}]   ;;  %s3293_s2 = inlined_call_operand.hbm [shape: f32[1,128], index: 2, kind: input, shape index: {}]   ;;  %s3294_s3 = inlined_call_operand.vmem [shape: bf16[2,16,128], index: 3, kind: output, shape index: {}]  }
   0x1   :  { %9 = vsyncpa [#allocation5], 0  ;;  %s2995_s12 = smov 0  }
   0x2 LB: > { %s3001_s13 = sadd.s32 4294967295, %s2967_s12   ;;  %p2135_p0 = scmp.ge.s32.totalorder %s2967_s12, 1  ;;  %s2967_s12 = sphi %s2995_s12, %s15_s12  }
   0x3   : > { %p114_p1 = scmp.lt.s32.totalorder %s2967_s12, 3  ;;  %s2969_s14 = smov [#allocation2]  }
   0x4   : > { %s126_s15 = sshll.u32 %s2969_s14, 4  ;;  %p2746_p3 = scmp.eq.s32.totalorder %s3001_s13, 0  ;;  %s127_s15 = int_to_ptr.vmem [resolvable:$true] %s126_s15 }
   0x5   : > { %p3005_p2 = pnand %p2135_p0, %p114_p1  ;;  %s2970_s17 = smov [#allocation4]  }
   0x6   : > { %s140_s18 = sshll.u32 %s2970_s17, 4  ;;  %s2912_s20 = scalar_lea.vmem %s127_s15, 15360  ;;  %s141_s18 = int_to_ptr.vmem [resolvable:$true] %s140_s18 }
   0x7   : > { %p2739_p4 = pneg %p3005_p2  ;;  %p2913_p7 = scmp.ne.s32.totalorder %s127_s15, %s2912_s20 }
   0x8   : > { %p2920_p10 = scmp.lt.s32.totalorder %s127_s15, %s127_s15  ;;  %p2921_p11 = scmp.lt.s32.totalorder %s2912_s20, %s2912_s20 }
   0x9   : > { %p3014_p5 = pnand %p2746_p3, %p2739_p4 }
   0xa   : > { %p2922_p12 = por %p2921_p11, %p2920_p10 }
   0xb   : > { %p2903_p6 = pneg %p3014_p5 }
   0xd   : > { %p2915_p8 = pnand %p2913_p7, %p2903_p6 }
   0xf   : > { %p2916_p9 = pneg %p2915_p8 }
  0x11   : > { %p2923_p13 = pnand %p2922_p12, %p2916_p9 }
  0x13   : > { %2926 = shalt.err (!%p2923_p13)
}
  0x14   : > { %s2971_s21 = smov 64   ;;  %s2972_s22 = smov 4  }
  0x15   : > { %2742 = dma.hbm_to_vmem [thread:$0]  (!%p3014_p5), %s3292_s1, 15360, %s127_s15, [#allocation3], %s2971_s21, %s2971_s21, %s2972_s22  }
  0x16   : > { %s2938_s25 = scalar_lea.vmem %s141_s18, 16  ;;  %s2945_s26 = scalar_lea.vmem %s141_s18, 32 }
  0x17   : > { %p2939_p0 = scmp.ne.s32.totalorder %s141_s18, %s2938_s25  ;;  %p2946_p7 = scmp.lt.s32.totalorder %s141_s18, %s141_s18 }
  0x18   : > { %p2947_p8 = scmp.lt.s32.totalorder %s2945_s26, %s2938_s25 }
  0x19   : > { %p2941_p1 = pnand %p2939_p0, %p2903_p6 }
  0x1a   : > { %p2948_p9 = por %p2947_p8, %p2946_p7 }
  0x1b   : > { %p2942_p4 = pneg %p2941_p1 }
  0x1d   : > { %p2949_p10 = pnand %p2948_p9, %p2942_p4 }
  0x1f   : > { %2952 = shalt.err (!%p2949_p10)
}
  0x20   : > { %2745 = dma.hbm_to_vmem [thread:$0]  (!%p3014_p5), %s3293_s2, 16, %s141_s18, [#allocation5]  }
  0x21   : > { %161 = sbr.rel (%p3005_p2) target bundleno = 506 (0x1fa), region = 32 }
  0x26   : > { %2958 = dma.done.wait (%p2746_p3), [#allocation3], 15360  }
  0x27   : > { %2960 = vsyncadd (%p2746_p3), [#allocation3], 4294951936 }
  0x28   : > { %2962 = dma.done.wait (%p2746_p3), [#allocation5], 16  }
  0x29   : > { %2964 = vsyncadd (%p2746_p3), [#allocation5], 4294967280  ;;  %v2973_v0 = vmov 0.0   ;;  %vm2974_vm0 = vmmov 0   ;;  %v2764_v1 = vld [vmem:[#allocation2 + $0x78] sm:$0xff]   ;;  %v2766_v3 = vld [vmem:[#allocation2 + $0x70] sm:$0xff]  }
  0x2a   : > { %2431 = vmatprep.subr.bf16.mxu0 %v2973_v0  ;;  %2451 = vmatprep.subr.bf16.mxu1 %v2973_v0  ;;  %v2765_v2 = vld [vmem:[#allocation2 + $0x38] sm:$0xff]   ;;  %p189_p2 = scmp.lt.s32.totalorder %s3001_s13, 1  ;;  %v2767_v4 = vld [vmem:[#allocation2 + $0x30] sm:$0xff]   ;;  %v2768_v5 = vld [vmem:[#allocation2 + $0x68] sm:$0xff]   ;;  %vm244_vm1 = vsmask.f32 7424 }
  0x2b   : > { %2447 = vmatprep.mubr.msk.bf16.mxu0 %vm2974_vm0, %v2973_v0  ;;  %2467 = vmatprep.mubr.msk.bf16.mxu1 %vm2974_vm0, %v2973_v0  ;;  %v2769_v6 = vld [vmem:[#allocation2 + $0x28] sm:$0xff]   ;;  %v2770_v7 = vld [vmem:[#allocation2 + $0x60] sm:$0xff]   ;;  %v2772_v9 = vld [vmem:[#allocation2 + $0x58] sm:$0xff]   ;;  %vm458_vm2 = vcmask 1046528   ;;  %vm575_vm3 = vsmask.f32 6400 }
  0x2c   : > { %2432 = vmatpush3.bf16.msra.mxu0 %v2764_v1  ;;  %2452 = vmatpush3.bf16.msra.mxu1 %v2765_v2  ;;  %s3298_s13 = smov (!%p189_p2, %s3001_s13), 1  ;;  %v2771_v8 = vld [vmem:[#allocation2 + $0x20] sm:$0xff]   ;;  %v2773_v10 = vld [vmem:[#allocation2 + $0x18] sm:$0xff]   ;;  %v2774_v13 = vld [vmem:[#allocation2 + $0x50] sm:$0xff]   ;;  %vm706_vm4 = vcmask 1045504   ;;  %vm954_vm6 = vcmask 1044480  }
  0x2d   : > { %2433 = vmatprep.subr.bf16.mxu0 %v2973_v0  ;;  %2453 = vmatprep.subr.bf16.mxu1 %v2973_v0  ;;  %s2287_s29 = sshll.u32 %s3298_s13, 4  ;;  %v2775_v16 = vld [vmem:[#allocation2 + $0x10] sm:$0xff]   ;;  %v2776_v18 = vld [vmem:[#allocation2 + $0x48] sm:$0xff]   ;;  %v2778_v23 = vld [vmem:[#allocation2 + $0x40] sm:$0xff]   ;;  %vm823_vm5 = vsmask.f32 5376 }
  0x2e   : > { %s3066_s5 = scalar_lea.vmem %s3291_s0, %s2287_s29  ;;  %v2777_v22 = vld [vmem:[#allocation2 + $0x8] sm:$0xff]   ;;  %v2779_v26 = vld [vmem:[#allocation2] sm:$0xff]   ;;  %v2782_v28 = vld [vmem:[#allocation2 + $0xb8] sm:$0xff]   ;;  %vm1071_vm7 = vsmask.f32 4352  ;;  %s2288_s6 = sshll.u32 %s3298_s13, 3 }
  0x2f   : > { %v200_v11 = vld [vmem:[%s3066_s5] sm:$0xf]  ;;  %v3072_v12 = vld [vmem:[%s3066_s5 + $0x4] sm:$0xf]  ;;  %v2783_v29 = vld [vmem:[#allocation2 + $0xf8] sm:$0xff]   ;;  %s198_s9 = scalar_lea.vmem %s3294_s3, %s2288_s6 }
  0x30   : > { %2434 = vmatpush3.bf16.msra.mxu0 %v2766_v3  ;;  %2454 = vmatpush3.bf16.msra.mxu1 %v2767_v4  ;;  %v2146_v14 = vcombine.low %v200_v11, %v3072_v12  ;;  %v3076_v15 = vld [vmem:[%s3066_s5 + $0x8] ss:$0 sps:$4 sm:$0x11]   ;;  %v2784_v30 = vld [vmem:[#allocation2 + $0xb0] sm:$0xff]   ;;  %v2788_v34 = vld [vmem:[#allocation2 + $0xa0] sm:$0xff]  }
  0x31   : > { %2435 = vmatprep.subr.bf16.mxu0 %v2973_v0  ;;  %2455 = vmatprep.subr.bf16.mxu1 %v2973_v0  ;;  %v253_v21 = vshll.u32 %v3076_v15, 16  ;;  %v2785_v31 = vld [vmem:[#allocation2 + $0xf0] sm:$0xff]   ;;  %v2786_v32 = vld [vmem:[#allocation2 + $0xa8] sm:$0xff]   ;;  %v2789_v35 = vld [vmem:[#allocation2 + $0xe0] sm:$0xff]   ;;  %v460_v55 = vrot.slane %v3076_v15, 1 }
  0x32   : > { %v248_v17 = vshll.u32 %v2146_v14, 16  ;;  %v246_v19 = vshrl.u32 %v2146_v14, 16  ;;  %v2787_v33 = vld [vmem:[#allocation2 + $0xe8] sm:$0xff]   ;;  %v437_v36 = vld [vmem:[%s3066_s5] sm:$0xe]  ;;  %v2790_v38 = vld [vmem:[#allocation2 + $0x98] sm:$0xff]  }
  0x33   : > { %v255_v25 = vrot.slane %v253_v21, 1  ;;  %v3100_v37 = vld [vmem:[%s3066_s5 + $0x8] ss:$0 sps:$4 sm:$0x33]   ;;  %v2164_v39 = vcombine.low %v437_v36, %v3072_v12  ;;  %v2791_v40 = vld [vmem:[#allocation2 + $0xd8] sm:$0xff]   ;;  %v2792_v41 = vld [vmem:[#allocation2 + $0x90] sm:$0xff]  }
  0x34   : > { %2436 = vmatpush3.bf16.msra.mxu0 %v2768_v5  ;;  %2456 = vmatpush3.bf16.msra.mxu1 %v2769_v6  ;;  %v250_v20 = vrot.slane %v248_v17, 1  ;;  %v2793_v44 = vld [vmem:[#allocation2 + $0xd0] sm:$0xff]   ;;  %v585_v45 = vshrl.u32 %v3100_v37, 16  ;;  %v588_v46 = vshll.u32 %v3100_v37, 16  ;;  %v2794_v47 = vld [vmem:[#allocation2 + $0x88] sm:$0xff]   ;;  %v2796_v53 = vld [vmem:[#allocation2 + $0x80] sm:$0xff]  }
  0x35   : > { %2437 = vmatprep.subr.bf16.mxu0 %v2973_v0  ;;  %2457 = vmatprep.subr.bf16.mxu1 %v2973_v0  ;;  %v577_v42 = vshrl.u32 %v2164_v39, 16  ;;  %v580_v43 = vshll.u32 %v2164_v39, 16  ;;  %v2795_v48 = vld [vmem:[#allocation2 + $0xc8] sm:$0xff]   ;;  %v459_v54 = vrot.slane %v2164_v39, 1  ;;  %v2797_v56 = vld [vmem:[#allocation2 + $0xc0] sm:$0xff]   ;;  %v2799_v60 = vld [vmem:[#allocation2 + $0x138] sm:$0xff]  }
  0x36   : > { %v251_v24 = vor.u32 %v250_v20, %v246_v19  ;;  %v587_v51 = vrot.slane %v585_v45, 1  ;;  %v590_v52 = vrot.slane %v588_v46, 2  ;;  %v2801_v62 = vld [vmem:[#allocation2 + $0x178] sm:$0xff]   ;;  %v2802_v63 = vld [vmem:[#allocation2 + $0x130] sm:$0xff]   ;;  %v2804_v2 = vld [vmem:[#allocation2 + $0x128] sm:$0xff]  }
  0x37   : > { %v579_v49 = vrot.slane %v577_v42, 1  ;;  %v582_v50 = vrot.slane %v580_v43, 2  ;;  %v461_v59 = vsel %vm458_vm2, %v459_v54, %v460_v55  ;;  %v2803_v1 = vld [vmem:[#allocation2 + $0x170] sm:$0xff]   ;;  %v2805_v3 = vld [vmem:[#allocation2 + $0x168] sm:$0xff]   ;;  %v2806_v4 = vld [vmem:[#allocation2 + $0x120] sm:$0xff]  }
  0x38   : > { %2438 = vmatpush3.bf16.msra.mxu0 %v2770_v7  ;;  %2458 = vmatpush3.bf16.msra.mxu1 %v2771_v8  ;;  %v256_v27 = vsel %vm244_vm1, %v251_v24, %v255_v25  ;;  %v591_v58 = vor.u32 %v590_v52, %v587_v51  ;;  %v2807_v5 = vld [vmem:[#allocation2 + $0x160] sm:$0xff]   ;;  %v2808_v7 = vld [vmem:[#allocation2 + $0x118] sm:$0xff]   ;;  %v3130_v8 = vld [vmem:[%s3066_s5 + $0x8] ss:$0 sps:$4 sm:$0x77]  }
  0x39   : > { %2439 = vmatprep.subr.bf16.mxu0 %v2973_v0  ;;  %2459 = vmatprep.subr.bf16.mxu1 %v2973_v0  ;;  %v583_v57 = vor.u32 %v582_v50, %v579_v49  ;;  %v685_v6 = vld [vmem:[%s3066_s5] sm:$0xc]  ;;  %v2810_v11 = vld [vmem:[#allocation2 + $0x110] sm:$0xff]   ;;  %v836_v17 = vshll.u32 %v3130_v8, 16  ;;  %v2813_v19 = vld [vmem:[#allocation2 + $0x148] sm:$0xff]  }
  0x3a   : > { %v2814_v24 = vld [vmem:[#allocation2 + $0x100] sm:$0xff]   ;;  %v2822_v36 = vld [vmem:[#allocation2 + $0x1a8] sm:$0xff]   ;;  %v2826_v42 = vld [vmem:[#allocation2 + $0x198] sm:$0xff]  }
  0x3b   : > { %v592_v61 = vsel %vm575_vm3, %v583_v57, %v591_v58  ;;  %v2825_v39 = vld [vmem:[#allocation2 + $0x1e0] sm:$0xff]   ;;  %v2828_v46 = vld [vmem:[#allocation2 + $0x190] sm:$0xff]   ;;  %v2831_v52 = vld [vmem:[#allocation2 + $0x1c8] sm:$0xff]   ;;  %v956_v57 = vrot.slane %v3130_v8, 3 }
  0x3c   : > { %2440 = vmatpush3.bf16.msra.mxu0 %v2772_v9  ;;  %2460 = vmatpush3.bf16.msra.mxu1 %v2773_v10  ;;  %v2182_v9 = vcombine.low %v685_v6, %v3072_v12  ;;  %v2809_v10 = vld [vmem:[#allocation2 + $0x158] sm:$0xff]   ;;  %v2832_v58 = vld [vmem:[#allocation2 + $0x180] sm:$0xff]   ;;  %v2839_v6 = vld [vmem:[#allocation2 + $0x270] sm:$0xff]  }
  0x3d   : > { %2441 = vmatprep.subr.bf16.mxu0 %v2973_v0  ;;  %2461 = vmatprep.subr.bf16.mxu1 %v2973_v0 }
  0x3e   : > { %v828_v15 = vshll.u32 %v2182_v9, 16  ;;  %v707_v25 = vrot.slane %v2182_v9, 2 }
  0x40   : > { %2442 = vmatpush3.bf16.msra.mxu0 %v2774_v13  ;;  %2462 = vmatpush3.bf16.msra.mxu1 %v2775_v16  ;;  %v2811_v13 = vld [vmem:[#allocation2 + $0x150] sm:$0xff]   ;;  %v833_v16 = vshrl.u32 %v3130_v8, 16  ;;  %v830_v21 = vrot.slane %v828_v15, 3  ;;  %v1915_v8 = vld [vmem:[%s3066_s5 + $0x4] sm:$0x8] }
  0x41   : > { %2443 = vmatprep.subr.bf16.mxu0 %v2973_v0  ;;  %2463 = vmatprep.subr.bf16.mxu1 %v2973_v0  ;;  %v2842_v15 = vld [vmem:[#allocation2 + $0x220] sm:$0xff]  }
  0x44   : > { %2444 = vmatpush3.bf16.msra.mxu0 %v2776_v18  ;;  %2464 = vmatpush3.bf16.msra.mxu1 %v2777_v22  ;;  %v2812_v18 = vld [vmem:[#allocation2 + $0x108] sm:$0xff]   ;;  %v835_v22 = vrot.slane %v833_v16, 2 }
  0x45   : > { %2445 = vmatprep.subr.bf16.mxu0 %v2973_v0  ;;  %2465 = vmatprep.subr.bf16.mxu1 %v2973_v0 }
  0x48   : > { %2446 = vmatpush3.bf16.msra.mxu0 %v2778_v23  ;;  %2466 = vmatpush3.bf16.msra.mxu1 %v2779_v26  ;;  %v838_v23 = vrot.slane %v836_v17, 3  ;;  %v708_v26 = vrot.slane %v3100_v37, 2  ;;  %v2823_v37 = vld [vmem:[#allocation2 + $0x1e8] sm:$0xff]   ;;  %v2843_v17 = vld [vmem:[#allocation2 + $0x260] sm:$0xff]  }
  0x49   : > { %2471 = vmatprep.subr.bf16.mxu0 %v2973_v0  ;;  %2491 = vmatprep.subr.bf16.mxu1 %v2973_v0 }
  0x4b   : > { %2448 = vmatmul.mubr.bf16.vlgmr.msra.gmra.mxu0 %v256_v27  ;;  %2468 = vmatmul.mubr.bf16.vlgmr.msra.gmra.mxu1 %v2146_v14  ;;  %v825_v14 = vshrl.u32 %v2182_v9, 16  ;;  %v2815_v27 = vld [vmem:[#allocation2 + $0x140] sm:$0xff]   ;;  %v2840_v9 = vld [vmem:[#allocation2 + $0x228] sm:$0xff]  }
  0x4c   : > { %2472 = vmatpush3.bf16.msra.mxu0 %v2782_v28  ;;  %2492 = vmatpush3.bf16.msra.mxu1 %v2783_v29  ;;  %v839_v29 = vor.u32 %v838_v23, %v835_v22  ;;  %v2846_v22 = vld [vmem:[#allocation2 + $0x210] sm:$0xff]  }
  0x4d   : > { %2473 = vmatprep.subr.bf16.mxu0 %v2973_v0  ;;  %2493 = vmatprep.subr.bf16.mxu1 %v2973_v0  ;;  %v827_v20 = vrot.slane %v825_v14, 2  ;;  %v2847_v23 = vld [vmem:[#allocation2 + $0x250] sm:$0xff]  }
  0x4e   : > { %2487 = vmatprep.mubr.msk.bf16.mxu0 %vm2974_vm0, %v2973_v0  ;;  %2507 = vmatprep.mubr.msk.bf16.mxu1 %vm2974_vm0, %v2973_v0 }
  0x4f   : > { %v831_v28 = vor.u32 %v830_v21, %v827_v20  ;;  %v2845_v20 = vld [vmem:[#allocation2 + $0x258] sm:$0xff]  }
  0x50   : > { %2474 = vmatpush3.bf16.msra.mxu0 %v2784_v30  ;;  %2494 = vmatpush3.bf16.msra.mxu1 %v2785_v31  ;;  %v709_v30 = vsel %vm706_vm4, %v707_v25, %v708_v26  ;;  %v2817_v31 = vld [vmem:[#allocation2 + $0x1b8] sm:$0xff]   ;;  %v2848_v26 = vld [vmem:[#allocation2 + $0x208] sm:$0xff]  }
  0x51   : > { %2475 = vmatprep.subr.bf16.mxu0 %v2973_v0  ;;  %2495 = vmatprep.subr.bf16.mxu1 %v2973_v0 }
  0x54   : > { %2476 = vmatpush3.bf16.msra.mxu0 %v2786_v32  ;;  %2496 = vmatpush3.bf16.msra.mxu1 %v2787_v33  ;;  %v840_v32 = vsel %vm823_vm5, %v831_v28, %v839_v29  ;;  %v2819_v33 = vld [vmem:[#allocation2 + $0x1f8] sm:$0xff]  }
  0x55   : > { %2477 = vmatprep.subr.bf16.mxu0 %v2973_v0  ;;  %2497 = vmatprep.subr.bf16.mxu1 %v2973_v0 }
  0x58   : > { %2478 = vmatpush3.bf16.msra.mxu0 %v2788_v34  ;;  %2498 = vmatpush3.bf16.msra.mxu1 %v2789_v35  ;;  %v2820_v34 = vld [vmem:[#allocation2 + $0x1b0] sm:$0xff]  }
  0x59   : > { %2479 = vmatprep.subr.bf16.mxu0 %v2973_v0  ;;  %2499 = vmatprep.subr.bf16.mxu1 %v2973_v0  ;;  %v2821_v35 = vld [vmem:[#allocation2 + $0x1f0] sm:$0xff]  }
  0x5c   : > { %2480 = vmatpush3.bf16.msra.mxu0 %v2790_v38  ;;  %2500 = vmatpush3.bf16.msra.mxu1 %v2791_v40  ;;  %v2824_v38 = vld [vmem:[#allocation2 + $0x1a0] sm:$0xff]  }
  0x5d   : > { %2481 = vmatprep.subr.bf16.mxu0 %v2973_v0  ;;  %2501 = vmatprep.subr.bf16.mxu1 %v2973_v0  ;;  %v933_v40 = vld [vmem:[%s3066_s5] sm:$0x8] }
  0x5e   : > { %v2200_v43 = vcombine.low %v933_v40, %v3072_v12  ;;  %v2830_v12 = vld [vmem:[#allocation2 + $0x188] sm:$0xff]   ;;  %v2857_v40 = vld [vmem:[#allocation2 + $0x2b0] sm:$0xff]  }
  0x60   : > { %2482 = vmatpush3.bf16.msra.mxu0 %v2792_v41  ;;  %2502 = vmatpush3.bf16.msra.mxu1 %v2793_v44  ;;  %v3160_v41 = vld [vmem:[%s3066_s5 + $0x8] sm:$0xf]  ;;  %v2827_v44 = vld [vmem:[#allocation2 + $0x1d8] sm:$0xff]   ;;  %v1076_v49 = vshll.u32 %v2200_v43, 16 }
  0x61   : > { %2483 = vmatprep.subr.bf16.mxu0 %v2973_v0  ;;  %2503 = vmatprep.subr.bf16.mxu1 %v2973_v0  ;;  %v2209_v45 = vcombine.low %v3160_v41, %v3160_v41 }
  0x62   : > { %v1078_v54 = vrot.slane %v1076_v49, 4 }
  0x63   : > { %v1081_v50 = vshrl.u32 %v2209_v45, 16  ;;  %v1084_v51 = vshll.u32 %v2209_v45, 16  ;;  %v2862_v45 = vld [vmem:[#allocation2 + $0x2e0] sm:$0xff]  }
  0x64   : > { %2484 = vmatpush3.bf16.msra.mxu0 %v2794_v47  ;;  %2504 = vmatpush3.bf16.msra.mxu1 %v2795_v48  ;;  %v2829_v47 = vld [vmem:[#allocation2 + $0x1d0] sm:$0xff]   ;;  %v1073_v48 = vshrl.u32 %v2200_v43, 16 }
  0x65   : > { %2485 = vmatprep.subr.bf16.mxu0 %v2973_v0  ;;  %2505 = vmatprep.subr.bf16.mxu1 %v2973_v0  ;;  %v1083_v55 = vrot.slane %v1081_v50, 3  ;;  %v3232_v50 = vld [vmem:[%s3066_s5 + $0xc] ss:$0 sps:$4 sm:$0x33]  }
  0x68   : > { %2486 = vmatpush3.bf16.msra.mxu0 %v2796_v53  ;;  %2506 = vmatpush3.bf16.msra.mxu1 %v2797_v56  ;;  %v1075_v53 = vrot.slane %v1073_v48, 3  ;;  %v1086_v56 = vrot.slane %v1084_v51, 4  ;;  %v2864_v48 = vld [vmem:[#allocation2 + $0x2d8] sm:$0xff]   ;;  %v2865_v51 = vld [vmem:[#allocation2 + $0x290] sm:$0xff]  }
  0x69   : > { %2511 = vmatprep.subr.bf16.mxu0 %v2973_v0  ;;  %2531 = vmatprep.subr.bf16.mxu1 %v2973_v0 }
  0x6b   : > { %2488 = vmatmul.mubr.bf16.vlgmr.msra.gmra.mxu0 %v461_v59  ;;  %2508 = vmatmul.mubr.bf16.vlgmr.msra.gmra.mxu1 %v592_v61  ;;  %v955_v59 = vrot.slane %v2200_v43, 3  ;;  %v1079_v61 = vor.u32 %v1078_v54, %v1075_v53  ;;  %v2860_v43 = vld [vmem:[#allocation2 + $0x2e8] sm:$0xff]   ;;  %v1569_v54 = vshrl.u32 %v3232_v50, 16 }
  0x6c   : > { %2512 = vmatpush3.bf16.msra.mxu0 %v2799_v60  ;;  %2532 = vmatpush3.bf16.msra.mxu1 %v2801_v62  ;;  %v2833_v60 = vld [vmem:[#allocation2 + $0x1c0] sm:$0xff]   ;;  %v1087_v62 = vor.u32 %v1086_v56, %v1083_v55  ;;  %v1572_v55 = vshll.u32 %v3232_v50, 16  ;;  %v2867_v56 = vld [vmem:[#allocation2 + $0x288] sm:$0xff]  }
  0x6d   : > { %2513 = vmatprep.subr.bf16.mxu0 %v2973_v0  ;;  %2533 = vmatprep.subr.bf16.mxu1 %v2973_v0 }
  0x6e   : > { %2527 = vmatprep.mubr.msk.bf16.mxu0 %vm2974_vm0, %v2973_v0  ;;  %2547 = vmatprep.mubr.msk.bf16.mxu1 %vm2974_vm0, %v2973_v0 }
  0x70   : > { %2514 = vmatpush3.bf16.msra.mxu0 %v2802_v63  ;;  %2534 = vmatpush3.bf16.msra.mxu1 %v2803_v1  ;;  %v957_v63 = vsel %vm954_vm6, %v955_v59, %v956_v57  ;;  %v2835_v1 = vld [vmem:[#allocation2 + $0x238] sm:$0xff]   ;;  %v2868_v57 = vld [vmem:[#allocation2 + $0x2c8] sm:$0xff]  }
  0x71   : > { %2515 = vmatprep.subr.bf16.mxu0 %v2973_v0  ;;  %2535 = vmatprep.subr.bf16.mxu1 %v2973_v0 }
  0x74   : > { %2516 = vmatpush3.bf16.msra.mxu0 %v2804_v2  ;;  %2536 = vmatpush3.bf16.msra.mxu1 %v2805_v3  ;;  %v1088_v2 = vsel %vm1071_vm7, %v1079_v61, %v1087_v62  ;;  %v2837_v3 = vld [vmem:[#allocation2 + $0x278] sm:$0xff]   ;;  %v1574_v61 = vrot.slane %v1572_v55, 2  ;;  %v2869_v62 = vld [vmem:[#allocation2 + $0x280] sm:$0xff]   ;;  %v2896_v55 = vld [vmem:[#allocation2 + $0x390] sm:$0xff]  }
  0x75   : > { %2517 = vmatprep.subr.bf16.mxu0 %v2973_v0  ;;  %2537 = vmatprep.subr.bf16.mxu1 %v2973_v0 }
  0x78   : > { %2518 = vmatpush3.bf16.msra.mxu0 %v2806_v4  ;;  %2538 = vmatpush3.bf16.msra.mxu1 %v2807_v5  ;;  %v2838_v4 = vld [vmem:[#allocation2 + $0x230] sm:$0xff]   ;;  %v3178_v5 = vld [vmem:[%s3066_s5 + $0xc] ss:$0 sps:$4 sm:$0x77]  }
  0x79   : > { %2519 = vmatprep.subr.bf16.mxu0 %v2973_v0  ;;  %2539 = vmatprep.subr.bf16.mxu1 %v2973_v0 }
  0x7c   : > { %2520 = vmatpush3.bf16.msra.mxu0 %v2808_v7  ;;  %2540 = vmatpush3.bf16.msra.mxu1 %v2809_v10  ;;  %v3187_v7 = vld [vmem:[%s3066_s5 + $0x8] sm:$0xf] }
  0x7d   : > { %2521 = vmatprep.subr.bf16.mxu0 %v2973_v0  ;;  %2541 = vmatprep.subr.bf16.mxu1 %v2973_v0  ;;  %v2273_v10 = vcombine.low %v1915_v8, %v3187_v7  ;;  %v2872_v8 = vld [vmem:[#allocation2 + $0x338] sm:$0xff]  }
  0x7f   : > { %v1936_v14 = vrot.slane %v2273_v10, 3  ;;  %v2874_v10 = vld [vmem:[#allocation2 + $0x378] sm:$0xff]  }
  0x80   : > { %2522 = vmatpush3.bf16.msra.mxu0 %v2810_v11  ;;  %2542 = vmatpush3.bf16.msra.mxu1 %v2811_v13  ;;  %v1937_v11 = vrot.slane %v3178_v5, 3  ;;  %v2841_v13 = vld [vmem:[#allocation2 + $0x268] sm:$0xff]  }
  0x81   : > { %2523 = vmatprep.subr.bf16.mxu0 %v2973_v0  ;;  %2543 = vmatprep.subr.bf16.mxu1 %v2973_v0 }
  0x82   : > { %v3195_v16 = vsel %vm954_vm6, %v1936_v14, %v1937_v11  ;;  %v2875_v11 = vld [vmem:[#allocation2 + $0x330] sm:$0xff]   ;;  %v2877_v14 = vld [vmem:[#allocation2 + $0x328] sm:$0xff]  }
  0x84   : > { %2524 = vmatpush3.bf16.msra.mxu0 %v2812_v18  ;;  %2544 = vmatpush3.bf16.msra.mxu1 %v2813_v19  ;;  %v1291_v18 = vld [vmem:[%s3066_s5 + $0x4] sm:$0xf]  ;;  %v2844_v19 = vld [vmem:[#allocation2 + $0x218] sm:$0xff]  }
  0x85   : > { %2525 = vmatprep.subr.bf16.mxu0 %v2973_v0  ;;  %2545 = vmatprep.subr.bf16.mxu1 %v2973_v0  ;;  %v2227_v21 = vcombine.low %v1291_v18, %v3187_v7  ;;  %v2880_v18 = vld [vmem:[#allocation2 + $0x360] sm:$0xff]  }
  0x87   : > { %v1322_v25 = vshll.u32 %v2227_v21, 16  ;;  %v1320_v28 = vshrl.u32 %v2227_v21, 16  ;;  %v2882_v21 = vld [vmem:[#allocation2 + $0x358] sm:$0xff]  }
  0x88   : > { %2526 = vmatpush3.bf16.msra.mxu0 %v2814_v24  ;;  %2546 = vmatpush3.bf16.msra.mxu1 %v2815_v27  ;;  %v3205_v24 = vld [vmem:[%s3066_s5 + $0xc] ss:$0 sps:$4 sm:$0x11]  }
  0x89   : > { %2551 = vmatprep.subr.bf16.mxu0 %v2973_v0  ;;  %2571 = vmatprep.subr.bf16.mxu1 %v2973_v0  ;;  %v2849_v27 = vld [vmem:[#allocation2 + $0x248] sm:$0xff]   ;;  %v1324_v29 = vrot.slane %v1322_v25, 1 }
  0x8b   : > { %2528 = vmatmul.mubr.bf16.vlgmr.msra.gmra.mxu0 %v709_v30  ;;  %2548 = vmatmul.mubr.bf16.vlgmr.msra.gmra.mxu1 %v840_v32  ;;  %v1327_v30 = vshll.u32 %v3205_v24, 16  ;;  %v2851_v32 = vld [vmem:[#allocation2 + $0x240] sm:$0xff]  }
  0x8c   : > { %2552 = vmatpush3.bf16.msra.mxu0 %v2817_v31  ;;  %2572 = vmatpush3.bf16.msra.mxu1 %v2819_v33  ;;  %v2850_v31 = vld [vmem:[#allocation2 + $0x200] sm:$0xff]   ;;  %v1325_v33 = vor.u32 %v1324_v29, %v1320_v28  ;;  %v1818_v28 = vshll.u32 %v3178_v5, 16  ;;  %v2885_v29 = vld [vmem:[#allocation2 + $0x308] sm:$0xff]  }
  0x8d   : > { %2553 = vmatprep.subr.bf16.mxu0 %v2973_v0  ;;  %2573 = vmatprep.subr.bf16.mxu1 %v2973_v0 }
  0x8e   : > { %2567 = vmatprep.mubr.msk.bf16.mxu0 %vm2974_vm0, %v2973_v0  ;;  %2587 = vmatprep.mubr.msk.bf16.mxu1 %vm2974_vm0, %v2973_v0 }
  0x90   : > { %2554 = vmatpush3.bf16.msra.mxu0 %v2820_v34  ;;  %2574 = vmatpush3.bf16.msra.mxu1 %v2821_v35  ;;  %v1329_v34 = vrot.slane %v1327_v30, 1  ;;  %v2900_v35 = vld [vmem:[%s3066_s5 + $0x4] sm:$0xf] }
  0x91   : > { %2555 = vmatprep.subr.bf16.mxu0 %v2973_v0  ;;  %2575 = vmatprep.subr.bf16.mxu1 %v2973_v0 }
  0x94   : > { %2556 = vmatpush3.bf16.msra.mxu0 %v2822_v36  ;;  %2576 = vmatpush3.bf16.msra.mxu1 %v2823_v37  ;;  %v2218_v36 = vcombine.low %v2900_v35, %v3160_v41  ;;  %v2853_v37 = vld [vmem:[#allocation2 + $0x2b8] sm:$0xff]   ;;  %v2859_v41 = vld [vmem:[#allocation2 + $0x2a8] sm:$0xff]  }
  0x95   : > { %2557 = vmatprep.subr.bf16.mxu0 %v2973_v0  ;;  %2577 = vmatprep.subr.bf16.mxu1 %v2973_v0 }
  0x98   : > { %2558 = vmatpush3.bf16.msra.mxu0 %v2824_v38  ;;  %2578 = vmatpush3.bf16.msra.mxu1 %v2825_v39  ;;  %v1330_v38 = vsel %vm244_vm1, %v1325_v33, %v1329_v34  ;;  %v2856_v39 = vld [vmem:[#allocation2 + $0x2f8] sm:$0xff]   ;;  %v1820_v33 = vrot.slane %v1818_v28, 3  ;;  %v2887_v34 = vld [vmem:[#allocation2 + $0x300] sm:$0xff]  }
  0x99   : > { %2559 = vmatprep.subr.bf16.mxu0 %v2973_v0  ;;  %2579 = vmatprep.subr.bf16.mxu1 %v2973_v0 }
  0x9c   : > { %2560 = vmatpush3.bf16.msra.mxu0 %v2826_v42  ;;  %2580 = vmatpush3.bf16.msra.mxu1 %v2827_v44  ;;  %v2858_v42 = vld [vmem:[#allocation2 + $0x2f0] sm:$0xff]   ;;  %v2861_v44 = vld [vmem:[#allocation2 + $0x2a0] sm:$0xff]  }
  0x9d   : > { %2561 = vmatprep.subr.bf16.mxu0 %v2973_v0  ;;  %2581 = vmatprep.subr.bf16.mxu1 %v2973_v0 }
  0xa0   : > { %2562 = vmatpush3.bf16.msra.mxu0 %v2828_v46  ;;  %2582 = vmatpush3.bf16.msra.mxu1 %v2829_v47  ;;  %v1423_v46 = vld [vmem:[%s3066_s5 + $0x4] sm:$0xe]  ;;  %v2863_v47 = vld [vmem:[#allocation2 + $0x298] sm:$0xff]  }
  0xa1   : > { %2563 = vmatprep.subr.bf16.mxu0 %v2973_v0  ;;  %2583 = vmatprep.subr.bf16.mxu1 %v2973_v0  ;;  %v2237_v49 = vcombine.low %v1423_v46, %v3187_v7 }
  0xa3   : > { %v1564_v53 = vshll.u32 %v2237_v49, 16 }
  0xa4   : > { %2564 = vmatpush3.bf16.msra.mxu0 %v2830_v12  ;;  %2584 = vmatpush3.bf16.msra.mxu1 %v2831_v52  ;;  %v2866_v12 = vld [vmem:[#allocation2 + $0x2d0] sm:$0xff]   ;;  %v1561_v52 = vshrl.u32 %v2237_v49, 16 }
  0xa5   : > { %2565 = vmatprep.subr.bf16.mxu0 %v2973_v0  ;;  %2585 = vmatprep.subr.bf16.mxu1 %v2973_v0  ;;  %v1566_v59 = vrot.slane %v1564_v53, 2  ;;  %v2894_v53 = vld [vmem:[#allocation2 + $0x3a0] sm:$0xff]  }
  0xa8   : > { %2566 = vmatpush3.bf16.msra.mxu0 %v2832_v58  ;;  %2586 = vmatpush3.bf16.msra.mxu1 %v2833_v60  ;;  %v1563_v58 = vrot.slane %v1561_v52, 1  ;;  %v1571_v60 = vrot.slane %v1569_v54, 1  ;;  %v2895_v54 = vld [vmem:[#allocation2 + $0x398] sm:$0xff]  }
  0xa9   : > { %2591 = vmatprep.subr.bf16.mxu0 %v2973_v0  ;;  %2611 = vmatprep.subr.bf16.mxu1 %v2973_v0 }
  0xab   : > { %2568 = vmatmul.mubr.bf16.vlgmr.msra.gmra.mxu0 %v957_v63  ;;  %2588 = vmatmul.mubr.bf16.vlgmr.msra.gmra.mxu1 %v1088_v2  ;;  %v1444_v63 = vrot.slane %v2237_v49, 1  ;;  %v2870_v2 = vld [vmem:[#allocation2 + $0x2c0] sm:$0xff]  }
  0xac   : > { %2592 = vmatpush3.bf16.msra.mxu0 %v2835_v1  ;;  %2612 = vmatpush3.bf16.msra.mxu1 %v2837_v3  ;;  %v1445_v1 = vrot.slane %v3205_v24, 1  ;;  %v1567_v3 = vor.u32 %v1566_v59, %v1563_v58  ;;  %v2884_v24 = vld [vmem:[#allocation2 + $0x350] sm:$0xff]  }
  0xad   : > { %2593 = vmatprep.subr.bf16.mxu0 %v2973_v0  ;;  %2613 = vmatprep.subr.bf16.mxu1 %v2973_v0 }
  0xae   : > { %2607 = vmatprep.mubr.msk.bf16.mxu0 %vm2974_vm0, %v2973_v0  ;;  %2627 = vmatprep.mubr.msk.bf16.mxu1 %vm2974_vm0, %v2973_v0 }
  0xb0   : > { %2594 = vmatpush3.bf16.msra.mxu0 %v2838_v4  ;;  %2614 = vmatpush3.bf16.msra.mxu1 %v2839_v6  ;;  %v1575_v4 = vor.u32 %v1574_v61, %v1571_v60  ;;  %v1446_v6 = vsel %vm458_vm2, %v1444_v63, %v1445_v1 }
  0xb1   : > { %2595 = vmatprep.subr.bf16.mxu0 %v2973_v0  ;;  %2615 = vmatprep.subr.bf16.mxu1 %v2973_v0 }
  0xb4   : > { %2596 = vmatpush3.bf16.msra.mxu0 %v2840_v9  ;;  %2616 = vmatpush3.bf16.msra.mxu1 %v2841_v13  ;;  %v1576_v9 = vsel %vm575_vm3, %v1567_v3, %v1575_v4  ;;  %v2876_v13 = vld [vmem:[#allocation2 + $0x370] sm:$0xff]  }
  0xb5   : > { %2597 = vmatprep.subr.bf16.mxu0 %v2973_v0  ;;  %2617 = vmatprep.subr.bf16.mxu1 %v2973_v0 }
  0xb8   : > { %2598 = vmatpush3.bf16.msra.mxu0 %v2842_v15  ;;  %2618 = vmatpush3.bf16.msra.mxu1 %v2843_v17  ;;  %v2878_v15 = vld [vmem:[#allocation2 + $0x368] sm:$0xff]   ;;  %v2879_v17 = vld [vmem:[#allocation2 + $0x320] sm:$0xff]  }
  0xb9   : > { %2599 = vmatprep.subr.bf16.mxu0 %v2973_v0  ;;  %2619 = vmatprep.subr.bf16.mxu1 %v2973_v0 }
  0xbc   : > { %2600 = vmatpush3.bf16.msra.mxu0 %v2844_v19  ;;  %2620 = vmatpush3.bf16.msra.mxu1 %v2845_v20  ;;  %v1669_v19 = vld [vmem:[%s3066_s5 + $0x4] sm:$0xc]  ;;  %v2881_v20 = vld [vmem:[#allocation2 + $0x318] sm:$0xff]  }
  0xbd   : > { %2601 = vmatprep.subr.bf16.mxu0 %v2973_v0  ;;  %2621 = vmatprep.subr.bf16.mxu1 %v2973_v0 }
  0xc0   : > { %2602 = vmatpush3.bf16.msra.mxu0 %v2846_v22  ;;  %2622 = vmatpush3.bf16.msra.mxu1 %v2847_v23  ;;  %v2255_v22 = vcombine.low %v1669_v19, %v3187_v7  ;;  %v2883_v23 = vld [vmem:[#allocation2 + $0x310] sm:$0xff]   ;;  %v2886_v7 = vld [vmem:[#allocation2 + $0x348] sm:$0xff]  }
  0xc1   : > { %2603 = vmatprep.subr.bf16.mxu0 %v2973_v0  ;;  %2623 = vmatprep.subr.bf16.mxu1 %v2973_v0 }
  0xc2   : > { %v1807_v25 = vshrl.u32 %v2255_v22, 16  ;;  %v1690_v35 = vrot.slane %v2255_v22, 2 }
  0xc4   : > { %2604 = vmatpush3.bf16.msra.mxu0 %v2848_v26  ;;  %2624 = vmatpush3.bf16.msra.mxu1 %v2849_v27  ;;  %v1810_v26 = vshll.u32 %v2255_v22, 16  ;;  %v1815_v27 = vshrl.u32 %v3178_v5, 16  ;;  %v1809_v30 = vrot.slane %v1807_v25, 2  ;;  %v2888_v5 = vld [vmem:[#allocation2 + $0x340] sm:$0xff]  }
  0xc5   : > { %2605 = vmatprep.subr.bf16.mxu0 %v2973_v0  ;;  %2625 = vmatprep.subr.bf16.mxu1 %v2973_v0 }
  0xc8   : > { %2606 = vmatpush3.bf16.msra.mxu0 %v2850_v31  ;;  %2626 = vmatpush3.bf16.msra.mxu1 %v2851_v32  ;;  %v1812_v31 = vrot.slane %v1810_v26, 3  ;;  %v1817_v32 = vrot.slane %v1815_v27, 2 }
  0xc9   : > { %2631 = vmatprep.subr.bf16.mxu0 %v2973_v0  ;;  %2651 = vmatprep.subr.bf16.mxu1 %v2973_v0 }
  0xcb   : > { %2608 = vmatmul.mubr.bf16.vlgmr.msra.gmra.mxu0 %v2218_v36  ;;  %2628 = vmatmul.mubr.bf16.vlgmr.msra.gmra.mxu1 %v1330_v38  ;;  %v1691_v36 = vrot.slane %v3232_v50, 2  ;;  %v1821_v38 = vor.u32 %v1820_v33, %v1817_v32  ;;  %v2893_v50 = vld [vmem:[#allocation2 + $0x3a8] sm:$0xff]  }
  0xcc   : > { %2632 = vmatpush3.bf16.msra.mxu0 %v2853_v37  ;;  %2652 = vmatpush3.bf16.msra.mxu1 %v2856_v39  ;;  %v1813_v37 = vor.u32 %v1812_v31, %v1809_v30 }
  0xcd   : > { %2633 = vmatprep.subr.bf16.mxu0 %v2973_v0  ;;  %2653 = vmatprep.subr.bf16.mxu1 %v2973_v0  ;;  %v1692_v39 = vsel %vm706_vm4, %v1690_v35, %v1691_v36 }
  0xce   : > { %2647 = vmatprep.mubr.msk.bf16.mxu0 %vm2974_vm0, %v2973_v0  ;;  %2667 = vmatprep.mubr.msk.bf16.mxu1 %vm2974_vm0, %v2973_v0 }
  0xd0   : > { %2634 = vmatpush3.bf16.msra.mxu0 %v2857_v40  ;;  %2654 = vmatpush3.bf16.msra.mxu1 %v2858_v42  ;;  %v2890_v40 = vld [vmem:[#allocation2 + $0x3b8] sm:$0xff]   ;;  %v1822_v42 = vsel %vm823_vm5, %v1813_v37, %v1821_v38 }
  0xd1   : > { %2635 = vmatprep.subr.bf16.mxu0 %v2973_v0  ;;  %2655 = vmatprep.subr.bf16.mxu1 %v2973_v0 }
  0xd4   : > { %2636 = vmatpush3.bf16.msra.mxu0 %v2859_v41  ;;  %2656 = vmatpush3.bf16.msra.mxu1 %v2860_v43 }
  0xd5   : > { %2637 = vmatprep.subr.bf16.mxu0 %v2973_v0  ;;  %2657 = vmatprep.subr.bf16.mxu1 %v2973_v0 }
  0xd8   : > { %2638 = vmatpush3.bf16.msra.mxu0 %v2861_v44  ;;  %2658 = vmatpush3.bf16.msra.mxu1 %v2862_v45  ;;  %v2892_v44 = vld [vmem:[#allocation2 + $0x3b0] sm:$0xff]  }
  0xd9   : > { %2639 = vmatprep.subr.bf16.mxu0 %v2973_v0  ;;  %2659 = vmatprep.subr.bf16.mxu1 %v2973_v0 }
  0xdc   : > { %2640 = vmatpush3.bf16.msra.mxu0 %v2863_v47  ;;  %2660 = vmatpush3.bf16.msra.mxu1 %v2864_v48 }
  0xdd   : > { %2641 = vmatprep.subr.bf16.mxu0 %v2973_v0  ;;  %2661 = vmatprep.subr.bf16.mxu1 %v2973_v0 }
  0xe0   : > { %2642 = vmatpush3.bf16.msra.mxu0 %v2865_v51  ;;  %2662 = vmatpush3.bf16.msra.mxu1 %v2866_v12 }
  0xe1   : > { %2643 = vmatprep.subr.bf16.mxu0 %v2973_v0  ;;  %2663 = vmatprep.subr.bf16.mxu1 %v2973_v0 }
  0xe4   : > { %2644 = vmatpush3.bf16.msra.mxu0 %v2867_v56  ;;  %2664 = vmatpush3.bf16.msra.mxu1 %v2868_v57  ;;  %v2897_v56 = vld [vmem:[#allocation2 + $0x388] sm:$0xff]   ;;  %v2898_v57 = vld [vmem:[#allocation2 + $0x380] sm:$0xff]  }
  0xe5   : > { %2645 = vmatprep.subr.bf16.mxu0 %v2973_v0  ;;  %2665 = vmatprep.subr.bf16.mxu1 %v2973_v0 }
  0xe8   : > { %2646 = vmatpush3.bf16.msra.mxu0 %v2869_v62  ;;  %2666 = vmatpush3.bf16.msra.mxu1 %v2870_v2 }
  0xe9   : > { %2671 = vmatprep.subr.bf16.mxu0 %v2973_v0  ;;  %2691 = vmatprep.subr.bf16.mxu1 %v2973_v0 }
  0xeb   : > { %2648 = vmatmul.mubr.bf16.vlgmr.msra.gmra.mxu0 %v1446_v6  ;;  %2668 = vmatmul.mubr.bf16.vlgmr.msra.gmra.mxu1 %v1576_v9 }
  0xec   : > { %2672 = vmatpush3.bf16.msra.mxu0 %v2872_v8  ;;  %2692 = vmatpush3.bf16.msra.mxu1 %v2874_v10 }
  0xed   : > { %2673 = vmatprep.subr.bf16.mxu0 %v2973_v0  ;;  %2693 = vmatprep.subr.bf16.mxu1 %v2973_v0 }
  0xee   : > { %2687 = vmatprep.mubr.msk.bf16.mxu0 %vm2974_vm0, %v2973_v0  ;;  %2707 = vmatprep.mubr.msk.bf16.mxu1 %vm2974_vm0, %v2973_v0 }
  0xf0   : > { %2674 = vmatpush3.bf16.msra.mxu0 %v2875_v11  ;;  %2694 = vmatpush3.bf16.msra.mxu1 %v2876_v13 }
  0xf1   : > { %2675 = vmatprep.subr.bf16.mxu0 %v2973_v0  ;;  %2695 = vmatprep.subr.bf16.mxu1 %v2973_v0 }
  0xf4   : > { %2676 = vmatpush3.bf16.msra.mxu0 %v2877_v14  ;;  %2696 = vmatpush3.bf16.msra.mxu1 %v2878_v15 }
  0xf5   : > { %2677 = vmatprep.subr.bf16.mxu0 %v2973_v0  ;;  %2697 = vmatprep.subr.bf16.mxu1 %v2973_v0 }
  0xf8   : > { %2678 = vmatpush3.bf16.msra.mxu0 %v2879_v17  ;;  %2698 = vmatpush3.bf16.msra.mxu1 %v2880_v18 }
  0xf9   : > { %2679 = vmatprep.subr.bf16.mxu0 %v2973_v0  ;;  %2699 = vmatprep.subr.bf16.mxu1 %v2973_v0 }
  0xfc   : > { %2680 = vmatpush3.bf16.msra.mxu0 %v2881_v20  ;;  %2700 = vmatpush3.bf16.msra.mxu1 %v2882_v21 }
  0xfd   : > { %2681 = vmatprep.subr.bf16.mxu0 %v2973_v0  ;;  %2701 = vmatprep.subr.bf16.mxu1 %v2973_v0 }
 0x100   : > { %2682 = vmatpush3.bf16.msra.mxu0 %v2883_v23  ;;  %2702 = vmatpush3.bf16.msra.mxu1 %v2884_v24 }
 0x101   : > { %2683 = vmatprep.subr.bf16.mxu0 %v2973_v0  ;;  %2703 = vmatprep.subr.bf16.mxu1 %v2973_v0 }
 0x104   : > { %2684 = vmatpush3.bf16.msra.mxu0 %v2885_v29  ;;  %2704 = vmatpush3.bf16.msra.mxu1 %v2886_v7 }
 0x105   : > { %2685 = vmatprep.subr.bf16.mxu0 %v2973_v0  ;;  %2705 = vmatprep.subr.bf16.mxu1 %v2973_v0 }
 0x108   : > { %2686 = vmatpush3.bf16.msra.mxu0 %v2887_v34  ;;  %2706 = vmatpush3.bf16.msra.mxu1 %v2888_v5 }
 0x109   : > { %2711 = vmatprep.subr.bf16.mxu0 %v2973_v0 }
 0x10b   : > { %v340_v41 = vpop.f32.mrf.mxu0  ;;  %2688 = vmatmul.mubr.bf16.vlgmr.msra.gmra.mxu0 %v1692_v39  ;;  %v430_v43 = vpop.f32.mrf.mxu1  ;;  %2708 = vmatmul.mubr.bf16.vlgmr.msra.gmra.mxu1 %v1822_v42 }
 0x10c   : > { %2712 = vmatpush3.bf16.msra.mxu0 %v2890_v40  ;;  %v431_v45 = vadd.f32 %v430_v43, %v340_v41  ;;  %2727 = vmatprep.mubr.msk.bf16.mxu0 %vm2974_vm0, %v2973_v0 }
 0x10d   : > { %v2449_v46 = vpop.f32.mrf.mxu0  ;;  %2713 = vmatprep.subr.bf16.mxu0 %v2973_v0  ;;  %v2469_v47 = vpop.f32.mrf.mxu1 }
 0x10f   : > { %v343_v48 = vpop.f32.mrf.mxu0  ;;  %v433_v49 = vpop.f32.mrf.mxu1 }
 0x110   : > { %2714 = vmatpush3.bf16.msra.mxu0 %v2892_v44  ;;  %v434_v51 = vadd.f32 %v433_v49, %v343_v48 }
 0x111   : > { %v2450_v12 = vpop.f32.mrf.mxu0  ;;  %2715 = vmatprep.subr.bf16.mxu0 %v2973_v0  ;;  %v2470_v52 = vpop.f32.mrf.mxu1 }
 0x114   : > { %2716 = vmatpush3.bf16.msra.mxu0 %v2893_v50 }
 0x115   : > { %2717 = vmatprep.subr.bf16.mxu0 %v2973_v0 }
 0x118   : > { %2718 = vmatpush3.bf16.msra.mxu0 %v2894_v53 }
 0x119   : > { %2719 = vmatprep.subr.bf16.mxu0 %v2973_v0 }
 0x11c   : > { %2720 = vmatpush3.bf16.msra.mxu0 %v2895_v54 }
 0x11d   : > { %2721 = vmatprep.subr.bf16.mxu0 %v2973_v0 }
 0x120   : > { %2722 = vmatpush3.bf16.msra.mxu0 %v2896_v55 }
 0x121   : > { %2723 = vmatprep.subr.bf16.mxu0 %v2973_v0 }
 0x124   : > { %2724 = vmatpush3.bf16.msra.mxu0 %v2897_v56 }
 0x125   : > { %2725 = vmatprep.subr.bf16.mxu0 %v2973_v0 }
 0x128   : > { %2726 = vmatpush3.bf16.msra.mxu0 %v2898_v57 }
 0x12b   : > { %v545_v58 = vpop.f32.mrf.mxu0  ;;  %2728 = vmatmul.mubr.bf16.vlgmr.msra.gmra.mxu0 %v3195_v16  ;;  %v676_v60 = vpop.f32.mrf.mxu1 }
 0x12c   : > { %v552_v59 = vadd.f32 %v545_v58, %v431_v45 }
 0x12d   : > { %v2489_v61 = vpop.f32.mrf.mxu0  ;;  %v2509_v63 = vpop.f32.mrf.mxu1 }
 0x12e   : > { %v683_v62 = vadd.f32 %v676_v60, %v552_v59 }
 0x12f   : > { %v548_v1 = vpop.f32.mrf.mxu0  ;;  %v679_v3 = vpop.f32.mrf.mxu1 }
 0x130   : > { %v553_v2 = vadd.f32 %v548_v1, %v434_v51 }
 0x131   : > { %v2490_v4 = vpop.f32.mrf.mxu0  ;;  %v2510_v8 = vpop.f32.mrf.mxu1 }
 0x132   : > { %v684_v6 = vadd.f32 %v679_v3, %v553_v2  ;;  %v2282_v3 = vld [vmem:[#allocation4] ss:$0 sm:$0xff] }
 0x14b   : > { %v793_v9 = vpop.f32.mrf.mxu0  ;;  %v924_v11 = vpop.f32.mrf.mxu1 }
 0x14c   : > { %v800_v10 = vadd.f32 %v793_v9, %v683_v62 }
 0x14d   : > { %v2529_v13 = vpop.f32.mrf.mxu0  ;;  %v2549_v14 = vpop.f32.mrf.mxu1 }
 0x14e   : > { %v931_v0 = vadd.f32 %v924_v11, %v800_v10 }
 0x14f   : > { %v796_v15 = vpop.f32.mrf.mxu0  ;;  %v927_v16 = vpop.f32.mrf.mxu1 }
 0x150   : > { %v801_v17 = vadd.f32 %v796_v15, %v684_v6 }
 0x151   : > { %v2530_v18 = vpop.f32.mrf.mxu0  ;;  %v2550_v20 = vpop.f32.mrf.mxu1 }
 0x152   : > { %v932_v19 = vadd.f32 %v927_v16, %v801_v17 }
 0x16b   : > { %v1041_v21 = vpop.f32.mrf.mxu0  ;;  %v1172_v23 = vpop.f32.mrf.mxu1 }
 0x16c   : > { %v1048_v22 = vadd.f32 %v1041_v21, %v931_v0 }
 0x16d   : > { %v2569_v24 = vpop.f32.mrf.mxu0  ;;  %v2589_v26 = vpop.f32.mrf.mxu1 }
 0x16e   : > { %v1179_v25 = vadd.f32 %v1172_v23, %v1048_v22 }
 0x16f   : > { %v1044_v27 = vpop.f32.mrf.mxu0  ;;  %v1175_v29 = vpop.f32.mrf.mxu1 }
 0x170   : > { %v1049_v28 = vadd.f32 %v1044_v27, %v932_v19 }
 0x171   : > { %v2570_v7 = vpop.f32.mrf.mxu0  ;;  %v2590_v31 = vpop.f32.mrf.mxu1 }
 0x172   : > { %v1180_v30 = vadd.f32 %v1175_v29, %v1049_v28 }
 0x18b   : > { %v1282_v32 = vpop.f32.mrf.mxu0  ;;  %v1414_v34 = vpop.f32.mrf.mxu1 }
 0x18c   : > { %v1289_v33 = vadd.f32 %v1282_v32, %v1179_v25 }
 0x18d   : > { %v2609_v35 = vpop.f32.mrf.mxu0  ;;  %v2629_v5 = vpop.f32.mrf.mxu1 }
 0x18e   : > { %v1421_v36 = vadd.f32 %v1414_v34, %v1289_v33 }
 0x18f   : > { %v1285_v37 = vpop.f32.mrf.mxu0  ;;  %v1417_v39 = vpop.f32.mrf.mxu1 }
 0x190   : > { %v1290_v38 = vadd.f32 %v1285_v37, %v1180_v30 }
 0x191   : > { %v2610_v40 = vpop.f32.mrf.mxu0  ;;  %v2630_v41 = vpop.f32.mrf.mxu1 }
 0x192   : > { %v1422_v42 = vadd.f32 %v1417_v39, %v1290_v38 }
 0x1ab   : > { %v1530_v43 = vpop.f32.mrf.mxu0  ;;  %v1660_v44 = vpop.f32.mrf.mxu1 }
 0x1ac   : > { %v1537_v58 = vadd.f32 %v1530_v43, %v1421_v36 }
 0x1ad   : > { %v2649_v45 = vpop.f32.mrf.mxu0  ;;  %v2669_v46 = vpop.f32.mrf.mxu1 }
 0x1ae   : > { %v1667_v59 = vadd.f32 %v1660_v44, %v1537_v58 }
 0x1af   : > { %v1533_v47 = vpop.f32.mrf.mxu0  ;;  %v1663_v48 = vpop.f32.mrf.mxu1 }
 0x1b0   : > { %v1538_v60 = vadd.f32 %v1533_v47, %v1422_v42 }
 0x1b1   : > { %v2650_v49 = vpop.f32.mrf.mxu0  ;;  %v2670_v50 = vpop.f32.mrf.mxu1 }
 0x1b2   : > { %v1668_v62 = vadd.f32 %v1663_v48, %v1538_v60 }
 0x1cb   : > { %v1776_v51 = vpop.f32.mrf.mxu0  ;;  %v1906_v12 = vpop.f32.mrf.mxu1 }
 0x1cc   : > { %v1783_v61 = vadd.f32 %v1776_v51, %v1667_v59 }
 0x1cd   : > { %v2689_v52 = vpop.f32.mrf.mxu0  ;;  %v2709_v53 = vpop.f32.mrf.mxu1 }
 0x1ce   : > { %v1913_v63 = vadd.f32 %v1906_v12, %v1783_v61 }
 0x1cf   : > { %v1779_v54 = vpop.f32.mrf.mxu0  ;;  %v1909_v55 = vpop.f32.mrf.mxu1 }
 0x1d0   : > { %v1784_v1 = vadd.f32 %v1779_v54, %v1668_v62 }
 0x1d1   : > { %v2690_v56 = vpop.f32.mrf.mxu0  ;;  %v2710_v57 = vpop.f32.mrf.mxu1 }
 0x1d2   : > { %v1914_v8 = vadd.f32 %v1909_v55, %v1784_v1 }
 0x1eb   : > { %v2022_v2 = vpop.f32.mrf.mxu0 }
 0x1ec   : > { %v2029_v4 = vadd.f32 %v2022_v2, %v1913_v63 }
 0x1ed   : > { %v2729_v6 = vpop.f32.mrf.mxu0 }
 0x1ee   : > { %v2038_v9 = vadd.f32 %v2282_v3, %v2029_v4 }
 0x1ef   : > { %v2025_v10 = vpop.f32.mrf.mxu0 }
 0x1f0   : > { %v2030_v11 = vadd.f32 %v2025_v10, %v1914_v8  ;;  %v2042_v0 = vmul.f32 0.1, %v2038_v9  ;;  %vm2040_vm8 = vcmp.ge.f32.partialorder %v2038_v9, 0.0 }
 0x1f1   : > { %v2730_v13 = vpop.f32.mrf.mxu0 }
 0x1f2   : > { %v2039_v14 = vadd.f32 %v2282_v3, %v2030_v11  ;;  %v2044_v17 = vsel %vm2040_vm8, %v2038_v9, %v2042_v0 }
 0x1f4   : > { %vm2041_vm9 = vcmp.ge.f32.partialorder %v2039_v14, 0.0  ;;  %v2043_v15 = vmul.f32 0.1, %v2039_v14 }
 0x1f6   : > { %v2045_v16 = vsel %vm2041_vm9, %v2039_v14, %v2043_v15 }
 0x1f7   : > { %v2294_v18 = vpack.c.bf16 %v2045_v16, %v2044_v17 }
 0x1f9   : > { %2295 = vst [vmem:[%s198_s9] sm:$0xff] %v2294_v18  }
 0x1fa PF: > { %s15_s12 = sadd.s32 1, %s2967_s12  }
 0x1fb   : > { %p12_p3 = scmp.ge.s32.totalorder %s15_s12, 4  }
 0x1fd   :  { %14 = sbr.rel (!%p12_p3) target bundleno = 2 (0x2), region = 85 }
 0x202   :  { %2077 = vsyncpa [#allocation3], 1 }
 0x203   :  { %2079 = vsyncpa [#allocation3 + $0x1], 1 }
 0x204   :  { %2080 = vsyncpa [#allocation5], 1 }

// kernel: forward.10
= control target key start
LH: loop header
LB: loop body
LE: loop exit
PB: predicated region body
PF: predicated region fallthrough
CT: control target
= control target key end

     0   :  { %8 = vsyncpa [#allocation3], 0  ;;  %s3427_s0 = inlined_call_operand.vmem [shape: bf16[2,22,128], index: 0, kind: input, shape index: {}]   ;;  %s3428_s1 = inlined_call_operand.hbm [shape: bf16[15,128,256], index: 1, kind: input, shape index: {}]   ;;  %s3429_s2 = inlined_call_operand.hbm [shape: f32[1,256], index: 2, kind: input, shape index: {}]   ;;  %s3430_s3 = inlined_call_operand.vmem [shape: bf16[2,8,256], index: 3, kind: output, shape index: {}]  }
   0x1   :  { %9 = vsyncpa [#allocation5], 0  ;;  %s3301_s12 = smov 0  }
   0x2 LB: > { %s3307_s13 = sadd.s32 4294967295, %s3274_s12   ;;  %p2534_p0 = scmp.ge.s32.totalorder %s3274_s12, 1  ;;  %s3274_s12 = sphi %s3301_s12, %s15_s12  }
   0x3   : > { %p114_p1 = scmp.lt.s32.totalorder %s3274_s12, 3  ;;  %s3276_s14 = smov [#allocation2]  }
   0x4   : > { %s126_s15 = sshll.u32 %s3276_s14, 4  ;;  %p2818_p3 = scmp.eq.s32.totalorder %s3307_s13, 0  ;;  %s127_s15 = int_to_ptr.vmem [resolvable:$true] %s126_s15 }
   0x5   : > { %p3311_p2 = pnand %p2534_p0, %p114_p1  ;;  %s3277_s17 = smov [#allocation4]  }
   0x6   : > { %s140_s18 = sshll.u32 %s3277_s17, 4  ;;  %s3219_s20 = scalar_lea.vmem %s127_s15, 30720  ;;  %s141_s18 = int_to_ptr.vmem [resolvable:$true] %s140_s18 }
   0x7   : > { %p2811_p4 = pneg %p3311_p2  ;;  %p3220_p7 = scmp.ne.s32.totalorder %s127_s15, %s3219_s20 }
   0x8   : > { %p3227_p10 = scmp.lt.s32.totalorder %s127_s15, %s127_s15  ;;  %p3228_p11 = scmp.lt.s32.totalorder %s3219_s20, %s3219_s20 }
   0x9   : > { %p3320_p5 = pnand %p2818_p3, %p2811_p4 }
   0xa   : > { %p3229_p12 = por %p3228_p11, %p3227_p10 }
   0xb   : > { %p3210_p6 = pneg %p3320_p5 }
   0xd   : > { %p3222_p8 = pnand %p3220_p7, %p3210_p6 }
   0xf   : > { %p3223_p9 = pneg %p3222_p8 }
  0x11   : > { %p3230_p13 = pnand %p3229_p12, %p3223_p9 }
  0x13   : > { %3233 = shalt.err (!%p3230_p13)
}
  0x14   : > { %s3278_s21 = smov 128   ;;  %s3279_s22 = smov 8  }
  0x15   : > { %2814 = dma.hbm_to_vmem [thread:$0]  (!%p3320_p5), %s3428_s1, 30720, %s127_s15, [#allocation3], %s3278_s21, %s3278_s21, %s3279_s22  }
  0x16   : > { %s3245_s25 = scalar_lea.vmem %s141_s18, 32  ;;  %p3253_p7 = scmp.lt.s32.totalorder %s141_s18, %s141_s18 }
  0x17   : > { %p3246_p0 = scmp.ne.s32.totalorder %s141_s18, %s3245_s25  ;;  %p3254_p8 = scmp.lt.s32.totalorder %s3245_s25, %s3245_s25 }
  0x19   : > { %p3248_p1 = pnand %p3246_p0, %p3210_p6  ;;  %p3255_p10 = por %p3254_p8, %p3253_p7 }
  0x1b   : > { %p3249_p4 = pneg %p3248_p1 }
  0x1d   : > { %p3256_p9 = pnand %p3255_p10, %p3249_p4 }
  0x1f   : > { %3259 = shalt.err (!%p3256_p9)
}
  0x20   : > { %2817 = dma.hbm_to_vmem [thread:$0]  (!%p3320_p5), %s3429_s2, 32, %s141_s18, [#allocation5]  }
  0x21   : > { %161 = sbr.rel (%p3311_p2) target bundleno = 504 (0x1f8), region = 32 }
  0x26   : > { %3265 = dma.done.wait (%p2818_p3), [#allocation3], 30720  }
  0x27   : > { %3267 = vsyncadd (%p2818_p3), [#allocation3], 4294936576 }
  0x28   : > { %3269 = dma.done.wait (%p2818_p3), [#allocation5], 32  }
  0x29   : > { %3271 = vsyncadd (%p2818_p3), [#allocation5], 4294967264  ;;  %v3280_v0 = vmov 0   ;;  %v2835_v1 = vld [vmem:[#allocation2 + $0xf4] ss:$8 sps:$4 sm:$0xff]   ;;  %p189_p2 = scmp.lt.s32.totalorder %s3307_s13, 1 }
  0x2a   : > { %360 = vmatprep.mubr.bf16.mxu0 %v3280_v0  ;;  %481 = vmatprep.mubr.bf16.mxu1 %v3280_v0  ;;  %v2837_v2 = vld [vmem:[#allocation2 + $0x74] ss:$8 sps:$4 sm:$0xff]   ;;  %v2839_v3 = vld [vmem:[#allocation2 + $0xf0] ss:$8 sps:$4 sm:$0xff]   ;;  %v2841_v5 = vld [vmem:[#allocation2 + $0xe4] ss:$8 sps:$4 sm:$0xff]  }
  0x2b   : > { %328 = vmatprep.subr.bf16.mxu0 %v2835_v1  ;;  %v2840_v4 = vld [vmem:[#allocation2 + $0x70] ss:$8 sps:$4 sm:$0xff]   ;;  %449 = vmatprep.subr.bf16.mxu1 %v2837_v2  ;;  %v2843_v6 = vld [vmem:[#allocation2 + $0x64] ss:$8 sps:$4 sm:$0xff]   ;;  %v2845_v7 = vld [vmem:[#allocation2 + $0xe0] ss:$8 sps:$4 sm:$0xff]  }
  0x2c   : > { %329 = vmatpush1.bf16.msra.mxu0 %v2839_v3  ;;  %450 = vmatpush1.bf16.msra.mxu1 %v2840_v4  ;;  %v2846_v8 = vld [vmem:[#allocation2 + $0x60] ss:$8 sps:$4 sm:$0xff]   ;;  %v2847_v9 = vld [vmem:[#allocation2 + $0xd4] ss:$8 sps:$4 sm:$0xff]   ;;  %v2851_v11 = vld [vmem:[#allocation2 + $0xd0] ss:$8 sps:$4 sm:$0xff]  }
  0x2d   : > { %330 = vmatprep.subr.bf16.mxu0 %v2841_v5  ;;  %451 = vmatprep.subr.bf16.mxu1 %v2843_v6  ;;  %v2849_v10 = vld [vmem:[#allocation2 + $0x54] ss:$8 sps:$4 sm:$0xff]   ;;  %v2852_v12 = vld [vmem:[#allocation2 + $0x50] ss:$8 sps:$4 sm:$0xff]   ;;  %v2853_v13 = vld [vmem:[#allocation2 + $0xc4] ss:$8 sps:$4 sm:$0xff]  }
  0x2e   : > { %v2855_v14 = vld [vmem:[#allocation2 + $0x44] ss:$8 sps:$4 sm:$0xff]   ;;  %s3434_s13 = smov (!%p189_p2, %s3307_s13), 1  ;;  %v2857_v15 = vld [vmem:[#allocation2 + $0xc0] ss:$8 sps:$4 sm:$0xff]  }
  0x2f   : > { %v2858_v16 = vld [vmem:[#allocation2 + $0x40] ss:$8 sps:$4 sm:$0xff]   ;;  %v2859_v17 = vld [vmem:[#allocation2 + $0xb4] ss:$8 sps:$4 sm:$0xff]   ;;  %s2802_s28 = smul.u32 12, %s3434_s13  ;;  %s2800_s5 = sshll.u32 %s3434_s13, 3 }
  0x30   : > { %331 = vmatpush1.bf16.msra.mxu0 %v2845_v7  ;;  %452 = vmatpush1.bf16.msra.mxu1 %v2846_v8  ;;  %v2861_v18 = vld [vmem:[#allocation2 + $0x34] ss:$8 sps:$4 sm:$0xff]   ;;  %v2863_v19 = vld [vmem:[#allocation2 + $0xb0] ss:$8 sps:$4 sm:$0xff]   ;;  %v2865_v21 = vld [vmem:[#allocation2 + $0xa4] ss:$8 sps:$4 sm:$0xff]   ;;  %s198_s8 = scalar_lea.vmem %s3430_s3, %s2800_s5 }
  0x31   : > { %332 = vmatprep.subr.bf16.mxu0 %v2847_v9  ;;  %453 = vmatprep.subr.bf16.mxu1 %v2849_v10  ;;  %v2864_v20 = vld [vmem:[#allocation2 + $0x30] ss:$8 sps:$4 sm:$0xff]   ;;  %v2867_v22 = vld [vmem:[#allocation2 + $0x24] ss:$8 sps:$4 sm:$0xff]   ;;  %s3362_s4 = scalar_lea.vmem %s3427_s0, %s2802_s28  ;;  %v2869_v23 = vld [vmem:[#allocation2 + $0xa0] ss:$8 sps:$4 sm:$0xff]  }
  0x32   : > { %v2870_v24 = vld [vmem:[#allocation2 + $0x20] ss:$8 sps:$4 sm:$0xff]   ;;  %v2871_v25 = vld [vmem:[#allocation2 + $0x94] ss:$8 sps:$4 sm:$0xff]   ;;  %v3366_v28 = vld [vmem:[%s3362_s4 + $0x4] sm:$0x1] }
  0x33   : > { %v2873_v26 = vld [vmem:[#allocation2 + $0x14] ss:$8 sps:$4 sm:$0xff]   ;;  %v200_v27 = vld [vmem:[%s3362_s4] sm:$0xf]  ;;  %v2875_v30 = vld [vmem:[#allocation2 + $0x90] ss:$8 sps:$4 sm:$0xff]  }
  0x34   : > { %333 = vmatpush1.bf16.msra.mxu0 %v2851_v11  ;;  %454 = vmatpush1.bf16.msra.mxu1 %v2852_v12  ;;  %v2544_v29 = vcombine.low %v200_v27, %v3366_v28  ;;  %v2876_v31 = vld [vmem:[#allocation2 + $0x10] ss:$8 sps:$4 sm:$0xff]   ;;  %v2877_v32 = vld [vmem:[#allocation2 + $0x84] ss:$8 sps:$4 sm:$0xff]   ;;  %v2881_v35 = vld [vmem:[#allocation2 + $0x80] ss:$8 sps:$4 sm:$0xff]  }
  0x35   : > { %334 = vmatprep.subr.bf16.mxu0 %v2853_v13  ;;  %455 = vmatprep.subr.bf16.mxu1 %v2855_v14  ;;  %v2879_v34 = vld [vmem:[#allocation2 + $0x4] ss:$8 sps:$4 sm:$0xff]   ;;  %v2882_v38 = vld [vmem:[#allocation2] ss:$8 sps:$4 sm:$0xff]   ;;  %v2886_v39 = vld [vmem:[#allocation2 + $0x174] ss:$8 sps:$4 sm:$0xff]  }
  0x36   : > { %v243_v33 = vshll.u32 %v2544_v29, 16  ;;  %v241_v36 = vshrl.u32 %v2544_v29, 16  ;;  %v2889_v40 = vld [vmem:[#allocation2 + $0x1f4] ss:$8 sps:$4 sm:$0xff]   ;;  %v2884_v42 = vld [vmem:[#allocation2 + $0x170] ss:$8 sps:$4 sm:$0xff]  }
  0x37   : > { %v2887_v43 = vld [vmem:[#allocation2 + $0x1f0] ss:$8 sps:$4 sm:$0xff]   ;;  %v2892_v44 = vld [vmem:[#allocation2 + $0x164] ss:$8 sps:$4 sm:$0xff]   ;;  %v2890_v46 = vld [vmem:[#allocation2 + $0x160] ss:$8 sps:$4 sm:$0xff]  }
  0x38   : > { %335 = vmatpush1.bf16.msra.mxu0 %v2857_v15  ;;  %456 = vmatpush1.bf16.msra.mxu1 %v2858_v16  ;;  %v245_v37 = vrot.slane %v243_v33, 1  ;;  %v2895_v45 = vld [vmem:[#allocation2 + $0x1e4] ss:$8 sps:$4 sm:$0xff]   ;;  %v2893_v47 = vld [vmem:[#allocation2 + $0x1e0] ss:$8 sps:$4 sm:$0xff]  }
  0x39   : > { %336 = vmatprep.subr.bf16.mxu0 %v2859_v17  ;;  %457 = vmatprep.subr.bf16.mxu1 %v2861_v18  ;;  %v2898_v48 = vld [vmem:[#allocation2 + $0x154] ss:$8 sps:$4 sm:$0xff]   ;;  %v2896_v50 = vld [vmem:[#allocation2 + $0x150] ss:$8 sps:$4 sm:$0xff]   ;;  %v2904_v52 = vld [vmem:[#allocation2 + $0x144] ss:$8 sps:$4 sm:$0xff]  }
  0x3a   : > { %v246_v41 = vor.u32 %v245_v37, %v241_v36  ;;  %v2901_v49 = vld [vmem:[#allocation2 + $0x1d4] ss:$8 sps:$4 sm:$0xff]   ;;  %v2899_v51 = vld [vmem:[#allocation2 + $0x1d0] ss:$8 sps:$4 sm:$0xff]   ;;  %v2907_v53 = vld [vmem:[#allocation2 + $0x1c4] ss:$8 sps:$4 sm:$0xff]  }
  0x3b   : > { %v2902_v54 = vld [vmem:[#allocation2 + $0x140] ss:$8 sps:$4 sm:$0xff]   ;;  %v2910_v56 = vld [vmem:[#allocation2 + $0x134] ss:$8 sps:$4 sm:$0xff]   ;;  %v2908_v58 = vld [vmem:[#allocation2 + $0x130] ss:$8 sps:$4 sm:$0xff]  }
  0x3c   : > { %337 = vmatpush1.bf16.msra.mxu0 %v2863_v19  ;;  %458 = vmatpush1.bf16.msra.mxu1 %v2864_v20  ;;  %v2905_v55 = vld [vmem:[#allocation2 + $0x1c0] ss:$8 sps:$4 sm:$0xff]   ;;  %v2913_v57 = vld [vmem:[#allocation2 + $0x1b4] ss:$8 sps:$4 sm:$0xff]   ;;  %v2911_v59 = vld [vmem:[#allocation2 + $0x1b0] ss:$8 sps:$4 sm:$0xff]  }
  0x3d   : > { %338 = vmatprep.subr.bf16.mxu0 %v2865_v21  ;;  %459 = vmatprep.subr.bf16.mxu1 %v2867_v22  ;;  %v490_v60 = vld [vmem:[%s3362_s4] sm:$0xe]  ;;  %v3373_v61 = vld [vmem:[%s3362_s4 + $0x4] sm:$0x3]  ;;  %v2922_v4 = vld [vmem:[#allocation2 + $0x114] ss:$8 sps:$4 sm:$0xff]  }
  0x3e   : > { %v2916_v62 = vld [vmem:[#allocation2 + $0x124] ss:$8 sps:$4 sm:$0xff]   ;;  %v2594_v1 = vcombine.low %v490_v60, %v3373_v61  ;;  %v2914_v2 = vld [vmem:[#allocation2 + $0x120] ss:$8 sps:$4 sm:$0xff]   ;;  %v2925_v5 = vld [vmem:[#allocation2 + $0x194] ss:$8 sps:$4 sm:$0xff]   ;;  %v2577_v12 = vcombine.low %v490_v60, %v3366_v28 }
  0x3f   : > { %v2919_v63 = vld [vmem:[#allocation2 + $0x1a4] ss:$8 sps:$4 sm:$0xff]   ;;  %v2917_v3 = vld [vmem:[#allocation2 + $0x1a0] ss:$8 sps:$4 sm:$0xff]   ;;  %v2920_v8 = vld [vmem:[#allocation2 + $0x110] ss:$8 sps:$4 sm:$0xff]  }
  0x40   : > { %339 = vmatpush1.bf16.msra.mxu0 %v2869_v23  ;;  %460 = vmatpush1.bf16.msra.mxu1 %v2870_v24  ;;  %v658_v6 = vshrl.u32 %v2594_v1, 16  ;;  %v661_v7 = vshll.u32 %v2594_v1, 16  ;;  %v2923_v9 = vld [vmem:[#allocation2 + $0x190] ss:$8 sps:$4 sm:$0xff]   ;;  %v2928_v10 = vld [vmem:[#allocation2 + $0x104] ss:$8 sps:$4 sm:$0xff]  }
  0x41   : > { %340 = vmatprep.subr.bf16.mxu0 %v2871_v25  ;;  %461 = vmatprep.subr.bf16.mxu1 %v2873_v26  ;;  %v2931_v11 = vld [vmem:[#allocation2 + $0x184] ss:$8 sps:$4 sm:$0xff]   ;;  %v2926_v15 = vld [vmem:[#allocation2 + $0x100] ss:$8 sps:$4 sm:$0xff]   ;;  %v2936_v17 = vld [vmem:[#allocation2 + $0x274] ss:$8 sps:$4 sm:$0xff]  }
  0x42   : > { %v660_v13 = vrot.slane %v658_v6, 1  ;;  %v663_v14 = vrot.slane %v661_v7, 2  ;;  %v2929_v16 = vld [vmem:[#allocation2 + $0x180] ss:$8 sps:$4 sm:$0xff]   ;;  %v2939_v18 = vld [vmem:[#allocation2 + $0x2f4] ss:$8 sps:$4 sm:$0xff]  }
  0x43   : > { %v511_v19 = vrot.slane %v2577_v12, 1  ;;  %v2934_v21 = vld [vmem:[#allocation2 + $0x270] ss:$8 sps:$4 sm:$0xff]   ;;  %v2942_v23 = vld [vmem:[#allocation2 + $0x264] ss:$8 sps:$4 sm:$0xff]  }
  0x44   : > { %341 = vmatpush1.bf16.msra.mxu0 %v2875_v30  ;;  %462 = vmatpush1.bf16.msra.mxu1 %v2876_v31  ;;  %v664_v20 = vor.u32 %v663_v14, %v660_v13  ;;  %v2937_v22 = vld [vmem:[#allocation2 + $0x2f0] ss:$8 sps:$4 sm:$0xff]   ;;  %v2945_v24 = vld [vmem:[#allocation2 + $0x2e4] ss:$8 sps:$4 sm:$0xff]   ;;  %v2940_v25 = vld [vmem:[#allocation2 + $0x260] ss:$8 sps:$4 sm:$0xff]  }
  0x45   : > { %342 = vmatprep.subr.bf16.mxu0 %v2877_v32  ;;  %463 = vmatprep.subr.bf16.mxu1 %v2879_v34  ;;  %v2943_v26 = vld [vmem:[#allocation2 + $0x2e0] ss:$8 sps:$4 sm:$0xff]   ;;  %v2951_v28 = vld [vmem:[#allocation2 + $0x2d4] ss:$8 sps:$4 sm:$0xff]   ;;  %v2946_v29 = vld [vmem:[#allocation2 + $0x250] ss:$8 sps:$4 sm:$0xff]  }
  0x46   : > { %v2949_v30 = vld [vmem:[#allocation2 + $0x2d0] ss:$8 sps:$4 sm:$0xff]   ;;  %v2954_v31 = vld [vmem:[#allocation2 + $0x244] ss:$8 sps:$4 sm:$0xff]   ;;  %v2952_v33 = vld [vmem:[#allocation2 + $0x240] ss:$8 sps:$4 sm:$0xff]  }
  0x47   : > { %v2957_v32 = vld [vmem:[#allocation2 + $0x2c4] ss:$8 sps:$4 sm:$0xff]   ;;  %v2955_v34 = vld [vmem:[#allocation2 + $0x2c0] ss:$8 sps:$4 sm:$0xff]   ;;  %v2963_v36 = vld [vmem:[#allocation2 + $0x2b4] ss:$8 sps:$4 sm:$0xff]  }
  0x48   : > { %343 = vmatpush1.bf16.msra.mxu0 %v2881_v35  ;;  %464 = vmatpush1.bf16.msra.mxu1 %v2882_v38  ;;  %v2960_v35 = vld [vmem:[#allocation2 + $0x234] ss:$8 sps:$4 sm:$0xff]   ;;  %v2958_v37 = vld [vmem:[#allocation2 + $0x230] ss:$8 sps:$4 sm:$0xff]   ;;  %v3002_v12 = vld [vmem:[#allocation2 + $0x340] ss:$8 sps:$4 sm:$0xff]  }
  0x49   : > { %593 = vmatprep.subr.bf16.mxu0 %v2886_v39  ;;  %746 = vmatprep.subr.bf16.mxu1 %v2889_v40  ;;  %v2961_v38 = vld [vmem:[#allocation2 + $0x2b0] ss:$8 sps:$4 sm:$0xff]   ;;  %v789_v39 = vld [vmem:[%s3362_s4] sm:$0xc]  ;;  %v3381_v40 = vld [vmem:[%s3362_s4 + $0x4] sm:$0x7] }
  0x4a   : > { %v2989_v60 = vld [vmem:[#allocation2 + $0x3f4] ss:$8 sps:$4 sm:$0xff]   ;;  %v3005_v13 = vld [vmem:[#allocation2 + $0x3c0] ss:$8 sps:$4 sm:$0xff]  }
  0x4b   : > { %361 = vmatmul.mubr.bf16.vlgmr.msra.gmra.mxu0 %v246_v41  ;;  %482 = vmatmul.mubr.bf16.vlgmr.msra.gmra.mxu1 %v200_v27  ;;  %v2948_v27 = vld [vmem:[#allocation2 + $0x254] ss:$8 sps:$4 sm:$0xff]   ;;  %v2966_v41 = vld [vmem:[#allocation2 + $0x224] ss:$8 sps:$4 sm:$0xff]  }
  0x4c   : > { %594 = vmatpush1.bf16.msra.mxu0 %v2884_v42  ;;  %747 = vmatpush1.bf16.msra.mxu1 %v2887_v43  ;;  %v2969_v42 = vld [vmem:[#allocation2 + $0x2a4] ss:$8 sps:$4 sm:$0xff]   ;;  %v2964_v43 = vld [vmem:[#allocation2 + $0x220] ss:$8 sps:$4 sm:$0xff]   ;;  %v2998_v6 = vld [vmem:[#allocation2 + $0x354] ss:$8 sps:$4 sm:$0xff]  }
  0x4d   : > { %595 = vmatprep.subr.bf16.mxu0 %v2892_v44  ;;  %748 = vmatprep.subr.bf16.mxu1 %v2895_v45  ;;  %v2628_v44 = vcombine.low %v789_v39, %v3381_v40  ;;  %v2967_v45 = vld [vmem:[#allocation2 + $0x2a0] ss:$8 sps:$4 sm:$0xff]   ;;  %v3001_v7 = vld [vmem:[#allocation2 + $0x3d4] ss:$8 sps:$4 sm:$0xff]  }
  0x4e   : > { %625 = vmatprep.mubr.bf16.mxu0 %v3280_v0  ;;  %778 = vmatprep.mubr.bf16.mxu1 %v3280_v0  ;;  %v3010_v14 = vld [vmem:[#allocation2 + $0x334] ss:$8 sps:$4 sm:$0xff]  }
  0x50   : > { %596 = vmatpush1.bf16.msra.mxu0 %v2890_v46  ;;  %749 = vmatpush1.bf16.msra.mxu1 %v2893_v47  ;;  %v2972_v46 = vld [vmem:[#allocation2 + $0x214] ss:$8 sps:$4 sm:$0xff]  }
  0x51   : > { %597 = vmatprep.subr.bf16.mxu0 %v2898_v48  ;;  %750 = vmatprep.subr.bf16.mxu1 %v2901_v49  ;;  %v2975_v47 = vld [vmem:[#allocation2 + $0x294] ss:$8 sps:$4 sm:$0xff]   ;;  %v957_v48 = vshrl.u32 %v2628_v44, 16  ;;  %v960_v49 = vshll.u32 %v2628_v44, 16  ;;  %v3037_v44 = vld [vmem:[#allocation2 + $0x4f0] ss:$8 sps:$4 sm:$0xff]  }
  0x54   : > { %598 = vmatpush1.bf16.msra.mxu0 %v2896_v50  ;;  %751 = vmatpush1.bf16.msra.mxu1 %v2899_v51  ;;  %v2970_v50 = vld [vmem:[#allocation2 + $0x210] ss:$8 sps:$4 sm:$0xff]  }
  0x55   : > { %599 = vmatprep.subr.bf16.mxu0 %v2904_v52  ;;  %752 = vmatprep.subr.bf16.mxu1 %v2907_v53  ;;  %v2973_v51 = vld [vmem:[#allocation2 + $0x290] ss:$8 sps:$4 sm:$0xff]   ;;  %v2978_v52 = vld [vmem:[#allocation2 + $0x204] ss:$8 sps:$4 sm:$0xff]  }
  0x56   : > { %v2981_v53 = vld [vmem:[#allocation2 + $0x284] ss:$8 sps:$4 sm:$0xff]  }
  0x58   : > { %600 = vmatpush1.bf16.msra.mxu0 %v2902_v54  ;;  %753 = vmatpush1.bf16.msra.mxu1 %v2905_v55  ;;  %v2976_v54 = vld [vmem:[#allocation2 + $0x200] ss:$8 sps:$4 sm:$0xff]   ;;  %v2611_v55 = vcombine.low %v789_v39, %v3373_v61  ;;  %v3039_v39 = vld [vmem:[#allocation2 + $0x4f4] ss:$8 sps:$4 sm:$0xff]  }
  0x59   : > { %601 = vmatprep.subr.bf16.mxu0 %v2910_v56  ;;  %754 = vmatprep.subr.bf16.mxu1 %v2913_v57  ;;  %v959_v56 = vrot.slane %v957_v48, 2  ;;  %v962_v57 = vrot.slane %v960_v49, 3  ;;  %v2990_v61 = vld [vmem:[#allocation2 + $0x360] ss:$8 sps:$4 sm:$0xff]   ;;  %v3048_v48 = vld [vmem:[#allocation2 + $0x454] ss:$8 sps:$4 sm:$0xff]  }
  0x5a   : > { %v3051_v49 = vld [vmem:[#allocation2 + $0x4d4] ss:$8 sps:$4 sm:$0xff]  }
  0x5b   : > { %v963_v1 = vor.u32 %v962_v57, %v959_v56  ;;  %v3060_v56 = vld [vmem:[#allocation2 + $0x434] ss:$8 sps:$4 sm:$0xff]  }
  0x5c   : > { %602 = vmatpush1.bf16.msra.mxu0 %v2908_v58  ;;  %755 = vmatpush1.bf16.msra.mxu1 %v2911_v59  ;;  %v2979_v58 = vld [vmem:[#allocation2 + $0x280] ss:$8 sps:$4 sm:$0xff]   ;;  %v2986_v59 = vld [vmem:[#allocation2 + $0x374] ss:$8 sps:$4 sm:$0xff]  }
  0x5d   : > { %603 = vmatprep.subr.bf16.mxu0 %v2916_v62  ;;  %756 = vmatprep.subr.bf16.mxu1 %v2919_v63  ;;  %v810_v62 = vrot.slane %v2611_v55, 2  ;;  %v2984_v63 = vld [vmem:[#allocation2 + $0x370] ss:$8 sps:$4 sm:$0xff]   ;;  %v3055_v55 = vld [vmem:[#allocation2 + $0x4c0] ss:$8 sps:$4 sm:$0xff]  }
  0x5e   : > { %v3063_v57 = vld [vmem:[#allocation2 + $0x4b4] ss:$8 sps:$4 sm:$0xff]  }
  0x60   : > { %604 = vmatpush1.bf16.msra.mxu0 %v2914_v2  ;;  %757 = vmatpush1.bf16.msra.mxu1 %v2917_v3  ;;  %v2987_v2 = vld [vmem:[#allocation2 + $0x3f0] ss:$8 sps:$4 sm:$0xff]   ;;  %v2992_v3 = vld [vmem:[#allocation2 + $0x364] ss:$8 sps:$4 sm:$0xff]  }
  0x61   : > { %605 = vmatprep.subr.bf16.mxu0 %v2922_v4  ;;  %758 = vmatprep.subr.bf16.mxu1 %v2925_v5  ;;  %v2995_v4 = vld [vmem:[#allocation2 + $0x3e4] ss:$8 sps:$4 sm:$0xff]   ;;  %v2993_v5 = vld [vmem:[#allocation2 + $0x3e0] ss:$8 sps:$4 sm:$0xff]  }
  0x64   : > { %606 = vmatpush1.bf16.msra.mxu0 %v2920_v8  ;;  %759 = vmatpush1.bf16.msra.mxu1 %v2923_v9  ;;  %v2996_v8 = vld [vmem:[#allocation2 + $0x350] ss:$8 sps:$4 sm:$0xff]  }
  0x65   : > { %607 = vmatprep.subr.bf16.mxu0 %v2928_v10  ;;  %760 = vmatprep.subr.bf16.mxu1 %v2931_v11  ;;  %v2999_v9 = vld [vmem:[#allocation2 + $0x3d0] ss:$8 sps:$4 sm:$0xff]   ;;  %v3004_v10 = vld [vmem:[#allocation2 + $0x344] ss:$8 sps:$4 sm:$0xff]  }
  0x66   : > { %v3007_v11 = vld [vmem:[#allocation2 + $0x3c4] ss:$8 sps:$4 sm:$0xff]  }
  0x68   : > { %608 = vmatpush1.bf16.msra.mxu0 %v2926_v15  ;;  %761 = vmatpush1.bf16.msra.mxu1 %v2929_v16  ;;  %v3013_v15 = vld [vmem:[#allocation2 + $0x3b4] ss:$8 sps:$4 sm:$0xff]   ;;  %v3008_v16 = vld [vmem:[#allocation2 + $0x330] ss:$8 sps:$4 sm:$0xff]  }
  0x69   : > { %892 = vmatprep.subr.bf16.mxu0 %v2936_v17  ;;  %1045 = vmatprep.subr.bf16.mxu1 %v2939_v18  ;;  %v3011_v17 = vld [vmem:[#allocation2 + $0x3b0] ss:$8 sps:$4 sm:$0xff]   ;;  %v1088_v18 = vld [vmem:[%s3362_s4] sm:$0x8] }
  0x6b   : > { %626 = vmatmul.mubr.bf16.vlgmr.msra.gmra.mxu0 %v511_v19  ;;  %779 = vmatmul.mubr.bf16.vlgmr.msra.gmra.mxu1 %v664_v20  ;;  %v3389_v19 = vld [vmem:[%s3362_s4 + $0x4] sm:$0xf] }
  0x6c   : > { %893 = vmatpush1.bf16.msra.mxu0 %v2934_v21  ;;  %1046 = vmatpush1.bf16.msra.mxu1 %v2937_v22  ;;  %v3016_v20 = vld [vmem:[#allocation2 + $0x324] ss:$8 sps:$4 sm:$0xff]   ;;  %v2662_v22 = vcombine.low %v1088_v18, %v3389_v19 }
  0x6d   : > { %894 = vmatprep.subr.bf16.mxu0 %v2942_v23  ;;  %1047 = vmatprep.subr.bf16.mxu1 %v2945_v24  ;;  %v3019_v21 = vld [vmem:[#allocation2 + $0x3a4] ss:$8 sps:$4 sm:$0xff]   ;;  %v3014_v23 = vld [vmem:[#allocation2 + $0x320] ss:$8 sps:$4 sm:$0xff]  }
  0x6e   : > { %924 = vmatprep.mubr.bf16.mxu0 %v3280_v0  ;;  %1077 = vmatprep.mubr.bf16.mxu1 %v3280_v0  ;;  %v3017_v24 = vld [vmem:[#allocation2 + $0x3a0] ss:$8 sps:$4 sm:$0xff]  }
  0x70   : > { %895 = vmatpush1.bf16.msra.mxu0 %v2940_v25  ;;  %1048 = vmatpush1.bf16.msra.mxu1 %v2943_v26  ;;  %v3022_v25 = vld [vmem:[#allocation2 + $0x314] ss:$8 sps:$4 sm:$0xff]  }
  0x71   : > { %896 = vmatprep.subr.bf16.mxu0 %v2948_v27  ;;  %1049 = vmatprep.subr.bf16.mxu1 %v2951_v28  ;;  %v3025_v26 = vld [vmem:[#allocation2 + $0x394] ss:$8 sps:$4 sm:$0xff]   ;;  %v1256_v27 = vshrl.u32 %v2662_v22, 16  ;;  %v1259_v28 = vshll.u32 %v2662_v22, 16  ;;  %v3094_v22 = vld [vmem:[#allocation2 + $0x5e4] ss:$8 sps:$4 sm:$0xff]  }
  0x74   : > { %897 = vmatpush1.bf16.msra.mxu0 %v2946_v29  ;;  %1050 = vmatpush1.bf16.msra.mxu1 %v2949_v30  ;;  %v3020_v29 = vld [vmem:[#allocation2 + $0x310] ss:$8 sps:$4 sm:$0xff]  }
  0x75   : > { %898 = vmatprep.subr.bf16.mxu0 %v2954_v31  ;;  %1051 = vmatprep.subr.bf16.mxu1 %v2957_v32  ;;  %v3023_v30 = vld [vmem:[#allocation2 + $0x390] ss:$8 sps:$4 sm:$0xff]   ;;  %v3028_v31 = vld [vmem:[#allocation2 + $0x304] ss:$8 sps:$4 sm:$0xff]  }
  0x76   : > { %v3031_v32 = vld [vmem:[#allocation2 + $0x384] ss:$8 sps:$4 sm:$0xff]  }
  0x78   : > { %899 = vmatpush1.bf16.msra.mxu0 %v2952_v33  ;;  %1052 = vmatpush1.bf16.msra.mxu1 %v2955_v34  ;;  %v2645_v33 = vcombine.low %v1088_v18, %v3381_v40  ;;  %v1258_v34 = vrot.slane %v1256_v27, 3  ;;  %v3045_v40 = vld [vmem:[#allocation2 + $0x4e4] ss:$8 sps:$4 sm:$0xff]   ;;  %v3095_v27 = vld [vmem:[#allocation2 + $0x550] ss:$8 sps:$4 sm:$0xff]  }
  0x79   : > { %900 = vmatprep.subr.bf16.mxu0 %v2960_v35  ;;  %1053 = vmatprep.subr.bf16.mxu1 %v2963_v36  ;;  %v1261_v35 = vrot.slane %v1259_v28, 4  ;;  %v3026_v36 = vld [vmem:[#allocation2 + $0x300] ss:$8 sps:$4 sm:$0xff]   ;;  %v3098_v28 = vld [vmem:[#allocation2 + $0x5d0] ss:$8 sps:$4 sm:$0xff]  }
  0x7c   : > { %901 = vmatpush1.bf16.msra.mxu0 %v2958_v37  ;;  %1054 = vmatpush1.bf16.msra.mxu1 %v2961_v38  ;;  %v3029_v37 = vld [vmem:[#allocation2 + $0x380] ss:$8 sps:$4 sm:$0xff]   ;;  %v3036_v38 = vld [vmem:[#allocation2 + $0x474] ss:$8 sps:$4 sm:$0xff]  }
  0x7d   : > { %902 = vmatprep.subr.bf16.mxu0 %v2966_v41  ;;  %1055 = vmatprep.subr.bf16.mxu1 %v2969_v42  ;;  %v1109_v41 = vrot.slane %v2645_v33, 3  ;;  %v1262_v42 = vor.u32 %v1261_v35, %v1258_v34  ;;  %v3112_v33 = vld [vmem:[#allocation2 + $0x5b4] ss:$8 sps:$4 sm:$0xff]   ;;  %v3107_v34 = vld [vmem:[#allocation2 + $0x530] ss:$8 sps:$4 sm:$0xff]  }
  0x7e   : > { %v3110_v35 = vld [vmem:[#allocation2 + $0x5b0] ss:$8 sps:$4 sm:$0xff]  }
  0x80   : > { %903 = vmatpush1.bf16.msra.mxu0 %v2964_v43  ;;  %1056 = vmatpush1.bf16.msra.mxu1 %v2967_v45  ;;  %v3034_v43 = vld [vmem:[#allocation2 + $0x470] ss:$8 sps:$4 sm:$0xff]   ;;  %v3042_v45 = vld [vmem:[#allocation2 + $0x464] ss:$8 sps:$4 sm:$0xff]  }
  0x81   : > { %904 = vmatprep.subr.bf16.mxu0 %v2972_v46  ;;  %1057 = vmatprep.subr.bf16.mxu1 %v2975_v47  ;;  %v3040_v46 = vld [vmem:[#allocation2 + $0x460] ss:$8 sps:$4 sm:$0xff]  }
  0x82   : > { %v3043_v47 = vld [vmem:[#allocation2 + $0x4e0] ss:$8 sps:$4 sm:$0xff]  }
  0x84   : > { %905 = vmatpush1.bf16.msra.mxu0 %v2970_v50  ;;  %1058 = vmatpush1.bf16.msra.mxu1 %v2973_v51  ;;  %v3046_v50 = vld [vmem:[#allocation2 + $0x450] ss:$8 sps:$4 sm:$0xff]  }
  0x85   : > { %906 = vmatprep.subr.bf16.mxu0 %v2978_v52  ;;  %1059 = vmatprep.subr.bf16.mxu1 %v2981_v53  ;;  %v3049_v51 = vld [vmem:[#allocation2 + $0x4d0] ss:$8 sps:$4 sm:$0xff]   ;;  %v3054_v52 = vld [vmem:[#allocation2 + $0x444] ss:$8 sps:$4 sm:$0xff]  }
  0x86   : > { %v3057_v53 = vld [vmem:[#allocation2 + $0x4c4] ss:$8 sps:$4 sm:$0xff]  }
  0x88   : > { %907 = vmatpush1.bf16.msra.mxu0 %v2976_v54  ;;  %1060 = vmatpush1.bf16.msra.mxu1 %v2979_v58  ;;  %v3052_v54 = vld [vmem:[#allocation2 + $0x440] ss:$8 sps:$4 sm:$0xff]   ;;  %v3058_v58 = vld [vmem:[#allocation2 + $0x430] ss:$8 sps:$4 sm:$0xff]  }
  0x89   : > { %1191 = vmatprep.subr.bf16.mxu0 %v2986_v59  ;;  %1344 = vmatprep.subr.bf16.mxu1 %v2989_v60  ;;  %v3061_v59 = vld [vmem:[#allocation2 + $0x4b0] ss:$8 sps:$4 sm:$0xff]   ;;  %v1527_v60 = vld [vmem:[%s3362_s4 + $0x4] sm:$0xf] }
  0x8b   : > { %925 = vmatmul.mubr.bf16.vlgmr.msra.gmra.mxu0 %v810_v62  ;;  %1078 = vmatmul.mubr.bf16.vlgmr.msra.gmra.mxu1 %v963_v1  ;;  %v3397_v62 = vld [vmem:[%s3362_s4 + $0x8] sm:$0x1]  ;;  %v3069_v1 = vld [vmem:[#allocation2 + $0x4a4] ss:$8 sps:$4 sm:$0xff]  }
  0x8c   : > { %1192 = vmatpush1.bf16.msra.mxu0 %v2984_v63  ;;  %1345 = vmatpush1.bf16.msra.mxu1 %v2987_v2  ;;  %v3066_v63 = vld [vmem:[#allocation2 + $0x424] ss:$8 sps:$4 sm:$0xff]   ;;  %v3064_v2 = vld [vmem:[#allocation2 + $0x420] ss:$8 sps:$4 sm:$0xff]  }
  0x8d   : > { %1193 = vmatprep.subr.bf16.mxu0 %v2992_v3  ;;  %1346 = vmatprep.subr.bf16.mxu1 %v2995_v4  ;;  %v2695_v3 = vcombine.low %v1527_v60, %v3397_v62  ;;  %v3067_v4 = vld [vmem:[#allocation2 + $0x4a0] ss:$8 sps:$4 sm:$0xff]   ;;  %v3133_v60 = vld [vmem:[#allocation2 + $0x670] ss:$8 sps:$4 sm:$0xff]  }
  0x8e   : > { %1223 = vmatprep.mubr.bf16.mxu0 %v3280_v0  ;;  %1376 = vmatprep.mubr.bf16.mxu1 %v3280_v0 }
  0x90   : > { %1194 = vmatpush1.bf16.msra.mxu0 %v2990_v61  ;;  %1347 = vmatpush1.bf16.msra.mxu1 %v2993_v5  ;;  %v3072_v61 = vld [vmem:[#allocation2 + $0x414] ss:$8 sps:$4 sm:$0xff]  }
  0x91   : > { %1195 = vmatprep.subr.bf16.mxu0 %v2998_v6  ;;  %1348 = vmatprep.subr.bf16.mxu1 %v3001_v7  ;;  %v3075_v5 = vld [vmem:[#allocation2 + $0x494] ss:$8 sps:$4 sm:$0xff]   ;;  %v3070_v6 = vld [vmem:[#allocation2 + $0x410] ss:$8 sps:$4 sm:$0xff]   ;;  %v1554_v7 = vshll.u32 %v2695_v3, 16 }
  0x94   : > { %1196 = vmatpush1.bf16.msra.mxu0 %v2996_v8  ;;  %1349 = vmatpush1.bf16.msra.mxu1 %v2999_v9  ;;  %v3073_v8 = vld [vmem:[#allocation2 + $0x490] ss:$8 sps:$4 sm:$0xff]   ;;  %v3078_v9 = vld [vmem:[#allocation2 + $0x404] ss:$8 sps:$4 sm:$0xff]  }
  0x95   : > { %1197 = vmatprep.subr.bf16.mxu0 %v3004_v10  ;;  %1350 = vmatprep.subr.bf16.mxu1 %v3007_v11  ;;  %v3081_v10 = vld [vmem:[#allocation2 + $0x484] ss:$8 sps:$4 sm:$0xff]   ;;  %v3076_v11 = vld [vmem:[#allocation2 + $0x400] ss:$8 sps:$4 sm:$0xff]  }
  0x98   : > { %1198 = vmatpush1.bf16.msra.mxu0 %v3002_v12  ;;  %1351 = vmatpush1.bf16.msra.mxu1 %v3005_v13  ;;  %v1552_v12 = vshrl.u32 %v2695_v3, 16  ;;  %v1556_v13 = vrot.slane %v1554_v7, 1  ;;  %v3142_v3 = vld [vmem:[#allocation2 + $0x6e0] ss:$8 sps:$4 sm:$0xff]   ;;  %v3153_v7 = vld [vmem:[#allocation2 + $0x644] ss:$8 sps:$4 sm:$0xff]  }
  0x99   : > { %1199 = vmatprep.subr.bf16.mxu0 %v3010_v14  ;;  %1352 = vmatprep.subr.bf16.mxu1 %v3013_v15  ;;  %v3079_v14 = vld [vmem:[#allocation2 + $0x480] ss:$8 sps:$4 sm:$0xff]   ;;  %v3084_v15 = vld [vmem:[#allocation2 + $0x574] ss:$8 sps:$4 sm:$0xff]  }
  0x9a   : > { %v1557_v18 = vor.u32 %v1556_v13, %v1552_v12  ;;  %v3162_v12 = vld [vmem:[#allocation2 + $0x6b4] ss:$8 sps:$4 sm:$0xff]   ;;  %v3157_v13 = vld [vmem:[#allocation2 + $0x630] ss:$8 sps:$4 sm:$0xff]  }
  0x9c   : > { %1200 = vmatpush1.bf16.msra.mxu0 %v3008_v16  ;;  %1353 = vmatpush1.bf16.msra.mxu1 %v3011_v17  ;;  %v3088_v16 = vld [vmem:[#allocation2 + $0x5f4] ss:$8 sps:$4 sm:$0xff]   ;;  %v3082_v17 = vld [vmem:[#allocation2 + $0x570] ss:$8 sps:$4 sm:$0xff]  }
  0x9d   : > { %1201 = vmatprep.subr.bf16.mxu0 %v3016_v20  ;;  %1354 = vmatprep.subr.bf16.mxu1 %v3019_v21  ;;  %v3086_v20 = vld [vmem:[#allocation2 + $0x5f0] ss:$8 sps:$4 sm:$0xff]   ;;  %v3091_v21 = vld [vmem:[#allocation2 + $0x564] ss:$8 sps:$4 sm:$0xff]  }
  0xa0   : > { %1202 = vmatpush1.bf16.msra.mxu0 %v3014_v23  ;;  %1355 = vmatpush1.bf16.msra.mxu1 %v3017_v24  ;;  %v3089_v23 = vld [vmem:[#allocation2 + $0x560] ss:$8 sps:$4 sm:$0xff]  }
  0xa1   : > { %1203 = vmatprep.subr.bf16.mxu0 %v3022_v25  ;;  %1356 = vmatprep.subr.bf16.mxu1 %v3025_v26  ;;  %v3092_v24 = vld [vmem:[#allocation2 + $0x5e0] ss:$8 sps:$4 sm:$0xff]   ;;  %v3097_v25 = vld [vmem:[#allocation2 + $0x554] ss:$8 sps:$4 sm:$0xff]  }
  0xa2   : > { %v3100_v26 = vld [vmem:[#allocation2 + $0x5d4] ss:$8 sps:$4 sm:$0xff]  }
  0xa4   : > { %1204 = vmatpush1.bf16.msra.mxu0 %v3020_v29  ;;  %1357 = vmatpush1.bf16.msra.mxu1 %v3023_v30  ;;  %v3106_v29 = vld [vmem:[#allocation2 + $0x5c4] ss:$8 sps:$4 sm:$0xff]   ;;  %v3101_v30 = vld [vmem:[#allocation2 + $0x540] ss:$8 sps:$4 sm:$0xff]  }
  0xa5   : > { %1205 = vmatprep.subr.bf16.mxu0 %v3028_v31  ;;  %1358 = vmatprep.subr.bf16.mxu1 %v3031_v32  ;;  %v3104_v31 = vld [vmem:[#allocation2 + $0x5c0] ss:$8 sps:$4 sm:$0xff]   ;;  %v3109_v32 = vld [vmem:[#allocation2 + $0x534] ss:$8 sps:$4 sm:$0xff]  }
  0xa8   : > { %1206 = vmatpush1.bf16.msra.mxu0 %v3026_v36  ;;  %1359 = vmatpush1.bf16.msra.mxu1 %v3029_v37  ;;  %v1682_v36 = vld [vmem:[%s3362_s4 + $0x4] sm:$0xe]  ;;  %v3405_v37 = vld [vmem:[%s3362_s4 + $0x8] sm:$0x3] }
  0xa9   : > { %1484 = vmatprep.subr.bf16.mxu0 %v3036_v38  ;;  %1639 = vmatprep.subr.bf16.mxu1 %v3039_v39  ;;  %v3115_v38 = vld [vmem:[#allocation2 + $0x524] ss:$8 sps:$4 sm:$0xff]  }
  0xaa   : > { %v3118_v39 = vld [vmem:[#allocation2 + $0x5a4] ss:$8 sps:$4 sm:$0xff]  }
  0xab   : > { %1224 = vmatmul.mubr.bf16.vlgmr.msra.gmra.mxu0 %v1109_v41  ;;  %1377 = vmatmul.mubr.bf16.vlgmr.msra.gmra.mxu1 %v1262_v42  ;;  %v2729_v41 = vcombine.low %v1682_v36, %v3405_v37  ;;  %v3113_v42 = vld [vmem:[#allocation2 + $0x520] ss:$8 sps:$4 sm:$0xff]  }
  0xac   : > { %1485 = vmatpush1.bf16.msra.mxu0 %v3034_v43  ;;  %1640 = vmatpush1.bf16.msra.mxu1 %v3037_v44  ;;  %v3116_v43 = vld [vmem:[#allocation2 + $0x5a0] ss:$8 sps:$4 sm:$0xff]   ;;  %v3121_v44 = vld [vmem:[#allocation2 + $0x514] ss:$8 sps:$4 sm:$0xff]  }
  0xad   : > { %1486 = vmatprep.subr.bf16.mxu0 %v3042_v45  ;;  %1641 = vmatprep.subr.bf16.mxu1 %v3045_v40  ;;  %v3124_v45 = vld [vmem:[#allocation2 + $0x594] ss:$8 sps:$4 sm:$0xff]   ;;  %v1850_v40 = vshrl.u32 %v2729_v41, 16 }
  0xae   : > { %1516 = vmatprep.mubr.bf16.mxu0 %v3280_v0  ;;  %1671 = vmatprep.mubr.bf16.mxu1 %v3280_v0 }
  0xb0   : > { %1487 = vmatpush1.bf16.msra.mxu0 %v3040_v46  ;;  %1642 = vmatpush1.bf16.msra.mxu1 %v3043_v47  ;;  %v1853_v46 = vshll.u32 %v2729_v41, 16  ;;  %v3119_v47 = vld [vmem:[#allocation2 + $0x510] ss:$8 sps:$4 sm:$0xff]   ;;  %v3188_v41 = vld [vmem:[#allocation2 + $0x764] ss:$8 sps:$4 sm:$0xff]  }
  0xb1   : > { %1488 = vmatprep.subr.bf16.mxu0 %v3048_v48  ;;  %1643 = vmatprep.subr.bf16.mxu1 %v3051_v49  ;;  %v3122_v48 = vld [vmem:[#allocation2 + $0x590] ss:$8 sps:$4 sm:$0xff]   ;;  %v3127_v49 = vld [vmem:[#allocation2 + $0x504] ss:$8 sps:$4 sm:$0xff]  }
  0xb4   : > { %1489 = vmatpush1.bf16.msra.mxu0 %v3046_v50  ;;  %1644 = vmatpush1.bf16.msra.mxu1 %v3049_v51  ;;  %v3130_v50 = vld [vmem:[#allocation2 + $0x584] ss:$8 sps:$4 sm:$0xff]   ;;  %v2712_v51 = vcombine.low %v1682_v36, %v3397_v62 }
  0xb5   : > { %1490 = vmatprep.subr.bf16.mxu0 %v3054_v52  ;;  %1645 = vmatprep.subr.bf16.mxu1 %v3057_v53  ;;  %v1852_v52 = vrot.slane %v1850_v40, 1  ;;  %v1855_v53 = vrot.slane %v1853_v46, 2  ;;  %v3144_v62 = vld [vmem:[#allocation2 + $0x6e4] ss:$8 sps:$4 sm:$0xff]   ;;  %v3191_v46 = vld [vmem:[#allocation2 + $0x754] ss:$8 sps:$4 sm:$0xff]  }
  0xb8   : > { %1491 = vmatpush1.bf16.msra.mxu0 %v3052_v54  ;;  %1646 = vmatpush1.bf16.msra.mxu1 %v3055_v55  ;;  %v3125_v54 = vld [vmem:[#allocation2 + $0x500] ss:$8 sps:$4 sm:$0xff]  }
  0xb9   : > { %1492 = vmatprep.subr.bf16.mxu0 %v3060_v56  ;;  %1647 = vmatprep.subr.bf16.mxu1 %v3063_v57  ;;  %v3128_v55 = vld [vmem:[#allocation2 + $0x580] ss:$8 sps:$4 sm:$0xff]   ;;  %v3135_v56 = vld [vmem:[#allocation2 + $0x674] ss:$8 sps:$4 sm:$0xff]  }
  0xba   : > { %v3138_v57 = vld [vmem:[#allocation2 + $0x6f4] ss:$8 sps:$4 sm:$0xff]  }
  0xbc   : > { %1493 = vmatpush1.bf16.msra.mxu0 %v3058_v58  ;;  %1648 = vmatpush1.bf16.msra.mxu1 %v3061_v59  ;;  %v1703_v58 = vrot.slane %v2712_v51, 1  ;;  %v1856_v59 = vor.u32 %v1855_v53, %v1852_v52  ;;  %v3194_v52 = vld [vmem:[#allocation2 + $0x744] ss:$8 sps:$4 sm:$0xff]  }
  0xbd   : > { %1494 = vmatprep.subr.bf16.mxu0 %v3066_v63  ;;  %1649 = vmatprep.subr.bf16.mxu1 %v3069_v1  ;;  %v3136_v63 = vld [vmem:[#allocation2 + $0x6f0] ss:$8 sps:$4 sm:$0xff]   ;;  %v3141_v1 = vld [vmem:[#allocation2 + $0x664] ss:$8 sps:$4 sm:$0xff]  }
  0xc0   : > { %1495 = vmatpush1.bf16.msra.mxu0 %v3064_v2  ;;  %1650 = vmatpush1.bf16.msra.mxu1 %v3067_v4  ;;  %v3139_v2 = vld [vmem:[#allocation2 + $0x660] ss:$8 sps:$4 sm:$0xff]   ;;  %v3147_v4 = vld [vmem:[#allocation2 + $0x654] ss:$8 sps:$4 sm:$0xff]  }
  0xc1   : > { %1496 = vmatprep.subr.bf16.mxu0 %v3072_v61  ;;  %1651 = vmatprep.subr.bf16.mxu1 %v3075_v5  ;;  %v3150_v61 = vld [vmem:[#allocation2 + $0x6d4] ss:$8 sps:$4 sm:$0xff]   ;;  %v3145_v5 = vld [vmem:[#allocation2 + $0x650] ss:$8 sps:$4 sm:$0xff]  }
  0xc4   : > { %1497 = vmatpush1.bf16.msra.mxu0 %v3070_v6  ;;  %1652 = vmatpush1.bf16.msra.mxu1 %v3073_v8  ;;  %v3148_v6 = vld [vmem:[#allocation2 + $0x6d0] ss:$8 sps:$4 sm:$0xff]   ;;  %v3156_v8 = vld [vmem:[#allocation2 + $0x6c4] ss:$8 sps:$4 sm:$0xff]  }
  0xc5   : > { %1498 = vmatprep.subr.bf16.mxu0 %v3078_v9  ;;  %1653 = vmatprep.subr.bf16.mxu1 %v3081_v10  ;;  %v3151_v9 = vld [vmem:[#allocation2 + $0x640] ss:$8 sps:$4 sm:$0xff]  }
  0xc6   : > { %v3154_v10 = vld [vmem:[#allocation2 + $0x6c0] ss:$8 sps:$4 sm:$0xff]  }
  0xc8   : > { %1499 = vmatpush1.bf16.msra.mxu0 %v3076_v11  ;;  %1654 = vmatpush1.bf16.msra.mxu1 %v3079_v14  ;;  %v3159_v11 = vld [vmem:[#allocation2 + $0x634] ss:$8 sps:$4 sm:$0xff]   ;;  %v3160_v14 = vld [vmem:[#allocation2 + $0x6b0] ss:$8 sps:$4 sm:$0xff]  }
  0xc9   : > { %1785 = vmatprep.subr.bf16.mxu0 %v3084_v15  ;;  %1938 = vmatprep.subr.bf16.mxu1 %v3088_v16  ;;  %v1981_v15 = vld [vmem:[%s3362_s4 + $0x4] sm:$0xc]  ;;  %v3413_v16 = vld [vmem:[%s3362_s4 + $0x8] sm:$0x7] }
  0xcb   : > { %1517 = vmatmul.mubr.bf16.vlgmr.msra.gmra.mxu0 %v3389_v19  ;;  %1672 = vmatmul.mubr.bf16.vlgmr.msra.gmra.mxu1 %v1557_v18  ;;  %v3103_v19 = vld [vmem:[#allocation2 + $0x544] ss:$8 sps:$4 sm:$0xff]  }
  0xcc   : > { %1786 = vmatpush1.bf16.msra.mxu0 %v3082_v17  ;;  %1939 = vmatpush1.bf16.msra.mxu1 %v3086_v20  ;;  %v3165_v17 = vld [vmem:[#allocation2 + $0x624] ss:$8 sps:$4 sm:$0xff]   ;;  %v2763_v20 = vcombine.low %v1981_v15, %v3413_v16 }
  0xcd   : > { %1787 = vmatprep.subr.bf16.mxu0 %v3091_v21  ;;  %1940 = vmatprep.subr.bf16.mxu1 %v3094_v22  ;;  %v3168_v18 = vld [vmem:[#allocation2 + $0x6a4] ss:$8 sps:$4 sm:$0xff]   ;;  %v3163_v21 = vld [vmem:[#allocation2 + $0x620] ss:$8 sps:$4 sm:$0xff]  }
  0xce   : > { %1817 = vmatprep.mubr.bf16.mxu0 %v3280_v0  ;;  %1970 = vmatprep.mubr.bf16.mxu1 %v3280_v0  ;;  %v3166_v22 = vld [vmem:[#allocation2 + $0x6a0] ss:$8 sps:$4 sm:$0xff]  }
  0xd0   : > { %1788 = vmatpush1.bf16.msra.mxu0 %v3089_v23  ;;  %1941 = vmatpush1.bf16.msra.mxu1 %v3092_v24  ;;  %v3171_v23 = vld [vmem:[#allocation2 + $0x614] ss:$8 sps:$4 sm:$0xff]  }
  0xd1   : > { %1789 = vmatprep.subr.bf16.mxu0 %v3097_v25  ;;  %1942 = vmatprep.subr.bf16.mxu1 %v3100_v26  ;;  %v3174_v24 = vld [vmem:[#allocation2 + $0x694] ss:$8 sps:$4 sm:$0xff]   ;;  %v2149_v25 = vshrl.u32 %v2763_v20, 16  ;;  %v2152_v26 = vshll.u32 %v2763_v20, 16 }
  0xd4   : > { %1790 = vmatpush1.bf16.msra.mxu0 %v3095_v27  ;;  %1943 = vmatpush1.bf16.msra.mxu1 %v3098_v28  ;;  %v3169_v27 = vld [vmem:[#allocation2 + $0x610] ss:$8 sps:$4 sm:$0xff]  }
  0xd5   : > { %1791 = vmatprep.subr.bf16.mxu0 %v3103_v19  ;;  %1944 = vmatprep.subr.bf16.mxu1 %v3106_v29  ;;  %v3172_v28 = vld [vmem:[#allocation2 + $0x690] ss:$8 sps:$4 sm:$0xff]   ;;  %v3177_v19 = vld [vmem:[#allocation2 + $0x604] ss:$8 sps:$4 sm:$0xff]  }
  0xd6   : > { %v3180_v29 = vld [vmem:[#allocation2 + $0x684] ss:$8 sps:$4 sm:$0xff]  }
  0xd8   : > { %1792 = vmatpush1.bf16.msra.mxu0 %v3101_v30  ;;  %1945 = vmatpush1.bf16.msra.mxu1 %v3104_v31  ;;  %v2746_v30 = vcombine.low %v1981_v15, %v3405_v37  ;;  %v2151_v31 = vrot.slane %v2149_v25, 2 }
  0xd9   : > { %1793 = vmatprep.subr.bf16.mxu0 %v3109_v32  ;;  %1946 = vmatprep.subr.bf16.mxu1 %v3112_v33  ;;  %v2154_v32 = vrot.slane %v2152_v26, 3  ;;  %v3175_v33 = vld [vmem:[#allocation2 + $0x600] ss:$8 sps:$4 sm:$0xff]  }
  0xda   : > { %v2002_v36 = vrot.slane %v2746_v30, 2 }
  0xdc   : > { %1794 = vmatpush1.bf16.msra.mxu0 %v3107_v34  ;;  %1947 = vmatpush1.bf16.msra.mxu1 %v3110_v35  ;;  %v3178_v34 = vld [vmem:[#allocation2 + $0x680] ss:$8 sps:$4 sm:$0xff]   ;;  %v3185_v35 = vld [vmem:[#allocation2 + $0x774] ss:$8 sps:$4 sm:$0xff]  }
  0xdd   : > { %1795 = vmatprep.subr.bf16.mxu0 %v3115_v38  ;;  %1948 = vmatprep.subr.bf16.mxu1 %v3118_v39  ;;  %v2155_v38 = vor.u32 %v2154_v32, %v2151_v31  ;;  %v3183_v39 = vld [vmem:[#allocation2 + $0x770] ss:$8 sps:$4 sm:$0xff]  }
  0xe0   : > { %1796 = vmatpush1.bf16.msra.mxu0 %v3113_v42  ;;  %1949 = vmatpush1.bf16.msra.mxu1 %v3116_v43 }
  0xe1   : > { %1797 = vmatprep.subr.bf16.mxu0 %v3121_v44  ;;  %1950 = vmatprep.subr.bf16.mxu1 %v3124_v45  ;;  %v3186_v44 = vld [vmem:[#allocation2 + $0x760] ss:$8 sps:$4 sm:$0xff]  }
  0xe4   : > { %1798 = vmatpush1.bf16.msra.mxu0 %v3119_v47  ;;  %1951 = vmatpush1.bf16.msra.mxu1 %v3122_v48 }
  0xe5   : > { %1799 = vmatprep.subr.bf16.mxu0 %v3127_v49  ;;  %1952 = vmatprep.subr.bf16.mxu1 %v3130_v50  ;;  %v3189_v50 = vld [vmem:[#allocation2 + $0x750] ss:$8 sps:$4 sm:$0xff]  }
  0xe8   : > { %1800 = vmatpush1.bf16.msra.mxu0 %v3125_v54  ;;  %1953 = vmatpush1.bf16.msra.mxu1 %v3128_v55  ;;  %v3192_v54 = vld [vmem:[#allocation2 + $0x740] ss:$8 sps:$4 sm:$0xff]   ;;  %v3197_v55 = vld [vmem:[#allocation2 + $0x734] ss:$8 sps:$4 sm:$0xff]  }
  0xe9   : > { %2084 = vmatprep.subr.bf16.mxu0 %v3135_v56  ;;  %2237 = vmatprep.subr.bf16.mxu1 %v3138_v57  ;;  %v3200_v56 = vld [vmem:[#allocation2 + $0x724] ss:$8 sps:$4 sm:$0xff]   ;;  %v3198_v57 = vld [vmem:[#allocation2 + $0x720] ss:$8 sps:$4 sm:$0xff]  }
  0xeb   : > { %1818 = vmatmul.mubr.bf16.vlgmr.msra.gmra.mxu0 %v1703_v58  ;;  %1971 = vmatmul.mubr.bf16.vlgmr.msra.gmra.mxu1 %v1856_v59  ;;  %v3203_v58 = vld [vmem:[#allocation2 + $0x714] ss:$8 sps:$4 sm:$0xff]   ;;  %v3201_v59 = vld [vmem:[#allocation2 + $0x710] ss:$8 sps:$4 sm:$0xff]  }
  0xec   : > { %2085 = vmatpush1.bf16.msra.mxu0 %v3133_v60  ;;  %2238 = vmatpush1.bf16.msra.mxu1 %v3136_v63  ;;  %v2280_v60 = vld [vmem:[%s3362_s4 + $0x4] sm:$0x8] }
  0xed   : > { %2086 = vmatprep.subr.bf16.mxu0 %v3141_v1  ;;  %2239 = vmatprep.subr.bf16.mxu1 %v3144_v62  ;;  %v3206_v63 = vld [vmem:[#allocation2 + $0x704] ss:$8 sps:$4 sm:$0xff]   ;;  %v2780_v1 = vcombine.low %v2280_v60, %v3413_v16  ;;  %v3204_v62 = vld [vmem:[#allocation2 + $0x700] ss:$8 sps:$4 sm:$0xff]  }
  0xee   : > { %2116 = vmatprep.mubr.bf16.mxu0 %v3280_v0  ;;  %2269 = vmatprep.mubr.bf16.mxu1 %v3280_v0 }
  0xf0   : > { %2087 = vmatpush1.bf16.msra.mxu0 %v3139_v2  ;;  %2240 = vmatpush1.bf16.msra.mxu1 %v3142_v3  ;;  %v2301_v2 = vrot.slane %v2780_v1, 3 }
  0xf1   : > { %2088 = vmatprep.subr.bf16.mxu0 %v3147_v4  ;;  %2241 = vmatprep.subr.bf16.mxu1 %v3150_v61 }
  0xf4   : > { %2089 = vmatpush1.bf16.msra.mxu0 %v3145_v5  ;;  %2242 = vmatpush1.bf16.msra.mxu1 %v3148_v6 }
  0xf5   : > { %2090 = vmatprep.subr.bf16.mxu0 %v3153_v7  ;;  %2243 = vmatprep.subr.bf16.mxu1 %v3156_v8 }
  0xf8   : > { %2091 = vmatpush1.bf16.msra.mxu0 %v3151_v9  ;;  %2244 = vmatpush1.bf16.msra.mxu1 %v3154_v10 }
  0xf9   : > { %2092 = vmatprep.subr.bf16.mxu0 %v3159_v11  ;;  %2245 = vmatprep.subr.bf16.mxu1 %v3162_v12 }
  0xfc   : > { %2093 = vmatpush1.bf16.msra.mxu0 %v3157_v13  ;;  %2246 = vmatpush1.bf16.msra.mxu1 %v3160_v14 }
  0xfd   : > { %2094 = vmatprep.subr.bf16.mxu0 %v3165_v17  ;;  %2247 = vmatprep.subr.bf16.mxu1 %v3168_v18 }
 0x100   : > { %2095 = vmatpush1.bf16.msra.mxu0 %v3163_v21  ;;  %2248 = vmatpush1.bf16.msra.mxu1 %v3166_v22 }
 0x101   : > { %2096 = vmatprep.subr.bf16.mxu0 %v3171_v23  ;;  %2249 = vmatprep.subr.bf16.mxu1 %v3174_v24 }
 0x104   : > { %2097 = vmatpush1.bf16.msra.mxu0 %v3169_v27  ;;  %2250 = vmatpush1.bf16.msra.mxu1 %v3172_v28 }
 0x105   : > { %2098 = vmatprep.subr.bf16.mxu0 %v3177_v19  ;;  %2251 = vmatprep.subr.bf16.mxu1 %v3180_v29 }
 0x108   : > { %2099 = vmatpush1.bf16.msra.mxu0 %v3175_v33  ;;  %2252 = vmatpush1.bf16.msra.mxu1 %v3178_v34 }
 0x109   : > { %2383 = vmatprep.subr.bf16.mxu0 %v3185_v35 }
 0x10b   : > { %v362_v42 = vpop.f32.mrf.mxu0  ;;  %v483_v43 = vpop.f32.mrf.mxu1  ;;  %2117 = vmatmul.mubr.bf16.vlgmr.msra.gmra.mxu0 %v2002_v36  ;;  %2270 = vmatmul.mubr.bf16.vlgmr.msra.gmra.mxu1 %v2155_v38 }
 0x10c   : > { %v484_v37 = vadd.f32 %v483_v43, %v362_v42  ;;  %2384 = vmatpush1.bf16.msra.mxu0 %v3183_v39  ;;  %2415 = vmatprep.mubr.bf16.mxu0 %v3280_v0  ;;  %v3195_v0 = vld [vmem:[#allocation2 + $0x730] ss:$8 sps:$4 sm:$0xff]  }
 0x10d   : > { %v364_v45 = vpop.f32.mrf.mxu0  ;;  %v485_v40 = vpop.f32.mrf.mxu1  ;;  %2385 = vmatprep.subr.bf16.mxu0 %v3188_v41 }
 0x10e   : > { %v486_v47 = vadd.f32 %v485_v40, %v364_v45 }
 0x10f   : > { %v366_v48 = vpop.f32.mrf.mxu0  ;;  %v487_v49 = vpop.f32.mrf.mxu1 }
 0x110   : > { %2386 = vmatpush1.bf16.msra.mxu0 %v3186_v44 }
 0x111   : > { %v367_v51 = vpop.f32.mrf.mxu0  ;;  %2387 = vmatprep.subr.bf16.mxu0 %v3191_v46  ;;  %v488_v53 = vpop.f32.mrf.mxu1 }
 0x114   : > { %2388 = vmatpush1.bf16.msra.mxu0 %v3189_v50 }
 0x115   : > { %2389 = vmatprep.subr.bf16.mxu0 %v3194_v52 }
 0x118   : > { %2390 = vmatpush1.bf16.msra.mxu0 %v3192_v54 }
 0x119   : > { %2391 = vmatprep.subr.bf16.mxu0 %v3197_v55 }
 0x11c   : > { %2392 = vmatpush1.bf16.msra.mxu0 %v3195_v0 }
 0x11d   : > { %2393 = vmatprep.subr.bf16.mxu0 %v3200_v56 }
 0x120   : > { %2394 = vmatpush1.bf16.msra.mxu0 %v3198_v57 }
 0x121   : > { %2395 = vmatprep.subr.bf16.mxu0 %v3203_v58 }
 0x124   : > { %2396 = vmatpush1.bf16.msra.mxu0 %v3201_v59 }
 0x125   : > { %2397 = vmatprep.subr.bf16.mxu0 %v3206_v63 }
 0x128   : > { %2398 = vmatpush1.bf16.msra.mxu0 %v3204_v62 }
 0x12b   : > { %v627_v3 = vpop.f32.mrf.mxu0  ;;  %2416 = vmatmul.mubr.bf16.vlgmr.msra.gmra.mxu0 %v2301_v2  ;;  %v780_v4 = vpop.f32.mrf.mxu1 }
 0x12c   : > { %v634_v61 = vadd.f32 %v627_v3, %v484_v37  ;;  %v2428_v3 = vlaneseq }
 0x12d   : > { %v629_v5 = vpop.f32.mrf.mxu0  ;;  %v782_v6 = vpop.f32.mrf.mxu1 }
 0x12e   : > { %v635_v7 = vadd.f32 %v629_v5, %v486_v47  ;;  %v787_v8 = vadd.f32 %v780_v4, %v634_v61  ;;  %v2429_v5 = vshrl.u32 %v2428_v3, 7 }
 0x12f   : > { %v631_v9 = vpop.f32.mrf.mxu0  ;;  %v784_v10 = vpop.f32.mrf.mxu1 }
 0x130   : > { %v788_v11 = vadd.f32 %v782_v6, %v635_v7  ;;  %v2430_v9 = vsub.s32 0, %v2429_v5  ;;  %v2426_v10 = vld [vmem:[#allocation4] sm:$0x3] }
 0x131   : > { %v632_v12 = vpop.f32.mrf.mxu0  ;;  %v785_v13 = vpop.f32.mrf.mxu1 }
 0x132   : > { %v2434_v12 = vsub.s32 1, %v2429_v5 }
 0x14b   : > { %v926_v14 = vpop.f32.mrf.mxu0  ;;  %v1079_v15 = vpop.f32.mrf.mxu1 }
 0x14c   : > { %v933_v16 = vadd.f32 %v926_v14, %v787_v8  ;;  %v2431_v14 = vrot.slane %v2426_v10, %v2430_v9 }
 0x14d   : > { %v928_v17 = vpop.f32.mrf.mxu0  ;;  %v1081_v18 = vpop.f32.mrf.mxu1 }
 0x14e   : > { %v934_v20 = vadd.f32 %v928_v17, %v788_v11  ;;  %v1086_v21 = vadd.f32 %v1079_v15, %v933_v16 }
 0x14f   : > { %v930_v22 = vpop.f32.mrf.mxu0  ;;  %v1083_v23 = vpop.f32.mrf.mxu1 }
 0x150   : > { %v1087_v24 = vadd.f32 %v1081_v18, %v934_v20  ;;  %v2435_v18 = vrot.slane %v2426_v10, %v2434_v12 }
 0x151   : > { %v931_v25 = vpop.f32.mrf.mxu0  ;;  %v1084_v26 = vpop.f32.mrf.mxu1 }
 0x16b   : > { %v1225_v27 = vpop.f32.mrf.mxu0  ;;  %v1378_v28 = vpop.f32.mrf.mxu1 }
 0x16c   : > { %v1232_v19 = vadd.f32 %v1225_v27, %v1086_v21 }
 0x16d   : > { %v1227_v29 = vpop.f32.mrf.mxu0  ;;  %v1380_v30 = vpop.f32.mrf.mxu1 }
 0x16e   : > { %v1233_v31 = vadd.f32 %v1227_v29, %v1087_v24  ;;  %v1385_v32 = vadd.f32 %v1378_v28, %v1232_v19 }
 0x16f   : > { %v1229_v33 = vpop.f32.mrf.mxu0  ;;  %v1382_v34 = vpop.f32.mrf.mxu1 }
 0x170   : > { %v1386_v35 = vadd.f32 %v1380_v30, %v1233_v31 }
 0x171   : > { %v1230_v36 = vpop.f32.mrf.mxu0  ;;  %v1383_v38 = vpop.f32.mrf.mxu1 }
 0x18b   : > { %v1518_v39 = vpop.f32.mrf.mxu0  ;;  %v1673_v41 = vpop.f32.mrf.mxu1 }
 0x18c   : > { %v1525_v42 = vadd.f32 %v1518_v39, %v1385_v32 }
 0x18d   : > { %v1520_v43 = vpop.f32.mrf.mxu0  ;;  %v1675_v37 = vpop.f32.mrf.mxu1 }
 0x18e   : > { %v1526_v44 = vadd.f32 %v1520_v43, %v1386_v35  ;;  %v1680_v45 = vadd.f32 %v1673_v41, %v1525_v42 }
 0x18f   : > { %v1522_v40 = vpop.f32.mrf.mxu0  ;;  %v1677_v46 = vpop.f32.mrf.mxu1 }
 0x190   : > { %v1681_v47 = vadd.f32 %v1675_v37, %v1526_v44 }
 0x191   : > { %v1523_v48 = vpop.f32.mrf.mxu0  ;;  %v1678_v49 = vpop.f32.mrf.mxu1 }
 0x1ab   : > { %v1819_v50 = vpop.f32.mrf.mxu0  ;;  %v1972_v51 = vpop.f32.mrf.mxu1 }
 0x1ac   : > { %v1826_v4 = vadd.f32 %v1819_v50, %v1680_v45 }
 0x1ad   : > { %v1821_v52 = vpop.f32.mrf.mxu0  ;;  %v1974_v53 = vpop.f32.mrf.mxu1 }
 0x1ae   : > { %v1827_v61 = vadd.f32 %v1821_v52, %v1681_v47  ;;  %v1979_v6 = vadd.f32 %v1972_v51, %v1826_v4 }
 0x1af   : > { %v1823_v54 = vpop.f32.mrf.mxu0  ;;  %v1976_v55 = vpop.f32.mrf.mxu1 }
 0x1b0   : > { %v1980_v7 = vadd.f32 %v1974_v53, %v1827_v61 }
 0x1b1   : > { %v1824_v0 = vpop.f32.mrf.mxu0  ;;  %v1977_v56 = vpop.f32.mrf.mxu1 }
 0x1cb   : > { %v2118_v57 = vpop.f32.mrf.mxu0  ;;  %v2271_v58 = vpop.f32.mrf.mxu1 }
 0x1cc   : > { %v2125_v8 = vadd.f32 %v2118_v57, %v1979_v6 }
 0x1cd   : > { %v2120_v59 = vpop.f32.mrf.mxu0  ;;  %v2273_v60 = vpop.f32.mrf.mxu1 }
 0x1ce   : > { %v2126_v11 = vadd.f32 %v2120_v59, %v1980_v7  ;;  %v2278_v13 = vadd.f32 %v2271_v58, %v2125_v8 }
 0x1cf   : > { %v2122_v63 = vpop.f32.mrf.mxu0  ;;  %v2275_v1 = vpop.f32.mrf.mxu1 }
 0x1d0   : > { %v2279_v16 = vadd.f32 %v2273_v60, %v2126_v11 }
 0x1d1   : > { %v2123_v62 = vpop.f32.mrf.mxu0  ;;  %v2276_v2 = vpop.f32.mrf.mxu1 }
 0x1eb   : > { %v2417_v15 = vpop.f32.mrf.mxu0 }
 0x1ec   : > { %v2424_v17 = vadd.f32 %v2417_v15, %v2278_v13 }
 0x1ed   : > { %v2419_v20 = vpop.f32.mrf.mxu0 }
 0x1ee   : > { %v2438_v21 = vadd.f32 %v2431_v14, %v2424_v17  ;;  %v2425_v22 = vadd.f32 %v2419_v20, %v2279_v16 }
 0x1ef   : > { %v2421_v23 = vpop.f32.mrf.mxu0 }
 0x1f0   : > { %v2442_v24 = vmul.f32 0.1, %v2438_v21  ;;  %v2439_v25 = vadd.f32 %v2435_v18, %v2425_v22  ;;  %vm2440_vm0 = vcmp.ge.f32.partialorder %v2438_v21, 0.0 }
 0x1f1   : > { %v2422_v26 = vpop.f32.mrf.mxu0 }
 0x1f2   : > { %vm2441_vm1 = vcmp.ge.f32.partialorder %v2439_v25, 0.0  ;;  %v2443_v27 = vmul.f32 0.1, %v2439_v25  ;;  %v2444_v28 = vsel %vm2440_vm0, %v2438_v21, %v2442_v24 }
 0x1f4   : > { %v2445_v19 = vsel %vm2441_vm1, %v2439_v25, %v2443_v27 }
 0x1f5   : > { %v2801_v29 = vpack.c.bf16 %v2445_v19, %v2444_v28 }
 0x1f7   : > { %2454 = vst [vmem:[%s198_s8] sm:$0xff] %v2801_v29 }
 0x1f8 PF: > { %s15_s12 = sadd.s32 1, %s3274_s12  }
 0x1f9   : > { %p12_p3 = scmp.ge.s32.totalorder %s15_s12, 4  }
 0x1fb   :  { %14 = sbr.rel (!%p12_p3) target bundleno = 2 (0x2), region = 85 }
 0x200   :  { %2476 = vsyncpa [#allocation3], 1 }
 0x201   :  { %2478 = vsyncpa [#allocation3 + $0x1], 1 }
 0x202   :  { %2479 = vsyncpa [#allocation5], 1 }

// kernel: forward.12
= control target key start
LH: loop header
LB: loop body
LE: loop exit
PB: predicated region body
PF: predicated region fallthrough
CT: control target
= control target key end

     0   :  { %s1803_s15 = smov 0   ;;  %s2246_s0 = inlined_call_operand.vmem [shape: bf16[2,5,256], index: 0, kind: input, shape index: {}]   ;;  %s2247_s1 = inlined_call_operand.vmem [shape: bf16[2,5,256], index: 1, kind: input, shape index: {}]   ;;  %s2248_s2 = inlined_call_operand.vmem [shape: bf16[4,256,256], index: 2, kind: input, shape index: {}]   ;;  %s2249_s3 = inlined_call_operand.vmem [shape: f32[1,256], index: 3, kind: input, shape index: {}]   ;;  %s2250_s4 = inlined_call_operand.vmem [shape: bf16[2,4,256], index: 4, kind: output, shape index: {}]  }
   0x1 LB: > { %s1312_s16 = sadd.s32 4294967295, %s1776_s15   ;;  %p1316_p0 = scmp.ge.s32.totalorder %s1776_s15, 1  ;;  %s1776_s15 = sphi %s1803_s15, %s14_s15  }
   0x2   : > { %p172_p1 = scmp.lt.s32.totalorder %s1776_s15, 3 }
   0x4   : > { %p173_p2 = pnand %p1316_p0, %p172_p1 }
   0x5   : > { %p203_p3 = scmp.lt.s32.totalorder (!%p173_p2), %s1312_s16, 1 }
   0x6   : > { %176 = sbr.rel (%p173_p2) target bundleno = 344 (0x158), region = 36 }
   0xb   : > { %v1570_v0 = vld [vmem:[%s2248_s2 + $0x174] ss:$8 sps:$4 sm:$0xff]   ;;  %v1574_v2 = vld [vmem:[%s2248_s2 + $0x170] ss:$8 sps:$4 sm:$0xff]   ;;  %v1576_v4 = vld [vmem:[%s2248_s2 + $0x164] ss:$8 sps:$4 sm:$0xff]  }
   0xc   : > { %v1572_v1 = vld [vmem:[%s2248_s2 + $0x74] ss:$8 sps:$4 sm:$0xff]   ;;  %452 = vmatprep.subr.bf16.mxu0 %v1570_v0  ;;  %v1575_v3 = vld [vmem:[%s2248_s2 + $0x70] ss:$8 sps:$4 sm:$0xff]   ;;  %v1578_v5 = vld [vmem:[%s2248_s2 + $0x64] ss:$8 sps:$4 sm:$0xff]  }
   0xd   : > { %660 = vmatprep.subr.bf16.mxu1 %v1572_v1  ;;  %453 = vmatpush1.bf16.msra.mxu0 %v1574_v2  ;;  %v1580_v6 = vld [vmem:[%s2248_s2 + $0x160] ss:$8 sps:$4 sm:$0xff]   ;;  %v1582_v8 = vld [vmem:[%s2248_s2 + $0x154] ss:$8 sps:$4 sm:$0xff]   ;;  %v1586_v10 = vld [vmem:[%s2248_s2 + $0x150] ss:$8 sps:$4 sm:$0xff]  }
   0xe   : > { %661 = vmatpush1.bf16.msra.mxu1 %v1575_v3  ;;  %454 = vmatprep.subr.bf16.mxu0 %v1576_v4  ;;  %v1581_v7 = vld [vmem:[%s2248_s2 + $0x60] ss:$8 sps:$4 sm:$0xff]   ;;  %v1584_v9 = vld [vmem:[%s2248_s2 + $0x54] ss:$8 sps:$4 sm:$0xff]   ;;  %v1587_v11 = vld [vmem:[%s2248_s2 + $0x50] ss:$8 sps:$4 sm:$0xff]  }
   0xf   : > { %662 = vmatprep.subr.bf16.mxu1 %v1578_v5  ;;  %v1588_v12 = vld [vmem:[%s2248_s2 + $0x144] ss:$8 sps:$4 sm:$0xff]   ;;  %v1592_v14 = vld [vmem:[%s2248_s2 + $0x140] ss:$8 sps:$4 sm:$0xff]   ;;  %v1594_v16 = vld [vmem:[%s2248_s2 + $0x134] ss:$8 sps:$4 sm:$0xff]  }
  0x10   : > { %v1590_v13 = vld [vmem:[%s2248_s2 + $0x44] ss:$8 sps:$4 sm:$0xff]   ;;  %v1593_v15 = vld [vmem:[%s2248_s2 + $0x40] ss:$8 sps:$4 sm:$0xff]   ;;  %v1596_v17 = vld [vmem:[%s2248_s2 + $0x34] ss:$8 sps:$4 sm:$0xff]  }
  0x11   : > { %455 = vmatpush1.bf16.msra.mxu0 %v1580_v6  ;;  %v1598_v18 = vld [vmem:[%s2248_s2 + $0x130] ss:$8 sps:$4 sm:$0xff]   ;;  %v1600_v20 = vld [vmem:[%s2248_s2 + $0x124] ss:$8 sps:$4 sm:$0xff]   ;;  %v1604_v22 = vld [vmem:[%s2248_s2 + $0x120] ss:$8 sps:$4 sm:$0xff]  }
  0x12   : > { %663 = vmatpush1.bf16.msra.mxu1 %v1581_v7  ;;  %456 = vmatprep.subr.bf16.mxu0 %v1582_v8  ;;  %v1599_v19 = vld [vmem:[%s2248_s2 + $0x30] ss:$8 sps:$4 sm:$0xff]   ;;  %v1602_v21 = vld [vmem:[%s2248_s2 + $0x24] ss:$8 sps:$4 sm:$0xff]   ;;  %v1605_v23 = vld [vmem:[%s2248_s2 + $0x20] ss:$8 sps:$4 sm:$0xff]  }
  0x13   : > { %664 = vmatprep.subr.bf16.mxu1 %v1584_v9  ;;  %v1606_v24 = vld [vmem:[%s2248_s2 + $0x114] ss:$8 sps:$4 sm:$0xff]   ;;  %v1610_v26 = vld [vmem:[%s2248_s2 + $0x110] ss:$8 sps:$4 sm:$0xff]   ;;  %v1612_v28 = vld [vmem:[%s2248_s2 + $0x104] ss:$8 sps:$4 sm:$0xff]  }
  0x14   : > { %v1608_v25 = vld [vmem:[%s2248_s2 + $0x14] ss:$8 sps:$4 sm:$0xff]   ;;  %v1611_v27 = vld [vmem:[%s2248_s2 + $0x10] ss:$8 sps:$4 sm:$0xff]   ;;  %v1614_v29 = vld [vmem:[%s2248_s2 + $0x4] ss:$8 sps:$4 sm:$0xff]  }
  0x15   : > { %457 = vmatpush1.bf16.msra.mxu0 %v1586_v10  ;;  %v1616_v30 = vld [vmem:[%s2248_s2 + $0x100] ss:$8 sps:$4 sm:$0xff]   ;;  %v1618_v32 = vld [vmem:[%s2248_s2 + $0x1f4] ss:$8 sps:$4 sm:$0xff]   ;;  %v1622_v34 = vld [vmem:[%s2248_s2 + $0x1f0] ss:$8 sps:$4 sm:$0xff]  }
  0x16   : > { %665 = vmatpush1.bf16.msra.mxu1 %v1587_v11  ;;  %458 = vmatprep.subr.bf16.mxu0 %v1588_v12  ;;  %v1617_v31 = vld [vmem:[%s2248_s2] ss:$8 sps:$4 sm:$0xff]   ;;  %v1620_v33 = vld [vmem:[%s2248_s2 + $0xf4] ss:$8 sps:$4 sm:$0xff]   ;;  %v1623_v35 = vld [vmem:[%s2248_s2 + $0xf0] ss:$8 sps:$4 sm:$0xff]  }
  0x17   : > { %666 = vmatprep.subr.bf16.mxu1 %v1590_v13  ;;  %v1624_v36 = vld [vmem:[%s2248_s2 + $0x1e4] ss:$8 sps:$4 sm:$0xff]   ;;  %s2252_s16 = smov (!%p203_p3, %s1312_s16), 1  ;;  %v1628_v38 = vld [vmem:[%s2248_s2 + $0x1e0] ss:$8 sps:$4 sm:$0xff]  }
  0x18   : > { %v1626_v37 = vld [vmem:[%s2248_s2 + $0xe4] ss:$8 sps:$4 sm:$0xff]   ;;  %v1629_v39 = vld [vmem:[%s2248_s2 + $0xe0] ss:$8 sps:$4 sm:$0xff]   ;;  %v1630_v40 = vld [vmem:[%s2248_s2 + $0x1d4] ss:$8 sps:$4 sm:$0xff]  }
  0x19   : > { %459 = vmatpush1.bf16.msra.mxu0 %v1592_v14  ;;  %s1559_s27 = sshll.u32 %s2252_s16, 3  ;;  %v1632_v41 = vld [vmem:[%s2248_s2 + $0xd4] ss:$8 sps:$4 sm:$0xff]   ;;  %v1634_v42 = vld [vmem:[%s2248_s2 + $0x1d0] ss:$8 sps:$4 sm:$0xff]  }
  0x1a   : > { %667 = vmatpush1.bf16.msra.mxu1 %v1593_v15  ;;  %460 = vmatprep.subr.bf16.mxu0 %v1594_v16  ;;  %v1635_v43 = vld [vmem:[%s2248_s2 + $0xd0] ss:$8 sps:$4 sm:$0xff]   ;;  %s1953_s10 = scalar_lea.vmem %s2247_s1, %s1559_s27  ;;  %v1636_v44 = vld [vmem:[%s2248_s2 + $0x1c4] ss:$8 sps:$4 sm:$0xff]   ;;  %s207_s17 = scalar_lea.vmem %s2246_s0, %s1559_s27  ;;  %v1640_v47 = vld [vmem:[%s2248_s2 + $0x1c0] ss:$8 sps:$4 sm:$0xff]  }
  0x1b   : > { %668 = vmatprep.subr.bf16.mxu1 %v1596_v17  ;;  %v1638_v45 = vld [vmem:[%s2248_s2 + $0xc4] ss:$8 sps:$4 sm:$0xff]   ;;  %v1641_v48 = vld [vmem:[%s2248_s2 + $0xc0] ss:$8 sps:$4 sm:$0xff]   ;;  %v1642_v51 = vld [vmem:[%s2248_s2 + $0x1b4] ss:$8 sps:$4 sm:$0xff]  }
  0x1c   : > { %v1965_v46 = vld [vmem:[%s1953_s10] sm:$0x33]  ;;  %v1644_v52 = vld [vmem:[%s2248_s2 + $0xb4] ss:$8 sps:$4 sm:$0xff]   ;;  %v1646_v54 = vld [vmem:[%s2248_s2 + $0x1b0] ss:$8 sps:$4 sm:$0xff]  }
  0x1d   : > { %461 = vmatpush1.bf16.msra.mxu0 %v1598_v18  ;;  %v1356_v49 = vcombine.high %v1965_v46, %v1965_v46  ;;  %v1975_v50 = vld [vmem:[%s207_s17] sm:$0x33]  ;;  %v1647_v55 = vld [vmem:[%s2248_s2 + $0xb0] ss:$8 sps:$4 sm:$0xff]   ;;  %v1654_v62 = vld [vmem:[%s2248_s2 + $0x194] ss:$8 sps:$4 sm:$0xff]   ;;  %v1355_v16 = vcombine.low %v1965_v46, %v1965_v46 }
  0x1e   : > { %669 = vmatpush1.bf16.msra.mxu1 %v1599_v19  ;;  %462 = vmatprep.subr.bf16.mxu0 %v1600_v20  ;;  %v1390_v53 = vcombine.high %v1975_v50, %v1975_v50  ;;  %v1648_v56 = vld [vmem:[%s2248_s2 + $0x1a4] ss:$8 sps:$4 sm:$0xff]   ;;  %v1652_v60 = vld [vmem:[%s2248_s2 + $0x1a0] ss:$8 sps:$4 sm:$0xff]   ;;  %v1656_v63 = vld [vmem:[%s2248_s2 + $0x94] ss:$8 sps:$4 sm:$0xff]   ;;  %v1389_v17 = vcombine.low %v1975_v50, %v1975_v50 }
  0x1f   : > { %670 = vmatprep.subr.bf16.mxu1 %v1602_v21  ;;  %484 = vmatprep.mubr.bf16.mxu0 %v1356_v49  ;;  %v1650_v57 = vld [vmem:[%s2248_s2 + $0xa4] ss:$8 sps:$4 sm:$0xff]   ;;  %v1653_v61 = vld [vmem:[%s2248_s2 + $0xa0] ss:$8 sps:$4 sm:$0xff]   ;;  %v1658_v2 = vld [vmem:[%s2248_s2 + $0x190] ss:$8 sps:$4 sm:$0xff]  }
  0x20   : > { %692 = vmatprep.mubr.bf16.mxu1 %v1390_v53  ;;  %v1998_v58 = vld [vmem:[%s1953_s10] sm:$0x77]  ;;  %v1659_v3 = vld [vmem:[%s2248_s2 + $0x90] ss:$8 sps:$4 sm:$0xff]   ;;  %v1676_v10 = vld [vmem:[%s2248_s2 + $0x274] ss:$8 sps:$4 sm:$0xff]  }
  0x21   : > { %463 = vmatpush1.bf16.msra.mxu0 %v1604_v22  ;;  %v2000_v59 = vld [vmem:[%s207_s17] sm:$0x77]  ;;  %v1522_v0 = vcombine.high %v1998_v58, %v1998_v58  ;;  %v1679_v11 = vld [vmem:[%s2248_s2 + $0x374] ss:$8 sps:$4 sm:$0xff]   ;;  %v1674_v18 = vld [vmem:[%s2248_s2 + $0x270] ss:$8 sps:$4 sm:$0xff]  }
  0x22   : > { %671 = vmatpush1.bf16.msra.mxu1 %v1605_v23  ;;  %464 = vmatprep.subr.bf16.mxu0 %v1606_v24  ;;  %v1456_v1 = vcombine.high %v2000_v59, %v2000_v59  ;;  %v1660_v4 = vld [vmem:[%s2248_s2 + $0x184] ss:$8 sps:$4 sm:$0xff]   ;;  %v1664_v8 = vld [vmem:[%s2248_s2 + $0x180] ss:$8 sps:$4 sm:$0xff]   ;;  %v1677_v19 = vld [vmem:[%s2248_s2 + $0x370] ss:$8 sps:$4 sm:$0xff]  }
  0x23   : > { %672 = vmatprep.subr.bf16.mxu1 %v1608_v25  ;;  %v1662_v5 = vld [vmem:[%s2248_s2 + $0x84] ss:$8 sps:$4 sm:$0xff]   ;;  %v1008_v6 = vshll.u32 %v1522_v0, 16  ;;  %v1665_v9 = vld [vmem:[%s2248_s2 + $0x80] ss:$8 sps:$4 sm:$0xff]   ;;  %v1006_v14 = vshrl.u32 %v1522_v0, 16 }
  0x24   : > { %v750_v7 = vshll.u32 %v1456_v1, 16  ;;  %v748_v12 = vshrl.u32 %v1456_v1, 16  ;;  %v1682_v20 = vld [vmem:[%s2248_s2 + $0x264] ss:$8 sps:$4 sm:$0xff]   ;;  %v1680_v24 = vld [vmem:[%s2248_s2 + $0x260] ss:$8 sps:$4 sm:$0xff]  }
  0x25   : > { %465 = vmatpush1.bf16.msra.mxu0 %v1610_v26  ;;  %v1010_v15 = vrot.slane %v1008_v6, 1  ;;  %v1685_v21 = vld [vmem:[%s2248_s2 + $0x364] ss:$8 sps:$4 sm:$0xff]   ;;  %v1683_v25 = vld [vmem:[%s2248_s2 + $0x360] ss:$8 sps:$4 sm:$0xff]   ;;  %s1561_s10 = sshll.u32 %s2252_s16, 2 }
  0x26   : > { %673 = vmatpush1.bf16.msra.mxu1 %v1611_v27  ;;  %466 = vmatprep.subr.bf16.mxu0 %v1612_v28  ;;  %v752_v13 = vrot.slane %v750_v7, 1  ;;  %v1688_v26 = vld [vmem:[%s2248_s2 + $0x254] ss:$8 sps:$4 sm:$0xff]   ;;  %v1686_v28 = vld [vmem:[%s2248_s2 + $0x250] ss:$8 sps:$4 sm:$0xff]   ;;  %s217_s21 = scalar_lea.vmem %s2250_s4, %s1561_s10 }
  0x27   : > { %674 = vmatprep.subr.bf16.mxu1 %v1614_v29  ;;  %v1011_v23 = vor.u32 %v1010_v15, %v1006_v14  ;;  %v1691_v27 = vld [vmem:[%s2248_s2 + $0x354] ss:$8 sps:$4 sm:$0xff]   ;;  %v1689_v29 = vld [vmem:[%s2248_s2 + $0x350] ss:$8 sps:$4 sm:$0xff]   ;;  %v1718_v46 = vld [vmem:[%s2248_s2 + $0x204] ss:$8 sps:$4 sm:$0xff]  }
  0x28   : > { %v753_v22 = vor.u32 %v752_v13, %v748_v12  ;;  %v1719_v49 = vld [vmem:[%s2248_s2 + $0x300] ss:$8 sps:$4 sm:$0xff]   ;;  %v1724_v50 = vld [vmem:[%s2248_s2 + $0x2f4] ss:$8 sps:$4 sm:$0xff]   ;;  %v1725_v53 = vld [vmem:[%s2248_s2 + $0x3f0] ss:$8 sps:$4 sm:$0xff]  }
  0x29   : > { %467 = vmatpush1.bf16.msra.mxu0 %v1616_v30  ;;  %v1694_v30 = vld [vmem:[%s2248_s2 + $0x244] ss:$8 sps:$4 sm:$0xff]   ;;  %v1746_v6 = vld [vmem:[%s2248_s2 + $0x2b0] ss:$8 sps:$4 sm:$0xff]   ;;  %v1752_v12 = vld [vmem:[%s2248_s2 + $0x2a0] ss:$8 sps:$4 sm:$0xff]  }
  0x2a   : > { %675 = vmatpush1.bf16.msra.mxu1 %v1617_v31  ;;  %468 = vmatprep.subr.bf16.mxu0 %v1618_v32  ;;  %v1697_v31 = vld [vmem:[%s2248_s2 + $0x344] ss:$8 sps:$4 sm:$0xff]   ;;  %v1692_v32 = vld [vmem:[%s2248_s2 + $0x240] ss:$8 sps:$4 sm:$0xff]   ;;  %v1749_v7 = vld [vmem:[%s2248_s2 + $0x3b0] ss:$8 sps:$4 sm:$0xff]  }
  0x2b   : > { %676 = vmatprep.subr.bf16.mxu1 %v1620_v33  ;;  %v1695_v33 = vld [vmem:[%s2248_s2 + $0x340] ss:$8 sps:$4 sm:$0xff]   ;;  %v1742_v0 = vld [vmem:[%s2248_s2 + $0x2c4] ss:$8 sps:$4 sm:$0xff]   ;;  %v1760_v14 = vld [vmem:[%s2248_s2 + $0x294] ss:$8 sps:$4 sm:$0xff]  }
  0x2c   : > { %v1745_v1 = vld [vmem:[%s2248_s2 + $0x3c4] ss:$8 sps:$4 sm:$0xff]   ;;  %v1755_v13 = vld [vmem:[%s2248_s2 + $0x3a0] ss:$8 sps:$4 sm:$0xff]  }
  0x2d   : > { %469 = vmatpush2.bf16.msra.mxu0 %v1622_v34  ;;  %v1700_v34 = vld [vmem:[%s2248_s2 + $0x234] ss:$8 sps:$4 sm:$0xff]  }
  0x2e   : > { %677 = vmatpush2.bf16.msra.mxu1 %v1623_v35  ;;  %470 = vmatprep.subr.bf16.mxu0 %v1624_v36  ;;  %v1703_v35 = vld [vmem:[%s2248_s2 + $0x334] ss:$8 sps:$4 sm:$0xff]   ;;  %v1698_v36 = vld [vmem:[%s2248_s2 + $0x230] ss:$8 sps:$4 sm:$0xff]  }
  0x2f   : > { %678 = vmatprep.subr.bf16.mxu1 %v1626_v37  ;;  %v1701_v37 = vld [vmem:[%s2248_s2 + $0x330] ss:$8 sps:$4 sm:$0xff]  }
  0x31   : > { %471 = vmatpush2.bf16.msra.mxu0 %v1628_v38  ;;  %v1706_v38 = vld [vmem:[%s2248_s2 + $0x224] ss:$8 sps:$4 sm:$0xff]  }
  0x32   : > { %679 = vmatpush2.bf16.msra.mxu1 %v1629_v39  ;;  %472 = vmatprep.subr.bf16.mxu0 %v1630_v40  ;;  %v1709_v39 = vld [vmem:[%s2248_s2 + $0x324] ss:$8 sps:$4 sm:$0xff]   ;;  %v1704_v40 = vld [vmem:[%s2248_s2 + $0x220] ss:$8 sps:$4 sm:$0xff]  }
  0x33   : > { %680 = vmatprep.subr.bf16.mxu1 %v1632_v41  ;;  %v1707_v41 = vld [vmem:[%s2248_s2 + $0x320] ss:$8 sps:$4 sm:$0xff]  }
  0x35   : > { %473 = vmatpush2.bf16.msra.mxu0 %v1634_v42  ;;  %v1712_v42 = vld [vmem:[%s2248_s2 + $0x214] ss:$8 sps:$4 sm:$0xff]  }
  0x36   : > { %681 = vmatpush2.bf16.msra.mxu1 %v1635_v43  ;;  %474 = vmatprep.subr.bf16.mxu0 %v1636_v44  ;;  %v1715_v43 = vld [vmem:[%s2248_s2 + $0x314] ss:$8 sps:$4 sm:$0xff]   ;;  %v1710_v44 = vld [vmem:[%s2248_s2 + $0x210] ss:$8 sps:$4 sm:$0xff]  }
  0x37   : > { %682 = vmatprep.subr.bf16.mxu1 %v1638_v45  ;;  %v1713_v45 = vld [vmem:[%s2248_s2 + $0x310] ss:$8 sps:$4 sm:$0xff]  }
  0x39   : > { %475 = vmatpush2.bf16.msra.mxu0 %v1640_v47  ;;  %v1721_v47 = vld [vmem:[%s2248_s2 + $0x304] ss:$8 sps:$4 sm:$0xff]  }
  0x3a   : > { %683 = vmatpush2.bf16.msra.mxu1 %v1641_v48  ;;  %476 = vmatprep.subr.bf16.mxu0 %v1642_v51  ;;  %v1716_v48 = vld [vmem:[%s2248_s2 + $0x200] ss:$8 sps:$4 sm:$0xff]   ;;  %v1727_v51 = vld [vmem:[%s2248_s2 + $0x3f4] ss:$8 sps:$4 sm:$0xff]  }
  0x3b   : > { %684 = vmatprep.subr.bf16.mxu1 %v1644_v52  ;;  %v1722_v52 = vld [vmem:[%s2248_s2 + $0x2f0] ss:$8 sps:$4 sm:$0xff]  }
  0x3d   : > { %477 = vmatpush2.bf16.msra.mxu0 %v1646_v54  ;;  %v1730_v54 = vld [vmem:[%s2248_s2 + $0x2e4] ss:$8 sps:$4 sm:$0xff]  }
  0x3e   : > { %685 = vmatpush2.bf16.msra.mxu1 %v1647_v55  ;;  %478 = vmatprep.subr.bf16.mxu0 %v1648_v56  ;;  %v1733_v55 = vld [vmem:[%s2248_s2 + $0x3e4] ss:$8 sps:$4 sm:$0xff]   ;;  %v1728_v56 = vld [vmem:[%s2248_s2 + $0x2e0] ss:$8 sps:$4 sm:$0xff]  }
  0x3f   : > { %686 = vmatprep.subr.bf16.mxu1 %v1650_v57  ;;  %v1731_v57 = vld [vmem:[%s2248_s2 + $0x3e0] ss:$8 sps:$4 sm:$0xff]  }
  0x41   : > { %479 = vmatpush2.bf16.msra.mxu0 %v1652_v60  ;;  %v1736_v60 = vld [vmem:[%s2248_s2 + $0x2d4] ss:$8 sps:$4 sm:$0xff]  }
  0x42   : > { %687 = vmatpush2.bf16.msra.mxu1 %v1653_v61  ;;  %480 = vmatprep.subr.bf16.mxu0 %v1654_v62  ;;  %v1739_v61 = vld [vmem:[%s2248_s2 + $0x3d4] ss:$8 sps:$4 sm:$0xff]   ;;  %v1734_v62 = vld [vmem:[%s2248_s2 + $0x2d0] ss:$8 sps:$4 sm:$0xff]  }
  0x43   : > { %688 = vmatprep.subr.bf16.mxu1 %v1656_v63  ;;  %v1737_v63 = vld [vmem:[%s2248_s2 + $0x3d0] ss:$8 sps:$4 sm:$0xff]  }
  0x45   : > { %481 = vmatpush2.bf16.msra.mxu0 %v1658_v2  ;;  %v1740_v2 = vld [vmem:[%s2248_s2 + $0x2c0] ss:$8 sps:$4 sm:$0xff]  }
  0x46   : > { %689 = vmatpush2.bf16.msra.mxu1 %v1659_v3  ;;  %482 = vmatprep.subr.bf16.mxu0 %v1660_v4  ;;  %v1743_v3 = vld [vmem:[%s2248_s2 + $0x3c0] ss:$8 sps:$4 sm:$0xff]   ;;  %v1748_v4 = vld [vmem:[%s2248_s2 + $0x2b4] ss:$8 sps:$4 sm:$0xff]  }
  0x47   : > { %690 = vmatprep.subr.bf16.mxu1 %v1662_v5  ;;  %v1751_v5 = vld [vmem:[%s2248_s2 + $0x3b4] ss:$8 sps:$4 sm:$0xff]  }
  0x49   : > { %483 = vmatpush2.bf16.msra.mxu0 %v1664_v8  ;;  %v1754_v8 = vld [vmem:[%s2248_s2 + $0x2a4] ss:$8 sps:$4 sm:$0xff]  }
  0x4a   : > { %691 = vmatpush2.bf16.msra.mxu1 %v1665_v9  ;;  %916 = vmatprep.subr.bf16.mxu0 %v1676_v10  ;;  %v1757_v9 = vld [vmem:[%s2248_s2 + $0x3a4] ss:$8 sps:$4 sm:$0xff]   ;;  %v1521_v10 = vcombine.low %v1998_v58, %v1998_v58  ;;  %v1763_v58 = vld [vmem:[%s2248_s2 + $0x394] ss:$8 sps:$4 sm:$0xff]  }
  0x4b   : > { %1174 = vmatprep.subr.bf16.mxu1 %v1679_v11  ;;  %v1455_v11 = vcombine.low %v2000_v59, %v2000_v59 }
  0x4c   : > { %485 = vmatmul.mubr.bf16.vlgmr.msra.gmra.mxu0 %v1355_v16  ;;  %v1001_v59 = vshll.u32 %v1521_v10, 16  ;;  %v1758_v16 = vld [vmem:[%s2248_s2 + $0x290] ss:$8 sps:$4 sm:$0xff]  }
  0x4d   : > { %693 = vmatmul.mubr.bf16.vlgmr.msra.gmra.mxu1 %v1389_v17  ;;  %917 = vmatpush1.bf16.msra.mxu0 %v1674_v18  ;;  %v743_v15 = vshll.u32 %v1455_v11, 16  ;;  %v1761_v17 = vld [vmem:[%s2248_s2 + $0x390] ss:$8 sps:$4 sm:$0xff]   ;;  %v1766_v18 = vld [vmem:[%s2248_s2 + $0x284] ss:$8 sps:$4 sm:$0xff]  }
  0x4e   : > { %1175 = vmatpush1.bf16.msra.mxu1 %v1677_v19  ;;  %918 = vmatprep.subr.bf16.mxu0 %v1682_v20  ;;  %v1769_v19 = vld [vmem:[%s2248_s2 + $0x384] ss:$8 sps:$4 sm:$0xff]   ;;  %v999_v20 = vshrl.u32 %v1521_v10, 16 }
  0x4f   : > { %1176 = vmatprep.subr.bf16.mxu1 %v1685_v21  ;;  %948 = vmatprep.mubr.bf16.mxu0 %v753_v22  ;;  %v1003_v21 = vrot.slane %v1001_v59, 1  ;;  %v741_v22 = vshrl.u32 %v1455_v11, 16 }
  0x50   : > { %1206 = vmatprep.mubr.bf16.mxu1 %v1011_v23  ;;  %v745_v23 = vrot.slane %v743_v15, 1 }
  0x51   : > { %919 = vmatpush1.bf16.msra.mxu0 %v1680_v24  ;;  %v1764_v24 = vld [vmem:[%s2248_s2 + $0x280] ss:$8 sps:$4 sm:$0xff]  }
  0x52   : > { %1177 = vmatpush1.bf16.msra.mxu1 %v1683_v25  ;;  %920 = vmatprep.subr.bf16.mxu0 %v1688_v26  ;;  %v1767_v25 = vld [vmem:[%s2248_s2 + $0x380] ss:$8 sps:$4 sm:$0xff]   ;;  %v746_v26 = vor.u32 %v745_v23, %v741_v22 }
  0x53   : > { %1178 = vmatprep.subr.bf16.mxu1 %v1691_v27  ;;  %v1004_v27 = vor.u32 %v1003_v21, %v999_v20 }
  0x55   : > { %921 = vmatpush1.bf16.msra.mxu0 %v1686_v28 }
  0x56   : > { %1179 = vmatpush1.bf16.msra.mxu1 %v1689_v29  ;;  %922 = vmatprep.subr.bf16.mxu0 %v1694_v30 }
  0x57   : > { %1180 = vmatprep.subr.bf16.mxu1 %v1697_v31 }
  0x59   : > { %923 = vmatpush1.bf16.msra.mxu0 %v1692_v32 }
  0x5a   : > { %1181 = vmatpush1.bf16.msra.mxu1 %v1695_v33  ;;  %924 = vmatprep.subr.bf16.mxu0 %v1700_v34 }
  0x5b   : > { %1182 = vmatprep.subr.bf16.mxu1 %v1703_v35 }
  0x5d   : > { %925 = vmatpush1.bf16.msra.mxu0 %v1698_v36 }
  0x5e   : > { %1183 = vmatpush1.bf16.msra.mxu1 %v1701_v37  ;;  %926 = vmatprep.subr.bf16.mxu0 %v1706_v38  ;;  %v1219_v37 = vlaneseq }
  0x5f   : > { %1184 = vmatprep.subr.bf16.mxu1 %v1709_v39 }
  0x60   : > { %v1220_v38 = vshrl.u32 %v1219_v37, 7 }
  0x61   : > { %927 = vmatpush1.bf16.msra.mxu0 %v1704_v40 }
  0x62   : > { %1185 = vmatpush1.bf16.msra.mxu1 %v1707_v41  ;;  %928 = vmatprep.subr.bf16.mxu0 %v1712_v42  ;;  %v1221_v39 = vsub.s32 0, %v1220_v38  ;;  %v1225_v40 = vsub.s32 1, %v1220_v38 }
  0x63   : > { %1186 = vmatprep.subr.bf16.mxu1 %v1715_v43  ;;  %v1217_v43 = vld [vmem:[%s2249_s3] sm:$0x3] }
  0x65   : > { %929 = vmatpush1.bf16.msra.mxu0 %v1710_v44 }
  0x66   : > { %1187 = vmatpush1.bf16.msra.mxu1 %v1713_v45  ;;  %930 = vmatprep.subr.bf16.mxu0 %v1718_v46 }
  0x67   : > { %1188 = vmatprep.subr.bf16.mxu1 %v1721_v47 }
  0x69   : > { %931 = vmatpush1.bf16.msra.mxu0 %v1716_v48 }
  0x6a   : > { %1189 = vmatpush1.bf16.msra.mxu1 %v1719_v49  ;;  %932 = vmatprep.subr.bf16.mxu0 %v1724_v50  ;;  %v1222_v49 = vrot.slane %v1217_v43, %v1221_v39 }
  0x6b   : > { %1190 = vmatprep.subr.bf16.mxu1 %v1727_v51  ;;  %v1226_v51 = vrot.slane %v1217_v43, %v1225_v40 }
  0x6d   : > { %933 = vmatpush2.bf16.msra.mxu0 %v1722_v52 }
  0x6e   : > { %1191 = vmatpush2.bf16.msra.mxu1 %v1725_v53  ;;  %934 = vmatprep.subr.bf16.mxu0 %v1730_v54 }
  0x6f   : > { %1192 = vmatprep.subr.bf16.mxu1 %v1733_v55 }
  0x71   : > { %935 = vmatpush2.bf16.msra.mxu0 %v1728_v56 }
  0x72   : > { %1193 = vmatpush2.bf16.msra.mxu1 %v1731_v57  ;;  %936 = vmatprep.subr.bf16.mxu0 %v1736_v60 }
  0x73   : > { %1194 = vmatprep.subr.bf16.mxu1 %v1739_v61 }
  0x75   : > { %937 = vmatpush2.bf16.msra.mxu0 %v1734_v62 }
  0x76   : > { %1195 = vmatpush2.bf16.msra.mxu1 %v1737_v63  ;;  %938 = vmatprep.subr.bf16.mxu0 %v1742_v0 }
  0x77   : > { %1196 = vmatprep.subr.bf16.mxu1 %v1745_v1 }
  0x79   : > { %939 = vmatpush2.bf16.msra.mxu0 %v1740_v2 }
  0x7a   : > { %1197 = vmatpush2.bf16.msra.mxu1 %v1743_v3  ;;  %940 = vmatprep.subr.bf16.mxu0 %v1748_v4 }
  0x7b   : > { %1198 = vmatprep.subr.bf16.mxu1 %v1751_v5 }
  0x7d   : > { %941 = vmatpush2.bf16.msra.mxu0 %v1746_v6 }
  0x7e   : > { %1199 = vmatpush2.bf16.msra.mxu1 %v1749_v7  ;;  %942 = vmatprep.subr.bf16.mxu0 %v1754_v8 }
  0x7f   : > { %1200 = vmatprep.subr.bf16.mxu1 %v1757_v9 }
  0x81   : > { %943 = vmatpush2.bf16.msra.mxu0 %v1752_v12 }
  0x82   : > { %1201 = vmatpush2.bf16.msra.mxu1 %v1755_v13  ;;  %944 = vmatprep.subr.bf16.mxu0 %v1760_v14 }
  0x83   : > { %1202 = vmatprep.subr.bf16.mxu1 %v1763_v58 }
  0x85   : > { %945 = vmatpush2.bf16.msra.mxu0 %v1758_v16 }
  0x86   : > { %1203 = vmatpush2.bf16.msra.mxu1 %v1761_v17  ;;  %946 = vmatprep.subr.bf16.mxu0 %v1766_v18 }
  0x87   : > { %1204 = vmatprep.subr.bf16.mxu1 %v1769_v19 }
  0x89   : > { %947 = vmatpush2.bf16.msra.mxu0 %v1764_v24 }
  0x8a   : > { %1205 = vmatpush2.bf16.msra.mxu1 %v1767_v25 }
  0x8c   : > { %949 = vmatmul.mubr.bf16.vlgmr.msra.gmra.mxu0 %v746_v26 }
  0x8d   : > { %1207 = vmatmul.mubr.bf16.vlgmr.msra.gmra.mxu1 %v1004_v27 }
 0x10c   : > { %v486_v28 = vpop.f32.mrf.mxu0 }
 0x10d   : > { %v694_v29 = vpop.f32.mrf.mxu1 }
 0x10e   : > { %v695_v30 = vadd.f32 %v694_v29, %v486_v28  ;;  %v488_v31 = vpop.f32.mrf.mxu0 }
 0x10f   : > { %v696_v32 = vpop.f32.mrf.mxu1 }
 0x110   : > { %v490_v33 = vpop.f32.mrf.mxu0  ;;  %v697_v44 = vadd.f32 %v696_v32, %v488_v31 }
 0x111   : > { %v698_v34 = vpop.f32.mrf.mxu1 }
 0x112   : > { %v491_v35 = vpop.f32.mrf.mxu0 }
 0x113   : > { %v699_v36 = vpop.f32.mrf.mxu1 }
 0x14c   : > { %v950_v41 = vpop.f32.mrf.mxu0 }
 0x14d   : > { %v1208_v42 = vpop.f32.mrf.mxu1  ;;  %v957_v45 = vadd.f32 %v950_v41, %v695_v30 }
 0x14e   : > { %v952_v46 = vpop.f32.mrf.mxu0 }
 0x14f   : > { %v1210_v47 = vpop.f32.mrf.mxu1  ;;  %v1215_v48 = vadd.f32 %v1208_v42, %v957_v45  ;;  %v958_v50 = vadd.f32 %v952_v46, %v697_v44 }
 0x150   : > { %v954_v52 = vpop.f32.mrf.mxu0 }
 0x151   : > { %v1212_v53 = vpop.f32.mrf.mxu1  ;;  %v1216_v54 = vadd.f32 %v1210_v47, %v958_v50  ;;  %v1229_v57 = vadd.f32 %v1222_v49, %v1215_v48 }
 0x152   : > { %v955_v55 = vpop.f32.mrf.mxu0 }
 0x153   : > { %v1213_v56 = vpop.f32.mrf.mxu1  ;;  %v1230_v60 = vadd.f32 %v1226_v51, %v1216_v54 }
 0x155   : > { %v1555_v61 = vpack.c.bf16 %v1230_v60, %v1229_v57 }
 0x157   : > { %1556 = vst.sshfl [vmem:[%s217_s21] sm:$0x33 pattern:$0x76325410] %v1555_v61 }
 0x158 PF: > { %s14_s15 = sadd.s32 1, %s1776_s15  }
 0x159   : > { %p11_p4 = scmp.ge.s32.totalorder %s14_s15, 4  }
 0x15b   :  { %13 = sbr.rel (!%p11_p4) target bundleno = 1 (0x1), region = 72 }

// kernel: forward.13
= control target key start
LH: loop header
LB: loop body
LE: loop exit
PB: predicated region body
PF: predicated region fallthrough
CT: control target
= control target key end

     0   :  { %8 = vsyncpa [#allocation3], 0  ;;  %s1759_s0 = inlined_call_operand.vmem [shape: bf16[2,6,256], index: 0, kind: input, shape index: {}]   ;;  %s1760_s1 = inlined_call_operand.vmem [shape: bf16[3,256,32], index: 1, kind: input, shape index: {}]   ;;  %s1761_s2 = inlined_call_operand.vmem [shape: f32[1,32], index: 2, kind: input, shape index: {}]   ;;  %s1762_s3 = inlined_call_operand.hbm [shape: f32[2,1,4], index: 3, kind: output, shape index: {}]  }
   0x1   :  { %10 = vsyncpa [#allocation3 + $0x1], 0  ;;  %s1434_s12 = smov 0   ;;  %s1436_s13 = smov 0  }
   0x2   :  { %s1438_s14 = smov 0   ;;  %s1440_s15 = smov 0  }
   0x3 LB: > { %s1455_s16 = sadd.s32 4294967295, %s1410_s15   ;;  %s1057_s17 = sadd.s32 4294967294, %s1410_s15   ;;  %s1410_s15 = sphi %s1440_s15, %s1768_s15   ;;  %s1406_s14 = sphi %s1438_s14, %s1767_s14   ;;  %s1402_s13 = sphi %s1436_s13, %s1766_s13   ;;  %s1398_s12 = sphi %s1434_s12, %s1765_s12  }
   0x4   : > { %s1459_s18 = sadd.s32 1, %s1410_s15   ;;  %s91_s19 = sadd.s32 1, %s1406_s14 }
   0x5   : > { %s88_s20 = ssub.s32 %s1410_s15, %s1459_s18  ;;  %p101_p0 = scmp.ne.s32.totalorder %s1406_s14, %s1402_s13 }
   0x6   : > { %p89_p1 = scmp.eq.s32.totalorder %s88_s20, 0  ;;  %p102_p2 = scmp.eq.s32.totalorder %s1455_s16, 1 }
   0x7   : > { %p107_p3 = scmp.ne.s32.totalorder %s1402_s13, %s1398_s12  ;;  %p108_p4 = scmp.eq.s32.totalorder %s1057_s17, 1 }
   0x8   : > { %s1470_s21 = scalar_select %p89_p1, %s1406_s14, %s91_s19  }
   0x9   : > { %p1472_p5 = por %p102_p2, %p101_p0  ;;  %p1476_p6 = por %p108_p4, %p107_p3 }
   0xa   : > { %p1060_p7 = scmp.ge.s32.totalorder %s1410_s15, 1  ;;  %p140_p8 = scmp.lt.s32.totalorder %s1410_s15, 3 }
   0xc   : > { %p141_p9 = pnand %p1060_p7, %p140_p8 }
   0xd   : > { %p163_p10 = scmp.lt.s32.totalorder (!%p141_p9), %s1455_s16, 1  ;;  %s161_s11 = sand.u32 (!%p141_p9), 1, %s1402_s13  }
   0xe   : > { %144 = sbr.rel (%p141_p9) target bundleno = 896 (0x380), region = 32  ;;  %s1186_s17 = sshll.u32 (!%p141_p9), %s1455_s16, 4 }
   0xf   : > { %s162_s19 = scalar_lea.vmem (!%p141_p9), [#allocation2], %s161_s11  ;;  %s990_s26 = scalar_lea.sflag (!%p141_p9), [#allocation3], %s161_s11 }
  0x10   : > { %s1002_s20 = sshll.u32 (!%p141_p9), %s162_s19, 4  ;;  %s1413_s28 = smov (!%p141_p9), [#allocation2]   ;;  %s1003_s20 = int_to_ptr.vmem [resolvable:$true] %s1002_s20 }
  0x11   : > { %s1350_s27 = scalar_lea.vmem (!%p141_p9), %s1003_s20, 16 }
  0x12   : > { %p1351_p11 = scmp.ne.s32.totalorder (!%p141_p9), %s1003_s20, %s1350_s27 }
  0x13   : > { %v1296_v0 = vld [vmem:[%s1760_s1 + $0xf8] sm:$0xff]   ;;  %v1300_v4 = vld [vmem:[%s1760_s1 + $0xf0] sm:$0xff]   ;;  %v1304_v8 = vld [vmem:[%s1760_s1 + $0xe8] sm:$0xff]   ;;  %s164_s7 = scalar_select %p163_p10, %s1455_s16, 1  ;;  %vm735_vm10 = vcmask 257024   ;;  %vm764_vm11 = vcmask 261120  }
  0x14   : > { %v1297_v1 = vld [vmem:[%s1760_s1 + $0x78] sm:$0xff]   ;;  %1190 = vmatprep.subr.bf16.mxu0 %v1296_v0  ;;  %v1301_v5 = vld [vmem:[%s1760_s1 + $0x70] sm:$0xff]   ;;  %v1305_v9 = vld [vmem:[%s1760_s1 + $0x68] sm:$0xff]   ;;  %p1352_p12 = pnand %p1351_p11, %p1472_p5  ;;  %s1354_s16 = sshll.u32 %s1413_s28, 4  ;;  %s1355_s16 = int_to_ptr.vmem [resolvable:$false] %s1354_s16 }
  0x15   : > { %v1298_v2 = vld [vmem:[%s1760_s1 + $0xb8] sm:$0xff]   ;;  %1212 = vmatprep.subr.bf16.mxu1 %v1297_v1  ;;  %v1302_v6 = vld [vmem:[%s1760_s1 + $0xb0] sm:$0xff]   ;;  %v1306_v10 = vld [vmem:[%s1760_s1 + $0xa8] sm:$0xff]   ;;  %s1189_s25 = sshll.u32 %s164_s7, 3  ;;  %s1356_s29 = scalar_lea.vmem %s1355_s16, 32 }
  0x16   : > { %v1299_v3 = vld [vmem:[%s1760_s1 + $0x38] sm:$0xff]   ;;  %1191 = vmatpush3.bf16.msra.mxu0 %v1298_v2  ;;  %v1303_v7 = vld [vmem:[%s1760_s1 + $0x30] sm:$0xff]   ;;  %v1307_v11 = vld [vmem:[%s1760_s1 + $0x28] sm:$0xff]   ;;  %s1577_s8 = scalar_lea.vmem %s1759_s0, %s1189_s25  ;;  %s1000_s25 = scalar_lea.hbm %s1762_s3, %s1186_s17 }
  0x17   : > { %1213 = vmatpush3.bf16.msra.mxu1 %v1299_v3  ;;  %1192 = vmatprep.subr.bf16.mxu0 %v1300_v4  ;;  %v1308_v12 = vld [vmem:[%s1760_s1 + $0xe0] sm:$0xff]   ;;  %v1312_v16 = vld [vmem:[%s1760_s1 + $0xd8] sm:$0xff]   ;;  %v1316_v20 = vld [vmem:[%s1760_s1 + $0xd0] sm:$0xff]   ;;  %p1353_p13 = pneg %p1352_p12  ;;  %p1357_p0 = scmp.lt.s32.totalorder %s1003_s20, %s1355_s16 }
  0x18   : > { %1214 = vmatprep.subr.bf16.mxu1 %v1301_v5  ;;  %v1309_v13 = vld [vmem:[%s1760_s1 + $0x60] sm:$0xff]   ;;  %v1313_v17 = vld [vmem:[%s1760_s1 + $0x58] sm:$0xff]   ;;  %v1317_v21 = vld [vmem:[%s1760_s1 + $0x50] sm:$0xff]   ;;  %p1358_p1 = scmp.lt.s32.totalorder %s1356_s29, %s1350_s27 }
  0x19   : > { %v1310_v14 = vld [vmem:[%s1760_s1 + $0xa0] sm:$0xff]   ;;  %v1314_v18 = vld [vmem:[%s1760_s1 + $0x98] sm:$0xff]   ;;  %v1318_v22 = vld [vmem:[%s1760_s1 + $0x90] sm:$0xff]  }
  0x1a   : > { %1193 = vmatpush3.bf16.msra.mxu0 %v1302_v6  ;;  %v1311_v15 = vld [vmem:[%s1760_s1 + $0x20] sm:$0xff]   ;;  %v1315_v19 = vld [vmem:[%s1760_s1 + $0x18] sm:$0xff]   ;;  %v1319_v23 = vld [vmem:[%s1760_s1 + $0x10] sm:$0xff]   ;;  %p1359_p2 = por %p1358_p1, %p1357_p0 }
  0x1b   : > { %1215 = vmatpush3.bf16.msra.mxu1 %v1303_v7  ;;  %1194 = vmatprep.subr.bf16.mxu0 %v1304_v8  ;;  %v1320_v24 = vld [vmem:[%s1760_s1 + $0xc8] sm:$0xff]   ;;  %v1324_v28 = vld [vmem:[%s1760_s1 + $0xc0] sm:$0xff]   ;;  %v1332_v38 = vld [vmem:[%s1760_s1 + $0x178] sm:$0xff]  }
  0x1c   : > { %1216 = vmatprep.subr.bf16.mxu1 %v1305_v9  ;;  %v1321_v25 = vld [vmem:[%s1760_s1 + $0x48] sm:$0xff]   ;;  %v1325_v29 = vld [vmem:[%s1760_s1 + $0x40] sm:$0xff]   ;;  %v1333_v47 = vld [vmem:[%s1760_s1 + $0x138] sm:$0xff]   ;;  %p1360_p3 = pnand %p1359_p2, %p1353_p13 }
  0x1d   : > { %v1322_v26 = vld [vmem:[%s1760_s1 + $0x88] sm:$0xff]   ;;  %v1326_v30 = vld [vmem:[%s1760_s1 + $0x80] sm:$0xff]   ;;  %v1334_v48 = vld [vmem:[%s1760_s1 + $0x170] sm:$0xff]  }
  0x1e   : > { %1195 = vmatpush3.bf16.msra.mxu0 %v1306_v10  ;;  %v1323_v27 = vld [vmem:[%s1760_s1 + $0x8] sm:$0xff]   ;;  %v1327_v31 = vld [vmem:[%s1760_s1] sm:$0xff]   ;;  %v1335_v49 = vld [vmem:[%s1760_s1 + $0x130] sm:$0xff]  }
  0x1f   : > { %1217 = vmatpush3.bf16.msra.mxu1 %v1307_v11  ;;  %1196 = vmatprep.subr.bf16.mxu0 %v1308_v12  ;;  %v202_v32 = vld [vmem:[%s1577_s8] sm:$0x77]  ;;  %v1336_v50 = vld [vmem:[%s1760_s1 + $0x168] sm:$0xff]   ;;  %v1340_v56 = vld [vmem:[%s1760_s1 + $0x158] sm:$0xff]   ;;  %v725_v11 = vlaneseq }
  0x20   : > { %1218 = vmatprep.subr.bf16.mxu1 %v1309_v13  ;;  %v169_v33 = vld [vmem:[%s1577_s8] sm:$0x33]  ;;  %v1095_v34 = vcombine.low %v202_v32, %v202_v32  ;;  %v1096_v35 = vcombine.high %v202_v32, %v202_v32  ;;  %v1337_v51 = vld [vmem:[%s1760_s1 + $0x128] sm:$0xff]   ;;  %v1341_v58 = vld [vmem:[%s1760_s1 + $0x118] sm:$0xff]  }
  0x21   : > { %v1113_v36 = vcombine.low %v169_v33, %v169_v33  ;;  %v1114_v37 = vcombine.high %v169_v33, %v169_v33  ;;  %v1338_v52 = vld [vmem:[%s1760_s1 + $0x160] sm:$0xff]   ;;  %v1342_v59 = vld [vmem:[%s1760_s1 + $0x150] sm:$0xff]   ;;  %v1344_v61 = vld [vmem:[%s1760_s1 + $0x148] sm:$0xff]  }
  0x22   : > { %1197 = vmatpush3.bf16.msra.mxu0 %v1310_v14  ;;  %v249_v39 = vshrl.u32 %v1096_v35, 16  ;;  %v251_v40 = vshll.u32 %v1096_v35, 16  ;;  %v242_v41 = vshrl.u32 %v1095_v34, 16  ;;  %v244_v42 = vshll.u32 %v1095_v34, 16  ;;  %v536_v53 = vld [vmem:[%s1577_s8] sm:$0x66] }
  0x23   : > { %1219 = vmatpush3.bf16.msra.mxu1 %v1311_v15  ;;  %1198 = vmatprep.subr.bf16.mxu0 %v1312_v16  ;;  %v1164_v54 = vcombine.high %v536_v53, %v536_v53  ;;  %v1339_v55 = vld [vmem:[%s1760_s1 + $0x120] sm:$0xff]   ;;  %v1343_v60 = vld [vmem:[%s1760_s1 + $0x110] sm:$0xff]   ;;  %v1345_v62 = vld [vmem:[%s1760_s1 + $0x108] sm:$0xff]   ;;  %v1163_v0 = vcombine.low %v536_v53, %v536_v53  ;;  %v1636_v14 = vand.u32 127, %v725_v11  ;;  %v1655_v53 = vshrl.u32 %v725_v11, 7 }
  0x24   : > { %1220 = vmatprep.subr.bf16.mxu1 %v1313_v17  ;;  %528 = vmatprep.mubr.bf16.mxu1 %v1114_v37  ;;  %v253_v43 = vrot.slane %v251_v40, 1  ;;  %v246_v44 = vrot.slane %v244_v42, 1  ;;  %v1346_v63 = vld [vmem:[%s1760_s1 + $0x140] sm:$0xff]  }
  0x25   : > { %v576_v57 = vrot.slane %v1164_v54, 1  ;;  %v1347_v1 = vld [vmem:[%s1760_s1 + $0x100] sm:$0xff]   ;;  %v575_v2 = vrot.slane %v1163_v0, 1  ;;  %vm859_vm0 = vcmp.ge.s32.totalorder %v1636_v14, 16  ;;  %vm860_vm1 = vcmp.lt.s32.totalorder %v1636_v14, 24 }
  0x26   : > { %1199 = vmatpush3.bf16.msra.mxu0 %v1314_v18  ;;  %v254_v45 = vor.u32 %v253_v43, %v249_v39  ;;  %v247_v46 = vor.u32 %v246_v44, %v242_v41  ;;  %vm923_vm2 = vcmp.ge.s32.totalorder %v1636_v14, 24  ;;  %vm924_vm3 = vcmp.lt.s32.totalorder %v1636_v14, 32  ;;  %vm861_vm6 = vmand %vm859_vm0, %vm860_vm1 }
  0x27   : > { %1221 = vmatpush3.bf16.msra.mxu1 %v1315_v19  ;;  %1200 = vmatprep.subr.bf16.mxu0 %v1316_v20  ;;  %v1181_v19 = vld [vmem:[%s1761_s2] ss:$0 sm:$0xff]  ;;  %vm795_vm4 = vcmp.ge.s32.totalorder %v1636_v14, 8  ;;  %vm796_vm5 = vcmp.lt.s32.totalorder %v1636_v14, 16  ;;  %vm925_vm7 = vmand %vm923_vm2, %vm924_vm3  ;;  %vm730_vm8 = vcmp.lt.s32.totalorder %v1636_v14, 8 }
  0x28   : > { %1222 = vmatprep.subr.bf16.mxu1 %v1317_v21  ;;  %385 = vmatprep.mubr.bf16.mxu0 %v254_v45  ;;  %vm797_vm9 = vmand %vm795_vm4, %vm796_vm5 }
  0x2a   : > { %1201 = vmatpush3.bf16.msra.mxu0 %v1318_v22 }
  0x2b   : > { %1223 = vmatpush3.bf16.msra.mxu1 %v1319_v23  ;;  %1202 = vmatprep.subr.bf16.mxu0 %v1320_v24 }
  0x2c   : > { %1224 = vmatprep.subr.bf16.mxu1 %v1321_v25 }
  0x2e   : > { %1203 = vmatpush3.bf16.msra.mxu0 %v1322_v26 }
  0x2f   : > { %1225 = vmatpush3.bf16.msra.mxu1 %v1323_v27  ;;  %1204 = vmatprep.subr.bf16.mxu0 %v1324_v28 }
  0x30   : > { %1226 = vmatprep.subr.bf16.mxu1 %v1325_v29 }
  0x32   : > { %1205 = vmatpush3.bf16.msra.mxu0 %v1326_v30 }
  0x33   : > { %1227 = vmatpush3.bf16.msra.mxu1 %v1327_v31  ;;  %1234 = vmatprep.subr.bf16.mxu0 %v1332_v38 }
  0x35   : > { %386 = vmatmul.mubr.bf16.vlgmr.msra.gmra.mxu0 %v247_v46 }
  0x36   : > { %529 = vmatmul.mubr.bf16.vlgmr.msra.gmra.mxu1 %v1113_v36  ;;  %1235 = vmatpush3.bf16.msra.mxu0 %v1333_v47 }
  0x37   : > { %1236 = vmatprep.subr.bf16.mxu0 %v1334_v48  ;;  %707 = vmatprep.mubr.bf16.mxu0 %v576_v57 }
  0x3a   : > { %1237 = vmatpush3.bf16.msra.mxu0 %v1335_v49 }
  0x3b   : > { %1238 = vmatprep.subr.bf16.mxu0 %v1336_v50 }
  0x3e   : > { %1239 = vmatpush3.bf16.msra.mxu0 %v1337_v51 }
  0x3f   : > { %1240 = vmatprep.subr.bf16.mxu0 %v1338_v52 }
  0x42   : > { %1241 = vmatpush3.bf16.msra.mxu0 %v1339_v55 }
  0x43   : > { %1242 = vmatprep.subr.bf16.mxu0 %v1340_v56 }
  0x46   : > { %1243 = vmatpush3.bf16.msra.mxu0 %v1341_v58 }
  0x47   : > { %1244 = vmatprep.subr.bf16.mxu0 %v1342_v59 }
  0x4a   : > { %1245 = vmatpush3.bf16.msra.mxu0 %v1343_v60 }
  0x4b   : > { %1246 = vmatprep.subr.bf16.mxu0 %v1344_v61 }
  0x4e   : > { %1247 = vmatpush3.bf16.msra.mxu0 %v1345_v62 }
  0x4f   : > { %1248 = vmatprep.subr.bf16.mxu0 %v1346_v63 }
  0x52   : > { %1249 = vmatpush3.bf16.msra.mxu0 %v1347_v1 }
  0x55   : > { %708 = vmatmul.mubr.bf16.vlgmr.msra.gmra.mxu0 %v575_v2 }
  0xf5   : > { %v1206_v6 = vpop.f32.mrf.mxu0 }
  0xf6   : > { %v1228_v3 = vpop.f32.mrf.mxu1 }
  0xf7   : > { %v1207_v8 = vpop.f32.mrf.mxu0 }
  0xf8   : > { %v1229_v4 = vpop.f32.mrf.mxu1  ;;  %v1208_v12 = vadd.f32 %v1207_v8, %v1206_v6 }
  0xf9   : > { %v1209_v9 = vpop.f32.mrf.mxu0  ;;  %v1230_v13 = vadd.f32 %v1229_v4, %v1228_v3 }
  0xfa   : > { %v1231_v5 = vpop.f32.mrf.mxu1 }
  0xfb   : > { %v1210_v10 = vpop.f32.mrf.mxu0  ;;  %v531_v17 = vadd.f32 %v1230_v13, %v1208_v12 }
  0xfc   : > { %v1232_v7 = vpop.f32.mrf.mxu1 }
 0x115   : > { %v1250_v15 = vpop.f32.mrf.mxu0 }
 0x117   : > { %v1251_v16 = vpop.f32.mrf.mxu0 }
 0x118   : > { %v1252_v18 = vadd.f32 %v1251_v16, %v1250_v15 }
 0x119   : > { %v1253_v20 = vpop.f32.mrf.mxu0 }
 0x11a   : > { %v715_v21 = vadd.f32 %v1252_v18, %v531_v17 }
 0x11b   : > { %v1254_v22 = vpop.f32.mrf.mxu0 }
 0x11c   : > { %v1647_v23 = vadd.f32 %v1181_v19, %v715_v21 }
 0x11e   : > { %v724_v24 = vand.u32 2147483647, %v1647_v23 }
 0x120   : > { %v864_v25 = vsel %vm861_vm6, %v724_v24, -1.0  ;;  %v734_v26 = vsel %vm730_vm8, %v724_v24, -1.0  ;;  %v928_v27 = vsel %vm925_vm7, %v724_v24, -1.0  ;;  %v800_v28 = vsel %vm797_vm9, %v724_v24, -1.0 }
 0x121   : > { %v865_v29 = vsel %vm735_vm10, %v864_v25, -inf  ;;  %v736_v30 = vsel %vm735_vm10, %v734_v26, -inf  ;;  %v929_v31 = vsel %vm735_vm10, %v928_v27, -inf  ;;  %v801_v32 = vsel %vm735_vm10, %v800_v28, -inf }
 0x122   : > { %v866_v33 = vrot.slane %v865_v29, 4  ;;  %v737_v34 = vrot.slane %v736_v30, 4  ;;  %v930_v35 = vrot.slane %v929_v31, 4  ;;  %v802_v36 = vrot.slane %v801_v32, 4 }
 0x124   : > { %v867_v37 = vmax.f32 %v865_v29, %v866_v33  ;;  %v738_v38 = vmax.f32 %v736_v30, %v737_v34  ;;  %v931_v39 = vmax.f32 %v929_v31, %v930_v35  ;;  %v803_v40 = vmax.f32 %v801_v32, %v802_v36 }
 0x126   : > { %v868_v41 = vrot.slane %v867_v37, 2  ;;  %v739_v42 = vrot.slane %v738_v38, 2  ;;  %v932_v43 = vrot.slane %v931_v39, 2  ;;  %v804_v44 = vrot.slane %v803_v40, 2 }
 0x128   : > { %v869_v45 = vmax.f32 %v867_v37, %v868_v41  ;;  %v740_v46 = vmax.f32 %v738_v38, %v739_v42  ;;  %v933_v47 = vmax.f32 %v931_v39, %v932_v43  ;;  %v805_v48 = vmax.f32 %v803_v40, %v804_v44 }
 0x12a   : > { %v870_v49 = vrot.slane %v869_v45, 1  ;;  %v741_v50 = vrot.slane %v740_v46, 1  ;;  %v934_v51 = vrot.slane %v933_v47, 1  ;;  %v806_v52 = vrot.slane %v805_v48, 1 }
 0x12c   : > { %v1657_v54 = vmax.f32 %v869_v45, %v870_v49  ;;  %v1659_v55 = vmax.f32 %v740_v46, %v741_v50  ;;  %v1661_v56 = vmax.f32 %v933_v47, %v934_v51  ;;  %v1663_v57 = vmax.f32 %v805_v48, %v806_v52 }
 0x12e   : > { %v893_v58 = vsel %vm764_vm11, %v1657_v54, -inf  ;;  %vm872_vm12 = vcmp.eq.f32.partialorder %v864_v25, %v1657_v54  ;;  %v765_v59 = vsel %vm764_vm11, %v1659_v55, -inf  ;;  %vm743_vm13 = vcmp.eq.f32.partialorder %v734_v26, %v1659_v55 }
 0x12f   : > { %894 = vmax.xlane.f32.xlu1 %v893_v58  ;;  %v873_v60 = vsel %vm872_vm12, %v1655_v53, 4  ;;  %766 = vmax.xlane.f32.xlu0 %v765_v59  ;;  %v744_v61 = vsel %vm743_vm13, %v1655_v53, 4  ;;  %vm936_vm14 = vcmp.eq.f32.partialorder %v928_v27, %v1661_v56  ;;  %vm808_vm15 = vcmp.eq.f32.partialorder %v800_v28, %v1663_v57 }
 0x130   : > { %v874_v62 = vsel %vm735_vm10, %v873_v60, 2147483647  ;;  %v745_v63 = vsel %vm735_vm10, %v744_v61, 2147483647  ;;  %v937_v0 = vsel %vm936_vm14, %v1655_v53, 4  ;;  %v809_v4 = vsel %vm808_vm15, %v1655_v53, 4 }
 0x131   : > { %v875_v1 = vrot.slane %v874_v62, 4  ;;  %v746_v2 = vrot.slane %v745_v63, 4  ;;  %v938_v3 = vsel %vm735_vm10, %v937_v0, 2147483647  ;;  %v957_v6 = vsel %vm764_vm11, %v1661_v56, -inf }
 0x132   : > { %v939_v5 = vrot.slane %v938_v3, 4  ;;  %v810_v7 = vsel %vm735_vm10, %v809_v4, 2147483647  ;;  %v829_v8 = vsel %vm764_vm11, %v1663_v57, -inf }
 0x133   : > { %vm876_vm0 = vcmp.lt.s32.totalorder %v874_v62, %v875_v1  ;;  %vm747_vm1 = vcmp.lt.s32.totalorder %v745_v63, %v746_v2  ;;  %958 = vmax.xlane.f32.xlu1 %v957_v6  ;;  %v811_v9 = vrot.slane %v810_v7, 4  ;;  %830 = vmax.xlane.f32.xlu0 %v829_v8 }
 0x134   : > { %v877_v10 = vsel %vm876_vm0, %v874_v62, %v875_v1  ;;  %v748_v11 = vsel %vm747_vm1, %v745_v63, %v746_v2  ;;  %vm940_vm2 = vcmp.lt.s32.totalorder %v938_v3, %v939_v5 }
 0x135   : > { %v878_v12 = vrot.slane %v877_v10, 2  ;;  %v749_v13 = vrot.slane %v748_v11, 2  ;;  %v941_v15 = vsel %vm940_vm2, %v938_v3, %v939_v5  ;;  %vm812_vm3 = vcmp.lt.s32.totalorder %v810_v7, %v811_v9 }
 0x136   : > { %v942_v16 = vrot.slane %v941_v15, 2  ;;  %v813_v17 = vsel %vm812_vm3, %v810_v7, %v811_v9 }
 0x137   : > { %vm879_vm4 = vcmp.lt.s32.totalorder %v877_v10, %v878_v12  ;;  %vm750_vm5 = vcmp.lt.s32.totalorder %v748_v11, %v749_v13  ;;  %v814_v18 = vrot.slane %v813_v17, 2 }
 0x138   : > { %v751_v19 = vsel %vm750_vm5, %v748_v11, %v749_v13  ;;  %v880_v20 = vsel %vm879_vm4, %v877_v10, %v878_v12  ;;  %vm943_vm6 = vcmp.lt.s32.totalorder %v941_v15, %v942_v16 }
 0x139   : > { %v752_v21 = vrot.slane %v751_v19, 1  ;;  %vm815_vm7 = vcmp.lt.s32.totalorder %v813_v17, %v814_v18  ;;  %v881_v22 = vrot.slane %v880_v20, 1  ;;  %v944_v24 = vsel %vm943_vm6, %v941_v15, %v942_v16 }
 0x13a   : > { %v816_v25 = vsel %vm815_vm7, %v813_v17, %v814_v18  ;;  %v945_v26 = vrot.slane %v944_v24, 1 }
 0x13b   : > { %vm753_vm8 = vcmp.lt.s32.totalorder %v751_v19, %v752_v21  ;;  %v817_v27 = vrot.slane %v816_v25, 1  ;;  %vm882_vm9 = vcmp.lt.s32.totalorder %v880_v20, %v881_v22 }
 0x13c   : > { %v754_v28 = vsel %vm753_vm8, %v751_v19, %v752_v21  ;;  %v883_v29 = vsel %vm882_vm9, %v880_v20, %v881_v22  ;;  %vm946_vm12 = vcmp.lt.s32.totalorder %v944_v24, %v945_v26 }
 0x13d   : > { %vm755_vm13 = vcmp.eq.s32.totalorder %v1655_v53, %v754_v28  ;;  %vm818_vm14 = vcmp.lt.s32.totalorder %v816_v25, %v817_v27  ;;  %vm884_vm15 = vcmp.eq.s32.totalorder %v1655_v53, %v883_v29  ;;  %v947_v30 = vsel %vm946_vm12, %v944_v24, %v945_v26 }
 0x13e   : > { %v756_v31 = vsel %vm755_vm13, %v1647_v23, 0.0  ;;  %v819_v32 = vsel %vm818_vm14, %v816_v25, %v817_v27  ;;  %v885_v33 = vsel %vm884_vm15, %v1647_v23, 0.0  ;;  %vm948_vm0 = vcmp.eq.s32.totalorder %v1655_v53, %v947_v30 }
 0x13f   : > { %v757_v34 = vsel %vm735_vm10, %v756_v31, 0.0  ;;  %vm820_vm1 = vcmp.eq.s32.totalorder %v1655_v53, %v819_v32  ;;  %v886_v35 = vsel %vm735_vm10, %v885_v33, 0.0  ;;  %v949_v36 = vsel %vm948_vm0, %v1647_v23, 0.0 }
 0x140   : > { %v821_v37 = vsel %vm820_vm1, %v1647_v23, 0.0  ;;  %v1696_v38 = vsel %vm735_vm10, %v949_v36, 0.0  ;;  %v758_v11 = vrot.slane %v757_v34, 4  ;;  %v887_v12 = vrot.slane %v886_v35, 4 }
 0x141   : > { %v822_v39 = vsel %vm735_vm10, %v821_v37, 0.0  ;;  %v951_v17 = vrot.slane %v1696_v38, 4  ;;  %vm790_vm15 = vcmp.eq.s32.totalorder %v1636_v14, 0  ;;  %vm854_vm0 = vcmp.eq.s32.totalorder %v1636_v14, 1 }
 0x142   : > { %v759_v13 = vadd.f32 %v758_v11, %v757_v34  ;;  %v823_v15 = vrot.slane %v822_v39, 4  ;;  %v888_v16 = vadd.f32 %v887_v12, %v886_v35  ;;  %vm918_vm1 = vcmp.eq.s32.totalorder %v1636_v14, 2 }
 0x143   : > { %v952_v21 = vadd.f32 %v951_v17, %v1696_v38 }
 0x144   : > { %v760_v18 = vrot.slane %v759_v13, 2  ;;  %v824_v19 = vadd.f32 %v823_v15, %v822_v39  ;;  %v889_v20 = vrot.slane %v888_v16, 2 }
 0x145   : > { %v953_v27 = vrot.slane %v952_v21, 2 }
 0x146   : > { %v761_v22 = vadd.f32 %v760_v18, %v759_v13  ;;  %v825_v24 = vrot.slane %v824_v19, 2  ;;  %v890_v26 = vadd.f32 %v889_v20, %v888_v16 }
 0x147   : > { %v954_v37 = vadd.f32 %v953_v27, %v952_v21 }
 0x148   : > { %v762_v31 = vrot.slane %v761_v22, 1  ;;  %v826_v32 = vadd.f32 %v825_v24, %v824_v19  ;;  %v891_v36 = vrot.slane %v890_v26, 1 }
 0x14a   : > { %v763_v38 = vadd.f32 %v762_v31, %v761_v22 }
 0x1b8   : > { %v895_v40 = vpop.xlane.xlu1 %894  ;;  %v767_v41 = vpop.xlane.xlu0 %766 }
 0x1b9   : > { %vm896_vm2 = vcmp.eq.f32.partialorder %v1657_v54, %v895_v40  ;;  %vm768_vm3 = vcmp.eq.f32.partialorder %v1659_v55, %v767_v41 }
 0x1ba   : > { %v897_v42 = vsel %vm896_vm2, %v1636_v14, 32  ;;  %v769_v43 = vsel %vm768_vm3, %v1636_v14, 32  ;;  %vm982_vm2 = vcmp.eq.s32.totalorder %v1636_v14, 3 }
 0x1bb   : > { %v898_v44 = vsel %vm764_vm11, %v897_v42, 2147483647  ;;  %v770_v45 = vsel %vm764_vm11, %v769_v43, 2147483647  ;;  %v827_v43 = vrot.slane %v826_v32, 1 }
 0x1bc   : > { %v959_v23 = vpop.xlane.xlu1 %958  ;;  %v831_v46 = vpop.xlane.xlu0 %830  ;;  %v772_v47 = vshra.s32 %v770_v45, 16  ;;  %v900_v51 = vshra.s32 %v898_v44, 16  ;;  %v899_v63 = vand.u32 65535, %v898_v44 }
 0x1bd   : > { %vm960_vm4 = vcmp.eq.f32.partialorder %v1661_v56, %v959_v23  ;;  %vm832_vm10 = vcmp.eq.f32.partialorder %v1663_v57, %v831_v46  ;;  %v771_v57 = vand.u32 65535, %v770_v45 }
 0x1be   : > { %v961_v48 = vsel %vm960_vm4, %v1636_v14, 32  ;;  %v833_v49 = vsel %vm832_vm10, %v1636_v14, 32  ;;  %v774_v50 = vcvt.s32.f32 %v772_v47  ;;  %v902_v55 = vcvt.s32.f32 %v900_v51 }
 0x1bf   : > { %v962_v52 = vsel %vm764_vm11, %v961_v48, 2147483647  ;;  %v834_v53 = vsel %vm764_vm11, %v833_v49, 2147483647  ;;  %v773_v61 = vcvt.s32.f32 %v771_v57  ;;  %v901_v4 = vcvt.s32.f32 %v899_v63 }
 0x1c0   : > { %775 = vmin.xlane.f32.xlu0 %v774_v50  ;;  %v836_v54 = vshra.s32 %v834_v53, 16  ;;  %v964_v59 = vshra.s32 %v962_v52, 16  ;;  %v835_v62 = vand.u32 65535, %v834_v53  ;;  %v963_v5 = vand.u32 65535, %v962_v52 }
 0x1c1   : > { %v828_v51 = vadd.f32 %v827_v43, %v826_v32  ;;  %v892_v52 = vadd.f32 %v891_v36, %v890_v26  ;;  %v955_v53 = vrot.slane %v954_v37, 1 }
 0x1c2   : > { %v838_v58 = vcvt.s32.f32 %v836_v54  ;;  %v966_v56 = vcvt.s32.f32 %v964_v59  ;;  %v837_v3 = vcvt.s32.f32 %v835_v62  ;;  %v965_v9 = vcvt.s32.f32 %v963_v5 }
 0x1c4   : > { %903 = vmin.xlane.f32.xlu0 %v902_v55  ;;  %839 = vmin.xlane.f32.xlu1 %v838_v58 }
 0x1c8   : > { %967 = vmin.xlane.f32.xlu1 %v966_v56 }
 0x249   : > { %v776_v60 = vpop.xlane.xlu0 %775 }
 0x24a   : > { %vm777_vm5 = vcmp.eq.f32.partialorder %v774_v50, %v776_v60  ;;  %v782_v25 = vcvt.f32.s32 %v776_v60 }
 0x24b   : > { %v778_v0 = vsel %vm777_vm5, %v773_v61, inf  ;;  %v956_v61 = vadd.f32 %v955_v53, %v954_v37 }
 0x24c   : > { %779 = vmin.xlane.f32.xlu0 %v778_v0  ;;  %v783_v33 = vshll.u32 %v782_v25, 16 }
 0x24d   : > { %v840_v1 = vpop.xlane.xlu1 %839  ;;  %v904_v2 = vpop.xlane.xlu0 %903 }
 0x24e   : > { %vm841_vm6 = vcmp.eq.f32.partialorder %v838_v58, %v840_v1  ;;  %vm905_vm7 = vcmp.eq.f32.partialorder %v902_v55, %v904_v2  ;;  %v846_v28 = vcvt.f32.s32 %v840_v1  ;;  %v910_v29 = vcvt.f32.s32 %v904_v2 }
 0x24f   : > { %v842_v6 = vsel %vm841_vm6, %v837_v3, inf  ;;  %v906_v7 = vsel %vm905_vm7, %v901_v4, inf  ;;  %v1412_v1 = vmov 0.0  }
 0x250   : > { %843 = vmin.xlane.f32.xlu1 %v842_v6  ;;  %907 = vmin.xlane.f32.xlu0 %v906_v7  ;;  %v847_v40 = vshll.u32 %v846_v28, 16  ;;  %v911_v39 = vshll.u32 %v910_v29, 16  ;;  %v1182_v2 = vsel %vm790_vm15, 1.0, %v1412_v1  ;;  %v1183_v3 = vsel %vm854_vm0, 1.0, %v1412_v1 }
 0x251   : > { %v968_v8 = vpop.xlane.xlu1 %967  ;;  %v1184_v5 = vsel %vm918_vm1, 1.0, %v1412_v1 }
 0x252   : > { %vm969_vm8 = vcmp.eq.f32.partialorder %v966_v56, %v968_v8  ;;  %v974_v44 = vcvt.f32.s32 %v968_v8 }
 0x253   : > { %v970_v10 = vsel %vm969_vm8, %v965_v9, inf  ;;  %v1185_v9 = vsel %vm982_vm2, 1.0, %v1412_v1 }
 0x254   : > { %971 = vmin.xlane.f32.xlu1 %v970_v10  ;;  %v975_v54 = vshll.u32 %v974_v44, 16 }
 0x2d5   : > { %v780_v30 = vpop.xlane.xlu0 %779 }
 0x2d6   : > { %v781_v34 = vcvt.f32.s32 %v780_v30 }
 0x2d8   : > { %v784_v35 = vadd.s32 %v783_v33, %v781_v34 }
 0x2d9   : > { %v844_v41 = vpop.xlane.xlu1 %843  ;;  %v908_v42 = vpop.xlane.xlu0 %907 }
 0x2da   : > { %v845_v45 = vcvt.f32.s32 %v844_v41  ;;  %v909_v23 = vcvt.f32.s32 %v908_v42  ;;  %vm785_vm9 = vcmp.eq.s32.totalorder %v1636_v14, %v784_v35 }
 0x2db   : > { %v786_v46 = vsel %vm785_vm9, %v763_v38, 0.0 }
 0x2dc   : > { %v848_v47 = vadd.s32 %v847_v40, %v845_v45  ;;  %v912_v48 = vadd.s32 %v911_v39, %v909_v23  ;;  %v787_v49 = vsel %vm764_vm11, %v786_v46, 0.0 }
 0x2dd   : > { %v972_v50 = vpop.xlane.xlu1 %971  ;;  %788 = vadd.xlane.f32.xlu0 %v787_v49 }
 0x2de   : > { %v973_v55 = vcvt.f32.s32 %v972_v50  ;;  %vm849_vm12 = vcmp.eq.s32.totalorder %v1636_v14, %v848_v47  ;;  %vm913_vm13 = vcmp.eq.s32.totalorder %v1636_v14, %v912_v48 }
 0x2df   : > { %v850_v58 = vsel %vm849_vm12, %v828_v51, 0.0  ;;  %v914_v59 = vsel %vm913_vm13, %v892_v52, 0.0 }
 0x2e0   : > { %v976_v56 = vadd.s32 %v975_v54, %v973_v55  ;;  %v851_v57 = vsel %vm764_vm11, %v850_v58, 0.0  ;;  %v915_v60 = vsel %vm764_vm11, %v914_v59, 0.0 }
 0x2e1   : > { %852 = vadd.xlane.f32.xlu1 %v851_v57  ;;  %916 = vadd.xlane.f32.xlu0 %v915_v60 }
 0x2e2   : > { %vm977_vm14 = vcmp.eq.s32.totalorder %v1636_v14, %v976_v56 }
 0x2e3   : > { %v978_v62 = vsel %vm977_vm14, %v956_v61, 0.0 }
 0x2e4   : > { %v979_v63 = vsel %vm764_vm11, %v978_v62, 0.0  ;;  %vm987_vm11 = vcmask 24576  }
 0x2e5   : > { %980 = vadd.xlane.f32.xlu1 %v979_v63 }
 0x366   : > { %v789_v0 = vpop.xlane.xlu0 %788 }
 0x367   : > { %v793_v7 = vmul.f32 %v1182_v2, %v789_v0 }
 0x36a   : > { %v853_v4 = vpop.xlane.xlu1 %852  ;;  %v917_v6 = vpop.xlane.xlu0 %916 }
 0x36b   : > { %v857_v8 = vmul.f32 %v1183_v3, %v853_v4  ;;  %v921_v11 = vmul.f32 %v1184_v5, %v917_v6 }
 0x36d   : > { %v858_v10 = vadd.f32 %v857_v8, %v793_v7 }
 0x36e   : > { %v981_v12 = vpop.xlane.xlu1 %980 }
 0x36f   : > { %v922_v13 = vadd.f32 %v921_v11, %v858_v10  ;;  %v985_v15 = vmul.f32 %v1185_v9, %v981_v12 }
 0x371   : > { %v986_v16 = vadd.f32 %v985_v15, %v922_v13 }
 0x373   : > { %988 = vst.msk [vmem:[%s162_s19] sm:$0x1] %vm987_vm11, %v986_v16 }
 0x374   : > { %1363 = shalt.err (!%p1360_p3)
}
 0x375   : > { %s1364_s30 = scalar_lea.hbm %s1000_s25, 16  ;;  %s1368_s6 = scalar_lea.hbm %s1762_s3, 32 }
 0x376   : > { %p1365_p4 = scmp.ne.s32.totalorder %s1000_s25, %s1364_s30  ;;  %p1369_p9 = scmp.lt.s32.totalorder %s1000_s25, %s1762_s3 }
 0x377   : > { %p1370_p10 = scmp.lt.s32.totalorder %s1368_s6, %s1364_s30 }
 0x378   : > { %p1366_p7 = pnand %p1365_p4, %p1472_p5 }
 0x379   : > { %p1371_p11 = por %p1370_p10, %p1369_p9 }
 0x37a   : > { %p1367_p8 = pneg %p1366_p7 }
 0x37c   : > { %p1372_p12 = pnand %p1371_p11, %p1367_p8 }
 0x37e   : > { %1375 = shalt.err (!%p1372_p12)
}
 0x37f   : > { %1256 = dma.vmem_to_hbm [thread:$0]  (%p1472_p5), %s1003_s20, 16, %s1000_s25, %s990_s26  }
 0x380 PF: > { %p1262_p13 = scmp.ge.s32.totalorder %s1410_s15, 2  ;;  %s1014_s10 = sand.u32 1, %s1398_s12  }
 0x381   : > { %s1015_s11 = scalar_lea.sflag [#allocation3], %s1014_s10 }
 0x382   : > { %p1259_p0 = pnand %p1262_p13, %p1476_p6 }
 0x384   : > { %p1260_p1 = pneg %p1259_p0 }
 0x386   : > { %1393 = dma.done.wait (%p1260_p1), %s1015_s11, 16  }
 0x387   : > { %1395 = vsyncadd (%p1260_p1), %s1015_s11, 4294967280  ;;  %p13_p2 = scmp.ge.s32.totalorder %s1459_s18, 4   ;;  %s1765_s12 = smov %s1402_s13 }
 0x388   : > { %s1766_s13 = smov %s1406_s14  ;;  %s1767_s14 = smov %s1470_s21 }
 0x389   : > { %s1768_s15 = smov %s1459_s18  ;;  %15 = sbr.rel (!%p13_p2) target bundleno = 3 (0x3), region = 69 }
 0x38e   :  { %1019 = vsyncpa [#allocation3], 1 }
 0x38f   :  { %1021 = vsyncpa [#allocation3 + $0x1], 1 }

// kernel: forward.11
= control target key start
LH: loop header
LB: loop body
LE: loop exit
PB: predicated region body
PF: predicated region fallthrough
CT: control target
= control target key end

     0   :  { %s5789_s12 = smov 0   ;;  %s7393_s0 = inlined_call_operand.vmem [shape: bf16[2,22,256], index: 0, kind: input, shape index: {}]   ;;  %s7394_s1 = inlined_call_operand.vmem [shape: bf16[15,256,256], index: 1, kind: input, shape index: {}]   ;;  %s7395_s2 = inlined_call_operand.vmem [shape: f32[1,256], index: 2, kind: input, shape index: {}]   ;;  %s7396_s3 = inlined_call_operand.vmem [shape: bf16[2,8,256], index: 3, kind: output, shape index: {}]  }
   0x1 LB: > { %s4030_s13 = sadd.s32 4294967295, %s5767_s12   ;;  %p4034_p0 = scmp.ge.s32.totalorder %s5767_s12, 1  ;;  %s5767_s12 = sphi %s5789_s12, %s13_s12  }
   0x2   : > { %p137_p1 = scmp.lt.s32.totalorder %s5767_s12, 3 }
   0x4   : > { %p138_p2 = pnand %p4034_p0, %p137_p1 }
   0x5   : > { %p161_p3 = scmp.lt.s32.totalorder (!%p138_p2), %s4030_s13, 1 }
   0x6   : > { %141 = sbr.rel (%p138_p2) target bundleno = 729 (0x2d9), region = 32 }
   0xb   : > { %v5010_v0 = vld [vmem:[%s7394_s1 + $0x174] ss:$8 sps:$4 sm:$0xff]   ;;  %v5014_v2 = vld [vmem:[%s7394_s1 + $0x170] ss:$8 sps:$4 sm:$0xff]   ;;  %v5016_v4 = vld [vmem:[%s7394_s1 + $0x164] ss:$8 sps:$4 sm:$0xff]  }
   0xc   : > { %v5012_v1 = vld [vmem:[%s7394_s1 + $0x74] ss:$8 sps:$4 sm:$0xff]   ;;  %422 = vmatprep.subr.bf16.mxu0 %v5010_v0  ;;  %v5015_v3 = vld [vmem:[%s7394_s1 + $0x70] ss:$8 sps:$4 sm:$0xff]   ;;  %v5018_v5 = vld [vmem:[%s7394_s1 + $0x64] ss:$8 sps:$4 sm:$0xff]  }
   0xd   : > { %627 = vmatprep.subr.bf16.mxu1 %v5012_v1  ;;  %423 = vmatpush1.bf16.msra.mxu0 %v5014_v2  ;;  %v5020_v6 = vld [vmem:[%s7394_s1 + $0x160] ss:$8 sps:$4 sm:$0xff]   ;;  %v5022_v8 = vld [vmem:[%s7394_s1 + $0x154] ss:$8 sps:$4 sm:$0xff]   ;;  %v5026_v10 = vld [vmem:[%s7394_s1 + $0x150] ss:$8 sps:$4 sm:$0xff]  }
   0xe   : > { %628 = vmatpush1.bf16.msra.mxu1 %v5015_v3  ;;  %424 = vmatprep.subr.bf16.mxu0 %v5016_v4  ;;  %v5021_v7 = vld [vmem:[%s7394_s1 + $0x60] ss:$8 sps:$4 sm:$0xff]   ;;  %v5024_v9 = vld [vmem:[%s7394_s1 + $0x54] ss:$8 sps:$4 sm:$0xff]   ;;  %v5027_v11 = vld [vmem:[%s7394_s1 + $0x50] ss:$8 sps:$4 sm:$0xff]  }
   0xf   : > { %629 = vmatprep.subr.bf16.mxu1 %v5018_v5  ;;  %v5028_v12 = vld [vmem:[%s7394_s1 + $0x144] ss:$8 sps:$4 sm:$0xff]   ;;  %v5032_v14 = vld [vmem:[%s7394_s1 + $0x140] ss:$8 sps:$4 sm:$0xff]   ;;  %v5034_v16 = vld [vmem:[%s7394_s1 + $0x134] ss:$8 sps:$4 sm:$0xff]  }
  0x10   : > { %v5030_v13 = vld [vmem:[%s7394_s1 + $0x44] ss:$8 sps:$4 sm:$0xff]   ;;  %v5033_v15 = vld [vmem:[%s7394_s1 + $0x40] ss:$8 sps:$4 sm:$0xff]   ;;  %v5036_v17 = vld [vmem:[%s7394_s1 + $0x34] ss:$8 sps:$4 sm:$0xff]  }
  0x11   : > { %425 = vmatpush1.bf16.msra.mxu0 %v5020_v6  ;;  %v5038_v18 = vld [vmem:[%s7394_s1 + $0x130] ss:$8 sps:$4 sm:$0xff]   ;;  %v5040_v20 = vld [vmem:[%s7394_s1 + $0x124] ss:$8 sps:$4 sm:$0xff]   ;;  %v5044_v22 = vld [vmem:[%s7394_s1 + $0x120] ss:$8 sps:$4 sm:$0xff]  }
  0x12   : > { %630 = vmatpush1.bf16.msra.mxu1 %v5021_v7  ;;  %426 = vmatprep.subr.bf16.mxu0 %v5022_v8  ;;  %v5039_v19 = vld [vmem:[%s7394_s1 + $0x30] ss:$8 sps:$4 sm:$0xff]   ;;  %v5042_v21 = vld [vmem:[%s7394_s1 + $0x24] ss:$8 sps:$4 sm:$0xff]   ;;  %v5045_v23 = vld [vmem:[%s7394_s1 + $0x20] ss:$8 sps:$4 sm:$0xff]  }
  0x13   : > { %631 = vmatprep.subr.bf16.mxu1 %v5024_v9  ;;  %v5046_v24 = vld [vmem:[%s7394_s1 + $0x114] ss:$8 sps:$4 sm:$0xff]   ;;  %v5050_v26 = vld [vmem:[%s7394_s1 + $0x110] ss:$8 sps:$4 sm:$0xff]   ;;  %v5052_v28 = vld [vmem:[%s7394_s1 + $0x104] ss:$8 sps:$4 sm:$0xff]  }
  0x14   : > { %v5048_v25 = vld [vmem:[%s7394_s1 + $0x14] ss:$8 sps:$4 sm:$0xff]   ;;  %v5051_v27 = vld [vmem:[%s7394_s1 + $0x10] ss:$8 sps:$4 sm:$0xff]   ;;  %v5054_v29 = vld [vmem:[%s7394_s1 + $0x4] ss:$8 sps:$4 sm:$0xff]  }
  0x15   : > { %427 = vmatpush1.bf16.msra.mxu0 %v5026_v10  ;;  %v5056_v30 = vld [vmem:[%s7394_s1 + $0x100] ss:$8 sps:$4 sm:$0xff]   ;;  %v5058_v32 = vld [vmem:[%s7394_s1 + $0x1f4] ss:$8 sps:$4 sm:$0xff]   ;;  %v5062_v34 = vld [vmem:[%s7394_s1 + $0x1f0] ss:$8 sps:$4 sm:$0xff]  }
  0x16   : > { %632 = vmatpush1.bf16.msra.mxu1 %v5027_v11  ;;  %428 = vmatprep.subr.bf16.mxu0 %v5028_v12  ;;  %v5057_v31 = vld [vmem:[%s7394_s1] ss:$8 sps:$4 sm:$0xff]   ;;  %v5060_v33 = vld [vmem:[%s7394_s1 + $0xf4] ss:$8 sps:$4 sm:$0xff]   ;;  %v5063_v35 = vld [vmem:[%s7394_s1 + $0xf0] ss:$8 sps:$4 sm:$0xff]  }
  0x17   : > { %633 = vmatprep.subr.bf16.mxu1 %v5030_v13  ;;  %s7398_s13 = smov (!%p161_p3, %s4030_s13), 1  ;;  %v5064_v36 = vld [vmem:[%s7394_s1 + $0x1e4] ss:$8 sps:$4 sm:$0xff]   ;;  %v5068_v38 = vld [vmem:[%s7394_s1 + $0x1e0] ss:$8 sps:$4 sm:$0xff]  }
  0x18   : > { %v5066_v37 = vld [vmem:[%s7394_s1 + $0xe4] ss:$8 sps:$4 sm:$0xff]   ;;  %s5001_s17 = smul.u32 24, %s7398_s13  ;;  %v5069_v39 = vld [vmem:[%s7394_s1 + $0xe0] ss:$8 sps:$4 sm:$0xff]   ;;  %s4999_s11 = sshll.u32 %s7398_s13, 3 }
  0x19   : > { %429 = vmatpush1.bf16.msra.mxu0 %v5032_v14  ;;  %v5070_v40 = vld [vmem:[%s7394_s1 + $0x1d4] ss:$8 sps:$4 sm:$0xff]   ;;  %v5074_v42 = vld [vmem:[%s7394_s1 + $0x1d0] ss:$8 sps:$4 sm:$0xff]   ;;  %v5076_v44 = vld [vmem:[%s7394_s1 + $0x1c4] ss:$8 sps:$4 sm:$0xff]   ;;  %s170_s16 = scalar_lea.vmem %s7396_s3, %s4999_s11 }
  0x1a   : > { %634 = vmatpush1.bf16.msra.mxu1 %v5033_v15  ;;  %430 = vmatprep.subr.bf16.mxu0 %v5034_v16  ;;  %v5072_v41 = vld [vmem:[%s7394_s1 + $0xd4] ss:$8 sps:$4 sm:$0xff]   ;;  %v5075_v43 = vld [vmem:[%s7394_s1 + $0xd0] ss:$8 sps:$4 sm:$0xff]   ;;  %s5939_s30 = scalar_lea.vmem %s7393_s0, %s5001_s17  ;;  %v5078_v45 = vld [vmem:[%s7394_s1 + $0xc4] ss:$8 sps:$4 sm:$0xff]  }
  0x1b   : > { %635 = vmatprep.subr.bf16.mxu1 %v5036_v17  ;;  %v5948_v46 = vld [vmem:[%s5939_s30] sm:$0xff]  ;;  %v5951_v47 = vld [vmem:[%s5939_s30 + $0x8] sm:$0x11]  ;;  %v5082_v52 = vld [vmem:[%s7394_s1 + $0x1b4] ss:$8 sps:$4 sm:$0xff]  }
  0x1c   : > { %v4105_v48 = vcombine.high %v5948_v46, %v5948_v46  ;;  %v5080_v49 = vld [vmem:[%s7394_s1 + $0x1c0] ss:$8 sps:$4 sm:$0xff]   ;;  %v4071_v51 = vcombine.high %v5948_v46, %v5951_v47  ;;  %v5084_v53 = vld [vmem:[%s7394_s1 + $0xb4] ss:$8 sps:$4 sm:$0xff]   ;;  %v5086_v56 = vld [vmem:[%s7394_s1 + $0x1b0] ss:$8 sps:$4 sm:$0xff]   ;;  %v4070_v63 = vcombine.low %v5948_v46, %v5951_v47  ;;  %v4104_v15 = vcombine.low %v5948_v46, %v5948_v46 }
  0x1d   : > { %431 = vmatpush1.bf16.msra.mxu0 %v5038_v18  ;;  %v5081_v50 = vld [vmem:[%s7394_s1 + $0xc0] ss:$8 sps:$4 sm:$0xff]   ;;  %v5087_v57 = vld [vmem:[%s7394_s1 + $0xb0] ss:$8 sps:$4 sm:$0xff]   ;;  %v5088_v59 = vld [vmem:[%s7394_s1 + $0x1a4] ss:$8 sps:$4 sm:$0xff]  }
  0x1e   : > { %636 = vmatpush1.bf16.msra.mxu1 %v5039_v19  ;;  %432 = vmatprep.subr.bf16.mxu0 %v5040_v20  ;;  %v254_v54 = vshrl.u32 %v4071_v51, 16  ;;  %v256_v55 = vshll.u32 %v4071_v51, 16  ;;  %v5090_v60 = vld [vmem:[%s7394_s1 + $0xa4] ss:$8 sps:$4 sm:$0xff]   ;;  %v5092_v62 = vld [vmem:[%s7394_s1 + $0x1a0] ss:$8 sps:$4 sm:$0xff]  }
  0x1f   : > { %637 = vmatprep.subr.bf16.mxu1 %v5042_v21  ;;  %659 = vmatprep.mubr.bf16.mxu1 %v4105_v48  ;;  %v5093_v0 = vld [vmem:[%s7394_s1 + $0xa0] ss:$8 sps:$4 sm:$0xff]   ;;  %v5094_v1 = vld [vmem:[%s7394_s1 + $0x194] ss:$8 sps:$4 sm:$0xff]   ;;  %v5098_v3 = vld [vmem:[%s7394_s1 + $0x190] ss:$8 sps:$4 sm:$0xff]  }
  0x20   : > { %v258_v58 = vrot.slane %v256_v55, 1  ;;  %v5096_v2 = vld [vmem:[%s7394_s1 + $0x94] ss:$8 sps:$4 sm:$0xff]   ;;  %v249_v4 = vshll.u32 %v4070_v63, 16  ;;  %v5099_v5 = vld [vmem:[%s7394_s1 + $0x90] ss:$8 sps:$4 sm:$0xff]  }
  0x21   : > { %433 = vmatpush1.bf16.msra.mxu0 %v5044_v22  ;;  %v5100_v6 = vld [vmem:[%s7394_s1 + $0x184] ss:$8 sps:$4 sm:$0xff]   ;;  %v5104_v8 = vld [vmem:[%s7394_s1 + $0x180] ss:$8 sps:$4 sm:$0xff]   ;;  %v247_v9 = vshrl.u32 %v4070_v63, 16 }
  0x22   : > { %638 = vmatpush1.bf16.msra.mxu1 %v5045_v23  ;;  %434 = vmatprep.subr.bf16.mxu0 %v5046_v24  ;;  %v259_v61 = vor.u32 %v258_v58, %v254_v54  ;;  %v5102_v7 = vld [vmem:[%s7394_s1 + $0x84] ss:$8 sps:$4 sm:$0xff]   ;;  %v251_v10 = vrot.slane %v249_v4, 1  ;;  %v5105_v11 = vld [vmem:[%s7394_s1 + $0x80] ss:$8 sps:$4 sm:$0xff]  }
  0x23   : > { %639 = vmatprep.subr.bf16.mxu1 %v5048_v25  ;;  %v5112_v12 = vld [vmem:[%s7394_s1 + $0x274] ss:$8 sps:$4 sm:$0xff]   ;;  %v5110_v16 = vld [vmem:[%s7394_s1 + $0x270] ss:$8 sps:$4 sm:$0xff]   ;;  %v5118_v18 = vld [vmem:[%s7394_s1 + $0x264] ss:$8 sps:$4 sm:$0xff]  }
  0x24   : > { %454 = vmatprep.mubr.bf16.mxu0 %v259_v61  ;;  %v5115_v13 = vld [vmem:[%s7394_s1 + $0x374] ss:$8 sps:$4 sm:$0xff]   ;;  %v252_v14 = vor.u32 %v251_v10, %v247_v9  ;;  %v5113_v17 = vld [vmem:[%s7394_s1 + $0x370] ss:$8 sps:$4 sm:$0xff]   ;;  %v5121_v19 = vld [vmem:[%s7394_s1 + $0x364] ss:$8 sps:$4 sm:$0xff]  }
  0x25   : > { %435 = vmatpush1.bf16.msra.mxu0 %v5050_v26  ;;  %v5116_v20 = vld [vmem:[%s7394_s1 + $0x260] ss:$8 sps:$4 sm:$0xff]   ;;  %v5124_v22 = vld [vmem:[%s7394_s1 + $0x254] ss:$8 sps:$4 sm:$0xff]   ;;  %v5122_v24 = vld [vmem:[%s7394_s1 + $0x250] ss:$8 sps:$4 sm:$0xff]  }
  0x26   : > { %640 = vmatpush1.bf16.msra.mxu1 %v5051_v27  ;;  %436 = vmatprep.subr.bf16.mxu0 %v5052_v28  ;;  %v5119_v21 = vld [vmem:[%s7394_s1 + $0x360] ss:$8 sps:$4 sm:$0xff]   ;;  %v5127_v23 = vld [vmem:[%s7394_s1 + $0x354] ss:$8 sps:$4 sm:$0xff]   ;;  %v5125_v25 = vld [vmem:[%s7394_s1 + $0x350] ss:$8 sps:$4 sm:$0xff]  }
  0x27   : > { %641 = vmatprep.subr.bf16.mxu1 %v5054_v29  ;;  %v5130_v26 = vld [vmem:[%s7394_s1 + $0x244] ss:$8 sps:$4 sm:$0xff]   ;;  %v5128_v28 = vld [vmem:[%s7394_s1 + $0x240] ss:$8 sps:$4 sm:$0xff]   ;;  %v5160_v54 = vld [vmem:[%s7394_s1 + $0x2f4] ss:$8 sps:$4 sm:$0xff]  }
  0x28   : > { %v5133_v27 = vld [vmem:[%s7394_s1 + $0x344] ss:$8 sps:$4 sm:$0xff]   ;;  %v5131_v29 = vld [vmem:[%s7394_s1 + $0x340] ss:$8 sps:$4 sm:$0xff]   ;;  %v5163_v55 = vld [vmem:[%s7394_s1 + $0x3f4] ss:$8 sps:$4 sm:$0xff]  }
  0x29   : > { %437 = vmatpush1.bf16.msra.mxu0 %v5056_v30  ;;  %v5136_v30 = vld [vmem:[%s7394_s1 + $0x234] ss:$8 sps:$4 sm:$0xff]   ;;  %v5157_v46 = vld [vmem:[%s7394_s1 + $0x304] ss:$8 sps:$4 sm:$0xff]   ;;  %v5164_v63 = vld [vmem:[%s7394_s1 + $0x2e0] ss:$8 sps:$4 sm:$0xff]  }
  0x2a   : > { %642 = vmatpush1.bf16.msra.mxu1 %v5057_v31  ;;  %438 = vmatprep.subr.bf16.mxu0 %v5058_v32  ;;  %v5139_v31 = vld [vmem:[%s7394_s1 + $0x334] ss:$8 sps:$4 sm:$0xff]   ;;  %v5134_v32 = vld [vmem:[%s7394_s1 + $0x230] ss:$8 sps:$4 sm:$0xff]   ;;  %v5166_v61 = vld [vmem:[%s7394_s1 + $0x2e4] ss:$8 sps:$4 sm:$0xff]  }
  0x2b   : > { %643 = vmatprep.subr.bf16.mxu1 %v5060_v33  ;;  %v5137_v33 = vld [vmem:[%s7394_s1 + $0x330] ss:$8 sps:$4 sm:$0xff]   ;;  %v5184_v9 = vld [vmem:[%s7394_s1 + $0x2b4] ss:$8 sps:$4 sm:$0xff]  }
  0x2c   : > { %v5173_v4 = vld [vmem:[%s7394_s1 + $0x3d0] ss:$8 sps:$4 sm:$0xff]   ;;  %v5187_v10 = vld [vmem:[%s7394_s1 + $0x3b4] ss:$8 sps:$4 sm:$0xff]  }
  0x2d   : > { %439 = vmatpush2.bf16.msra.mxu0 %v5062_v34  ;;  %v5142_v34 = vld [vmem:[%s7394_s1 + $0x224] ss:$8 sps:$4 sm:$0xff]  }
  0x2e   : > { %644 = vmatpush2.bf16.msra.mxu1 %v5063_v35  ;;  %440 = vmatprep.subr.bf16.mxu0 %v5064_v36  ;;  %v5145_v35 = vld [vmem:[%s7394_s1 + $0x324] ss:$8 sps:$4 sm:$0xff]   ;;  %v5140_v36 = vld [vmem:[%s7394_s1 + $0x220] ss:$8 sps:$4 sm:$0xff]  }
  0x2f   : > { %645 = vmatprep.subr.bf16.mxu1 %v5066_v37  ;;  %v5143_v37 = vld [vmem:[%s7394_s1 + $0x320] ss:$8 sps:$4 sm:$0xff]  }
  0x31   : > { %441 = vmatpush2.bf16.msra.mxu0 %v5068_v38  ;;  %v5148_v38 = vld [vmem:[%s7394_s1 + $0x214] ss:$8 sps:$4 sm:$0xff]  }
  0x32   : > { %646 = vmatpush2.bf16.msra.mxu1 %v5069_v39  ;;  %442 = vmatprep.subr.bf16.mxu0 %v5070_v40  ;;  %v5151_v39 = vld [vmem:[%s7394_s1 + $0x314] ss:$8 sps:$4 sm:$0xff]   ;;  %v6094_v40 = vld [vmem:[%s5939_s30] sm:$0xee] }
  0x33   : > { %647 = vmatprep.subr.bf16.mxu1 %v5072_v41  ;;  %v5146_v41 = vld [vmem:[%s7394_s1 + $0x210] ss:$8 sps:$4 sm:$0xff]  }
  0x35   : > { %443 = vmatpush2.bf16.msra.mxu0 %v5074_v42  ;;  %v5149_v42 = vld [vmem:[%s7394_s1 + $0x310] ss:$8 sps:$4 sm:$0xff]  }
  0x36   : > { %648 = vmatpush2.bf16.msra.mxu1 %v5075_v43  ;;  %444 = vmatprep.subr.bf16.mxu0 %v5076_v44  ;;  %v4171_v43 = vcombine.high %v6094_v40, %v5951_v47  ;;  %v6105_v44 = vld [vmem:[%s5939_s30 + $0x8] sm:$0x33] }
  0x37   : > { %649 = vmatprep.subr.bf16.mxu1 %v5078_v45  ;;  %v5154_v45 = vld [vmem:[%s7394_s1 + $0x204] ss:$8 sps:$4 sm:$0xff]  }
  0x38   : > { %v708_v48 = vrot.slane %v4171_v43, 1 }
  0x39   : > { %445 = vmatpush2.bf16.msra.mxu0 %v5080_v49  ;;  %v4237_v49 = vcombine.high %v6094_v40, %v6105_v44 }
  0x3a   : > { %650 = vmatpush2.bf16.msra.mxu1 %v5081_v50  ;;  %446 = vmatprep.subr.bf16.mxu0 %v5082_v52  ;;  %v5152_v50 = vld [vmem:[%s7394_s1 + $0x200] ss:$8 sps:$4 sm:$0xff]  }
  0x3b   : > { %651 = vmatprep.subr.bf16.mxu1 %v5084_v53  ;;  %v962_v51 = vshrl.u32 %v4237_v49, 16  ;;  %v965_v52 = vshll.u32 %v4237_v49, 16  ;;  %v5155_v53 = vld [vmem:[%s7394_s1 + $0x300] ss:$8 sps:$4 sm:$0xff]   ;;  %v5222_v49 = vld [vmem:[%s7394_s1 + $0x450] ss:$8 sps:$4 sm:$0xff]  }
  0x3d   : > { %447 = vmatpush2.bf16.msra.mxu0 %v5086_v56  ;;  %v964_v56 = vrot.slane %v962_v51, 1  ;;  %v5230_v51 = vld [vmem:[%s7394_s1 + $0x444] ss:$8 sps:$4 sm:$0xff]  }
  0x3e   : > { %652 = vmatpush2.bf16.msra.mxu1 %v5087_v57  ;;  %448 = vmatprep.subr.bf16.mxu0 %v5088_v59  ;;  %v967_v57 = vrot.slane %v965_v52, 2  ;;  %v5158_v59 = vld [vmem:[%s7394_s1 + $0x2f0] ss:$8 sps:$4 sm:$0xff]  }
  0x3f   : > { %653 = vmatprep.subr.bf16.mxu1 %v5090_v60  ;;  %v5161_v60 = vld [vmem:[%s7394_s1 + $0x3f0] ss:$8 sps:$4 sm:$0xff]  }
  0x40   : > { %v968_v58 = vor.u32 %v967_v57, %v964_v56  ;;  %v5228_v57 = vld [vmem:[%s7394_s1 + $0x440] ss:$8 sps:$4 sm:$0xff]  }
  0x41   : > { %449 = vmatpush2.bf16.msra.mxu0 %v5092_v62  ;;  %v5169_v62 = vld [vmem:[%s7394_s1 + $0x3e4] ss:$8 sps:$4 sm:$0xff]  }
  0x42   : > { %654 = vmatpush2.bf16.msra.mxu1 %v5093_v0  ;;  %450 = vmatprep.subr.bf16.mxu0 %v5094_v1  ;;  %v5167_v0 = vld [vmem:[%s7394_s1 + $0x3e0] ss:$8 sps:$4 sm:$0xff]   ;;  %v5172_v1 = vld [vmem:[%s7394_s1 + $0x2d4] ss:$8 sps:$4 sm:$0xff]  }
  0x43   : > { %655 = vmatprep.subr.bf16.mxu1 %v5096_v2  ;;  %v5175_v2 = vld [vmem:[%s7394_s1 + $0x3d4] ss:$8 sps:$4 sm:$0xff]  }
  0x45   : > { %451 = vmatpush2.bf16.msra.mxu0 %v5098_v3  ;;  %v5170_v3 = vld [vmem:[%s7394_s1 + $0x2d0] ss:$8 sps:$4 sm:$0xff]  }
  0x46   : > { %656 = vmatpush2.bf16.msra.mxu1 %v5099_v5  ;;  %452 = vmatprep.subr.bf16.mxu0 %v5100_v6  ;;  %v5178_v5 = vld [vmem:[%s7394_s1 + $0x2c4] ss:$8 sps:$4 sm:$0xff]  }
  0x47   : > { %657 = vmatprep.subr.bf16.mxu1 %v5102_v7  ;;  %v5181_v6 = vld [vmem:[%s7394_s1 + $0x3c4] ss:$8 sps:$4 sm:$0xff]   ;;  %v5176_v7 = vld [vmem:[%s7394_s1 + $0x2c0] ss:$8 sps:$4 sm:$0xff]  }
  0x49   : > { %453 = vmatpush2.bf16.msra.mxu0 %v5104_v8  ;;  %v5179_v8 = vld [vmem:[%s7394_s1 + $0x3c0] ss:$8 sps:$4 sm:$0xff]  }
  0x4a   : > { %658 = vmatpush2.bf16.msra.mxu1 %v5105_v11  ;;  %871 = vmatprep.subr.bf16.mxu0 %v5112_v12  ;;  %v5182_v11 = vld [vmem:[%s7394_s1 + $0x2b0] ss:$8 sps:$4 sm:$0xff]  }
  0x4b   : > { %1131 = vmatprep.subr.bf16.mxu1 %v5115_v13  ;;  %v5185_v12 = vld [vmem:[%s7394_s1 + $0x3b0] ss:$8 sps:$4 sm:$0xff]   ;;  %v5190_v13 = vld [vmem:[%s7394_s1 + $0x2a4] ss:$8 sps:$4 sm:$0xff]  }
  0x4c   : > { %455 = vmatmul.mubr.bf16.vlgmr.msra.gmra.mxu0 %v252_v14  ;;  %v5193_v14 = vld [vmem:[%s7394_s1 + $0x3a4] ss:$8 sps:$4 sm:$0xff]  }
  0x4d   : > { %660 = vmatmul.mubr.bf16.vlgmr.msra.gmra.mxu1 %v4104_v15  ;;  %872 = vmatpush1.bf16.msra.mxu0 %v5110_v16  ;;  %v4236_v15 = vcombine.low %v6094_v40, %v6105_v44  ;;  %v5188_v16 = vld [vmem:[%s7394_s1 + $0x2a0] ss:$8 sps:$4 sm:$0xff]  }
  0x4e   : > { %1132 = vmatpush1.bf16.msra.mxu1 %v5113_v17  ;;  %873 = vmatprep.subr.bf16.mxu0 %v5118_v18  ;;  %v5191_v17 = vld [vmem:[%s7394_s1 + $0x3a0] ss:$8 sps:$4 sm:$0xff]   ;;  %v5196_v18 = vld [vmem:[%s7394_s1 + $0x294] ss:$8 sps:$4 sm:$0xff]  }
  0x4f   : > { %1133 = vmatprep.subr.bf16.mxu1 %v5121_v19  ;;  %903 = vmatprep.mubr.bf16.mxu0 %v708_v48  ;;  %v5199_v19 = vld [vmem:[%s7394_s1 + $0x394] ss:$8 sps:$4 sm:$0xff]  }
  0x50   : > { %1163 = vmatprep.mubr.bf16.mxu1 %v968_v58  ;;  %v5231_v58 = vld [vmem:[%s7394_s1 + $0x540] ss:$8 sps:$4 sm:$0xff]  }
  0x51   : > { %874 = vmatpush1.bf16.msra.mxu0 %v5116_v20  ;;  %v954_v20 = vshrl.u32 %v4236_v15, 16 }
  0x52   : > { %1134 = vmatpush1.bf16.msra.mxu1 %v5119_v21  ;;  %875 = vmatprep.subr.bf16.mxu0 %v5124_v22  ;;  %v957_v21 = vshll.u32 %v4236_v15, 16  ;;  %v5194_v22 = vld [vmem:[%s7394_s1 + $0x290] ss:$8 sps:$4 sm:$0xff]  }
  0x53   : > { %1135 = vmatprep.subr.bf16.mxu1 %v5127_v23  ;;  %v5197_v23 = vld [vmem:[%s7394_s1 + $0x390] ss:$8 sps:$4 sm:$0xff]  }
  0x54   : > { %v5261_v15 = vld [vmem:[%s7394_s1 + $0x5f0] ss:$8 sps:$4 sm:$0xff]  }
  0x55   : > { %876 = vmatpush1.bf16.msra.mxu0 %v5122_v24  ;;  %v5202_v24 = vld [vmem:[%s7394_s1 + $0x284] ss:$8 sps:$4 sm:$0xff]  }
  0x56   : > { %1136 = vmatpush1.bf16.msra.mxu1 %v5125_v25  ;;  %877 = vmatprep.subr.bf16.mxu0 %v5130_v26  ;;  %v5205_v25 = vld [vmem:[%s7394_s1 + $0x384] ss:$8 sps:$4 sm:$0xff]   ;;  %v4170_v26 = vcombine.low %v6094_v40, %v5951_v47  ;;  %v5215_v47 = vld [vmem:[%s7394_s1 + $0x574] ss:$8 sps:$4 sm:$0xff]  }
  0x57   : > { %1137 = vmatprep.subr.bf16.mxu1 %v5133_v27  ;;  %v956_v27 = vrot.slane %v954_v20, 1  ;;  %v6246_v40 = vld [vmem:[%s5939_s30] sm:$0xcc]  ;;  %v5272_v20 = vld [vmem:[%s7394_s1 + $0x4d4] ss:$8 sps:$4 sm:$0xff]  }
  0x58   : > { %v4303_v43 = vcombine.high %v6246_v40, %v6105_v44 }
  0x59   : > { %878 = vmatpush1.bf16.msra.mxu0 %v5128_v28  ;;  %v959_v28 = vrot.slane %v957_v21, 2  ;;  %v5275_v21 = vld [vmem:[%s7394_s1 + $0x5d4] ss:$8 sps:$4 sm:$0xff]  }
  0x5a   : > { %1138 = vmatpush1.bf16.msra.mxu1 %v5131_v29  ;;  %879 = vmatprep.subr.bf16.mxu0 %v5136_v30  ;;  %v5200_v29 = vld [vmem:[%s7394_s1 + $0x280] ss:$8 sps:$4 sm:$0xff]  }
  0x5b   : > { %1139 = vmatprep.subr.bf16.mxu1 %v5139_v31  ;;  %v5203_v30 = vld [vmem:[%s7394_s1 + $0x380] ss:$8 sps:$4 sm:$0xff]   ;;  %v5210_v31 = vld [vmem:[%s7394_s1 + $0x474] ss:$8 sps:$4 sm:$0xff]  }
  0x5d   : > { %880 = vmatpush1.bf16.msra.mxu0 %v5134_v32  ;;  %v707_v32 = vrot.slane %v4170_v26, 1  ;;  %v5276_v26 = vld [vmem:[%s7394_s1 + $0x4c0] ss:$8 sps:$4 sm:$0xff]  }
  0x5e   : > { %1140 = vmatpush1.bf16.msra.mxu1 %v5137_v33  ;;  %881 = vmatprep.subr.bf16.mxu0 %v5142_v34  ;;  %v960_v33 = vor.u32 %v959_v28, %v956_v27  ;;  %v5208_v34 = vld [vmem:[%s7394_s1 + $0x470] ss:$8 sps:$4 sm:$0xff]   ;;  %v5279_v27 = vld [vmem:[%s7394_s1 + $0x5c0] ss:$8 sps:$4 sm:$0xff]   ;;  %v5284_v28 = vld [vmem:[%s7394_s1 + $0x4b4] ss:$8 sps:$4 sm:$0xff]  }
  0x5f   : > { %1141 = vmatprep.subr.bf16.mxu1 %v5145_v35  ;;  %v5213_v35 = vld [vmem:[%s7394_s1 + $0x570] ss:$8 sps:$4 sm:$0xff]  }
  0x61   : > { %882 = vmatpush1.bf16.msra.mxu0 %v5140_v36  ;;  %v5218_v36 = vld [vmem:[%s7394_s1 + $0x464] ss:$8 sps:$4 sm:$0xff]  }
  0x62   : > { %1142 = vmatpush1.bf16.msra.mxu1 %v5143_v37  ;;  %883 = vmatprep.subr.bf16.mxu0 %v5148_v38  ;;  %v5221_v37 = vld [vmem:[%s7394_s1 + $0x564] ss:$8 sps:$4 sm:$0xff]   ;;  %v5216_v38 = vld [vmem:[%s7394_s1 + $0x460] ss:$8 sps:$4 sm:$0xff]  }
  0x63   : > { %1143 = vmatprep.subr.bf16.mxu1 %v5151_v39  ;;  %v5219_v39 = vld [vmem:[%s7394_s1 + $0x560] ss:$8 sps:$4 sm:$0xff]  }
  0x65   : > { %884 = vmatpush1.bf16.msra.mxu0 %v5146_v41  ;;  %v5224_v41 = vld [vmem:[%s7394_s1 + $0x454] ss:$8 sps:$4 sm:$0xff]  }
  0x66   : > { %1144 = vmatpush1.bf16.msra.mxu1 %v5149_v42  ;;  %885 = vmatprep.subr.bf16.mxu0 %v5154_v45  ;;  %v5227_v42 = vld [vmem:[%s7394_s1 + $0x554] ss:$8 sps:$4 sm:$0xff]   ;;  %v6257_v45 = vld [vmem:[%s5939_s30 + $0x8] sm:$0x77] }
  0x67   : > { %1145 = vmatprep.subr.bf16.mxu1 %v5157_v46  ;;  %v1214_v46 = vrot.slane %v4303_v43, 2  ;;  %v4369_v48 = vcombine.high %v6246_v40, %v6257_v45  ;;  %v5294_v43 = vld [vmem:[%s7394_s1 + $0x490] ss:$8 sps:$4 sm:$0xff]  }
  0x69   : > { %886 = vmatpush1.bf16.msra.mxu0 %v5152_v50  ;;  %v5225_v50 = vld [vmem:[%s7394_s1 + $0x550] ss:$8 sps:$4 sm:$0xff]   ;;  %v1468_v52 = vshrl.u32 %v4369_v48, 16 }
  0x6a   : > { %1146 = vmatpush1.bf16.msra.mxu1 %v5155_v53  ;;  %887 = vmatprep.subr.bf16.mxu0 %v5160_v54  ;;  %v1471_v53 = vshll.u32 %v4369_v48, 16  ;;  %v5233_v54 = vld [vmem:[%s7394_s1 + $0x544] ss:$8 sps:$4 sm:$0xff]  }
  0x6b   : > { %1147 = vmatprep.subr.bf16.mxu1 %v5163_v55  ;;  %v1470_v55 = vrot.slane %v1468_v52, 2  ;;  %v5300_v52 = vld [vmem:[%s7394_s1 + $0x480] ss:$8 sps:$4 sm:$0xff]  }
  0x6c   : > { %v1473_v56 = vrot.slane %v1471_v53, 3 }
  0x6d   : > { %888 = vmatpush2.bf16.msra.mxu0 %v5158_v59 }
  0x6e   : > { %1148 = vmatpush2.bf16.msra.mxu1 %v5161_v60  ;;  %889 = vmatprep.subr.bf16.mxu0 %v5166_v61  ;;  %v1474_v59 = vor.u32 %v1473_v56, %v1470_v55  ;;  %v5236_v60 = vld [vmem:[%s7394_s1 + $0x434] ss:$8 sps:$4 sm:$0xff]   ;;  %v5303_v55 = vld [vmem:[%s7394_s1 + $0x580] ss:$8 sps:$4 sm:$0xff]   ;;  %v4302_v56 = vcombine.low %v6246_v40, %v6105_v44 }
  0x6f   : > { %1149 = vmatprep.subr.bf16.mxu1 %v5169_v62  ;;  %v5239_v61 = vld [vmem:[%s7394_s1 + $0x534] ss:$8 sps:$4 sm:$0xff]   ;;  %v5234_v62 = vld [vmem:[%s7394_s1 + $0x430] ss:$8 sps:$4 sm:$0xff]  }
  0x70   : > { %v1213_v44 = vrot.slane %v4302_v56, 2  ;;  %v5382_v56 = vld [vmem:[%s7394_s1 + $0x6b0] ss:$8 sps:$4 sm:$0xff]  }
  0x71   : > { %890 = vmatpush2.bf16.msra.mxu0 %v5164_v63  ;;  %v5237_v63 = vld [vmem:[%s7394_s1 + $0x530] ss:$8 sps:$4 sm:$0xff]  }
  0x72   : > { %1150 = vmatpush2.bf16.msra.mxu1 %v5167_v0  ;;  %891 = vmatprep.subr.bf16.mxu0 %v5172_v1  ;;  %v5242_v0 = vld [vmem:[%s7394_s1 + $0x424] ss:$8 sps:$4 sm:$0xff]  }
  0x73   : > { %1151 = vmatprep.subr.bf16.mxu1 %v5175_v2  ;;  %v5245_v1 = vld [vmem:[%s7394_s1 + $0x524] ss:$8 sps:$4 sm:$0xff]   ;;  %v5240_v2 = vld [vmem:[%s7394_s1 + $0x420] ss:$8 sps:$4 sm:$0xff]  }
  0x75   : > { %892 = vmatpush2.bf16.msra.mxu0 %v5170_v3  ;;  %v5243_v3 = vld [vmem:[%s7394_s1 + $0x520] ss:$8 sps:$4 sm:$0xff]  }
  0x76   : > { %1152 = vmatpush2.bf16.msra.mxu1 %v5173_v4  ;;  %893 = vmatprep.subr.bf16.mxu0 %v5178_v5  ;;  %v5248_v4 = vld [vmem:[%s7394_s1 + $0x414] ss:$8 sps:$4 sm:$0xff]  }
  0x77   : > { %1153 = vmatprep.subr.bf16.mxu1 %v5181_v6  ;;  %v5251_v5 = vld [vmem:[%s7394_s1 + $0x514] ss:$8 sps:$4 sm:$0xff]   ;;  %v5246_v6 = vld [vmem:[%s7394_s1 + $0x410] ss:$8 sps:$4 sm:$0xff]  }
  0x79   : > { %894 = vmatpush2.bf16.msra.mxu0 %v5176_v7  ;;  %v5249_v7 = vld [vmem:[%s7394_s1 + $0x510] ss:$8 sps:$4 sm:$0xff]  }
  0x7a   : > { %1154 = vmatpush2.bf16.msra.mxu1 %v5179_v8  ;;  %895 = vmatprep.subr.bf16.mxu0 %v5184_v9  ;;  %v5254_v8 = vld [vmem:[%s7394_s1 + $0x404] ss:$8 sps:$4 sm:$0xff]  }
  0x7b   : > { %1155 = vmatprep.subr.bf16.mxu1 %v5187_v10  ;;  %v5257_v9 = vld [vmem:[%s7394_s1 + $0x504] ss:$8 sps:$4 sm:$0xff]   ;;  %v5252_v10 = vld [vmem:[%s7394_s1 + $0x400] ss:$8 sps:$4 sm:$0xff]  }
  0x7d   : > { %896 = vmatpush2.bf16.msra.mxu0 %v5182_v11  ;;  %v5255_v11 = vld [vmem:[%s7394_s1 + $0x500] ss:$8 sps:$4 sm:$0xff]  }
  0x7e   : > { %1156 = vmatpush2.bf16.msra.mxu1 %v5185_v12  ;;  %897 = vmatprep.subr.bf16.mxu0 %v5190_v13  ;;  %v5260_v12 = vld [vmem:[%s7394_s1 + $0x4f4] ss:$8 sps:$4 sm:$0xff]  }
  0x7f   : > { %1157 = vmatprep.subr.bf16.mxu1 %v5193_v14  ;;  %v5263_v13 = vld [vmem:[%s7394_s1 + $0x5f4] ss:$8 sps:$4 sm:$0xff]   ;;  %v5258_v14 = vld [vmem:[%s7394_s1 + $0x4f0] ss:$8 sps:$4 sm:$0xff]  }
  0x81   : > { %898 = vmatpush2.bf16.msra.mxu0 %v5188_v16  ;;  %v5266_v16 = vld [vmem:[%s7394_s1 + $0x4e4] ss:$8 sps:$4 sm:$0xff]  }
  0x82   : > { %1158 = vmatpush2.bf16.msra.mxu1 %v5191_v17  ;;  %899 = vmatprep.subr.bf16.mxu0 %v5196_v18  ;;  %v5269_v17 = vld [vmem:[%s7394_s1 + $0x5e4] ss:$8 sps:$4 sm:$0xff]   ;;  %v5264_v18 = vld [vmem:[%s7394_s1 + $0x4e0] ss:$8 sps:$4 sm:$0xff]  }
  0x83   : > { %1159 = vmatprep.subr.bf16.mxu1 %v5199_v19  ;;  %v5267_v19 = vld [vmem:[%s7394_s1 + $0x5e0] ss:$8 sps:$4 sm:$0xff]  }
  0x85   : > { %900 = vmatpush2.bf16.msra.mxu0 %v5194_v22  ;;  %v5270_v22 = vld [vmem:[%s7394_s1 + $0x4d0] ss:$8 sps:$4 sm:$0xff]  }
  0x86   : > { %1160 = vmatpush2.bf16.msra.mxu1 %v5197_v23  ;;  %901 = vmatprep.subr.bf16.mxu0 %v5202_v24  ;;  %v5273_v23 = vld [vmem:[%s7394_s1 + $0x5d0] ss:$8 sps:$4 sm:$0xff]   ;;  %v5278_v24 = vld [vmem:[%s7394_s1 + $0x4c4] ss:$8 sps:$4 sm:$0xff]  }
  0x87   : > { %1161 = vmatprep.subr.bf16.mxu1 %v5205_v25  ;;  %v5281_v25 = vld [vmem:[%s7394_s1 + $0x5c4] ss:$8 sps:$4 sm:$0xff]  }
  0x89   : > { %902 = vmatpush2.bf16.msra.mxu0 %v5200_v29  ;;  %v5287_v29 = vld [vmem:[%s7394_s1 + $0x5b4] ss:$8 sps:$4 sm:$0xff]  }
  0x8a   : > { %1162 = vmatpush2.bf16.msra.mxu1 %v5203_v30  ;;  %1377 = vmatprep.subr.bf16.mxu0 %v5210_v31  ;;  %v5282_v30 = vld [vmem:[%s7394_s1 + $0x4b0] ss:$8 sps:$4 sm:$0xff]  }
  0x8b   : > { %1637 = vmatprep.subr.bf16.mxu1 %v5215_v47  ;;  %v5285_v31 = vld [vmem:[%s7394_s1 + $0x5b0] ss:$8 sps:$4 sm:$0xff]   ;;  %v6388_v47 = vld [vmem:[%s5939_s30] sm:$0x88] }
  0x8c   : > { %904 = vmatmul.mubr.bf16.vlgmr.msra.gmra.mxu0 %v707_v32  ;;  %v5290_v32 = vld [vmem:[%s7394_s1 + $0x4a4] ss:$8 sps:$4 sm:$0xff]  }
  0x8d   : > { %1164 = vmatmul.mubr.bf16.vlgmr.msra.gmra.mxu1 %v960_v33  ;;  %1378 = vmatpush1.bf16.msra.mxu0 %v5208_v34  ;;  %v5293_v33 = vld [vmem:[%s7394_s1 + $0x5a4] ss:$8 sps:$4 sm:$0xff]   ;;  %v4434_v34 = vcombine.low %v6388_v47, %v6257_v45 }
  0x8e   : > { %1638 = vmatpush1.bf16.msra.mxu1 %v5213_v35  ;;  %1379 = vmatprep.subr.bf16.mxu0 %v5218_v36  ;;  %v5288_v35 = vld [vmem:[%s7394_s1 + $0x4a0] ss:$8 sps:$4 sm:$0xff]   ;;  %v4368_v36 = vcombine.low %v6246_v40, %v6257_v45  ;;  %v5308_v40 = vld [vmem:[%s7394_s1 + $0x670] ss:$8 sps:$4 sm:$0xff]  }
  0x8f   : > { %1639 = vmatprep.subr.bf16.mxu1 %v5221_v37  ;;  %1409 = vmatprep.mubr.bf16.mxu0 %v1214_v46  ;;  %v6404_v37 = vld [vmem:[%s5939_s30 + $0x8] sm:$0xff]  ;;  %v5297_v46 = vld [vmem:[%s7394_s1 + $0x590] ss:$8 sps:$4 sm:$0xff]  }
  0x90   : > { %1669 = vmatprep.mubr.bf16.mxu1 %v1474_v59  ;;  %v1460_v48 = vshrl.u32 %v4368_v36, 16  ;;  %v5310_v59 = vld [vmem:[%s7394_s1 + $0x674] ss:$8 sps:$4 sm:$0xff]  }
  0x91   : > { %1380 = vmatpush1.bf16.msra.mxu0 %v5216_v38  ;;  %v5291_v38 = vld [vmem:[%s7394_s1 + $0x5a0] ss:$8 sps:$4 sm:$0xff]  }
  0x92   : > { %1640 = vmatpush1.bf16.msra.mxu1 %v5219_v39  ;;  %1381 = vmatprep.subr.bf16.mxu0 %v5224_v41  ;;  %v5296_v39 = vld [vmem:[%s7394_s1 + $0x494] ss:$8 sps:$4 sm:$0xff]  }
  0x93   : > { %1641 = vmatprep.subr.bf16.mxu1 %v5227_v42  ;;  %v5299_v41 = vld [vmem:[%s7394_s1 + $0x594] ss:$8 sps:$4 sm:$0xff]   ;;  %v4501_v42 = vcombine.high %v6388_v47, %v6404_v37 }
  0x95   : > { %1382 = vmatpush1.bf16.msra.mxu0 %v5222_v49  ;;  %v1463_v49 = vshll.u32 %v4368_v36, 16  ;;  %v1974_v53 = vshrl.u32 %v4501_v42, 16  ;;  %v5361_v36 = vld [vmem:[%s7394_s1 + $0x7f0] ss:$8 sps:$4 sm:$0xff]  }
  0x96   : > { %1642 = vmatpush1.bf16.msra.mxu1 %v5225_v50  ;;  %1383 = vmatprep.subr.bf16.mxu0 %v5230_v51  ;;  %v5302_v50 = vld [vmem:[%s7394_s1 + $0x484] ss:$8 sps:$4 sm:$0xff]  }
  0x97   : > { %1643 = vmatprep.subr.bf16.mxu1 %v5233_v54  ;;  %v5305_v51 = vld [vmem:[%s7394_s1 + $0x584] ss:$8 sps:$4 sm:$0xff]   ;;  %v1977_v54 = vshll.u32 %v4501_v42, 16  ;;  %v5367_v42 = vld [vmem:[%s7394_s1 + $0x7e0] ss:$8 sps:$4 sm:$0xff]  }
  0x99   : > { %1384 = vmatpush1.bf16.msra.mxu0 %v5228_v57  ;;  %v1462_v57 = vrot.slane %v1460_v48, 2  ;;  %v5370_v48 = vld [vmem:[%s7394_s1 + $0x6d0] ss:$8 sps:$4 sm:$0xff]  }
  0x9a   : > { %1644 = vmatpush1.bf16.msra.mxu1 %v5231_v58  ;;  %1385 = vmatprep.subr.bf16.mxu0 %v5236_v60  ;;  %v1465_v58 = vrot.slane %v1463_v49, 3  ;;  %v5315_v60 = vld [vmem:[%s7394_s1 + $0x774] ss:$8 sps:$4 sm:$0xff]   ;;  %v5373_v49 = vld [vmem:[%s7394_s1 + $0x7d0] ss:$8 sps:$4 sm:$0xff]  }
  0x9b   : > { %1645 = vmatprep.subr.bf16.mxu1 %v5239_v61  ;;  %v4435_v61 = vcombine.high %v6388_v47, %v6257_v45  ;;  %v5421_v45 = vld [vmem:[%s7394_s1 + $0x964] ss:$8 sps:$4 sm:$0xff]  }
  0x9d   : > { %1386 = vmatpush1.bf16.msra.mxu0 %v5234_v62  ;;  %v1976_v62 = vrot.slane %v1974_v53, 3  ;;  %v5379_v53 = vld [vmem:[%s7394_s1 + $0x7c0] ss:$8 sps:$4 sm:$0xff]  }
  0x9e   : > { %1646 = vmatpush1.bf16.msra.mxu1 %v5237_v63  ;;  %1387 = vmatprep.subr.bf16.mxu0 %v5242_v0  ;;  %v1979_v63 = vrot.slane %v1977_v54, 4  ;;  %v1466_v0 = vor.u32 %v1465_v58, %v1462_v57  ;;  %v5384_v54 = vld [vmem:[%s7394_s1 + $0x6b4] ss:$8 sps:$4 sm:$0xff]   ;;  %v5385_v57 = vld [vmem:[%s7394_s1 + $0x7b0] ss:$8 sps:$4 sm:$0xff]  }
  0x9f   : > { %1647 = vmatprep.subr.bf16.mxu1 %v5245_v1  ;;  %v5313_v1 = vld [vmem:[%s7394_s1 + $0x770] ss:$8 sps:$4 sm:$0xff]   ;;  %v5390_v58 = vld [vmem:[%s7394_s1 + $0x6a4] ss:$8 sps:$4 sm:$0xff]  }
  0xa1   : > { %1388 = vmatpush1.bf16.msra.mxu0 %v5240_v2  ;;  %v5318_v2 = vld [vmem:[%s7394_s1 + $0x664] ss:$8 sps:$4 sm:$0xff]  }
  0xa2   : > { %1648 = vmatpush1.bf16.msra.mxu1 %v5243_v3  ;;  %1389 = vmatprep.subr.bf16.mxu0 %v5248_v4  ;;  %v5321_v3 = vld [vmem:[%s7394_s1 + $0x764] ss:$8 sps:$4 sm:$0xff]   ;;  %v1720_v4 = vrot.slane %v4435_v61, 3  ;;  %v5391_v61 = vld [vmem:[%s7394_s1 + $0x7a0] ss:$8 sps:$4 sm:$0xff]  }
  0xa3   : > { %1649 = vmatprep.subr.bf16.mxu1 %v5251_v5  ;;  %v1980_v5 = vor.u32 %v1979_v63, %v1976_v62  ;;  %v4500_v62 = vcombine.low %v6388_v47, %v6404_v37  ;;  %v6610_v63 = vld [vmem:[%s5939_s30 + $0x10] sm:$0x11]  ;;  %v4567_v47 = vcombine.high %v6404_v37, %v6404_v37 }
  0xa5   : > { %1390 = vmatpush1.bf16.msra.mxu0 %v5246_v6  ;;  %v5316_v6 = vld [vmem:[%s7394_s1 + $0x660] ss:$8 sps:$4 sm:$0xff]  }
  0xa6   : > { %1650 = vmatpush1.bf16.msra.mxu1 %v5249_v7  ;;  %1391 = vmatprep.subr.bf16.mxu0 %v5254_v8  ;;  %v5319_v7 = vld [vmem:[%s7394_s1 + $0x760] ss:$8 sps:$4 sm:$0xff]   ;;  %v5324_v8 = vld [vmem:[%s7394_s1 + $0x654] ss:$8 sps:$4 sm:$0xff]  }
  0xa7   : > { %1651 = vmatprep.subr.bf16.mxu1 %v5257_v9  ;;  %v5327_v9 = vld [vmem:[%s7394_s1 + $0x754] ss:$8 sps:$4 sm:$0xff]  }
  0xa9   : > { %1392 = vmatpush1.bf16.msra.mxu0 %v5252_v10  ;;  %v5322_v10 = vld [vmem:[%s7394_s1 + $0x650] ss:$8 sps:$4 sm:$0xff]  }
  0xaa   : > { %1652 = vmatpush1.bf16.msra.mxu1 %v5255_v11  ;;  %1393 = vmatprep.subr.bf16.mxu0 %v5260_v12  ;;  %v5325_v11 = vld [vmem:[%s7394_s1 + $0x750] ss:$8 sps:$4 sm:$0xff]   ;;  %v5330_v12 = vld [vmem:[%s7394_s1 + $0x644] ss:$8 sps:$4 sm:$0xff]  }
  0xab   : > { %1653 = vmatprep.subr.bf16.mxu1 %v5263_v13  ;;  %v5333_v13 = vld [vmem:[%s7394_s1 + $0x744] ss:$8 sps:$4 sm:$0xff]  }
  0xad   : > { %1394 = vmatpush2.bf16.msra.mxu0 %v5258_v14  ;;  %v5328_v14 = vld [vmem:[%s7394_s1 + $0x640] ss:$8 sps:$4 sm:$0xff]  }
  0xae   : > { %1654 = vmatpush2.bf16.msra.mxu1 %v5261_v15  ;;  %1395 = vmatprep.subr.bf16.mxu0 %v5266_v16  ;;  %v5331_v15 = vld [vmem:[%s7394_s1 + $0x740] ss:$8 sps:$4 sm:$0xff]   ;;  %v5336_v16 = vld [vmem:[%s7394_s1 + $0x634] ss:$8 sps:$4 sm:$0xff]  }
  0xaf   : > { %1655 = vmatprep.subr.bf16.mxu1 %v5269_v17  ;;  %v5339_v17 = vld [vmem:[%s7394_s1 + $0x734] ss:$8 sps:$4 sm:$0xff]  }
  0xb1   : > { %1396 = vmatpush2.bf16.msra.mxu0 %v5264_v18  ;;  %v5334_v18 = vld [vmem:[%s7394_s1 + $0x630] ss:$8 sps:$4 sm:$0xff]  }
  0xb2   : > { %1656 = vmatpush2.bf16.msra.mxu1 %v5267_v19  ;;  %1397 = vmatprep.subr.bf16.mxu0 %v5272_v20  ;;  %v5337_v19 = vld [vmem:[%s7394_s1 + $0x730] ss:$8 sps:$4 sm:$0xff]   ;;  %v5342_v20 = vld [vmem:[%s7394_s1 + $0x624] ss:$8 sps:$4 sm:$0xff]  }
  0xb3   : > { %1657 = vmatprep.subr.bf16.mxu1 %v5275_v21  ;;  %v5345_v21 = vld [vmem:[%s7394_s1 + $0x724] ss:$8 sps:$4 sm:$0xff]  }
  0xb5   : > { %1398 = vmatpush2.bf16.msra.mxu0 %v5270_v22  ;;  %v5340_v22 = vld [vmem:[%s7394_s1 + $0x620] ss:$8 sps:$4 sm:$0xff]  }
  0xb6   : > { %1658 = vmatpush2.bf16.msra.mxu1 %v5273_v23  ;;  %1399 = vmatprep.subr.bf16.mxu0 %v5278_v24  ;;  %v5343_v23 = vld [vmem:[%s7394_s1 + $0x720] ss:$8 sps:$4 sm:$0xff]   ;;  %v5348_v24 = vld [vmem:[%s7394_s1 + $0x614] ss:$8 sps:$4 sm:$0xff]  }
  0xb7   : > { %1659 = vmatprep.subr.bf16.mxu1 %v5281_v25  ;;  %v5351_v25 = vld [vmem:[%s7394_s1 + $0x714] ss:$8 sps:$4 sm:$0xff]  }
  0xb9   : > { %1400 = vmatpush2.bf16.msra.mxu0 %v5276_v26  ;;  %v5346_v26 = vld [vmem:[%s7394_s1 + $0x610] ss:$8 sps:$4 sm:$0xff]  }
  0xba   : > { %1660 = vmatpush2.bf16.msra.mxu1 %v5279_v27  ;;  %1401 = vmatprep.subr.bf16.mxu0 %v5284_v28  ;;  %v5349_v27 = vld [vmem:[%s7394_s1 + $0x710] ss:$8 sps:$4 sm:$0xff]   ;;  %v5354_v28 = vld [vmem:[%s7394_s1 + $0x604] ss:$8 sps:$4 sm:$0xff]  }
  0xbb   : > { %1661 = vmatprep.subr.bf16.mxu1 %v5287_v29  ;;  %v5357_v29 = vld [vmem:[%s7394_s1 + $0x704] ss:$8 sps:$4 sm:$0xff]  }
  0xbd   : > { %1402 = vmatpush2.bf16.msra.mxu0 %v5282_v30  ;;  %v5352_v30 = vld [vmem:[%s7394_s1 + $0x600] ss:$8 sps:$4 sm:$0xff]  }
  0xbe   : > { %1662 = vmatpush2.bf16.msra.mxu1 %v5285_v31  ;;  %1403 = vmatprep.subr.bf16.mxu0 %v5290_v32  ;;  %v5355_v31 = vld [vmem:[%s7394_s1 + $0x700] ss:$8 sps:$4 sm:$0xff]   ;;  %v5360_v32 = vld [vmem:[%s7394_s1 + $0x6f4] ss:$8 sps:$4 sm:$0xff]  }
  0xbf   : > { %1663 = vmatprep.subr.bf16.mxu1 %v5293_v33  ;;  %v5363_v33 = vld [vmem:[%s7394_s1 + $0x7f4] ss:$8 sps:$4 sm:$0xff]  }
  0xc1   : > { %1404 = vmatpush2.bf16.msra.mxu0 %v5288_v35  ;;  %v5358_v35 = vld [vmem:[%s7394_s1 + $0x6f0] ss:$8 sps:$4 sm:$0xff]  }
  0xc2   : > { %1664 = vmatpush2.bf16.msra.mxu1 %v5291_v38  ;;  %1405 = vmatprep.subr.bf16.mxu0 %v5296_v39  ;;  %v5366_v38 = vld [vmem:[%s7394_s1 + $0x6e4] ss:$8 sps:$4 sm:$0xff]  }
  0xc3   : > { %1665 = vmatprep.subr.bf16.mxu1 %v5299_v41  ;;  %v5369_v39 = vld [vmem:[%s7394_s1 + $0x7e4] ss:$8 sps:$4 sm:$0xff]   ;;  %v5364_v41 = vld [vmem:[%s7394_s1 + $0x6e0] ss:$8 sps:$4 sm:$0xff]  }
  0xc5   : > { %1406 = vmatpush2.bf16.msra.mxu0 %v5294_v43  ;;  %v5372_v43 = vld [vmem:[%s7394_s1 + $0x6d4] ss:$8 sps:$4 sm:$0xff]  }
  0xc6   : > { %1666 = vmatpush2.bf16.msra.mxu1 %v5297_v46  ;;  %1407 = vmatprep.subr.bf16.mxu0 %v5302_v50  ;;  %v5375_v46 = vld [vmem:[%s7394_s1 + $0x7d4] ss:$8 sps:$4 sm:$0xff]   ;;  %v5378_v50 = vld [vmem:[%s7394_s1 + $0x6c4] ss:$8 sps:$4 sm:$0xff]  }
  0xc7   : > { %1667 = vmatprep.subr.bf16.mxu1 %v5305_v51  ;;  %v5381_v51 = vld [vmem:[%s7394_s1 + $0x7c4] ss:$8 sps:$4 sm:$0xff]  }
  0xc9   : > { %1408 = vmatpush2.bf16.msra.mxu0 %v5300_v52  ;;  %v5376_v52 = vld [vmem:[%s7394_s1 + $0x6c0] ss:$8 sps:$4 sm:$0xff]  }
  0xca   : > { %1668 = vmatpush2.bf16.msra.mxu1 %v5303_v55  ;;  %1883 = vmatprep.subr.bf16.mxu0 %v5310_v59  ;;  %v5387_v55 = vld [vmem:[%s7394_s1 + $0x7b4] ss:$8 sps:$4 sm:$0xff]   ;;  %v5393_v59 = vld [vmem:[%s7394_s1 + $0x7a4] ss:$8 sps:$4 sm:$0xff]  }
  0xcb   : > { %2143 = vmatprep.subr.bf16.mxu1 %v5315_v60  ;;  %v5388_v60 = vld [vmem:[%s7394_s1 + $0x6a0] ss:$8 sps:$4 sm:$0xff]  }
  0xcc   : > { %1410 = vmatmul.mubr.bf16.vlgmr.msra.gmra.mxu0 %v1213_v44  ;;  %v5396_v44 = vld [vmem:[%s7394_s1 + $0x694] ss:$8 sps:$4 sm:$0xff]  }
  0xcd   : > { %1670 = vmatmul.mubr.bf16.vlgmr.msra.gmra.mxu1 %v1466_v0  ;;  %1884 = vmatpush1.bf16.msra.mxu0 %v5308_v40  ;;  %v5399_v40 = vld [vmem:[%s7394_s1 + $0x794] ss:$8 sps:$4 sm:$0xff]   ;;  %v5394_v0 = vld [vmem:[%s7394_s1 + $0x690] ss:$8 sps:$4 sm:$0xff]  }
  0xce   : > { %2144 = vmatpush1.bf16.msra.mxu1 %v5313_v1  ;;  %1885 = vmatprep.subr.bf16.mxu0 %v5318_v2  ;;  %v4633_v1 = vcombine.high %v6404_v37, %v6610_v63  ;;  %v5397_v2 = vld [vmem:[%s7394_s1 + $0x790] ss:$8 sps:$4 sm:$0xff]  }
  0xcf   : > { %2145 = vmatprep.subr.bf16.mxu1 %v5321_v3  ;;  %1915 = vmatprep.mubr.bf16.mxu0 %v1720_v4  ;;  %v1966_v3 = vshrl.u32 %v4500_v62, 16  ;;  %v1969_v4 = vshll.u32 %v4500_v62, 16  ;;  %v5457_v62 = vld [vmem:[%s7394_s1 + $0x904] ss:$8 sps:$4 sm:$0xff]  }
  0xd0   : > { %2175 = vmatprep.mubr.bf16.mxu1 %v1980_v5  ;;  %v5402_v5 = vld [vmem:[%s7394_s1 + $0x684] ss:$8 sps:$4 sm:$0xff]  }
  0xd1   : > { %1886 = vmatpush1.bf16.msra.mxu0 %v5316_v6  ;;  %v5405_v6 = vld [vmem:[%s7394_s1 + $0x784] ss:$8 sps:$4 sm:$0xff]  }
  0xd2   : > { %2146 = vmatpush1.bf16.msra.mxu1 %v5319_v7  ;;  %1887 = vmatprep.subr.bf16.mxu0 %v5324_v8  ;;  %v5400_v7 = vld [vmem:[%s7394_s1 + $0x680] ss:$8 sps:$4 sm:$0xff]   ;;  %v2479_v8 = vshll.u32 %v4633_v1, 16 }
  0xd3   : > { %2147 = vmatprep.subr.bf16.mxu1 %v5327_v9  ;;  %v5403_v9 = vld [vmem:[%s7394_s1 + $0x780] ss:$8 sps:$4 sm:$0xff]  }
  0xd5   : > { %1888 = vmatpush1.bf16.msra.mxu0 %v5322_v10  ;;  %v1968_v10 = vrot.slane %v1966_v3, 3  ;;  %v5461_v3 = vld [vmem:[%s7394_s1 + $0x9f0] ss:$8 sps:$4 sm:$0xff]  }
  0xd6   : > { %2148 = vmatpush1.bf16.msra.mxu1 %v5325_v11  ;;  %1889 = vmatprep.subr.bf16.mxu0 %v5330_v12  ;;  %v1971_v11 = vrot.slane %v1969_v4, 4  ;;  %v5410_v12 = vld [vmem:[%s7394_s1 + $0x874] ss:$8 sps:$4 sm:$0xff]   ;;  %v5466_v4 = vld [vmem:[%s7394_s1 + $0x8e4] ss:$8 sps:$4 sm:$0xff]  }
  0xd7   : > { %2149 = vmatprep.subr.bf16.mxu1 %v5333_v13  ;;  %v5415_v13 = vld [vmem:[%s7394_s1 + $0x974] ss:$8 sps:$4 sm:$0xff]  }
  0xd9   : > { %1890 = vmatpush1.bf16.msra.mxu0 %v5328_v14  ;;  %v2477_v14 = vshrl.u32 %v4633_v1, 16  ;;  %v5463_v1 = vld [vmem:[%s7394_s1 + $0x9f4] ss:$8 sps:$4 sm:$0xff]  }
  0xda   : > { %2150 = vmatpush1.bf16.msra.mxu1 %v5331_v15  ;;  %1891 = vmatprep.subr.bf16.mxu0 %v5336_v16  ;;  %v2481_v15 = vrot.slane %v2479_v8, 1  ;;  %v1719_v16 = vrot.slane %v4434_v34, 3  ;;  %v5472_v8 = vld [vmem:[%s7394_s1 + $0x8d4] ss:$8 sps:$4 sm:$0xff]  }
  0xdb   : > { %2151 = vmatprep.subr.bf16.mxu1 %v5339_v17  ;;  %v5408_v17 = vld [vmem:[%s7394_s1 + $0x870] ss:$8 sps:$4 sm:$0xff]  }
  0xdc   : > { %v2482_v34 = vor.u32 %v2481_v15, %v2477_v14  ;;  %v5476_v14 = vld [vmem:[%s7394_s1 + $0x8c0] ss:$8 sps:$4 sm:$0xff]  }
  0xdd   : > { %1892 = vmatpush1.bf16.msra.mxu0 %v5334_v18  ;;  %v1972_v18 = vor.u32 %v1971_v11, %v1968_v10  ;;  %v5470_v10 = vld [vmem:[%s7394_s1 + $0x8d0] ss:$8 sps:$4 sm:$0xff]   ;;  %v5479_v15 = vld [vmem:[%s7394_s1 + $0x9c0] ss:$8 sps:$4 sm:$0xff]  }
  0xde   : > { %2152 = vmatpush1.bf16.msra.mxu1 %v5337_v19  ;;  %1893 = vmatprep.subr.bf16.mxu0 %v5342_v20  ;;  %v5413_v19 = vld [vmem:[%s7394_s1 + $0x970] ss:$8 sps:$4 sm:$0xff]   ;;  %v5418_v20 = vld [vmem:[%s7394_s1 + $0x864] ss:$8 sps:$4 sm:$0xff]  }
  0xdf   : > { %2153 = vmatprep.subr.bf16.mxu1 %v5345_v21  ;;  %v5473_v11 = vld [vmem:[%s7394_s1 + $0x9d0] ss:$8 sps:$4 sm:$0xff]  }
  0xe1   : > { %1894 = vmatpush1.bf16.msra.mxu0 %v5340_v22 }
  0xe2   : > { %2154 = vmatpush1.bf16.msra.mxu1 %v5343_v23  ;;  %1895 = vmatprep.subr.bf16.mxu0 %v5348_v24  ;;  %v5416_v23 = vld [vmem:[%s7394_s1 + $0x860] ss:$8 sps:$4 sm:$0xff]  }
  0xe3   : > { %2155 = vmatprep.subr.bf16.mxu1 %v5351_v25  ;;  %v5419_v24 = vld [vmem:[%s7394_s1 + $0x960] ss:$8 sps:$4 sm:$0xff]  }
  0xe5   : > { %1896 = vmatpush1.bf16.msra.mxu0 %v5346_v26  ;;  %v5424_v26 = vld [vmem:[%s7394_s1 + $0x854] ss:$8 sps:$4 sm:$0xff]  }
  0xe6   : > { %2156 = vmatpush1.bf16.msra.mxu1 %v5349_v27  ;;  %1897 = vmatprep.subr.bf16.mxu0 %v5354_v28 }
  0xe7   : > { %2157 = vmatprep.subr.bf16.mxu1 %v5357_v29  ;;  %v5427_v29 = vld [vmem:[%s7394_s1 + $0x954] ss:$8 sps:$4 sm:$0xff]  }
  0xe9   : > { %1898 = vmatpush1.bf16.msra.mxu0 %v5352_v30 }
  0xea   : > { %2158 = vmatpush1.bf16.msra.mxu1 %v5355_v31  ;;  %1899 = vmatprep.subr.bf16.mxu0 %v5360_v32  ;;  %v5422_v32 = vld [vmem:[%s7394_s1 + $0x850] ss:$8 sps:$4 sm:$0xff]  }
  0xeb   : > { %2159 = vmatprep.subr.bf16.mxu1 %v5363_v33  ;;  %v5425_v33 = vld [vmem:[%s7394_s1 + $0x950] ss:$8 sps:$4 sm:$0xff]  }
  0xed   : > { %1900 = vmatpush2.bf16.msra.mxu0 %v5358_v35 }
  0xee   : > { %2160 = vmatpush2.bf16.msra.mxu1 %v5361_v36  ;;  %1901 = vmatprep.subr.bf16.mxu0 %v5366_v38  ;;  %v5430_v36 = vld [vmem:[%s7394_s1 + $0x844] ss:$8 sps:$4 sm:$0xff]  }
  0xef   : > { %2161 = vmatprep.subr.bf16.mxu1 %v5369_v39  ;;  %v5433_v39 = vld [vmem:[%s7394_s1 + $0x944] ss:$8 sps:$4 sm:$0xff]  }
  0xf1   : > { %1902 = vmatpush2.bf16.msra.mxu0 %v5364_v41 }
  0xf2   : > { %2162 = vmatpush2.bf16.msra.mxu1 %v5367_v42  ;;  %1903 = vmatprep.subr.bf16.mxu0 %v5372_v43  ;;  %v6690_v42 = vld [vmem:[%s5939_s30 + $0x8] sm:$0xee] }
  0xf3   : > { %2163 = vmatprep.subr.bf16.mxu1 %v5375_v46  ;;  %v4698_v43 = vcombine.low %v6690_v42, %v6610_v63  ;;  %v5428_v46 = vld [vmem:[%s7394_s1 + $0x840] ss:$8 sps:$4 sm:$0xff]  }
  0xf5   : > { %1904 = vmatpush2.bf16.msra.mxu0 %v5370_v48  ;;  %v5431_v48 = vld [vmem:[%s7394_s1 + $0x940] ss:$8 sps:$4 sm:$0xff]  }
  0xf6   : > { %2164 = vmatpush2.bf16.msra.mxu1 %v5373_v49  ;;  %1905 = vmatprep.subr.bf16.mxu0 %v5378_v50  ;;  %v5436_v49 = vld [vmem:[%s7394_s1 + $0x834] ss:$8 sps:$4 sm:$0xff]  }
  0xf7   : > { %2165 = vmatprep.subr.bf16.mxu1 %v5381_v51  ;;  %v5439_v50 = vld [vmem:[%s7394_s1 + $0x934] ss:$8 sps:$4 sm:$0xff]   ;;  %v5434_v51 = vld [vmem:[%s7394_s1 + $0x830] ss:$8 sps:$4 sm:$0xff]  }
  0xf9   : > { %1906 = vmatpush2.bf16.msra.mxu0 %v5376_v52  ;;  %v5437_v52 = vld [vmem:[%s7394_s1 + $0x930] ss:$8 sps:$4 sm:$0xff]  }
  0xfa   : > { %2166 = vmatpush2.bf16.msra.mxu1 %v5379_v53  ;;  %1907 = vmatprep.subr.bf16.mxu0 %v5384_v54  ;;  %v5442_v53 = vld [vmem:[%s7394_s1 + $0x824] ss:$8 sps:$4 sm:$0xff]  }
  0xfb   : > { %2167 = vmatprep.subr.bf16.mxu1 %v5387_v55  ;;  %v5445_v54 = vld [vmem:[%s7394_s1 + $0x924] ss:$8 sps:$4 sm:$0xff]   ;;  %v5440_v55 = vld [vmem:[%s7394_s1 + $0x820] ss:$8 sps:$4 sm:$0xff]  }
  0xfd   : > { %1908 = vmatpush2.bf16.msra.mxu0 %v5382_v56  ;;  %v5443_v56 = vld [vmem:[%s7394_s1 + $0x920] ss:$8 sps:$4 sm:$0xff]  }
  0xfe   : > { %2168 = vmatpush2.bf16.msra.mxu1 %v5385_v57  ;;  %1909 = vmatprep.subr.bf16.mxu0 %v5390_v58  ;;  %v5448_v57 = vld [vmem:[%s7394_s1 + $0x814] ss:$8 sps:$4 sm:$0xff]  }
  0xff   : > { %2169 = vmatprep.subr.bf16.mxu1 %v5393_v59  ;;  %v5451_v58 = vld [vmem:[%s7394_s1 + $0x914] ss:$8 sps:$4 sm:$0xff]   ;;  %v5446_v59 = vld [vmem:[%s7394_s1 + $0x810] ss:$8 sps:$4 sm:$0xff]  }
 0x101   : > { %1910 = vmatpush2.bf16.msra.mxu0 %v5388_v60  ;;  %v5449_v60 = vld [vmem:[%s7394_s1 + $0x910] ss:$8 sps:$4 sm:$0xff]  }
 0x102   : > { %2170 = vmatpush2.bf16.msra.mxu1 %v5391_v61  ;;  %1911 = vmatprep.subr.bf16.mxu0 %v5396_v44  ;;  %v5454_v61 = vld [vmem:[%s7394_s1 + $0x804] ss:$8 sps:$4 sm:$0xff]   ;;  %v5452_v44 = vld [vmem:[%s7394_s1 + $0x800] ss:$8 sps:$4 sm:$0xff]  }
 0x103   : > { %2171 = vmatprep.subr.bf16.mxu1 %v5399_v40  ;;  %v5455_v40 = vld [vmem:[%s7394_s1 + $0x900] ss:$8 sps:$4 sm:$0xff]  }
 0x105   : > { %1912 = vmatpush2.bf16.msra.mxu0 %v5394_v0  ;;  %v5460_v0 = vld [vmem:[%s7394_s1 + $0x8f4] ss:$8 sps:$4 sm:$0xff]  }
 0x106   : > { %2172 = vmatpush2.bf16.msra.mxu1 %v5397_v2  ;;  %1913 = vmatprep.subr.bf16.mxu0 %v5402_v5  ;;  %v5458_v2 = vld [vmem:[%s7394_s1 + $0x8f0] ss:$8 sps:$4 sm:$0xff]   ;;  %v5469_v5 = vld [vmem:[%s7394_s1 + $0x9e4] ss:$8 sps:$4 sm:$0xff]  }
 0x107   : > { %2173 = vmatprep.subr.bf16.mxu1 %v5405_v6  ;;  %v5464_v6 = vld [vmem:[%s7394_s1 + $0x8e0] ss:$8 sps:$4 sm:$0xff]  }
 0x109   : > { %1914 = vmatpush2.bf16.msra.mxu0 %v5400_v7  ;;  %v5467_v7 = vld [vmem:[%s7394_s1 + $0x9e0] ss:$8 sps:$4 sm:$0xff]  }
 0x10a   : > { %2174 = vmatpush2.bf16.msra.mxu1 %v5403_v9  ;;  %2383 = vmatprep.subr.bf16.mxu0 %v5410_v12  ;;  %v5475_v9 = vld [vmem:[%s7394_s1 + $0x9d4] ss:$8 sps:$4 sm:$0xff]   ;;  %v5478_v12 = vld [vmem:[%s7394_s1 + $0x8c4] ss:$8 sps:$4 sm:$0xff]  }
 0x10b   : > { %2645 = vmatprep.subr.bf16.mxu1 %v5415_v13  ;;  %v5481_v13 = vld [vmem:[%s7394_s1 + $0x9c4] ss:$8 sps:$4 sm:$0xff]  }
 0x10c   : > { %v456_v21 = vpop.f32.mrf.mxu0  ;;  %1916 = vmatmul.mubr.bf16.vlgmr.msra.gmra.mxu0 %v1719_v16  ;;  %v5484_v16 = vld [vmem:[%s7394_s1 + $0x8b4] ss:$8 sps:$4 sm:$0xff]  }
 0x10d   : > { %v661_v22 = vpop.f32.mrf.mxu1  ;;  %2176 = vmatmul.mubr.bf16.vlgmr.msra.gmra.mxu1 %v1972_v18  ;;  %2384 = vmatpush1.bf16.msra.mxu0 %v5408_v17  ;;  %v5487_v17 = vld [vmem:[%s7394_s1 + $0x9b4] ss:$8 sps:$4 sm:$0xff]   ;;  %v5482_v18 = vld [vmem:[%s7394_s1 + $0x8b0] ss:$8 sps:$4 sm:$0xff]  }
 0x10e   : > { %v6667_v25 = vadd.f32 %v661_v22, %v456_v21  ;;  %2646 = vmatpush1.bf16.msra.mxu1 %v5413_v19  ;;  %v458_v27 = vpop.f32.mrf.mxu0  ;;  %2385 = vmatprep.subr.bf16.mxu0 %v5418_v20  ;;  %v5485_v19 = vld [vmem:[%s7394_s1 + $0x9b0] ss:$8 sps:$4 sm:$0xff]   ;;  %v5490_v20 = vld [vmem:[%s7394_s1 + $0x8a4] ss:$8 sps:$4 sm:$0xff]   ;;  %v5491_v22 = vld [vmem:[%s7394_s1 + $0x9a0] ss:$8 sps:$4 sm:$0xff]  }
 0x10f   : > { %v663_v28 = vpop.f32.mrf.mxu1  ;;  %2647 = vmatprep.subr.bf16.mxu1 %v5421_v45  ;;  %2415 = vmatprep.mubr.bf16.mxu0 %v4567_v47  ;;  %v5493_v45 = vld [vmem:[%s7394_s1 + $0x9a4] ss:$8 sps:$4 sm:$0xff]   ;;  %v5488_v47 = vld [vmem:[%s7394_s1 + $0x8a0] ss:$8 sps:$4 sm:$0xff]   ;;  %v6820_v21 = vld [vmem:[%s5939_s30 + $0x10] sm:$0x33] }
 0x110   : > { %v6675_v30 = vadd.f32 %v663_v28, %v458_v27  ;;  %2677 = vmatprep.mubr.bf16.mxu1 %v2482_v34  ;;  %v460_v31 = vpop.f32.mrf.mxu0  ;;  %v4632_v34 = vcombine.low %v6404_v37, %v6610_v63  ;;  %v4765_v37 = vcombine.high %v6690_v42, %v6820_v21  ;;  %v5497_v28 = vld [vmem:[%s7394_s1 + $0x990] ss:$8 sps:$4 sm:$0xff]  }
 0x111   : > { %v665_v35 = vpop.f32.mrf.mxu1  ;;  %2386 = vmatpush1.bf16.msra.mxu0 %v5416_v23  ;;  %v5496_v23 = vld [vmem:[%s7394_s1 + $0x894] ss:$8 sps:$4 sm:$0xff]   ;;  %v5505_v31 = vld [vmem:[%s7394_s1 + $0x984] ss:$8 sps:$4 sm:$0xff]  }
 0x112   : > { %2648 = vmatpush1.bf16.msra.mxu1 %v5419_v24  ;;  %v461_v38 = vpop.f32.mrf.mxu0  ;;  %2387 = vmatprep.subr.bf16.mxu0 %v5424_v26  ;;  %v5499_v24 = vld [vmem:[%s7394_s1 + $0x994] ss:$8 sps:$4 sm:$0xff]   ;;  %v5494_v26 = vld [vmem:[%s7394_s1 + $0x890] ss:$8 sps:$4 sm:$0xff]   ;;  %v2472_v27 = vshll.u32 %v4632_v34, 16 }
 0x113   : > { %2649 = vmatprep.subr.bf16.mxu1 %v5427_v29  ;;  %v666_v41 = vpop.f32.mrf.mxu1  ;;  %v5502_v29 = vld [vmem:[%s7394_s1 + $0x884] ss:$8 sps:$4 sm:$0xff]   ;;  %v5500_v35 = vld [vmem:[%s7394_s1 + $0x880] ss:$8 sps:$4 sm:$0xff]   ;;  %v2470_v38 = vshrl.u32 %v4632_v34, 16 }
 0x114   : > { %v5510_v41 = vld [vmem:[%s7394_s1 + $0xa74] ss:$8 sps:$4 sm:$0xff]   ;;  %v5540_v34 = vld [vmem:[%s7394_s1 + $0xa20] ss:$8 sps:$4 sm:$0xff]  }
 0x115   : > { %2388 = vmatpush1.bf16.msra.mxu0 %v5422_v32  ;;  %v2982_v32 = vshrl.u32 %v4765_v37, 16 }
 0x116   : > { %2650 = vmatpush1.bf16.msra.mxu1 %v5425_v33  ;;  %2389 = vmatprep.subr.bf16.mxu0 %v5430_v36  ;;  %v2985_v33 = vshll.u32 %v4765_v37, 16  ;;  %v5503_v36 = vld [vmem:[%s7394_s1 + $0x980] ss:$8 sps:$4 sm:$0xff]   ;;  %v5546_v37 = vld [vmem:[%s7394_s1 + $0xa10] ss:$8 sps:$4 sm:$0xff]  }
 0x117   : > { %2651 = vmatprep.subr.bf16.mxu1 %v5433_v39  ;;  %v2474_v39 = vrot.slane %v2472_v27, 1  ;;  %v5554_v27 = vld [vmem:[%s7394_s1 + $0xa04] ss:$8 sps:$4 sm:$0xff]  }
 0x119   : > { %2390 = vmatpush1.bf16.msra.mxu0 %v5428_v46  ;;  %v5515_v46 = vld [vmem:[%s7394_s1 + $0xb74] ss:$8 sps:$4 sm:$0xff]  }
 0x11a   : > { %2652 = vmatpush1.bf16.msra.mxu1 %v5431_v48  ;;  %2391 = vmatprep.subr.bf16.mxu0 %v5436_v49  ;;  %v6858_v48 = vld [vmem:[%s5939_s30 + $0x8] sm:$0xcc]  ;;  %v4699_v49 = vcombine.high %v6690_v42, %v6610_v63 }
 0x11b   : > { %2653 = vmatprep.subr.bf16.mxu1 %v5439_v50  ;;  %v2984_v50 = vrot.slane %v2982_v32, 1  ;;  %v5560_v32 = vld [vmem:[%s7394_s1 + $0xaf4] ss:$8 sps:$4 sm:$0xff]   ;;  %v5621_v63 = vld [vmem:[%s7394_s1 + $0xd64] ss:$8 sps:$4 sm:$0xff]  }
 0x11d   : > { %2392 = vmatpush1.bf16.msra.mxu0 %v5434_v51  ;;  %v2987_v51 = vrot.slane %v2985_v33, 2  ;;  %v5563_v33 = vld [vmem:[%s7394_s1 + $0xbf4] ss:$8 sps:$4 sm:$0xff]  }
 0x11e   : > { %2654 = vmatpush1.bf16.msra.mxu1 %v5437_v52  ;;  %2393 = vmatprep.subr.bf16.mxu0 %v5442_v53  ;;  %v5760_v52 = vld [vmem:[%s5939_s30 + $0x8] sm:$0xff] }
 0x11f   : > { %2655 = vmatprep.subr.bf16.mxu1 %v5445_v54  ;;  %v4566_v53 = vcombine.low %v5760_v52, %v5760_v52  ;;  %v2475_v54 = vor.u32 %v2474_v39, %v2470_v38  ;;  %v5566_v38 = vld [vmem:[%s7394_s1 + $0xae4] ss:$8 sps:$4 sm:$0xff]   ;;  %v5573_v52 = vld [vmem:[%s7394_s1 + $0xbd0] ss:$8 sps:$4 sm:$0xff]  }
 0x120   : > { %v5569_v39 = vld [vmem:[%s7394_s1 + $0xbe4] ss:$8 sps:$4 sm:$0xff]  }
 0x121   : > { %2394 = vmatpush1.bf16.msra.mxu0 %v5440_v55  ;;  %v4830_v55 = vcombine.low %v6858_v48, %v6820_v21 }
 0x122   : > { %2656 = vmatpush1.bf16.msra.mxu1 %v5443_v56  ;;  %2395 = vmatprep.subr.bf16.mxu0 %v5448_v57  ;;  %v5508_v56 = vld [vmem:[%s7394_s1 + $0xa70] ss:$8 sps:$4 sm:$0xff]  }
 0x123   : > { %2657 = vmatprep.subr.bf16.mxu1 %v5451_v58  ;;  %v5513_v57 = vld [vmem:[%s7394_s1 + $0xb70] ss:$8 sps:$4 sm:$0xff]   ;;  %v5518_v58 = vld [vmem:[%s7394_s1 + $0xa64] ss:$8 sps:$4 sm:$0xff]  }
 0x125   : > { %2396 = vmatpush1.bf16.msra.mxu0 %v5446_v59  ;;  %v5521_v59 = vld [vmem:[%s7394_s1 + $0xb64] ss:$8 sps:$4 sm:$0xff]  }
 0x126   : > { %2658 = vmatpush1.bf16.msra.mxu1 %v5449_v60  ;;  %2397 = vmatprep.subr.bf16.mxu0 %v5454_v61  ;;  %v2728_v60 = vrot.slane %v4699_v49, 1  ;;  %v2988_v61 = vor.u32 %v2987_v51, %v2984_v50  ;;  %v5572_v49 = vld [vmem:[%s7394_s1 + $0xad4] ss:$8 sps:$4 sm:$0xff]   ;;  %v5570_v51 = vld [vmem:[%s7394_s1 + $0xad0] ss:$8 sps:$4 sm:$0xff]  }
 0x127   : > { %2659 = vmatprep.subr.bf16.mxu1 %v5457_v62  ;;  %v5575_v50 = vld [vmem:[%s7394_s1 + $0xbd4] ss:$8 sps:$4 sm:$0xff]  }
 0x129   : > { %2398 = vmatpush1.bf16.msra.mxu0 %v5452_v44 }
 0x12a   : > { %2660 = vmatpush1.bf16.msra.mxu1 %v5455_v40  ;;  %2399 = vmatprep.subr.bf16.mxu0 %v5460_v0  ;;  %v5516_v0 = vld [vmem:[%s7394_s1 + $0xa60] ss:$8 sps:$4 sm:$0xff]  }
 0x12b   : > { %2661 = vmatprep.subr.bf16.mxu1 %v5463_v1  ;;  %v5519_v1 = vld [vmem:[%s7394_s1 + $0xb60] ss:$8 sps:$4 sm:$0xff]  }
 0x12d   : > { %2400 = vmatpush2.bf16.msra.mxu0 %v5458_v2 }
 0x12e   : > { %2662 = vmatpush2.bf16.msra.mxu1 %v5461_v3  ;;  %2401 = vmatprep.subr.bf16.mxu0 %v5466_v4  ;;  %v5524_v4 = vld [vmem:[%s7394_s1 + $0xa54] ss:$8 sps:$4 sm:$0xff]  }
 0x12f   : > { %2663 = vmatprep.subr.bf16.mxu1 %v5469_v5 }
 0x131   : > { %2402 = vmatpush2.bf16.msra.mxu0 %v5464_v6 }
 0x132   : > { %2664 = vmatpush2.bf16.msra.mxu1 %v5467_v7  ;;  %2403 = vmatprep.subr.bf16.mxu0 %v5472_v8 }
 0x133   : > { %2665 = vmatprep.subr.bf16.mxu1 %v5475_v9 }
 0x135   : > { %2404 = vmatpush2.bf16.msra.mxu0 %v5470_v10  ;;  %v5522_v10 = vld [vmem:[%s7394_s1 + $0xa50] ss:$8 sps:$4 sm:$0xff]  }
 0x136   : > { %2666 = vmatpush2.bf16.msra.mxu1 %v5473_v11  ;;  %2405 = vmatprep.subr.bf16.mxu0 %v5478_v12  ;;  %v5525_v11 = vld [vmem:[%s7394_s1 + $0xb50] ss:$8 sps:$4 sm:$0xff]  }
 0x137   : > { %2667 = vmatprep.subr.bf16.mxu1 %v5481_v13  ;;  %v5533_v13 = vld [vmem:[%s7394_s1 + $0xb44] ss:$8 sps:$4 sm:$0xff]  }
 0x139   : > { %2406 = vmatpush2.bf16.msra.mxu0 %v5476_v14 }
 0x13a   : > { %2668 = vmatpush2.bf16.msra.mxu1 %v5479_v15  ;;  %2407 = vmatprep.subr.bf16.mxu0 %v5484_v16  ;;  %v5528_v15 = vld [vmem:[%s7394_s1 + $0xa40] ss:$8 sps:$4 sm:$0xff]  }
 0x13b   : > { %2669 = vmatprep.subr.bf16.mxu1 %v5487_v17  ;;  %v5531_v16 = vld [vmem:[%s7394_s1 + $0xb40] ss:$8 sps:$4 sm:$0xff]   ;;  %v5536_v17 = vld [vmem:[%s7394_s1 + $0xa34] ss:$8 sps:$4 sm:$0xff]  }
 0x13d   : > { %2408 = vmatpush2.bf16.msra.mxu0 %v5482_v18  ;;  %v5539_v18 = vld [vmem:[%s7394_s1 + $0xb34] ss:$8 sps:$4 sm:$0xff]  }
 0x13e   : > { %2670 = vmatpush2.bf16.msra.mxu1 %v5485_v19  ;;  %2409 = vmatprep.subr.bf16.mxu0 %v5490_v20  ;;  %v5534_v19 = vld [vmem:[%s7394_s1 + $0xa30] ss:$8 sps:$4 sm:$0xff]  }
 0x13f   : > { %2671 = vmatprep.subr.bf16.mxu1 %v5493_v45  ;;  %v5537_v20 = vld [vmem:[%s7394_s1 + $0xb30] ss:$8 sps:$4 sm:$0xff]   ;;  %v5542_v45 = vld [vmem:[%s7394_s1 + $0xa24] ss:$8 sps:$4 sm:$0xff]  }
 0x141   : > { %2410 = vmatpush2.bf16.msra.mxu0 %v5488_v47  ;;  %v5545_v47 = vld [vmem:[%s7394_s1 + $0xb24] ss:$8 sps:$4 sm:$0xff]  }
 0x142   : > { %2672 = vmatpush2.bf16.msra.mxu1 %v5491_v22  ;;  %2411 = vmatprep.subr.bf16.mxu0 %v5496_v23  ;;  %v5543_v22 = vld [vmem:[%s7394_s1 + $0xb20] ss:$8 sps:$4 sm:$0xff]   ;;  %v5548_v23 = vld [vmem:[%s7394_s1 + $0xa14] ss:$8 sps:$4 sm:$0xff]  }
 0x143   : > { %2673 = vmatprep.subr.bf16.mxu1 %v5499_v24  ;;  %v5551_v24 = vld [vmem:[%s7394_s1 + $0xb14] ss:$8 sps:$4 sm:$0xff]  }
 0x145   : > { %2412 = vmatpush2.bf16.msra.mxu0 %v5494_v26  ;;  %v5549_v26 = vld [vmem:[%s7394_s1 + $0xb10] ss:$8 sps:$4 sm:$0xff]  }
 0x146   : > { %2674 = vmatpush2.bf16.msra.mxu1 %v5497_v28  ;;  %2413 = vmatprep.subr.bf16.mxu0 %v5502_v29  ;;  %v5557_v28 = vld [vmem:[%s7394_s1 + $0xb04] ss:$8 sps:$4 sm:$0xff]   ;;  %v5552_v29 = vld [vmem:[%s7394_s1 + $0xa00] ss:$8 sps:$4 sm:$0xff]  }
 0x147   : > { %2675 = vmatprep.subr.bf16.mxu1 %v5505_v31  ;;  %v5555_v31 = vld [vmem:[%s7394_s1 + $0xb00] ss:$8 sps:$4 sm:$0xff]  }
 0x149   : > { %2414 = vmatpush2.bf16.msra.mxu0 %v5500_v35  ;;  %v5558_v35 = vld [vmem:[%s7394_s1 + $0xaf0] ss:$8 sps:$4 sm:$0xff]  }
 0x14a   : > { %2676 = vmatpush2.bf16.msra.mxu1 %v5503_v36  ;;  %2891 = vmatprep.subr.bf16.mxu0 %v5510_v41  ;;  %v5561_v36 = vld [vmem:[%s7394_s1 + $0xbf0] ss:$8 sps:$4 sm:$0xff]   ;;  %v5564_v41 = vld [vmem:[%s7394_s1 + $0xae0] ss:$8 sps:$4 sm:$0xff]  }
 0x14b   : > { %3151 = vmatprep.subr.bf16.mxu1 %v5515_v46  ;;  %v5567_v46 = vld [vmem:[%s7394_s1 + $0xbe0] ss:$8 sps:$4 sm:$0xff]  }
 0x14c   : > { %v905_v62 = vpop.f32.mrf.mxu0  ;;  %2416 = vmatmul.mubr.bf16.vlgmr.msra.gmra.mxu0 %v4566_v53  ;;  %v5578_v53 = vld [vmem:[%s7394_s1 + $0xac4] ss:$8 sps:$4 sm:$0xff]  }
 0x14d   : > { %v1165_v44 = vpop.f32.mrf.mxu1  ;;  %2678 = vmatmul.mubr.bf16.vlgmr.msra.gmra.mxu1 %v2475_v54  ;;  %v912_v40 = vadd.f32 %v905_v62, %v6667_v25  ;;  %2892 = vmatpush1.bf16.msra.mxu0 %v5508_v56  ;;  %v5527_v25 = vld [vmem:[%s7394_s1 + $0xb54] ss:$8 sps:$4 sm:$0xff]   ;;  %v5581_v54 = vld [vmem:[%s7394_s1 + $0xbc4] ss:$8 sps:$4 sm:$0xff]   ;;  %v5576_v56 = vld [vmem:[%s7394_s1 + $0xac0] ss:$8 sps:$4 sm:$0xff]  }
 0x14e   : > { %3152 = vmatpush1.bf16.msra.mxu1 %v5513_v57  ;;  %v907_v2 = vpop.f32.mrf.mxu0  ;;  %2893 = vmatprep.subr.bf16.mxu0 %v5518_v58  ;;  %v5579_v57 = vld [vmem:[%s7394_s1 + $0xbc0] ss:$8 sps:$4 sm:$0xff]   ;;  %v5584_v58 = vld [vmem:[%s7394_s1 + $0xab4] ss:$8 sps:$4 sm:$0xff]   ;;  %v5590_v62 = vld [vmem:[%s7394_s1 + $0xaa4] ss:$8 sps:$4 sm:$0xff]  }
 0x14f   : > { %v1167_v3 = vpop.f32.mrf.mxu1  ;;  %3153 = vmatprep.subr.bf16.mxu1 %v5521_v59  ;;  %v913_v5 = vadd.f32 %v907_v2, %v6675_v30  ;;  %v6891_v6 = vadd.f32 %v1165_v44, %v912_v40  ;;  %2923 = vmatprep.mubr.bf16.mxu0 %v2728_v60  ;;  %v5530_v30 = vld [vmem:[%s7394_s1 + $0xa44] ss:$8 sps:$4 sm:$0xff]   ;;  %v5587_v59 = vld [vmem:[%s7394_s1 + $0xbb4] ss:$8 sps:$4 sm:$0xff]   ;;  %v5582_v60 = vld [vmem:[%s7394_s1 + $0xab0] ss:$8 sps:$4 sm:$0xff]   ;;  %v4764_v40 = vcombine.low %v6690_v42, %v6820_v21 }
 0x150   : > { %3183 = vmatprep.mubr.bf16.mxu1 %v2988_v61  ;;  %v909_v7 = vpop.f32.mrf.mxu0  ;;  %v5585_v61 = vld [vmem:[%s7394_s1 + $0xbb0] ss:$8 sps:$4 sm:$0xff]   ;;  %v5593_v44 = vld [vmem:[%s7394_s1 + $0xba4] ss:$8 sps:$4 sm:$0xff]   ;;  %v5591_v2 = vld [vmem:[%s7394_s1 + $0xba0] ss:$8 sps:$4 sm:$0xff]  }
 0x151   : > { %v1169_v8 = vpop.f32.mrf.mxu1  ;;  %v6893_v9 = vadd.f32 %v1167_v3, %v913_v5  ;;  %2894 = vmatpush1.bf16.msra.mxu0 %v5516_v0  ;;  %v7030_v0 = vld [vmem:[%s5939_s30 + $0x10] sm:$0x77]  ;;  %v2974_v5 = vshrl.u32 %v4764_v40, 16  ;;  %v2977_v7 = vshll.u32 %v4764_v40, 16  ;;  %v5643_v40 = vld [vmem:[%s7394_s1 + $0xd20] ss:$8 sps:$4 sm:$0xff]  }
 0x152   : > { %3154 = vmatpush1.bf16.msra.mxu1 %v5519_v1  ;;  %v910_v12 = vpop.f32.mrf.mxu0  ;;  %2895 = vmatprep.subr.bf16.mxu0 %v5524_v4  ;;  %v5588_v1 = vld [vmem:[%s7394_s1 + $0xaa0] ss:$8 sps:$4 sm:$0xff]   ;;  %v5596_v3 = vld [vmem:[%s7394_s1 + $0xa94] ss:$8 sps:$4 sm:$0xff]   ;;  %v5594_v8 = vld [vmem:[%s7394_s1 + $0xa90] ss:$8 sps:$4 sm:$0xff]  }
 0x153   : > { %3155 = vmatprep.subr.bf16.mxu1 %v5527_v25  ;;  %v1170_v14 = vpop.f32.mrf.mxu1  ;;  %v5599_v4 = vld [vmem:[%s7394_s1 + $0xb94] ss:$8 sps:$4 sm:$0xff]   ;;  %v4897_v25 = vcombine.high %v6858_v48, %v7030_v0  ;;  %v5605_v12 = vld [vmem:[%s7394_s1 + $0xb84] ss:$8 sps:$4 sm:$0xff]  }
 0x154   : > { %v2976_v14 = vrot.slane %v2974_v5, 1  ;;  %v5657_v5 = vld [vmem:[%s7394_s1 + $0xd04] ss:$8 sps:$4 sm:$0xff]  }
 0x155   : > { %2896 = vmatpush1.bf16.msra.mxu0 %v5522_v10  ;;  %v5597_v10 = vld [vmem:[%s7394_s1 + $0xb90] ss:$8 sps:$4 sm:$0xff]  }
 0x156   : > { %3156 = vmatpush1.bf16.msra.mxu1 %v5525_v11  ;;  %2897 = vmatprep.subr.bf16.mxu0 %v5530_v30  ;;  %v5602_v11 = vld [vmem:[%s7394_s1 + $0xa84] ss:$8 sps:$4 sm:$0xff]   ;;  %v3488_v30 = vshrl.u32 %v4897_v25, 16 }
 0x157   : > { %3157 = vmatprep.subr.bf16.mxu1 %v5533_v13  ;;  %v3491_v13 = vshll.u32 %v4897_v25, 16  ;;  %v5654_v25 = vld [vmem:[%s7394_s1 + $0xc04] ss:$8 sps:$4 sm:$0xff]  }
 0x159   : > { %2898 = vmatpush1.bf16.msra.mxu0 %v5528_v15  ;;  %v2979_v15 = vrot.slane %v2977_v7, 2  ;;  %v5652_v7 = vld [vmem:[%s7394_s1 + $0xc00] ss:$8 sps:$4 sm:$0xff]  }
 0x15a   : > { %3158 = vmatpush1.bf16.msra.mxu1 %v5531_v16  ;;  %2899 = vmatprep.subr.bf16.mxu0 %v5536_v17  ;;  %v5600_v16 = vld [vmem:[%s7394_s1 + $0xa80] ss:$8 sps:$4 sm:$0xff]  }
 0x15b   : > { %3159 = vmatprep.subr.bf16.mxu1 %v5539_v18  ;;  %v5603_v17 = vld [vmem:[%s7394_s1 + $0xb80] ss:$8 sps:$4 sm:$0xff]   ;;  %v5610_v18 = vld [vmem:[%s7394_s1 + $0xc74] ss:$8 sps:$4 sm:$0xff]  }
 0x15d   : > { %2900 = vmatpush1.bf16.msra.mxu0 %v5534_v19  ;;  %v5615_v19 = vld [vmem:[%s7394_s1 + $0xd74] ss:$8 sps:$4 sm:$0xff]  }
 0x15e   : > { %3160 = vmatpush1.bf16.msra.mxu1 %v5537_v20  ;;  %2901 = vmatprep.subr.bf16.mxu0 %v5542_v45  ;;  %v4831_v20 = vcombine.high %v6858_v48, %v6820_v21  ;;  %v3490_v45 = vrot.slane %v3488_v30, 2  ;;  %v5661_v30 = vld [vmem:[%s7394_s1 + $0xdf0] ss:$8 sps:$4 sm:$0xff]  }
 0x15f   : > { %3161 = vmatprep.subr.bf16.mxu1 %v5545_v47  ;;  %v3493_v47 = vrot.slane %v3491_v13, 3  ;;  %v5666_v13 = vld [vmem:[%s7394_s1 + $0xce4] ss:$8 sps:$4 sm:$0xff]  }
 0x160   : > { %v3234_v42 = vrot.slane %v4831_v20, 2  ;;  %v5673_v20 = vld [vmem:[%s7394_s1 + $0xdd0] ss:$8 sps:$4 sm:$0xff]  }
 0x161   : > { %2902 = vmatpush1.bf16.msra.mxu0 %v5540_v34  ;;  %v2727_v34 = vrot.slane %v4698_v43, 1  ;;  %v3494_v43 = vor.u32 %v3493_v47, %v3490_v45  ;;  %v5678_v45 = vld [vmem:[%s7394_s1 + $0xcc4] ss:$8 sps:$4 sm:$0xff]  }
 0x162   : > { %3162 = vmatpush1.bf16.msra.mxu1 %v5543_v22  ;;  %2903 = vmatprep.subr.bf16.mxu0 %v5548_v23  ;;  %v2980_v22 = vor.u32 %v2979_v15, %v2976_v14  ;;  %v5608_v23 = vld [vmem:[%s7394_s1 + $0xc70] ss:$8 sps:$4 sm:$0xff]   ;;  %v5669_v14 = vld [vmem:[%s7394_s1 + $0xde4] ss:$8 sps:$4 sm:$0xff]   ;;  %v5664_v15 = vld [vmem:[%s7394_s1 + $0xce0] ss:$8 sps:$4 sm:$0xff]  }
 0x163   : > { %3163 = vmatprep.subr.bf16.mxu1 %v5551_v24  ;;  %v5613_v24 = vld [vmem:[%s7394_s1 + $0xd70] ss:$8 sps:$4 sm:$0xff]   ;;  %v5681_v47 = vld [vmem:[%s7394_s1 + $0xdc4] ss:$8 sps:$4 sm:$0xff]  }
 0x165   : > { %2904 = vmatpush1.bf16.msra.mxu0 %v5546_v37  ;;  %v5618_v37 = vld [vmem:[%s7394_s1 + $0xc64] ss:$8 sps:$4 sm:$0xff]  }
 0x166   : > { %3164 = vmatpush1.bf16.msra.mxu1 %v5549_v26  ;;  %2905 = vmatprep.subr.bf16.mxu0 %v5554_v27 }
 0x167   : > { %3165 = vmatprep.subr.bf16.mxu1 %v5557_v28 }
 0x169   : > { %2906 = vmatpush1.bf16.msra.mxu0 %v5552_v29  ;;  %v5616_v29 = vld [vmem:[%s7394_s1 + $0xc60] ss:$8 sps:$4 sm:$0xff]  }
 0x16a   : > { %3166 = vmatpush1.bf16.msra.mxu1 %v5555_v31  ;;  %2907 = vmatprep.subr.bf16.mxu0 %v5560_v32  ;;  %v5619_v31 = vld [vmem:[%s7394_s1 + $0xd60] ss:$8 sps:$4 sm:$0xff]  }
 0x16b   : > { %3167 = vmatprep.subr.bf16.mxu1 %v5563_v33 }
 0x16d   : > { %2908 = vmatpush2.bf16.msra.mxu0 %v5558_v35  ;;  %v5624_v35 = vld [vmem:[%s7394_s1 + $0xc54] ss:$8 sps:$4 sm:$0xff]  }
 0x16e   : > { %3168 = vmatpush2.bf16.msra.mxu1 %v5561_v36  ;;  %2909 = vmatprep.subr.bf16.mxu0 %v5566_v38 }
 0x16f   : > { %3169 = vmatprep.subr.bf16.mxu1 %v5569_v39 }
 0x171   : > { %2910 = vmatpush2.bf16.msra.mxu0 %v5564_v41 }
 0x172   : > { %3170 = vmatpush2.bf16.msra.mxu1 %v5567_v46  ;;  %2911 = vmatprep.subr.bf16.mxu0 %v5572_v49  ;;  %v5622_v49 = vld [vmem:[%s7394_s1 + $0xc50] ss:$8 sps:$4 sm:$0xff]  }
 0x173   : > { %3171 = vmatprep.subr.bf16.mxu1 %v5575_v50  ;;  %v5625_v50 = vld [vmem:[%s7394_s1 + $0xd50] ss:$8 sps:$4 sm:$0xff]  }
 0x175   : > { %2912 = vmatpush2.bf16.msra.mxu0 %v5570_v51 }
 0x176   : > { %3172 = vmatpush2.bf16.msra.mxu1 %v5573_v52  ;;  %2913 = vmatprep.subr.bf16.mxu0 %v5578_v53  ;;  %v5633_v52 = vld [vmem:[%s7394_s1 + $0xd44] ss:$8 sps:$4 sm:$0xff]  }
 0x177   : > { %3173 = vmatprep.subr.bf16.mxu1 %v5581_v54  ;;  %v5628_v54 = vld [vmem:[%s7394_s1 + $0xc40] ss:$8 sps:$4 sm:$0xff]  }
 0x179   : > { %2914 = vmatpush2.bf16.msra.mxu0 %v5576_v56  ;;  %v5631_v56 = vld [vmem:[%s7394_s1 + $0xd40] ss:$8 sps:$4 sm:$0xff]  }
 0x17a   : > { %3174 = vmatpush2.bf16.msra.mxu1 %v5579_v57  ;;  %2915 = vmatprep.subr.bf16.mxu0 %v5584_v58  ;;  %v5636_v57 = vld [vmem:[%s7394_s1 + $0xc34] ss:$8 sps:$4 sm:$0xff]  }
 0x17b   : > { %3175 = vmatprep.subr.bf16.mxu1 %v5587_v59  ;;  %v5639_v58 = vld [vmem:[%s7394_s1 + $0xd34] ss:$8 sps:$4 sm:$0xff]   ;;  %v5634_v59 = vld [vmem:[%s7394_s1 + $0xc30] ss:$8 sps:$4 sm:$0xff]  }
 0x17d   : > { %2916 = vmatpush2.bf16.msra.mxu0 %v5582_v60  ;;  %v5637_v60 = vld [vmem:[%s7394_s1 + $0xd30] ss:$8 sps:$4 sm:$0xff]  }
 0x17e   : > { %3176 = vmatpush2.bf16.msra.mxu1 %v5585_v61  ;;  %2917 = vmatprep.subr.bf16.mxu0 %v5590_v62  ;;  %v5642_v61 = vld [vmem:[%s7394_s1 + $0xc24] ss:$8 sps:$4 sm:$0xff]  }
 0x17f   : > { %3177 = vmatprep.subr.bf16.mxu1 %v5593_v44  ;;  %v5645_v62 = vld [vmem:[%s7394_s1 + $0xd24] ss:$8 sps:$4 sm:$0xff]   ;;  %v5640_v44 = vld [vmem:[%s7394_s1 + $0xc20] ss:$8 sps:$4 sm:$0xff]  }
 0x181   : > { %2918 = vmatpush2.bf16.msra.mxu0 %v5588_v1  ;;  %v5648_v1 = vld [vmem:[%s7394_s1 + $0xc14] ss:$8 sps:$4 sm:$0xff]  }
 0x182   : > { %3178 = vmatpush2.bf16.msra.mxu1 %v5591_v2  ;;  %2919 = vmatprep.subr.bf16.mxu0 %v5596_v3  ;;  %v5651_v2 = vld [vmem:[%s7394_s1 + $0xd14] ss:$8 sps:$4 sm:$0xff]   ;;  %v5646_v3 = vld [vmem:[%s7394_s1 + $0xc10] ss:$8 sps:$4 sm:$0xff]  }
 0x183   : > { %3179 = vmatprep.subr.bf16.mxu1 %v5599_v4  ;;  %v5649_v4 = vld [vmem:[%s7394_s1 + $0xd10] ss:$8 sps:$4 sm:$0xff]  }
 0x185   : > { %2920 = vmatpush2.bf16.msra.mxu0 %v5594_v8  ;;  %v5655_v8 = vld [vmem:[%s7394_s1 + $0xd00] ss:$8 sps:$4 sm:$0xff]  }
 0x186   : > { %3180 = vmatpush2.bf16.msra.mxu1 %v5597_v10  ;;  %2921 = vmatprep.subr.bf16.mxu0 %v5602_v11  ;;  %v5660_v10 = vld [vmem:[%s7394_s1 + $0xcf4] ss:$8 sps:$4 sm:$0xff]  }
 0x187   : > { %3181 = vmatprep.subr.bf16.mxu1 %v5605_v12  ;;  %v5663_v11 = vld [vmem:[%s7394_s1 + $0xdf4] ss:$8 sps:$4 sm:$0xff]   ;;  %v5658_v12 = vld [vmem:[%s7394_s1 + $0xcf0] ss:$8 sps:$4 sm:$0xff]  }
 0x189   : > { %2922 = vmatpush2.bf16.msra.mxu0 %v5600_v16  ;;  %v5667_v16 = vld [vmem:[%s7394_s1 + $0xde0] ss:$8 sps:$4 sm:$0xff]  }
 0x18a   : > { %3182 = vmatpush2.bf16.msra.mxu1 %v5603_v17  ;;  %3397 = vmatprep.subr.bf16.mxu0 %v5610_v18  ;;  %v5672_v17 = vld [vmem:[%s7394_s1 + $0xcd4] ss:$8 sps:$4 sm:$0xff]  }
 0x18b   : > { %3657 = vmatprep.subr.bf16.mxu1 %v5615_v19  ;;  %v5675_v18 = vld [vmem:[%s7394_s1 + $0xdd4] ss:$8 sps:$4 sm:$0xff]   ;;  %v5670_v19 = vld [vmem:[%s7394_s1 + $0xcd0] ss:$8 sps:$4 sm:$0xff]  }
 0x18c   : > { %v1411_v26 = vpop.f32.mrf.mxu0  ;;  %2924 = vmatmul.mubr.bf16.vlgmr.msra.gmra.mxu0 %v2727_v34  ;;  %v5676_v34 = vld [vmem:[%s7394_s1 + $0xcc0] ss:$8 sps:$4 sm:$0xff]  }
 0x18d   : > { %v1671_v27 = vpop.f32.mrf.mxu1  ;;  %3184 = vmatmul.mubr.bf16.vlgmr.msra.gmra.mxu1 %v2980_v22  ;;  %v1418_v28 = vadd.f32 %v1411_v26, %v6891_v6  ;;  %3398 = vmatpush1.bf16.msra.mxu0 %v5608_v23  ;;  %v5627_v6 = vld [vmem:[%s7394_s1 + $0xd54] ss:$8 sps:$4 sm:$0xff]   ;;  %v5679_v22 = vld [vmem:[%s7394_s1 + $0xdc0] ss:$8 sps:$4 sm:$0xff]   ;;  %v4896_v26 = vcombine.low %v6858_v48, %v7030_v0 }
 0x18e   : > { %3658 = vmatpush1.bf16.msra.mxu1 %v5613_v24  ;;  %v1413_v32 = vpop.f32.mrf.mxu0  ;;  %3399 = vmatprep.subr.bf16.mxu0 %v5618_v37  ;;  %v5684_v23 = vld [vmem:[%s7394_s1 + $0xcb4] ss:$8 sps:$4 sm:$0xff]   ;;  %v5682_v37 = vld [vmem:[%s7394_s1 + $0xcb0] ss:$8 sps:$4 sm:$0xff]   ;;  %v5713_v48 = vld [vmem:[%s7394_s1 + $0xe60] ss:$8 sps:$4 sm:$0xff]  }
 0x18f   : > { %v1673_v33 = vpop.f32.mrf.mxu1  ;;  %3659 = vmatprep.subr.bf16.mxu1 %v5621_v63  ;;  %v1419_v36 = vadd.f32 %v1413_v32, %v6893_v9  ;;  %v7101_v38 = vadd.f32 %v1671_v27, %v1418_v28  ;;  %3429 = vmatprep.mubr.bf16.mxu0 %v3234_v42  ;;  %v5630_v9 = vld [vmem:[%s7394_s1 + $0xc44] ss:$8 sps:$4 sm:$0xff]   ;;  %v5687_v24 = vld [vmem:[%s7394_s1 + $0xdb4] ss:$8 sps:$4 sm:$0xff]   ;;  %v5685_v63 = vld [vmem:[%s7394_s1 + $0xdb0] ss:$8 sps:$4 sm:$0xff]  }
 0x190   : > { %3689 = vmatprep.mubr.bf16.mxu1 %v3494_v43  ;;  %v1415_v39 = vpop.f32.mrf.mxu0  ;;  %v5690_v42 = vld [vmem:[%s7394_s1 + $0xca4] ss:$8 sps:$4 sm:$0xff]   ;;  %v5688_v27 = vld [vmem:[%s7394_s1 + $0xca0] ss:$8 sps:$4 sm:$0xff]   ;;  %v3480_v32 = vshrl.u32 %v4896_v26, 16 }
 0x191   : > { %v1675_v41 = vpop.f32.mrf.mxu1  ;;  %v7103_v46 = vadd.f32 %v1673_v33, %v1419_v36  ;;  %3400 = vmatpush1.bf16.msra.mxu0 %v5616_v29  ;;  %v5693_v43 = vld [vmem:[%s7394_s1 + $0xda4] ss:$8 sps:$4 sm:$0xff]   ;;  %v5691_v28 = vld [vmem:[%s7394_s1 + $0xda0] ss:$8 sps:$4 sm:$0xff]   ;;  %v5696_v29 = vld [vmem:[%s7394_s1 + $0xc94] ss:$8 sps:$4 sm:$0xff]  }
 0x192   : > { %3660 = vmatpush1.bf16.msra.mxu1 %v5619_v31  ;;  %v1416_v51 = vpop.f32.mrf.mxu0  ;;  %3401 = vmatprep.subr.bf16.mxu0 %v5624_v35  ;;  %v5699_v31 = vld [vmem:[%s7394_s1 + $0xd94] ss:$8 sps:$4 sm:$0xff]   ;;  %v3483_v33 = vshll.u32 %v4896_v26, 16  ;;  %v5694_v35 = vld [vmem:[%s7394_s1 + $0xc90] ss:$8 sps:$4 sm:$0xff]  }
 0x193   : > { %3661 = vmatprep.subr.bf16.mxu1 %v5627_v6  ;;  %v1676_v53 = vpop.f32.mrf.mxu1  ;;  %v5697_v6 = vld [vmem:[%s7394_s1 + $0xd90] ss:$8 sps:$4 sm:$0xff]   ;;  %v5702_v36 = vld [vmem:[%s7394_s1 + $0xc84] ss:$8 sps:$4 sm:$0xff]   ;;  %v5700_v51 = vld [vmem:[%s7394_s1 + $0xc80] ss:$8 sps:$4 sm:$0xff]  }
 0x194   : > { %v5705_v39 = vld [vmem:[%s7394_s1 + $0xd84] ss:$8 sps:$4 sm:$0xff]   ;;  %v5710_v53 = vld [vmem:[%s7394_s1 + $0xe74] ss:$8 sps:$4 sm:$0xff]  }
 0x195   : > { %3402 = vmatpush1.bf16.msra.mxu0 %v5622_v49  ;;  %v7264_v41 = vld [vmem:[%s5939_s30 + $0x8] sm:$0x88]  ;;  %v3482_v49 = vrot.slane %v3480_v32, 2 }
 0x196   : > { %3662 = vmatpush1.bf16.msra.mxu1 %v5625_v50  ;;  %3403 = vmatprep.subr.bf16.mxu0 %v5630_v9  ;;  %v3485_v50 = vrot.slane %v3483_v33, 3  ;;  %v5703_v9 = vld [vmem:[%s7394_s1 + $0xd80] ss:$8 sps:$4 sm:$0xff]   ;;  %v4962_v26 = vcombine.low %v7264_v41, %v7030_v0 }
 0x197   : > { %3663 = vmatprep.subr.bf16.mxu1 %v5633_v52  ;;  %v4963_v52 = vcombine.high %v7264_v41, %v7030_v0 }
 0x199   : > { %3404 = vmatpush1.bf16.msra.mxu0 %v5628_v54  ;;  %v3233_v54 = vrot.slane %v4830_v55, 2 }
 0x19a   : > { %3664 = vmatpush1.bf16.msra.mxu1 %v5631_v56  ;;  %3405 = vmatprep.subr.bf16.mxu0 %v5636_v57  ;;  %v3486_v56 = vor.u32 %v3485_v50, %v3482_v49  ;;  %v5708_v57 = vld [vmem:[%s7394_s1 + $0xe70] ss:$8 sps:$4 sm:$0xff]  }
 0x19b   : > { %3665 = vmatprep.subr.bf16.mxu1 %v5639_v58  ;;  %v3740_v58 = vrot.slane %v4963_v52, 3 }
 0x19d   : > { %3406 = vmatpush1.bf16.msra.mxu0 %v5634_v59  ;;  %v5715_v59 = vld [vmem:[%s7394_s1 + $0xe64] ss:$8 sps:$4 sm:$0xff]  }
 0x19e   : > { %3666 = vmatpush1.bf16.msra.mxu1 %v5637_v60  ;;  %3407 = vmatprep.subr.bf16.mxu0 %v5642_v61 }
 0x19f   : > { %3667 = vmatprep.subr.bf16.mxu1 %v5645_v62 }
 0x1a1   : > { %3408 = vmatpush1.bf16.msra.mxu0 %v5640_v44  ;;  %v5718_v44 = vld [vmem:[%s7394_s1 + $0xe54] ss:$8 sps:$4 sm:$0xff]  }
 0x1a2   : > { %3668 = vmatpush1.bf16.msra.mxu1 %v5643_v40  ;;  %3409 = vmatprep.subr.bf16.mxu0 %v5648_v1 }
 0x1a3   : > { %3669 = vmatprep.subr.bf16.mxu1 %v5651_v2 }
 0x1a5   : > { %3410 = vmatpush1.bf16.msra.mxu0 %v5646_v3 }
 0x1a6   : > { %3670 = vmatpush1.bf16.msra.mxu1 %v5649_v4  ;;  %3411 = vmatprep.subr.bf16.mxu0 %v5654_v25  ;;  %v5716_v4 = vld [vmem:[%s7394_s1 + $0xe50] ss:$8 sps:$4 sm:$0xff]  }
 0x1a7   : > { %3671 = vmatprep.subr.bf16.mxu1 %v5657_v5  ;;  %v5721_v5 = vld [vmem:[%s7394_s1 + $0xe44] ss:$8 sps:$4 sm:$0xff]  }
 0x1a9   : > { %3412 = vmatpush1.bf16.msra.mxu0 %v5652_v7 }
 0x1aa   : > { %3672 = vmatpush1.bf16.msra.mxu1 %v5655_v8  ;;  %3413 = vmatprep.subr.bf16.mxu0 %v5660_v10  ;;  %v5724_v8 = vld [vmem:[%s7394_s1 + $0xe34] ss:$8 sps:$4 sm:$0xff]   ;;  %v5722_v10 = vld [vmem:[%s7394_s1 + $0xe30] ss:$8 sps:$4 sm:$0xff]  }
 0x1ab   : > { %3673 = vmatprep.subr.bf16.mxu1 %v5663_v11  ;;  %v5727_v11 = vld [vmem:[%s7394_s1 + $0xe24] ss:$8 sps:$4 sm:$0xff]  }
 0x1ad   : > { %3414 = vmatpush2.bf16.msra.mxu0 %v5658_v12  ;;  %v5725_v12 = vld [vmem:[%s7394_s1 + $0xe20] ss:$8 sps:$4 sm:$0xff]  }
 0x1ae   : > { %3674 = vmatpush2.bf16.msra.mxu1 %v5661_v30  ;;  %3415 = vmatprep.subr.bf16.mxu0 %v5666_v13  ;;  %v5730_v30 = vld [vmem:[%s7394_s1 + $0xe14] ss:$8 sps:$4 sm:$0xff]   ;;  %v5728_v13 = vld [vmem:[%s7394_s1 + $0xe10] ss:$8 sps:$4 sm:$0xff]  }
 0x1af   : > { %3675 = vmatprep.subr.bf16.mxu1 %v5669_v14  ;;  %v5733_v14 = vld [vmem:[%s7394_s1 + $0xe04] ss:$8 sps:$4 sm:$0xff]  }
 0x1b1   : > { %3416 = vmatpush2.bf16.msra.mxu0 %v5664_v15  ;;  %v5731_v15 = vld [vmem:[%s7394_s1 + $0xe00] ss:$8 sps:$4 sm:$0xff]  }
 0x1b2   : > { %3676 = vmatpush2.bf16.msra.mxu1 %v5667_v16  ;;  %3417 = vmatprep.subr.bf16.mxu0 %v5672_v17  ;;  %v5736_v16 = vld [vmem:[%s7394_s1 + $0xef4] ss:$8 sps:$4 sm:$0xff]   ;;  %v5734_v17 = vld [vmem:[%s7394_s1 + $0xef0] ss:$8 sps:$4 sm:$0xff]  }
 0x1b3   : > { %3677 = vmatprep.subr.bf16.mxu1 %v5675_v18  ;;  %v5739_v18 = vld [vmem:[%s7394_s1 + $0xee4] ss:$8 sps:$4 sm:$0xff]  }
 0x1b5   : > { %3418 = vmatpush2.bf16.msra.mxu0 %v5670_v19  ;;  %v5737_v19 = vld [vmem:[%s7394_s1 + $0xee0] ss:$8 sps:$4 sm:$0xff]  }
 0x1b6   : > { %3678 = vmatpush2.bf16.msra.mxu1 %v5673_v20  ;;  %3419 = vmatprep.subr.bf16.mxu0 %v5678_v45  ;;  %v5742_v20 = vld [vmem:[%s7394_s1 + $0xed4] ss:$8 sps:$4 sm:$0xff]   ;;  %v5740_v45 = vld [vmem:[%s7394_s1 + $0xed0] ss:$8 sps:$4 sm:$0xff]  }
 0x1b7   : > { %3679 = vmatprep.subr.bf16.mxu1 %v5681_v47  ;;  %v5745_v47 = vld [vmem:[%s7394_s1 + $0xec4] ss:$8 sps:$4 sm:$0xff]  }
 0x1b9   : > { %3420 = vmatpush2.bf16.msra.mxu0 %v5676_v34  ;;  %v5743_v34 = vld [vmem:[%s7394_s1 + $0xec0] ss:$8 sps:$4 sm:$0xff]  }
 0x1ba   : > { %3680 = vmatpush2.bf16.msra.mxu1 %v5679_v22  ;;  %3421 = vmatprep.subr.bf16.mxu0 %v5684_v23  ;;  %v5748_v22 = vld [vmem:[%s7394_s1 + $0xeb4] ss:$8 sps:$4 sm:$0xff]   ;;  %v5746_v23 = vld [vmem:[%s7394_s1 + $0xeb0] ss:$8 sps:$4 sm:$0xff]  }
 0x1bb   : > { %3681 = vmatprep.subr.bf16.mxu1 %v5687_v24  ;;  %v5751_v24 = vld [vmem:[%s7394_s1 + $0xea4] ss:$8 sps:$4 sm:$0xff]  }
 0x1bd   : > { %3422 = vmatpush2.bf16.msra.mxu0 %v5682_v37  ;;  %v5749_v37 = vld [vmem:[%s7394_s1 + $0xea0] ss:$8 sps:$4 sm:$0xff]  }
 0x1be   : > { %3682 = vmatpush2.bf16.msra.mxu1 %v5685_v63  ;;  %3423 = vmatprep.subr.bf16.mxu0 %v5690_v42  ;;  %v5754_v63 = vld [vmem:[%s7394_s1 + $0xe94] ss:$8 sps:$4 sm:$0xff]   ;;  %v5752_v42 = vld [vmem:[%s7394_s1 + $0xe90] ss:$8 sps:$4 sm:$0xff]  }
 0x1bf   : > { %3683 = vmatprep.subr.bf16.mxu1 %v5693_v43  ;;  %v5757_v43 = vld [vmem:[%s7394_s1 + $0xe84] ss:$8 sps:$4 sm:$0xff]  }
 0x1c1   : > { %3424 = vmatpush2.bf16.msra.mxu0 %v5688_v27  ;;  %v5755_v27 = vld [vmem:[%s7394_s1 + $0xe80] ss:$8 sps:$4 sm:$0xff]  }
 0x1c2   : > { %3684 = vmatpush2.bf16.msra.mxu1 %v5691_v28  ;;  %3425 = vmatprep.subr.bf16.mxu0 %v5696_v29  ;;  %v3739_v28 = vrot.slane %v4962_v26, 3 }
 0x1c3   : > { %3685 = vmatprep.subr.bf16.mxu1 %v5699_v31 }
 0x1c5   : > { %3426 = vmatpush2.bf16.msra.mxu0 %v5694_v35 }
 0x1c6   : > { %3686 = vmatpush2.bf16.msra.mxu1 %v5697_v6  ;;  %3427 = vmatprep.subr.bf16.mxu0 %v5702_v36 }
 0x1c7   : > { %3687 = vmatprep.subr.bf16.mxu1 %v5705_v39 }
 0x1c9   : > { %3428 = vmatpush2.bf16.msra.mxu0 %v5700_v51 }
 0x1ca   : > { %3688 = vmatpush2.bf16.msra.mxu1 %v5703_v9  ;;  %3903 = vmatprep.subr.bf16.mxu0 %v5710_v53 }
 0x1cc   : > { %v1917_v60 = vpop.f32.mrf.mxu0  ;;  %3430 = vmatmul.mubr.bf16.vlgmr.msra.gmra.mxu0 %v3233_v54 }
 0x1cd   : > { %v2177_v61 = vpop.f32.mrf.mxu1  ;;  %3690 = vmatmul.mubr.bf16.vlgmr.msra.gmra.mxu1 %v3486_v56  ;;  %v1924_v21 = vadd.f32 %v1917_v60, %v7101_v38  ;;  %3904 = vmatpush1.bf16.msra.mxu0 %v5708_v57 }
 0x1ce   : > { %3935 = vmatprep.mubr.bf16.mxu0 %v3740_v58  ;;  %v1919_v55 = vpop.f32.mrf.mxu0  ;;  %3905 = vmatprep.subr.bf16.mxu0 %v5715_v59 }
 0x1cf   : > { %v2179_v62 = vpop.f32.mrf.mxu1  ;;  %v1925_v40 = vadd.f32 %v1919_v55, %v7103_v46  ;;  %v7294_v1 = vadd.f32 %v2177_v61, %v1924_v21  ;;  %v5719_v46 = vld [vmem:[%s7394_s1 + $0xe40] ss:$8 sps:$4 sm:$0xff]  }
 0x1d0   : > { %v1921_v2 = vpop.f32.mrf.mxu0 }
 0x1d1   : > { %v2181_v3 = vpop.f32.mrf.mxu1  ;;  %v7296_v38 = vadd.f32 %v2179_v62, %v1925_v40  ;;  %3906 = vmatpush1.bf16.msra.mxu0 %v5713_v48 }
 0x1d2   : > { %v1922_v25 = vpop.f32.mrf.mxu0  ;;  %3907 = vmatprep.subr.bf16.mxu0 %v5718_v44 }
 0x1d3   : > { %v2182_v7 = vpop.f32.mrf.mxu1  ;;  %v3948_v25 = vlaneseq }
 0x1d5   : > { %3908 = vmatpush1.bf16.msra.mxu0 %v5716_v4 }
 0x1d6   : > { %3909 = vmatprep.subr.bf16.mxu0 %v5721_v5  ;;  %v3949_v5 = vshrl.u32 %v3948_v25, 7 }
 0x1d8   : > { %v3950_v7 = vsub.s32 0, %v3949_v5 }
 0x1d9   : > { %3910 = vmatpush1.bf16.msra.mxu0 %v5719_v46  ;;  %v3946_v46 = vld [vmem:[%s7395_s2] sm:$0x3] }
 0x1da   : > { %3911 = vmatprep.subr.bf16.mxu0 %v5724_v8 }
 0x1dd   : > { %3912 = vmatpush1.bf16.msra.mxu0 %v5722_v10  ;;  %v3954_v10 = vsub.s32 1, %v3949_v5 }
 0x1de   : > { %3913 = vmatprep.subr.bf16.mxu0 %v5727_v11  ;;  %v3951_v11 = vrot.slane %v3946_v46, %v3950_v7 }
 0x1e1   : > { %3914 = vmatpush1.bf16.msra.mxu0 %v5725_v12 }
 0x1e2   : > { %3915 = vmatprep.subr.bf16.mxu0 %v5730_v30 }
 0x1e5   : > { %3916 = vmatpush1.bf16.msra.mxu0 %v5728_v13 }
 0x1e6   : > { %3917 = vmatprep.subr.bf16.mxu0 %v5733_v14  ;;  %v3955_v14 = vrot.slane %v3946_v46, %v3954_v10 }
 0x1e9   : > { %3918 = vmatpush1.bf16.msra.mxu0 %v5731_v15 }
 0x1ea   : > { %3919 = vmatprep.subr.bf16.mxu0 %v5736_v16 }
 0x1ed   : > { %3920 = vmatpush2.bf16.msra.mxu0 %v5734_v17 }
 0x1ee   : > { %3921 = vmatprep.subr.bf16.mxu0 %v5739_v18 }
 0x1f1   : > { %3922 = vmatpush2.bf16.msra.mxu0 %v5737_v19 }
 0x1f2   : > { %3923 = vmatprep.subr.bf16.mxu0 %v5742_v20 }
 0x1f5   : > { %3924 = vmatpush2.bf16.msra.mxu0 %v5740_v45 }
 0x1f6   : > { %3925 = vmatprep.subr.bf16.mxu0 %v5745_v47 }
 0x1f9   : > { %3926 = vmatpush2.bf16.msra.mxu0 %v5743_v34 }
 0x1fa   : > { %3927 = vmatprep.subr.bf16.mxu0 %v5748_v22 }
 0x1fd   : > { %3928 = vmatpush2.bf16.msra.mxu0 %v5746_v23 }
 0x1fe   : > { %3929 = vmatprep.subr.bf16.mxu0 %v5751_v24 }
 0x201   : > { %3930 = vmatpush2.bf16.msra.mxu0 %v5749_v37 }
 0x202   : > { %3931 = vmatprep.subr.bf16.mxu0 %v5754_v63 }
 0x205   : > { %3932 = vmatpush2.bf16.msra.mxu0 %v5752_v42 }
 0x206   : > { %3933 = vmatprep.subr.bf16.mxu0 %v5757_v43 }
 0x209   : > { %3934 = vmatpush2.bf16.msra.mxu0 %v5755_v27 }
 0x20c   : > { %v2417_v29 = vpop.f32.mrf.mxu0  ;;  %3936 = vmatmul.mubr.bf16.vlgmr.msra.gmra.mxu0 %v3739_v28 }
 0x20d   : > { %v2679_v31 = vpop.f32.mrf.mxu1  ;;  %v2424_v32 = vadd.f32 %v2417_v29, %v7294_v1 }
 0x20e   : > { %v2419_v33 = vpop.f32.mrf.mxu0 }
 0x20f   : > { %v2681_v35 = vpop.f32.mrf.mxu1  ;;  %v2425_v6 = vadd.f32 %v2419_v33, %v7296_v38  ;;  %v2686_v36 = vadd.f32 %v2679_v31, %v2424_v32 }
 0x210   : > { %v2421_v39 = vpop.f32.mrf.mxu0 }
 0x211   : > { %v2683_v0 = vpop.f32.mrf.mxu1  ;;  %v2687_v41 = vadd.f32 %v2681_v35, %v2425_v6 }
 0x212   : > { %v2422_v49 = vpop.f32.mrf.mxu0 }
 0x213   : > { %v2684_v50 = vpop.f32.mrf.mxu1 }
 0x24c   : > { %v2925_v51 = vpop.f32.mrf.mxu0 }
 0x24d   : > { %v3185_v9 = vpop.f32.mrf.mxu1  ;;  %v2932_v52 = vadd.f32 %v2925_v51, %v2686_v36 }
 0x24e   : > { %v2927_v53 = vpop.f32.mrf.mxu0 }
 0x24f   : > { %v3187_v54 = vpop.f32.mrf.mxu1  ;;  %v2933_v56 = vadd.f32 %v2927_v53, %v2687_v41  ;;  %v3192_v57 = vadd.f32 %v3185_v9, %v2932_v52 }
 0x250   : > { %v2929_v58 = vpop.f32.mrf.mxu0 }
 0x251   : > { %v3189_v59 = vpop.f32.mrf.mxu1  ;;  %v3193_v60 = vadd.f32 %v3187_v54, %v2933_v56 }
 0x252   : > { %v2930_v61 = vpop.f32.mrf.mxu0 }
 0x253   : > { %v3190_v21 = vpop.f32.mrf.mxu1 }
 0x28c   : > { %v3431_v48 = vpop.f32.mrf.mxu0 }
 0x28d   : > { %v3691_v55 = vpop.f32.mrf.mxu1  ;;  %v3438_v62 = vadd.f32 %v3431_v48, %v3192_v57 }
 0x28e   : > { %v3433_v44 = vpop.f32.mrf.mxu0 }
 0x28f   : > { %v3693_v40 = vpop.f32.mrf.mxu1  ;;  %v3698_v1 = vadd.f32 %v3691_v55, %v3438_v62  ;;  %v3439_v8 = vadd.f32 %v3433_v44, %v3193_v60 }
 0x290   : > { %v3435_v2 = vpop.f32.mrf.mxu0 }
 0x291   : > { %v3695_v3 = vpop.f32.mrf.mxu1  ;;  %v3699_v30 = vadd.f32 %v3693_v40, %v3439_v8 }
 0x292   : > { %v3436_v38 = vpop.f32.mrf.mxu0 }
 0x293   : > { %v3696_v4 = vpop.f32.mrf.mxu1 }
 0x2cc   : > { %v3937_v12 = vpop.f32.mrf.mxu0 }
 0x2cd   : > { %v3944_v13 = vadd.f32 %v3937_v12, %v3698_v1 }
 0x2ce   : > { %v3939_v15 = vpop.f32.mrf.mxu0 }
 0x2cf   : > { %v3958_v16 = vadd.f32 %v3951_v11, %v3944_v13  ;;  %v3945_v17 = vadd.f32 %v3939_v15, %v3699_v30 }
 0x2d0   : > { %v3941_v18 = vpop.f32.mrf.mxu0 }
 0x2d1   : > { %v3962_v19 = vmul.f32 0.1, %v3958_v16  ;;  %v3959_v20 = vadd.f32 %v3955_v14, %v3945_v17  ;;  %vm3960_vm0 = vcmp.ge.f32.partialorder %v3958_v16, 0.0 }
 0x2d2   : > { %v3942_v45 = vpop.f32.mrf.mxu0 }
 0x2d3   : > { %vm3961_vm1 = vcmp.ge.f32.partialorder %v3959_v20, 0.0  ;;  %v3963_v47 = vmul.f32 0.1, %v3959_v20  ;;  %v3964_v34 = vsel %vm3960_vm0, %v3958_v16, %v3962_v19 }
 0x2d5   : > { %v3965_v22 = vsel %vm3961_vm1, %v3959_v20, %v3963_v47 }
 0x2d6   : > { %v5000_v23 = vpack.c.bf16 %v3965_v22, %v3964_v34 }
 0x2d8   : > { %3974 = vst [vmem:[%s170_s16] sm:$0xff] %v5000_v23 }
 0x2d9 PF: > { %s13_s12 = sadd.s32 1, %s5767_s12  }
 0x2da   : > { %p10_p4 = scmp.ge.s32.totalorder %s13_s12, 4  }
 0x2dc   :  { %12 = sbr.rel (!%p10_p4) target bundleno = 1 (0x1), region = 76 }

</bundles_post_ra>
